<compile_context>
chip_gen: v7x
topology: tpu7x:2x2x1
jax: 0.10.0
libtpu: 0.0.40
codegen_flags: <defaults>
</compile_context>

<pallas_src>
import math
import numpy as np
import jax
import jax.numpy as jnp
from jax.experimental import pallas as pl
from jax.experimental.pallas import tpu as pltpu

# ---------------- configuration (small, forward-consistent shapes) -----------
BATCH = 2
IN_C = 4          # in_channels
S_C = 2           # s_channels (conditioning input)
HIDDEN = 32       # hidden_channels
OUT_C = 8         # out_channels
HEADS = 4
SLICE = (8, 8)    # (slice_height, slice_width)
H = W = 16
EPS = 1e-5        # GroupNorm eps (PyTorch default)
OUT_PAD = 128     # lane-dense padded output width


# ---------------- deterministic parameter construction -----------------------
def _wn_linear(key, out_f, in_f):
    """Weight-normalized linear params (as in NIN2d / NIN4d / Conv2dWeightNorm 1x1)."""
    kv, kg, kb = jax.random.split(key, 3)
    v = jax.random.normal(kv, (out_f, in_f), jnp.float32) * 0.1
    g = 1.0 + 0.1 * jax.random.normal(kg, (out_f, 1), jnp.float32)
    w = v * (g / jnp.linalg.norm(v, axis=1, keepdims=True))   # effective weight
    b = 0.1 * jax.random.normal(kb, (out_f,), jnp.float32)
    return w, b


def make_params(key):
    ks = jax.random.split(key, 6)
    p = {}
    p["nin1_w"], p["nin1_b"] = _wn_linear(ks[0], HIDDEN, IN_C + S_C)       # NIN2d
    p["qkv_w"], p["qkv_b"] = _wn_linear(ks[1], 3 * HIDDEN, HIDDEN)         # attn 1x1 proj
    p["nin2_w"], p["nin2_b"] = _wn_linear(ks[2], HIDDEN, HIDDEN)           # NIN4d
    p["nin3_w"], p["nin3_b"] = _wn_linear(ks[3], OUT_C, HIDDEN)            # NIN2d
    p["gn_gamma"] = 1.0 + 0.1 * jax.random.normal(ks[4], (HIDDEN,), jnp.float32)
    p["gn_beta"] = 0.1 * jax.random.normal(ks[5], (HIDDEN,), jnp.float32)

    # positional encoding, exactly as in NICESelfAttnBlock.__init__
    sh, sw = SLICE
    pe = np.array([[[(h * sw + w) / np.power(10000.0, 2.0 * (i // 2) / HIDDEN)
                     for i in range(HIDDEN)] for w in range(sw)] for h in range(sh)])
    pe[:, :, 0::2] = np.sin(pe[:, :, 0::2])
    pe[:, :, 1::2] = np.cos(pe[:, :, 1::2])
    p["pos_enc_hw_c"] = jnp.asarray(pe, jnp.float32)                       # (sh, sw, C)
    p["pos_enc_chw"] = jnp.asarray(np.transpose(pe, (2, 0, 1)), jnp.float32)  # (C, sh, sw)
    return p


# ---------------- Pallas kernel ----------------------------------------------
def _make_kernel(heads, hidden, g, n_pix):
    dim = hidden // heads
    scale = 1.0 / math.sqrt(dim)
    gp = g * n_pix
    inv_n = 1.0 / float(n_pix * dim)

    def kernel(x_ref, w1_ref, wqkv_ref, w2_ref, w3_ref, bqkv_ref, b3_ref,
               pe_ref, aux_ref, o_ref):
        # packed aux operand: rows [0:heads] = group indicator, then b1, gamma, beta, b2
        ind = aux_ref[0:heads, :]                          # (heads, hidden)
        b1 = aux_ref[heads:heads + 1, :]                   # (1, hidden)
        gamma = aux_ref[heads + 1:heads + 2, :]
        beta = aux_ref[heads + 2:heads + 3, :]
        b2 = aux_ref[heads + 3:heads + 4, :]

        x = x_ref[...]                                     # (G*P, c_in)

        # NIN2d #1 : channels -> hidden (per pixel), + positional encoding
        h = jnp.dot(x, w1_ref[...], preferred_element_type=jnp.float32) + b1
        h = h + pe_ref[...]                                # (G*P, hidden)

        # qkv projection (weight-normed 1x1 conv)
        qkv = jnp.dot(h, wqkv_ref[...], preferred_element_type=jnp.float32) + bqkv_ref[...]
        q3 = qkv[:, :hidden].reshape(g, n_pix, hidden)
        k3 = qkv[:, hidden:2 * hidden].reshape(g, n_pix, hidden)
        v3 = qkv[:, 2 * hidden:].reshape(g, n_pix, hidden)

        # per-head attention, batched over the G tiles; head restriction is a
        # channel mask (no 8-lane slices / concatenates).
        attn = jnp.zeros((g, n_pix, hidden), jnp.float32)
        for hd in range(heads):
            m = ind[hd:hd + 1, :]                          # (1, hidden) 0/1 mask
            s = jnp.einsum('gpc,gqc->gpq', q3, k3 * m,
                           preferred_element_type=jnp.float32) * scale   # (G,P,P)
            s = s - jnp.max(s, axis=-1, keepdims=True)
            pw = jnp.exp(s)
            pw = pw * pl.reciprocal(jnp.sum(pw, axis=-1, keepdims=True), approx=True)
            oh = jnp.einsum('gpq,gqc->gpc', pw, v3,
                            preferred_element_type=jnp.float32)          # (G,P,hidden)
            attn = attn + oh * m
        y = h.reshape(g, n_pix, hidden) + attn             # residual

        # GroupNorm(heads, hidden): per (tile, group) over (dim channels x P pixels),
        # group sums via indicator matmul; broadcast back via indicator matmul.
        sum_c = jnp.sum(y, axis=1)                         # (G, hidden)
        sumsq_c = jnp.sum(y * y, axis=1)                   # (G, hidden)
        gsum = jnp.einsum('gc,hc->gh', sum_c, ind, preferred_element_type=jnp.float32)
        gsq = jnp.einsum('gc,hc->gh', sumsq_c, ind, preferred_element_type=jnp.float32)
        gmean = gsum * inv_n                               # (G, heads)
        gvar = gsq * inv_n - gmean * gmean
        ginv = jax.lax.rsqrt(gvar + EPS)
        mean_bc = jnp.einsum('gh,hc->gc', gmean, ind, preferred_element_type=jnp.float32)
        inv_bc = jnp.einsum('gh,hc->gc', ginv, ind, preferred_element_type=jnp.float32)
        yn = (y - mean_bc[:, None, :]) * inv_bc[:, None, :]
        yn = yn.reshape(gp, hidden) * gamma + beta

        # NIN4d : hidden -> hidden (per pixel), then ELU
        h2 = jnp.dot(yn, w2_ref[...], preferred_element_type=jnp.float32) + b2
        h2 = jnp.where(h2 > 0, h2, jnp.exp(jnp.minimum(h2, 0.0)) - 1.0)

        # NIN2d #3 : hidden -> out_channels (padded to 128 lanes -> dense stores)
        out = jnp.dot(h2, w3_ref[...], preferred_element_type=jnp.float32) + b3_ref[...]
        o_ref[...] = out.astype(o_ref.dtype)

    return kernel


# ---------------- wrapper (layout glue + pallas_call) -------------------------
def nice_self_attn_block(x, s, p):
    bs, _, h_img, w_img = x.shape
    if s is not None:
        x = jnp.concatenate([x, s], axis=1)
    sh, sw = SLICE
    fh, fw = h_img // sh, w_img // sw
    c_in = x.shape[1]
    n_tiles = bs * fh * fw
    n_pix = sh * sw

    # NCHW -> flat (T*P, C) row layout (matches slice2d's view/permute ordering)
    xt = (x.reshape(bs, c_in, fh, sh, fw, sw)
            .transpose(0, 2, 4, 3, 5, 1)
            .reshape(n_tiles * n_pix, c_in))

    # 2 parallel steps (uses both TensorCores on v7x); G tiles per step.
    n_steps = 2 if n_tiles % 2 == 0 else 1
    g = n_tiles // n_steps
    gp = g * n_pix

    # weights (effective, weight-norm already folded)
    w1t = p["nin1_w"].T                            # (c_in, hidden)
    wqkvt = p["qkv_w"].T                           # (hidden, 3*hidden)
    w2t = p["nin2_w"].T                            # (hidden, hidden)
    w3t_pad = jnp.pad(p["nin3_w"].T, ((0, 0), (0, OUT_PAD - OUT_C)))   # (hidden, 128)
    bqkv = p["qkv_b"][None, :]                     # (1, 3*hidden)
    b3_pad = jnp.pad(p["nin3_b"], (0, OUT_PAD - OUT_C))[None, :]       # (1, 128)

    # positional encoding pre-tiled to the per-step slab
    pe = p["pos_enc_hw_c"].reshape(n_pix, HIDDEN)
    pe_tiled = jnp.tile(pe, (g, 1))                # (G*P, hidden)

    # packed aux operand: group indicator + b1 + gamma + beta + b2  -> (heads+4, hidden)
    ind = (jnp.arange(HIDDEN)[None, :] // (HIDDEN // HEADS)
           == jnp.arange(HEADS)[:, None]).astype(jnp.float32)
    aux = jnp.concatenate([ind,
                           p["nin1_b"][None, :],
                           p["gn_gamma"][None, :],
                           p["gn_beta"][None, :],
                           p["nin2_b"][None, :]], axis=0)

    def const_spec(arr):
        return pl.BlockSpec(arr.shape, lambda t: (0,) * arr.ndim)

    kernel = _make_kernel(HEADS, HIDDEN, g, n_pix)
    out_flat = pl.pallas_call(
        kernel,
        out_shape=jax.ShapeDtypeStruct((n_tiles * n_pix, OUT_PAD), jnp.float32),
        grid=(n_steps,),
        in_specs=[
            pl.BlockSpec((gp, c_in), lambda t: (t, 0)),
            const_spec(w1t), const_spec(wqkvt), const_spec(w2t), const_spec(w3t_pad),
            const_spec(bqkv), const_spec(b3_pad),
            const_spec(pe_tiled), const_spec(aux),
        ],
        out_specs=pl.BlockSpec((gp, OUT_PAD), lambda t: (t, 0)),
        compiler_params=pltpu.CompilerParams(dimension_semantics=("parallel",)),
    )(xt, w1t, wqkvt, w2t, w3t_pad, bqkv, b3_pad, pe_tiled, aux)

    # strip lane padding, (T, P, C) -> NCHW  (matches unslice2d's ordering);
    # the slice fuses with the transpose in XLA.
    out_t = out_flat[:, :OUT_C].reshape(n_tiles, n_pix, OUT_C)
    out = (out_t.reshape(bs, fh, fw, sh, sw, OUT_C)
                 .transpose(0, 5, 1, 3, 2, 4)
                 .reshape(bs, OUT_C, h_img, w_img))
    return out


# ---------------- pure-JAX reference (mirrors the PyTorch forward) ------------
def reference_forward(x, s, p):
    bs, _, h_img, w_img = x.shape
    if s is not None:
        x = jnp.concatenate([x, s], axis=1)
    sh, sw = SLICE
    fh, fw = h_img // sh, w_img // sw
    c_in = x.shape[1]

    # slice2d + NIN2d
    xr = x.reshape(bs, c_in, fh, sh, fw, sw).transpose(0, 2, 4, 1, 3, 5)
    h = jnp.einsum('bfgcij,oc->bfgoij', xr, p["nin1_w"]) + p["nin1_b"][:, None, None]
    h = h.reshape(bs * fh * fw, HIDDEN, sh, sw)

    # MultiHeadAttention2d
    xa = h + p["pos_enc_chw"][None]
    c = jnp.einsum('bcij,oc->boij', xa, p["qkv_w"]) + p["qkv_b"][:, None, None]
    T = xa.shape[0]
    dim = HIDDEN // HEADS
    c = c.reshape(T, 3, HEADS, dim, sh, sw)
    q, k, v = c[:, 0], c[:, 1], c[:, 2]
    aw = jnp.einsum('bhdij,bhdkl->bhijkl', q, k) / np.sqrt(dim)
    aw = jax.nn.softmax(aw.reshape(T, HEADS, sh, sw, sh * sw), axis=-1)
    vv = v.reshape(T, HEADS, dim, sh * sw)
    attn = jnp.einsum('bhijt,bhdt->bhdij', aw, vv).reshape(T, HIDDEN, sh, sw)
    y = xa + attn

    # GroupNorm(heads, hidden)
    yg = y.reshape(T, HEADS, dim, sh, sw)
    mu = jnp.mean(yg, axis=(2, 3, 4), keepdims=True)
    var = jnp.var(yg, axis=(2, 3, 4), keepdims=True)
    yn = ((yg - mu) / jnp.sqrt(var + EPS)).reshape(T, HIDDEN, sh, sw)
    yn = yn * p["gn_gamma"][:, None, None] + p["gn_beta"][:, None, None]

    # unslice2d + NIN4d + ELU
    xo = yn.reshape(bs, fh, fw, HIDDEN, sh, sw).transpose(0, 3, 1, 4, 2, 5)
    xo = jnp.einsum('bcfigj,oc->bofigj', xo, p["nin2_w"]) + p["nin2_b"][:, None, None, None, None]
    xo = jax.nn.elu(xo)
    xo = xo.reshape(bs, HIDDEN, h_img, w_img)

    # NIN2d #3
    out = jnp.einsum('bcij,oc->boij', xo, p["nin3_w"]) + p["nin3_b"][:, None, None]
    return out


# ---------------- main --------------------------------------------------------
if __name__ == "__main__":
    key = jax.random.PRNGKey(0)
    kx, ks, kp = jax.random.split(key, 3)
    x = jax.random.normal(kx, (BATCH, IN_C, H, W), jnp.float32)
    s = jax.random.normal(ks, (BATCH, S_C, H, W), jnp.float32)
    params = make_params(kp)

    out = nice_self_attn_block(x, s, params)
    out = jax.block_until_ready(out)
    assert out.shape == (BATCH, OUT_C, H, W), out.shape

    ref = jax.block_until_ready(reference_forward(x, s, params))
    if not np.allclose(np.asarray(out), np.asarray(ref), rtol=5e-3, atol=5e-3):
        err = float(np.max(np.abs(np.asarray(out) - np.asarray(ref))))
        raise SystemExit(f"kernel/reference mismatch, max abs err = {err}")

    print("KERNEL_OK")
</pallas_src>

<mosaic_0001>
module attributes {stable_mosaic.version = 11 : i64} {
  func.func @kernel(%arg0: i32, %arg1: memref<256x6xf32, #tpu.memory_space<vmem>>, %arg2: memref<6x32xf32, #tpu.memory_space<vmem>>, %arg3: memref<32x96xf32, #tpu.memory_space<vmem>>, %arg4: memref<32x32xf32, #tpu.memory_space<vmem>>, %arg5: memref<32x128xf32, #tpu.memory_space<vmem>>, %arg6: memref<1x96xf32, #tpu.memory_space<vmem>>, %arg7: memref<1x128xf32, #tpu.memory_space<vmem>>, %arg8: memref<256x32xf32, #tpu.memory_space<vmem>>, %arg9: memref<8x32xf32, #tpu.memory_space<vmem>>, %arg10: memref<256x128xf32, #tpu.memory_space<vmem>>) attributes {dimension_semantics = [#tpu.dimension_semantics<parallel>], iteration_bounds = array<i64: 2>, scalar_prefetch = 0 : i64, scratch_operands = 0 : i64, tpu.core_type = #tpu.core_type<tc>, window_params = [{transform_indices = @transform_0, window_bounds = array<i64: 256, 6>}, {pipeline_mode = #tpu.pipeline_mode<synchronous>, transform_indices = @transform_1, window_bounds = array<i64: 6, 32>}, {pipeline_mode = #tpu.pipeline_mode<synchronous>, transform_indices = @transform_2, window_bounds = array<i64: 32, 96>}, {pipeline_mode = #tpu.pipeline_mode<synchronous>, transform_indices = @transform_3, window_bounds = array<i64: 32, 32>}, {pipeline_mode = #tpu.pipeline_mode<synchronous>, transform_indices = @transform_4, window_bounds = array<i64: 32, 128>}, {pipeline_mode = #tpu.pipeline_mode<synchronous>, transform_indices = @transform_5, window_bounds = array<i64: 1, 96>}, {pipeline_mode = #tpu.pipeline_mode<synchronous>, transform_indices = @transform_6, window_bounds = array<i64: 1, 128>}, {pipeline_mode = #tpu.pipeline_mode<synchronous>, transform_indices = @transform_7, window_bounds = array<i64: 256, 32>}, {pipeline_mode = #tpu.pipeline_mode<synchronous>, transform_indices = @transform_8, window_bounds = array<i64: 8, 32>}, {transform_indices = @transform_9, window_bounds = array<i64: 256, 128>}]} {
    %c0 = arith.constant 0 : index
    %c0_0 = arith.constant 0 : index
    %0 = vector.load %arg9[%c0, %c0_0] : memref<8x32xf32, #tpu.memory_space<vmem>>, vector<4x32xf32>
    %c4 = arith.constant 4 : index
    %c0_1 = arith.constant 0 : index
    %1 = vector.load %arg9[%c4, %c0_1] : memref<8x32xf32, #tpu.memory_space<vmem>>, vector<1x32xf32>
    %c5 = arith.constant 5 : index
    %c0_2 = arith.constant 0 : index
    %2 = vector.load %arg9[%c5, %c0_2] : memref<8x32xf32, #tpu.memory_space<vmem>>, vector<1x32xf32>
    %c6 = arith.constant 6 : index
    %c0_3 = arith.constant 0 : index
    %3 = vector.load %arg9[%c6, %c0_3] : memref<8x32xf32, #tpu.memory_space<vmem>>, vector<1x32xf32>
    %c7 = arith.constant 7 : index
    %c0_4 = arith.constant 0 : index
    %4 = vector.load %arg9[%c7, %c0_4] : memref<8x32xf32, #tpu.memory_space<vmem>>, vector<1x32xf32>
    %c0_5 = arith.constant 0 : index
    %c0_6 = arith.constant 0 : index
    %5 = vector.load %arg1[%c0_5, %c0_6] : memref<256x6xf32, #tpu.memory_space<vmem>>, vector<256x6xf32>
    %c0_7 = arith.constant 0 : index
    %c0_8 = arith.constant 0 : index
    %6 = vector.load %arg2[%c0_7, %c0_8] : memref<6x32xf32, #tpu.memory_space<vmem>>, vector<6x32xf32>
    %cst = arith.constant dense<0.000000e+00> : vector<256x32xf32>
    %7 = tpu.matmul %5, %6, %cst {dimension_numbers = #tpu.dot_dimension_numbers<[1], [0], [0], [1], [0, 0, 1, 1], [], []>} : vector<256x6xf32>, vector<6x32xf32>, vector<256x32xf32> -> vector<256x32xf32>
    %8 = vector.broadcast %1 : vector<1x32xf32> to vector<256x32xf32>
    %9 = arith.addf %7, %8 : vector<256x32xf32>
    %c0_9 = arith.constant 0 : index
    %c0_10 = arith.constant 0 : index
    %10 = vector.load %arg8[%c0_9, %c0_10] : memref<256x32xf32, #tpu.memory_space<vmem>>, vector<256x32xf32>
    %11 = arith.addf %9, %10 : vector<256x32xf32>
    %c0_11 = arith.constant 0 : index
    %c0_12 = arith.constant 0 : index
    %12 = vector.load %arg3[%c0_11, %c0_12] : memref<32x96xf32, #tpu.memory_space<vmem>>, vector<32x96xf32>
    %cst_13 = arith.constant dense<0.000000e+00> : vector<256x96xf32>
    %13 = tpu.matmul %11, %12, %cst_13 {dimension_numbers = #tpu.dot_dimension_numbers<[1], [0], [0], [1], [0, 0, 1, 1], [], []>} : vector<256x32xf32>, vector<32x96xf32>, vector<256x96xf32> -> vector<256x96xf32>
    %c0_14 = arith.constant 0 : index
    %c0_15 = arith.constant 0 : index
    %14 = vector.load %arg6[%c0_14, %c0_15] : memref<1x96xf32, #tpu.memory_space<vmem>>, vector<1x96xf32>
    %15 = vector.broadcast %14 : vector<1x96xf32> to vector<256x96xf32>
    %16 = arith.addf %13, %15 : vector<256x96xf32>
    %17 = vector.extract_strided_slice %16 {offsets = [0, 0], sizes = [256, 32], strides = [1, 1]} : vector<256x96xf32> to vector<256x32xf32>
    %18 = vector.shape_cast %17 : vector<256x32xf32> to vector<4x64x32xf32>
    %19 = vector.extract_strided_slice %16 {offsets = [0, 32], sizes = [256, 32], strides = [1, 1]} : vector<256x96xf32> to vector<256x32xf32>
    %20 = vector.shape_cast %19 : vector<256x32xf32> to vector<4x64x32xf32>
    %21 = vector.extract_strided_slice %16 {offsets = [0, 64], sizes = [256, 32], strides = [1, 1]} : vector<256x96xf32> to vector<256x32xf32>
    %22 = vector.shape_cast %21 : vector<256x32xf32> to vector<4x64x32xf32>
    %cst_16 = arith.constant 0.000000e+00 : f32
    %23 = vector.broadcast %cst_16 : f32 to vector<4x64x32xf32>
    %24 = vector.extract_strided_slice %0 {offsets = [0, 0], sizes = [1, 32], strides = [1, 1]} : vector<4x32xf32> to vector<1x32xf32>
    %25 = vector.shape_cast %24 : vector<1x32xf32> to vector<1x1x32xf32>
    %26 = vector.broadcast %25 : vector<1x1x32xf32> to vector<4x64x32xf32>
    %27 = arith.mulf %20, %26 : vector<4x64x32xf32>
    "tpu.trace_start"() <{level = 10 : i32, message = "gpc,gqc->gpq"}> : () -> ()
    %cst_17 = arith.constant dense<0.000000e+00> : vector<4x64x64xf32>
    %28 = tpu.matmul %18, %27, %cst_17 {dimension_numbers = #tpu.dot_dimension_numbers<[2], [2], [1], [1], [0, 0, 0, 1, 1, 1], [0], [0]>} : vector<4x64x32xf32>, vector<4x64x32xf32>, vector<4x64x64xf32> -> vector<4x64x64xf32>
    "tpu.trace_stop"() : () -> ()
    %cst_18 = arith.constant 0.353553385 : f32
    %29 = vector.broadcast %cst_18 : f32 to vector<4x64x64xf32>
    %30 = arith.mulf %28, %29 : vector<4x64x64xf32>
    %cst_19 = arith.constant dense<0xFF800000> : vector<4x64xf32>
    %31 = vector.multi_reduction <maximumf>, %30, %cst_19 [2] : vector<4x64x64xf32> to vector<4x64xf32>
    %32 = vector.shape_cast %31 : vector<4x64xf32> to vector<4x64x1xf32>
    %33 = vector.broadcast %32 : vector<4x64x1xf32> to vector<4x64x64xf32>
    %34 = arith.subf %30, %33 : vector<4x64x64xf32>
    %35 = math.exp %34 : vector<4x64x64xf32>
    %cst_20 = arith.constant dense<0.000000e+00> : vector<4x64xf32>
    %36 = vector.multi_reduction <add>, %35, %cst_20 [2] : vector<4x64x64xf32> to vector<4x64xf32>
    %37 = vector.shape_cast %36 : vector<4x64xf32> to vector<4x64x1xf32>
    %38 = tpu.reciprocal %37 {approx = true} : vector<4x64x1xf32> -> vector<4x64x1xf32>
    %39 = vector.broadcast %38 : vector<4x64x1xf32> to vector<4x64x64xf32>
    %40 = arith.mulf %35, %39 : vector<4x64x64xf32>
    "tpu.trace_start"() <{level = 10 : i32, message = "gpq,gqc->gpc"}> : () -> ()
    %cst_21 = arith.constant dense<0.000000e+00> : vector<4x64x32xf32>
    %41 = tpu.matmul %40, %22, %cst_21 {dimension_numbers = #tpu.dot_dimension_numbers<[2], [1], [1], [2], [0, 0, 0, 1, 1, 2], [0], [0]>} : vector<4x64x64xf32>, vector<4x64x32xf32>, vector<4x64x32xf32> -> vector<4x64x32xf32>
    "tpu.trace_stop"() : () -> ()
    %42 = vector.shape_cast %24 : vector<1x32xf32> to vector<1x1x32xf32>
    %43 = vector.broadcast %42 : vector<1x1x32xf32> to vector<4x64x32xf32>
    %44 = arith.mulf %41, %43 : vector<4x64x32xf32>
    %45 = arith.addf %23, %44 : vector<4x64x32xf32>
    %46 = vector.extract_strided_slice %0 {offsets = [1, 0], sizes = [1, 32], strides = [1, 1]} : vector<4x32xf32> to vector<1x32xf32>
    %47 = vector.shape_cast %46 : vector<1x32xf32> to vector<1x1x32xf32>
    %48 = vector.broadcast %47 : vector<1x1x32xf32> to vector<4x64x32xf32>
    %49 = arith.mulf %20, %48 : vector<4x64x32xf32>
    "tpu.trace_start"() <{level = 10 : i32, message = "gpc,gqc->gpq"}> : () -> ()
    %cst_22 = arith.constant dense<0.000000e+00> : vector<4x64x64xf32>
    %50 = tpu.matmul %18, %49, %cst_22 {dimension_numbers = #tpu.dot_dimension_numbers<[2], [2], [1], [1], [0, 0, 0, 1, 1, 1], [0], [0]>} : vector<4x64x32xf32>, vector<4x64x32xf32>, vector<4x64x64xf32> -> vector<4x64x64xf32>
    "tpu.trace_stop"() : () -> ()
    %cst_23 = arith.constant 0.353553385 : f32
    %51 = vector.broadcast %cst_23 : f32 to vector<4x64x64xf32>
    %52 = arith.mulf %50, %51 : vector<4x64x64xf32>
    %cst_24 = arith.constant dense<0xFF800000> : vector<4x64xf32>
    %53 = vector.multi_reduction <maximumf>, %52, %cst_24 [2] : vector<4x64x64xf32> to vector<4x64xf32>
    %54 = vector.shape_cast %53 : vector<4x64xf32> to vector<4x64x1xf32>
    %55 = vector.broadcast %54 : vector<4x64x1xf32> to vector<4x64x64xf32>
    %56 = arith.subf %52, %55 : vector<4x64x64xf32>
    %57 = math.exp %56 : vector<4x64x64xf32>
    %cst_25 = arith.constant dense<0.000000e+00> : vector<4x64xf32>
    %58 = vector.multi_reduction <add>, %57, %cst_25 [2] : vector<4x64x64xf32> to vector<4x64xf32>
    %59 = vector.shape_cast %58 : vector<4x64xf32> to vector<4x64x1xf32>
    %60 = tpu.reciprocal %59 {approx = true} : vector<4x64x1xf32> -> vector<4x64x1xf32>
    %61 = vector.broadcast %60 : vector<4x64x1xf32> to vector<4x64x64xf32>
    %62 = arith.mulf %57, %61 : vector<4x64x64xf32>
    "tpu.trace_start"() <{level = 10 : i32, message = "gpq,gqc->gpc"}> : () -> ()
    %cst_26 = arith.constant dense<0.000000e+00> : vector<4x64x32xf32>
    %63 = tpu.matmul %62, %22, %cst_26 {dimension_numbers = #tpu.dot_dimension_numbers<[2], [1], [1], [2], [0, 0, 0, 1, 1, 2], [0], [0]>} : vector<4x64x64xf32>, vector<4x64x32xf32>, vector<4x64x32xf32> -> vector<4x64x32xf32>
    "tpu.trace_stop"() : () -> ()
    %64 = vector.shape_cast %46 : vector<1x32xf32> to vector<1x1x32xf32>
    %65 = vector.broadcast %64 : vector<1x1x32xf32> to vector<4x64x32xf32>
    %66 = arith.mulf %63, %65 : vector<4x64x32xf32>
    %67 = arith.addf %45, %66 : vector<4x64x32xf32>
    %68 = vector.extract_strided_slice %0 {offsets = [2, 0], sizes = [1, 32], strides = [1, 1]} : vector<4x32xf32> to vector<1x32xf32>
    %69 = vector.shape_cast %68 : vector<1x32xf32> to vector<1x1x32xf32>
    %70 = vector.broadcast %69 : vector<1x1x32xf32> to vector<4x64x32xf32>
    %71 = arith.mulf %20, %70 : vector<4x64x32xf32>
    "tpu.trace_start"() <{level = 10 : i32, message = "gpc,gqc->gpq"}> : () -> ()
    %cst_27 = arith.constant dense<0.000000e+00> : vector<4x64x64xf32>
    %72 = tpu.matmul %18, %71, %cst_27 {dimension_numbers = #tpu.dot_dimension_numbers<[2], [2], [1], [1], [0, 0, 0, 1, 1, 1], [0], [0]>} : vector<4x64x32xf32>, vector<4x64x32xf32>, vector<4x64x64xf32> -> vector<4x64x64xf32>
    "tpu.trace_stop"() : () -> ()
    %cst_28 = arith.constant 0.353553385 : f32
    %73 = vector.broadcast %cst_28 : f32 to vector<4x64x64xf32>
    %74 = arith.mulf %72, %73 : vector<4x64x64xf32>
    %cst_29 = arith.constant dense<0xFF800000> : vector<4x64xf32>
    %75 = vector.multi_reduction <maximumf>, %74, %cst_29 [2] : vector<4x64x64xf32> to vector<4x64xf32>
    %76 = vector.shape_cast %75 : vector<4x64xf32> to vector<4x64x1xf32>
    %77 = vector.broadcast %76 : vector<4x64x1xf32> to vector<4x64x64xf32>
    %78 = arith.subf %74, %77 : vector<4x64x64xf32>
    %79 = math.exp %78 : vector<4x64x64xf32>
    %cst_30 = arith.constant dense<0.000000e+00> : vector<4x64xf32>
    %80 = vector.multi_reduction <add>, %79, %cst_30 [2] : vector<4x64x64xf32> to vector<4x64xf32>
    %81 = vector.shape_cast %80 : vector<4x64xf32> to vector<4x64x1xf32>
    %82 = tpu.reciprocal %81 {approx = true} : vector<4x64x1xf32> -> vector<4x64x1xf32>
    %83 = vector.broadcast %82 : vector<4x64x1xf32> to vector<4x64x64xf32>
    %84 = arith.mulf %79, %83 : vector<4x64x64xf32>
    "tpu.trace_start"() <{level = 10 : i32, message = "gpq,gqc->gpc"}> : () -> ()
    %cst_31 = arith.constant dense<0.000000e+00> : vector<4x64x32xf32>
    %85 = tpu.matmul %84, %22, %cst_31 {dimension_numbers = #tpu.dot_dimension_numbers<[2], [1], [1], [2], [0, 0, 0, 1, 1, 2], [0], [0]>} : vector<4x64x64xf32>, vector<4x64x32xf32>, vector<4x64x32xf32> -> vector<4x64x32xf32>
    "tpu.trace_stop"() : () -> ()
    %86 = vector.shape_cast %68 : vector<1x32xf32> to vector<1x1x32xf32>
    %87 = vector.broadcast %86 : vector<1x1x32xf32> to vector<4x64x32xf32>
    %88 = arith.mulf %85, %87 : vector<4x64x32xf32>
    %89 = arith.addf %67, %88 : vector<4x64x32xf32>
    %90 = vector.extract_strided_slice %0 {offsets = [3, 0], sizes = [1, 32], strides = [1, 1]} : vector<4x32xf32> to vector<1x32xf32>
    %91 = vector.shape_cast %90 : vector<1x32xf32> to vector<1x1x32xf32>
    %92 = vector.broadcast %91 : vector<1x1x32xf32> to vector<4x64x32xf32>
    %93 = arith.mulf %20, %92 : vector<4x64x32xf32>
    "tpu.trace_start"() <{level = 10 : i32, message = "gpc,gqc->gpq"}> : () -> ()
    %cst_32 = arith.constant dense<0.000000e+00> : vector<4x64x64xf32>
    %94 = tpu.matmul %18, %93, %cst_32 {dimension_numbers = #tpu.dot_dimension_numbers<[2], [2], [1], [1], [0, 0, 0, 1, 1, 1], [0], [0]>} : vector<4x64x32xf32>, vector<4x64x32xf32>, vector<4x64x64xf32> -> vector<4x64x64xf32>
    "tpu.trace_stop"() : () -> ()
    %cst_33 = arith.constant 0.353553385 : f32
    %95 = vector.broadcast %cst_33 : f32 to vector<4x64x64xf32>
    %96 = arith.mulf %94, %95 : vector<4x64x64xf32>
    %cst_34 = arith.constant dense<0xFF800000> : vector<4x64xf32>
    %97 = vector.multi_reduction <maximumf>, %96, %cst_34 [2] : vector<4x64x64xf32> to vector<4x64xf32>
    %98 = vector.shape_cast %97 : vector<4x64xf32> to vector<4x64x1xf32>
    %99 = vector.broadcast %98 : vector<4x64x1xf32> to vector<4x64x64xf32>
    %100 = arith.subf %96, %99 : vector<4x64x64xf32>
    %101 = math.exp %100 : vector<4x64x64xf32>
    %cst_35 = arith.constant dense<0.000000e+00> : vector<4x64xf32>
    %102 = vector.multi_reduction <add>, %101, %cst_35 [2] : vector<4x64x64xf32> to vector<4x64xf32>
    %103 = vector.shape_cast %102 : vector<4x64xf32> to vector<4x64x1xf32>
    %104 = tpu.reciprocal %103 {approx = true} : vector<4x64x1xf32> -> vector<4x64x1xf32>
    %105 = vector.broadcast %104 : vector<4x64x1xf32> to vector<4x64x64xf32>
    %106 = arith.mulf %101, %105 : vector<4x64x64xf32>
    "tpu.trace_start"() <{level = 10 : i32, message = "gpq,gqc->gpc"}> : () -> ()
    %cst_36 = arith.constant dense<0.000000e+00> : vector<4x64x32xf32>
    %107 = tpu.matmul %106, %22, %cst_36 {dimension_numbers = #tpu.dot_dimension_numbers<[2], [1], [1], [2], [0, 0, 0, 1, 1, 2], [0], [0]>} : vector<4x64x64xf32>, vector<4x64x32xf32>, vector<4x64x32xf32> -> vector<4x64x32xf32>
    "tpu.trace_stop"() : () -> ()
    %108 = vector.shape_cast %90 : vector<1x32xf32> to vector<1x1x32xf32>
    %109 = vector.broadcast %108 : vector<1x1x32xf32> to vector<4x64x32xf32>
    %110 = arith.mulf %107, %109 : vector<4x64x32xf32>
    %111 = arith.addf %89, %110 : vector<4x64x32xf32>
    %112 = vector.shape_cast %11 : vector<256x32xf32> to vector<4x64x32xf32>
    %113 = arith.addf %112, %111 : vector<4x64x32xf32>
    %cst_37 = arith.constant dense<0.000000e+00> : vector<4x32xf32>
    %114 = vector.multi_reduction <add>, %113, %cst_37 [1] : vector<4x64x32xf32> to vector<4x32xf32>
    %115 = arith.mulf %113, %113 : vector<4x64x32xf32>
    %cst_38 = arith.constant dense<0.000000e+00> : vector<4x32xf32>
    %116 = vector.multi_reduction <add>, %115, %cst_38 [1] : vector<4x64x32xf32> to vector<4x32xf32>
    "tpu.trace_start"() <{level = 10 : i32, message = "gc,hc->gh"}> : () -> ()
    %cst_39 = arith.constant dense<0.000000e+00> : vector<4x4xf32>
    %117 = tpu.matmul %114, %0, %cst_39 {dimension_numbers = #tpu.dot_dimension_numbers<[1], [1], [0], [0], [0, 0, 1, 0], [], []>} : vector<4x32xf32>, vector<4x32xf32>, vector<4x4xf32> -> vector<4x4xf32>
    %cst_40 = arith.constant dense<0.000000e+00> : vector<4x4xf32>
    %118 = tpu.matmul %116, %0, %cst_40 {dimension_numbers = #tpu.dot_dimension_numbers<[1], [1], [0], [0], [0, 0, 1, 0], [], []>} : vector<4x32xf32>, vector<4x32xf32>, vector<4x4xf32> -> vector<4x4xf32>
    "tpu.trace_stop"() : () -> ()
    %cst_41 = arith.constant 0.001953125 : f32
    %119 = vector.broadcast %cst_41 : f32 to vector<4x4xf32>
    %120 = arith.mulf %117, %119 : vector<4x4xf32>
    %cst_42 = arith.constant 0.001953125 : f32
    %121 = vector.broadcast %cst_42 : f32 to vector<4x4xf32>
    %122 = arith.mulf %118, %121 : vector<4x4xf32>
    %123 = arith.mulf %120, %120 : vector<4x4xf32>
    %124 = arith.subf %122, %123 : vector<4x4xf32>
    %cst_43 = arith.constant 9.99999974E-6 : f32
    %125 = vector.broadcast %cst_43 : f32 to vector<4x4xf32>
    %126 = arith.addf %124, %125 : vector<4x4xf32>
    %127 = math.rsqrt %126 : vector<4x4xf32>
    "tpu.trace_start"() <{level = 10 : i32, message = "gh,hc->gc"}> : () -> ()
    %cst_44 = arith.constant dense<0.000000e+00> : vector<4x32xf32>
    %128 = tpu.matmul %120, %0, %cst_44 {dimension_numbers = #tpu.dot_dimension_numbers<[1], [0], [0], [1], [0, 0, 1, 1], [], []>} : vector<4x4xf32>, vector<4x32xf32>, vector<4x32xf32> -> vector<4x32xf32>
    %cst_45 = arith.constant dense<0.000000e+00> : vector<4x32xf32>
    %129 = tpu.matmul %127, %0, %cst_45 {dimension_numbers = #tpu.dot_dimension_numbers<[1], [0], [0], [1], [0, 0, 1, 1], [], []>} : vector<4x4xf32>, vector<4x32xf32>, vector<4x32xf32> -> vector<4x32xf32>
    "tpu.trace_stop"() : () -> ()
    %130 = vector.shape_cast %128 : vector<4x32xf32> to vector<4x1x32xf32>
    %131 = vector.broadcast %130 : vector<4x1x32xf32> to vector<4x64x32xf32>
    %132 = arith.subf %113, %131 : vector<4x64x32xf32>
    %133 = vector.shape_cast %129 : vector<4x32xf32> to vector<4x1x32xf32>
    %134 = vector.broadcast %133 : vector<4x1x32xf32> to vector<4x64x32xf32>
    %135 = arith.mulf %132, %134 : vector<4x64x32xf32>
    %136 = vector.shape_cast %135 : vector<4x64x32xf32> to vector<256x32xf32>
    %137 = vector.broadcast %2 : vector<1x32xf32> to vector<256x32xf32>
    %138 = arith.mulf %136, %137 : vector<256x32xf32>
    %139 = vector.broadcast %3 : vector<1x32xf32> to vector<256x32xf32>
    %140 = arith.addf %138, %139 : vector<256x32xf32>
    %c0_46 = arith.constant 0 : index
    %c0_47 = arith.constant 0 : index
    %141 = vector.load %arg4[%c0_46, %c0_47] : memref<32x32xf32, #tpu.memory_space<vmem>>, vector<32x32xf32>
    %cst_48 = arith.constant dense<0.000000e+00> : vector<256x32xf32>
    %142 = tpu.matmul %140, %141, %cst_48 {dimension_numbers = #tpu.dot_dimension_numbers<[1], [0], [0], [1], [0, 0, 1, 1], [], []>} : vector<256x32xf32>, vector<32x32xf32>, vector<256x32xf32> -> vector<256x32xf32>
    %143 = vector.broadcast %4 : vector<1x32xf32> to vector<256x32xf32>
    %144 = arith.addf %142, %143 : vector<256x32xf32>
    %cst_49 = arith.constant 0.000000e+00 : f32
    %145 = vector.broadcast %cst_49 : f32 to vector<256x32xf32>
    %146 = arith.cmpf ogt, %144, %145 : vector<256x32xf32>
    %cst_50 = arith.constant 0.000000e+00 : f32
    %147 = vector.broadcast %cst_50 : f32 to vector<256x32xf32>
    %148 = arith.minimumf %144, %147 : vector<256x32xf32>
    %149 = math.exp %148 : vector<256x32xf32>
    %cst_51 = arith.constant 1.000000e+00 : f32
    %150 = vector.broadcast %cst_51 : f32 to vector<256x32xf32>
    %151 = arith.subf %149, %150 : vector<256x32xf32>
    %152 = arith.select %146, %144, %151 : vector<256x32xi1>, vector<256x32xf32>
    %c0_52 = arith.constant 0 : index
    %c0_53 = arith.constant 0 : index
    %153 = vector.load %arg5[%c0_52, %c0_53] : memref<32x128xf32, #tpu.memory_space<vmem>>, vector<32x128xf32>
    %cst_54 = arith.constant dense<0.000000e+00> : vector<256x128xf32>
    %154 = tpu.matmul %152, %153, %cst_54 {dimension_numbers = #tpu.dot_dimension_numbers<[1], [0], [0], [1], [0, 0, 1, 1], [], []>} : vector<256x32xf32>, vector<32x128xf32>, vector<256x128xf32> -> vector<256x128xf32>
    %c0_55 = arith.constant 0 : index
    %c0_56 = arith.constant 0 : index
    %155 = vector.load %arg7[%c0_55, %c0_56] : memref<1x128xf32, #tpu.memory_space<vmem>>, vector<1x128xf32>
    %156 = vector.broadcast %155 : vector<1x128xf32> to vector<256x128xf32>
    %157 = arith.addf %154, %156 : vector<256x128xf32>
    %c0_57 = arith.constant 0 : index
    %c0_58 = arith.constant 0 : index
    %158 = vector.load %arg10[%c0_57, %c0_58] : memref<256x128xf32, #tpu.memory_space<vmem>>, vector<256x128xf32>
    tpu.vector_store %arg10[%c0_57, %c0_58], %157 {strides = array<i32>} : memref<256x128xf32, #tpu.memory_space<vmem>>, vector<256x128xf32>,
    return
  }
  func.func @transform_0(%arg0: i32) -> (i32, i32) {
    %c0_i32 = arith.constant 0 : i32
    %c0_i32_0 = arith.constant 0 : i32
    return %arg0, %c0_i32 : i32, i32
  }
  func.func @transform_1(%arg0: i32) -> (i32, i32) {
    %c0_i32 = arith.constant 0 : i32
    %c0_i32_0 = arith.constant 0 : i32
    %c0_i32_1 = arith.constant 0 : i32
    return %c0_i32, %c0_i32_0 : i32, i32
  }
  func.func @transform_2(%arg0: i32) -> (i32, i32) {
    %c0_i32 = arith.constant 0 : i32
    %c0_i32_0 = arith.constant 0 : i32
    %c0_i32_1 = arith.constant 0 : i32
    return %c0_i32, %c0_i32_0 : i32, i32
  }
  func.func @transform_3(%arg0: i32) -> (i32, i32) {
    %c0_i32 = arith.constant 0 : i32
    %c0_i32_0 = arith.constant 0 : i32
    %c0_i32_1 = arith.constant 0 : i32
    return %c0_i32, %c0_i32_0 : i32, i32
  }
  func.func @transform_4(%arg0: i32) -> (i32, i32) {
    %c0_i32 = arith.constant 0 : i32
    %c0_i32_0 = arith.constant 0 : i32
    %c0_i32_1 = arith.constant 0 : i32
    return %c0_i32, %c0_i32_0 : i32, i32
  }
  func.func @transform_5(%arg0: i32) -> (i32, i32) {
    %c0_i32 = arith.constant 0 : i32
    %c0_i32_0 = arith.constant 0 : i32
    %c0_i32_1 = arith.constant 0 : i32
    return %c0_i32, %c0_i32_0 : i32, i32
  }
  func.func @transform_6(%arg0: i32) -> (i32, i32) {
    %c0_i32 = arith.constant 0 : i32
    %c0_i32_0 = arith.constant 0 : i32
    %c0_i32_1 = arith.constant 0 : i32
    return %c0_i32, %c0_i32_0 : i32, i32
  }
  func.func @transform_7(%arg0: i32) -> (i32, i32) {
    %c0_i32 = arith.constant 0 : i32
    %c0_i32_0 = arith.constant 0 : i32
    %c0_i32_1 = arith.constant 0 : i32
    return %c0_i32, %c0_i32_0 : i32, i32
  }
  func.func @transform_8(%arg0: i32) -> (i32, i32) {
    %c0_i32 = arith.constant 0 : i32
    %c0_i32_0 = arith.constant 0 : i32
    %c0_i32_1 = arith.constant 0 : i32
    return %c0_i32, %c0_i32_0 : i32, i32
  }
  func.func @transform_9(%arg0: i32) -> (i32, i32) {
    %c0_i32 = arith.constant 0 : i32
    %c0_i32_0 = arith.constant 0 : i32
    return %arg0, %c0_i32 : i32, i32
  }
}

</mosaic_0001>

<bundles_post_ra>
// kernel: tpu_custom_call.1
= control target key start
LH: loop header
LB: loop body
LE: loop exit
PB: predicated region body
PF: predicated region fallthrough
CT: control target
= control target key end

     0   :  { %14 = vsyncpa [#allocation3], 0  ;;  %s17936_s0 = inlined_call_operand.vmem [shape: f32[512,6], index: 0, kind: input, shape index: {}]   ;;  %s17937_s1 = inlined_call_operand.vmem [shape: f32[6,32], index: 1, kind: input, shape index: {}]   ;;  %s17938_s2 = inlined_call_operand.vmem [shape: f32[32,96], index: 2, kind: input, shape index: {}]   ;;  %s17939_s3 = inlined_call_operand.vmem [shape: f32[32,32], index: 3, kind: input, shape index: {}]   ;;  %s17940_s4 = inlined_call_operand.vmem [shape: f32[32,128], index: 4, kind: input, shape index: {}]   ;;  %s17941_s5 = inlined_call_operand.vmem [shape: f32[1,96], index: 5, kind: input, shape index: {}]   ;;  %s17942_s6 = inlined_call_operand.vmem [shape: f32[1,128], index: 6, kind: input, shape index: {}]   ;;  %s17943_s7 = inlined_call_operand.vmem [shape: f32[256,32], index: 7, kind: input, shape index: {}]   ;;  %s17944_s8 = inlined_call_operand.vmem [shape: f32[8,32], index: 8, kind: input, shape index: {}]   ;;  %s17945_s9 = inlined_call_operand.hbm [shape: f32[512,128], index: 9, kind: output, shape index: {}]  }
   0x1   :  { %16 = vsyncpa [#allocation3 + $0x1], 0  ;;  %s13549_s30 = smov 0   ;;  %s13551_s10 = smov 0  }
   0x2   :  { %s13553_s11 = smov 0   ;;  %s13555_s12 = smov 0  }
   0x3 LB: > { %s13570_s13 = sadd.s32 4294967295, %s13488_s12   ;;  %s9367_s14 = sadd.s32 4294967294, %s13488_s12   ;;  %s13488_s12 = sphi %s13555_s12, %s18595_s12   ;;  %s13484_s11 = sphi %s13553_s11, %s18594_s11   ;;  %s13480_s10 = sphi %s13551_s10, %s18593_s10   ;;  %s13476_s30 = sphi %s13549_s30, %s18592_s30  }
   0x4   : > { %s13574_s15 = sadd.s32 1, %s13488_s12   ;;  %s223_s16 = sadd.s32 1, %s13484_s11 }
   0x5   : > { %s220_s17 = ssub.s32 %s13488_s12, %s13574_s15  ;;  %p233_p0 = scmp.ne.s32.totalorder %s13484_s11, %s13480_s10 }
   0x6   : > { %p221_p1 = scmp.eq.s32.totalorder %s220_s17, 0  ;;  %p234_p2 = scmp.eq.s32.totalorder %s13570_s13, 1 }
   0x7   : > { %p239_p3 = scmp.ne.s32.totalorder %s13480_s10, %s13476_s30  ;;  %p240_p4 = scmp.eq.s32.totalorder %s9367_s14, 1 }
   0x8   : > { %s13585_s18 = scalar_select %p221_p1, %s13484_s11, %s223_s16  }
   0x9   : > { %p13587_p5 = por %p234_p2, %p233_p0  ;;  %p13591_p6 = por %p240_p4, %p239_p3 }
   0xa   : > { %p9370_p7 = scmp.ge.s32.totalorder %s13488_s12, 1  ;;  %p291_p8 = scmp.lt.s32.totalorder %s13488_s12, 3 }
   0xc   : > { %p292_p9 = pnand %p9370_p7, %p291_p8 }
   0xe   : > { %295 = sbr.rel (%p292_p9) target bundleno = 4361 (0x1109), region = 56 }
  0x15   : > { %v371_v0 = vld [vmem:[%s17937_s1] sm:$0x3f]  ;;  %vm473_vm0 = vcmask 1045504   ;;  %s9372_s23 = sshll.u32 %s13570_s13, 5  ;;  %v767_v2 = vld [vmem:[%s17938_s2 + $0x8] sm:$0xff]  ;;  %vm376_vm1 = vcmask 48128   ;;  %v1099_v39 = vlaneseq }
  0x16   : > { %v766_v1 = vld [vmem:[%s17938_s2] sm:$0xff]  ;;  %10600 = vmatprep.subr.msk.mxu0 %vm473_vm0, %v371_v0  ;;  %p328_p10 = scmp.lt.s32.totalorder %s9372_s23, 63  ;;  %v768_v36 = vld [vmem:[%s17938_s2 + $0x10] sm:$0xff]  ;;  %v769_v37 = vld [vmem:[%s17938_s2 + $0x18] sm:$0xff]  ;;  %s13490_s26 = smov 32   ;;  %vm777_vm2 = vcmask 261120  }
  0x17   : > { %10601 = vmatpush3.msk.msra.mxu0 %vm473_vm0, %v371_v0  ;;  %v11734_v3 = vpack.c.bf16 %v767_v2, %v766_v1  ;;  %v11738_v38 = vpack.c.bf16 %v769_v37, %v768_v36  ;;  %v13682_v40 = vshrl.u32 %v1099_v39, 7  ;;  %v13687_v41 = vld [vmem:[%s17944_s8] sm:$0xf]  ;;  %v13701_v44 = vld [vmem:[%s17944_s8 + $0x4] ss:$0 sm:$0xff]  ;;  %v703_v49 = vld [vmem:[%s17943_s7 + $0x8] sm:$0xff] }
  0x18   : > { %s18597_s23 = smov (!%p328_p10, %s9372_s23), 63  ;;  %v702_v48 = vld [vmem:[%s17943_s7] sm:$0xff]  ;;  %v704_v56 = vld [vmem:[%s17943_s7 + $0x10] sm:$0xff]  ;;  %v705_v57 = vld [vmem:[%s17943_s7 + $0x18] sm:$0xff]  ;;  %s13491_s29 = smov 96   ;;  %vm1847_vm4 = vcmask 523264  }
  0x19   : > { %11735 = vmatprep.subr.bf16.mxu1 %v11734_v3  ;;  %s9373_s28 = sshll.u32 %s18597_s23, 3  ;;  %18154 = vst [vmem:[#allocation5_spill] sm:$0xff] %v13682_v40  ;;  %v13690_v42 = vsub.s32 0, %v13682_v40  ;;  %v706_v0 = vld [vmem:[%s17943_s7 + $0x20] sm:$0xff]  ;;  %v707_v1 = vld [vmem:[%s17943_s7 + $0x28] sm:$0xff]  ;;  %s13492_s14 = smov 64   ;;  %vm14202_vm3 = vmpackc.low %vm777_vm2, %vm777_vm2 }
  0x1a   : > { %11737 = vmatpush3.bf16.msra.mxu1 %v11734_v3  ;;  %s13610_s16 = scalar_lea.vmem %s17936_s0, %s9373_s28  ;;  %vm13494_vm5 = vmmov 0   ;;  %vm7864_vm6 = vcmask 1041409   ;;  %vm7866_vm7 = vcmask 1042434   ;;  %vm7868_vm8 = vcmask 1043459   ;;  %s9938_s28 = sshll.u32 %s13570_s13, 12 }
  0x1b   : > { %v339_v4 = vld [vmem:[%s13610_s16] sm:$0xff]  ;;  %v340_v5 = vld [vmem:[%s13610_s16 + $0x8] sm:$0xff]  ;;  %v341_v6 = vld [vmem:[%s13610_s16 + $0x10] sm:$0xff]  ;;  %11739 = vmatprep.subr.bf16.mxu1 %v11738_v38  ;;  %18155 = vst [vmem:[#allocation6_spill] sm:$0xff] %v13690_v42  ;;  %v13694_v43 = vrot.slane %v13687_v41, %v13690_v42  ;;  %vm8034_vm9 = vcmask 1043456   ;;  %vm8030_vm10 = vcmask 31744   ;;  %s17886_s17 = scalar_lea.hbm %s17945_s9, %s9938_s28 }
  0x1c   : > { %10602 = vmatprep.mubr.msk.f32.mxu0 %vm376_vm1, %v339_v4  ;;  %v342_v7 = vld [vmem:[%s13610_s16 + $0x18] sm:$0xff]  ;;  %v343_v8 = vld [vmem:[%s13610_s16 + $0x20] sm:$0xff]  ;;  %v344_v9 = vld [vmem:[%s13610_s16 + $0x28] sm:$0xff]  ;;  %s13496_s22 = smov [#allocation2]  }
  0x1d   : > { %10603 = vmatmul.mubr.msk.f32.vlgmr.msra.gmra.mrb[0].mxu0 %vm376_vm1, %v340_v5  ;;  %v345_v10 = vld [vmem:[%s13610_s16 + $0x30] sm:$0xff]  ;;  %v346_v11 = vld [vmem:[%s13610_s16 + $0x38] sm:$0xff]  ;;  %v347_v12 = vld [vmem:[%s13610_s16 + $0x40] sm:$0xff]  ;;  %18156 = vst [vmem:[#allocation7_spill] sm:$0xff] %v13694_v43  ;;  %1104 = vrot.lane.b32.xlu0 %v13694_v43, %s13490_s26 }
  0x1e   : > { %10605 = vmatprep.mubr.msk.f32.mxu0 %vm376_vm1, %v341_v6  ;;  %v348_v13 = vld [vmem:[%s13610_s16 + $0x48] sm:$0xff]  ;;  %v349_v14 = vld [vmem:[%s13610_s16 + $0x50] sm:$0xff]  ;;  %v350_v15 = vld [vmem:[%s13610_s16 + $0x58] sm:$0xff]  ;;  %11741 = vmatpush3.bf16.msra.mxu1 %v11738_v38 }
  0x1f   : > { %v351_v16 = vld [vmem:[%s13610_s16 + $0x60] sm:$0xff]  ;;  %v352_v17 = vld [vmem:[%s13610_s16 + $0x68] sm:$0xff]  ;;  %v353_v18 = vld [vmem:[%s13610_s16 + $0x70] sm:$0xff] }
  0x20   : > { %v354_v19 = vld [vmem:[%s13610_s16 + $0x78] sm:$0xff]  ;;  %v355_v20 = vld [vmem:[%s13610_s16 + $0x80] sm:$0xff]  ;;  %v356_v21 = vld [vmem:[%s13610_s16 + $0x88] sm:$0xff] }
  0x21   : > { %10606 = vmatmul.mubr.msk.f32.gmra.mrb[2].mxu0 %vm376_vm1, %v342_v7  ;;  %v357_v22 = vld [vmem:[%s13610_s16 + $0x90] sm:$0xff]  ;;  %v358_v23 = vld [vmem:[%s13610_s16 + $0x98] sm:$0xff]  ;;  %v359_v24 = vld [vmem:[%s13610_s16 + $0xa0] sm:$0xff] }
  0x22   : > { %10608 = vmatprep.mubr.msk.f32.mxu0 %vm376_vm1, %v343_v8  ;;  %v360_v25 = vld [vmem:[%s13610_s16 + $0xa8] sm:$0xff]  ;;  %v361_v26 = vld [vmem:[%s13610_s16 + $0xb0] sm:$0xff]  ;;  %v362_v27 = vld [vmem:[%s13610_s16 + $0xb8] sm:$0xff] }
  0x23   : > { %v363_v28 = vld [vmem:[%s13610_s16 + $0xc0] sm:$0xff]  ;;  %v364_v29 = vld [vmem:[%s13610_s16 + $0xc8] sm:$0xff]  ;;  %v365_v30 = vld [vmem:[%s13610_s16 + $0xd0] sm:$0xff] }
  0x24   : > { %v366_v31 = vld [vmem:[%s13610_s16 + $0xd8] sm:$0xff]  ;;  %v367_v32 = vld [vmem:[%s13610_s16 + $0xe0] sm:$0xff]  ;;  %v368_v33 = vld [vmem:[%s13610_s16 + $0xe8] sm:$0xff] }
  0x25   : > { %10609 = vmatmul.mubr.msk.f32.gmra.mrb[4].mxu0 %vm376_vm1, %v344_v9  ;;  %v369_v34 = vld [vmem:[%s13610_s16 + $0xf0] sm:$0xff]  ;;  %v370_v35 = vld [vmem:[%s13610_s16 + $0xf8] sm:$0xff] }
  0x26   : > { %10611 = vmatprep.mubr.msk.f32.mxu0 %vm376_vm1, %v345_v10  ;;  %v708_v8 = vld [vmem:[%s17943_s7 + $0x30] sm:$0xff]  ;;  %v709_v9 = vld [vmem:[%s17943_s7 + $0x38] sm:$0xff] }
  0x27   : > { %v717_v38 = vld [vmem:[%s17943_s7 + $0x78] sm:$0xff] }
  0x29   : > { %10612 = vmatmul.mubr.msk.f32.gmra.mrb[6].mxu0 %vm376_vm1, %v346_v11 }
  0x2a   : > { %10614 = vmatprep.mubr.msk.f32.mxu0 %vm376_vm1, %v347_v12 }
  0x2d   : > { %10615 = vmatmul.mubr.msk.f32.gmra.mrb[8].mxu0 %vm376_vm1, %v348_v13 }
  0x2e   : > { %10617 = vmatprep.mubr.msk.f32.mxu0 %vm376_vm1, %v349_v14 }
  0x31   : > { %10618 = vmatmul.mubr.msk.f32.gmra.mrb[10].mxu0 %vm376_vm1, %v350_v15 }
  0x32   : > { %10620 = vmatprep.mubr.msk.f32.mxu0 %vm376_vm1, %v351_v16  ;;  %v710_v16 = vld [vmem:[%s17943_s7 + $0x40] sm:$0xff] }
  0x35   : > { %10621 = vmatmul.mubr.msk.f32.gmra.mrb[12].mxu0 %vm376_vm1, %v352_v17  ;;  %v711_v17 = vld [vmem:[%s17943_s7 + $0x48] sm:$0xff] }
  0x36   : > { %10623 = vmatprep.mubr.msk.f32.mxu0 %vm376_vm1, %v353_v18 }
  0x39   : > { %10624 = vmatmul.mubr.msk.f32.gmra.mrb[14].mxu0 %vm376_vm1, %v354_v19 }
  0x3a   : > { %10626 = vmatprep.mubr.msk.f32.mxu0 %vm376_vm1, %v355_v20 }
  0x3d   : > { %10627 = vmatmul.mubr.msk.f32.gmra.mrb[16].mxu0 %vm376_vm1, %v356_v21  ;;  %v713_v21 = vld [vmem:[%s17943_s7 + $0x58] sm:$0xff] }
  0x3e   : > { %10629 = vmatprep.mubr.msk.f32.mxu0 %vm376_vm1, %v357_v22 }
  0x41   : > { %10630 = vmatmul.mubr.msk.f32.gmra.mrb[18].mxu0 %vm376_vm1, %v358_v23 }
  0x42   : > { %10632 = vmatprep.mubr.msk.f32.mxu0 %vm376_vm1, %v359_v24 }
  0x45   : > { %10633 = vmatmul.mubr.msk.f32.gmra.mrb[20].mxu0 %vm376_vm1, %v360_v25  ;;  %v712_v25 = vld [vmem:[%s17943_s7 + $0x50] sm:$0xff] }
  0x46   : > { %10635 = vmatprep.mubr.msk.f32.mxu0 %vm376_vm1, %v361_v26 }
  0x49   : > { %10636 = vmatmul.mubr.msk.f32.gmra.mrb[22].mxu0 %vm376_vm1, %v362_v27 }
  0x4a   : > { %10638 = vmatprep.mubr.msk.f32.mxu0 %vm376_vm1, %v363_v28 }
  0x4d   : > { %10639 = vmatmul.mubr.msk.f32.gmra.mrb[24].mxu0 %vm376_vm1, %v364_v29 }
  0x4e   : > { %10641 = vmatprep.mubr.msk.f32.mxu0 %vm376_vm1, %v365_v30  ;;  %v715_v30 = vld [vmem:[%s17943_s7 + $0x68] sm:$0xff] }
  0x51   : > { %10642 = vmatmul.mubr.msk.f32.gmra.mrb[26].mxu0 %vm376_vm1, %v366_v31 }
  0x52   : > { %10644 = vmatprep.mubr.msk.f32.mxu0 %vm376_vm1, %v367_v32 }
  0x55   : > { %10645 = vmatmul.mubr.msk.f32.gmra.mrb[28].mxu0 %vm376_vm1, %v368_v33  ;;  %v714_v33 = vld [vmem:[%s17943_s7 + $0x60] sm:$0xff] }
  0x56   : > { %10647 = vmatprep.mubr.msk.f32.mxu0 %vm376_vm1, %v369_v34 }
  0x59   : > { %10648 = vmatmul.mubr.msk.f32.gmra.mrb[30].mxu0 %vm376_vm1, %v370_v35 }
  0xf0   : > { %v10604_v45 = vpop.f32.mrb[0].mxu0 }
  0xf1   : > { %v549_v46 = vadd.f32 %v10604_v45, %v13701_v44  ;;  %v543_v47 = vpop.f32.mrb[1].mxu0 }
  0xf2   : > { %v544_v50 = vadd.f32 %v13701_v44, %v543_v47 }
  0xf3   : > { %v13713_v53 = vadd.f32 %v703_v49, %v549_v46  ;;  %v716_v46 = vld [vmem:[%s17943_s7 + $0x70] sm:$0xff] }
  0xf4   : > { %v10607_v51 = vpop.f32.mrb[2].mxu0  ;;  %v13711_v52 = vadd.f32 %v702_v48, %v544_v50 }
  0xf5   : > { %18158 = vst [vmem:[#allocation9_spill] sm:$0xff] %v13713_v53  ;;  %v559_v54 = vadd.f32 %v10607_v51, %v13701_v44  ;;  %v553_v55 = vpop.f32.mrb[3].mxu0  ;;  %v719_v51 = vld [vmem:[%s17943_s7 + $0x88] sm:$0xff] }
  0xf6   : > { %18157 = vst [vmem:[#allocation8_spill] sm:$0xff] %v13711_v52  ;;  %v554_v58 = vadd.f32 %v13701_v44, %v553_v55  ;;  %10658 = vmatprep.mubr.msk.f32.mxu1 %vm777_vm2, %v13711_v52 }
  0xf7   : > { %10659 = vmatmul.mubr.msk.f32.vlgmr.msra.gmra.mrb[0].mxu1 %vm777_vm2, %v13713_v53  ;;  %v13729_v61 = vadd.f32 %v705_v57, %v559_v54 }
  0xf8   : > { %v13727_v59 = vadd.f32 %v704_v56, %v554_v58  ;;  %v10610_v60 = vpop.f32.mrb[4].mxu0  ;;  %v718_v56 = vld [vmem:[%s17943_s7 + $0x80] sm:$0xff] }
  0xf9   : > { %18160 = vst [vmem:[#allocation11_spill] sm:$0xff] %v13729_v61  ;;  %v569_v62 = vadd.f32 %v10610_v60, %v13701_v44  ;;  %v563_v63 = vpop.f32.mrb[5].mxu0 }
  0xfa   : > { %18159 = vst [vmem:[#allocation10_spill] sm:$0xff] %v13727_v59  ;;  %v564_v2 = vadd.f32 %v13701_v44, %v563_v63  ;;  %10661 = vmatprep.mubr.msk.f32.mxu1 %vm777_vm2, %v13727_v59  ;;  %v721_v63 = vld [vmem:[%s17943_s7 + $0x98] sm:$0xff] }
  0xfb   : > { %10662 = vmatmul.mubr.msk.f32.gmra.mrb[2].mxu1 %vm777_vm2, %v13729_v61  ;;  %v13745_v5 = vadd.f32 %v707_v1, %v569_v62 }
  0xfc   : > { %v13743_v3 = vadd.f32 %v706_v0, %v564_v2  ;;  %v10613_v4 = vpop.f32.mrb[6].mxu0  ;;  %v720_v2 = vld [vmem:[%s17943_s7 + $0x90] sm:$0xff] }
  0xfd   : > { %18162 = vst [vmem:[#allocation13_spill] sm:$0xff] %v13745_v5  ;;  %v579_v6 = vadd.f32 %v10613_v4, %v13701_v44  ;;  %v573_v7 = vpop.f32.mrb[7].mxu0 }
  0xfe   : > { %18161 = vst [vmem:[#allocation12_spill] sm:$0xff] %v13743_v3  ;;  %v574_v10 = vadd.f32 %v13701_v44, %v573_v7  ;;  %10664 = vmatprep.mubr.msk.f32.mxu1 %vm777_vm2, %v13743_v3 }
  0xff   : > { %10665 = vmatmul.mubr.msk.f32.gmra.mrb[4].mxu1 %vm777_vm2, %v13745_v5  ;;  %v13761_v13 = vadd.f32 %v709_v9, %v579_v6  ;;  %v723_v9 = vld [vmem:[%s17943_s7 + $0xa8] sm:$0xff] }
 0x100   : > { %v13759_v11 = vadd.f32 %v708_v8, %v574_v10  ;;  %v10616_v12 = vpop.f32.mrb[8].mxu0 }
 0x101   : > { %18164 = vst [vmem:[#allocation15_spill] sm:$0xff] %v13761_v13  ;;  %v589_v14 = vadd.f32 %v10616_v12, %v13701_v44  ;;  %v583_v15 = vpop.f32.mrb[9].mxu0 }
 0x102   : > { %18163 = vst [vmem:[#allocation14_spill] sm:$0xff] %v13759_v11  ;;  %v584_v18 = vadd.f32 %v13701_v44, %v583_v15  ;;  %10667 = vmatprep.mubr.msk.f32.mxu1 %vm777_vm2, %v13759_v11 }
 0x103   : > { %10668 = vmatmul.mubr.msk.f32.gmra.mrb[6].mxu1 %vm777_vm2, %v13761_v13  ;;  %v13780_v22 = vadd.f32 %v711_v17, %v589_v14  ;;  %v722_v14 = vld [vmem:[%s17943_s7 + $0xa0] sm:$0xff] }
 0x104   : > { %v13775_v19 = vadd.f32 %v710_v16, %v584_v18  ;;  %v10619_v20 = vpop.f32.mrb[10].mxu0 }
 0x105   : > { %18166 = vst [vmem:[#allocation17_spill] sm:$0xff] %v13780_v22  ;;  %v599_v23 = vadd.f32 %v10619_v20, %v13701_v44  ;;  %v593_v24 = vpop.f32.mrb[11].mxu0  ;;  %v725_v20 = vld [vmem:[%s17943_s7 + $0xb8] sm:$0xff] }
 0x106   : > { %18165 = vst [vmem:[#allocation16_spill] sm:$0xff] %v13775_v19  ;;  %v594_v26 = vadd.f32 %v13701_v44, %v593_v24  ;;  %10670 = vmatprep.mubr.msk.f32.mxu1 %vm777_vm2, %v13775_v19  ;;  %v724_v24 = vld [vmem:[%s17943_s7 + $0xb0] sm:$0xff] }
 0x107   : > { %v13789_v27 = vadd.f32 %v713_v21, %v599_v23  ;;  %10671 = vmatmul.mubr.msk.f32.gmra.mrb[8].mxu1 %vm777_vm2, %v13780_v22 }
 0x108   : > { %v13793_v28 = vadd.f32 %v712_v25, %v594_v26  ;;  %v10622_v29 = vpop.f32.mrb[12].mxu0 }
 0x109   : > { %18167 = vst [vmem:[#allocation18_spill] sm:$0xff] %v13789_v27  ;;  %v609_v31 = vadd.f32 %v10622_v29, %v13701_v44  ;;  %v603_v32 = vpop.f32.mrb[13].mxu0 }
 0x10a   : > { %18168 = vst [vmem:[#allocation19_spill] sm:$0xff] %v13793_v28  ;;  %v604_v34 = vadd.f32 %v13701_v44, %v603_v32  ;;  %10673 = vmatprep.mubr.msk.f32.mxu1 %vm777_vm2, %v13793_v28 }
 0x10b   : > { %v13805_v35 = vadd.f32 %v715_v30, %v609_v31  ;;  %10674 = vmatmul.mubr.msk.f32.gmra.mrb[10].mxu1 %vm777_vm2, %v13789_v27  ;;  %v727_v31 = vld [vmem:[%s17943_s7 + $0xc8] sm:$0xff] }
 0x10c   : > { %v13809_v36 = vadd.f32 %v714_v33, %v604_v34  ;;  %v10625_v37 = vpop.f32.mrb[14].mxu0  ;;  %v726_v34 = vld [vmem:[%s17943_s7 + $0xc0] sm:$0xff] }
 0x10d   : > { %18169 = vst [vmem:[#allocation20_spill] sm:$0xff] %v13805_v35  ;;  %v619_v39 = vadd.f32 %v10625_v37, %v13701_v44  ;;  %v613_v45 = vpop.f32.mrb[15].mxu0 }
 0x10e   : > { %18170 = vst [vmem:[#allocation21_spill] sm:$0xff] %v13809_v36  ;;  %v614_v47 = vadd.f32 %v13701_v44, %v613_v45  ;;  %10676 = vmatprep.mubr.msk.f32.mxu1 %vm777_vm2, %v13809_v36 }
 0x10f   : > { %v13821_v48 = vadd.f32 %v717_v38, %v619_v39  ;;  %10677 = vmatmul.mubr.msk.f32.gmra.mrb[12].mxu1 %vm777_vm2, %v13805_v35 }
 0x110   : > { %v13825_v49 = vadd.f32 %v716_v46, %v614_v47  ;;  %v10628_v50 = vpop.f32.mrb[16].mxu0  ;;  %v729_v46 = vld [vmem:[%s17943_s7 + $0xd8] sm:$0xff] }
 0x111   : > { %18171 = vst [vmem:[#allocation22_spill] sm:$0xff] %v13821_v48  ;;  %v629_v54 = vadd.f32 %v10628_v50, %v13701_v44  ;;  %v623_v55 = vpop.f32.mrb[17].mxu0 }
 0x112   : > { %18172 = vst [vmem:[#allocation23_spill] sm:$0xff] %v13825_v49  ;;  %v624_v57 = vadd.f32 %v13701_v44, %v623_v55  ;;  %10679 = vmatprep.mubr.msk.f32.mxu1 %vm777_vm2, %v13825_v49 }
 0x113   : > { %v13837_v58 = vadd.f32 %v719_v51, %v629_v54  ;;  %10680 = vmatmul.mubr.msk.f32.gmra.mrb[14].mxu1 %vm777_vm2, %v13821_v48  ;;  %v728_v51 = vld [vmem:[%s17943_s7 + $0xd0] sm:$0xff] }
 0x114   : > { %v13841_v60 = vadd.f32 %v718_v56, %v624_v57  ;;  %v10631_v62 = vpop.f32.mrb[18].mxu0 }
 0x115   : > { %18173 = vst [vmem:[#allocation24_spill] sm:$0xff] %v13837_v58  ;;  %v639_v0 = vadd.f32 %v10631_v62, %v13701_v44  ;;  %v633_v1 = vpop.f32.mrb[19].mxu0  ;;  %v731_v62 = vld [vmem:[%s17943_s7 + $0xe8] sm:$0xff] }
 0x116   : > { %18174 = vst [vmem:[#allocation25_spill] sm:$0xff] %v13841_v60  ;;  %v634_v4 = vadd.f32 %v13701_v44, %v633_v1  ;;  %10682 = vmatprep.mubr.msk.f32.mxu1 %vm777_vm2, %v13841_v60  ;;  %v730_v1 = vld [vmem:[%s17943_s7 + $0xe0] sm:$0xff] }
 0x117   : > { %v13853_v6 = vadd.f32 %v721_v63, %v639_v0  ;;  %10683 = vmatmul.mubr.msk.f32.gmra.mrb[16].mxu1 %vm777_vm2, %v13837_v58 }
 0x118   : > { %v13857_v7 = vadd.f32 %v720_v2, %v634_v4  ;;  %v10634_v8 = vpop.f32.mrb[20].mxu0 }
 0x119   : > { %18175 = vst [vmem:[#allocation26_spill] sm:$0xff] %v13853_v6  ;;  %v649_v10 = vadd.f32 %v10634_v8, %v13701_v44  ;;  %v643_v12 = vpop.f32.mrb[21].mxu0 }
 0x11a   : > { %18176 = vst [vmem:[#allocation27_spill] sm:$0xff] %v13857_v7  ;;  %v644_v15 = vadd.f32 %v13701_v44, %v643_v12  ;;  %10685 = vmatprep.mubr.msk.f32.mxu1 %vm777_vm2, %v13857_v7 }
 0x11b   : > { %v13869_v16 = vadd.f32 %v723_v9, %v649_v10  ;;  %10686 = vmatmul.mubr.msk.f32.gmra.mrb[18].mxu1 %vm777_vm2, %v13853_v6  ;;  %v733_v10 = vld [vmem:[%s17943_s7 + $0xf8] sm:$0xff] }
 0x11c   : > { %v13873_v17 = vadd.f32 %v722_v14, %v644_v15  ;;  %v10637_v18 = vpop.f32.mrb[22].mxu0  ;;  %v732_v15 = vld [vmem:[%s17943_s7 + $0xf0] sm:$0xff] }
 0x11d   : > { %18177 = vst [vmem:[#allocation28_spill] sm:$0xff] %v13869_v16  ;;  %v659_v21 = vadd.f32 %v10637_v18, %v13701_v44  ;;  %v653_v23 = vpop.f32.mrb[23].mxu0 }
 0x11e   : > { %18178 = vst [vmem:[#allocation29_spill] sm:$0xff] %v13873_v17  ;;  %v654_v25 = vadd.f32 %v13701_v44, %v653_v23  ;;  %10688 = vmatprep.mubr.msk.f32.mxu1 %vm777_vm2, %v13873_v17 }
 0x11f   : > { %v13885_v26 = vadd.f32 %v725_v20, %v659_v21  ;;  %10689 = vmatmul.mubr.msk.f32.gmra.mrb[20].mxu1 %vm777_vm2, %v13869_v16 }
 0x120   : > { %v13889_v29 = vadd.f32 %v724_v24, %v654_v25  ;;  %v10640_v30 = vpop.f32.mrb[24].mxu0  ;;  %v13964_v24 = vpop.permute.xlu0 %1104 }
 0x121   : > { %18179 = vst [vmem:[#allocation30_spill] sm:$0xff] %v13885_v26  ;;  %v669_v32 = vadd.f32 %v10640_v30, %v13701_v44  ;;  %v663_v33 = vpop.f32.mrb[25].mxu0 }
 0x122   : > { %18180 = vst [vmem:[#allocation31_spill] sm:$0xff] %v13889_v29  ;;  %v664_v37 = vadd.f32 %v13701_v44, %v663_v33  ;;  %10691 = vmatprep.mubr.msk.f32.mxu1 %vm777_vm2, %v13889_v29 }
 0x123   : > { %v13901_v38 = vadd.f32 %v727_v31, %v669_v32  ;;  %10692 = vmatmul.mubr.msk.f32.gmra.mrb[22].mxu1 %vm777_vm2, %v13885_v26 }
 0x124   : > { %v13905_v39 = vadd.f32 %v726_v34, %v664_v37  ;;  %v10643_v45 = vpop.f32.mrb[26].mxu0 }
 0x125   : > { %18181 = vst [vmem:[#allocation32_spill] sm:$0xff] %v13901_v38  ;;  %v679_v47 = vadd.f32 %v10643_v45, %v13701_v44  ;;  %v673_v50 = vpop.f32.mrb[27].mxu0 }
 0x126   : > { %18182 = vst [vmem:[#allocation33_spill] sm:$0xff] %v13905_v39  ;;  %v674_v54 = vadd.f32 %v13701_v44, %v673_v50  ;;  %10694 = vmatprep.mubr.msk.f32.mxu1 %vm777_vm2, %v13905_v39 }
 0x127   : > { %v13917_v55 = vadd.f32 %v729_v46, %v679_v47  ;;  %10695 = vmatmul.mubr.msk.f32.gmra.mrb[24].mxu1 %vm777_vm2, %v13901_v38 }
 0x128   : > { %v13921_v56 = vadd.f32 %v728_v51, %v674_v54  ;;  %v10646_v57 = vpop.f32.mrb[28].mxu0 }
 0x129   : > { %18183 = vst [vmem:[#allocation34_spill] sm:$0xff] %v13917_v55  ;;  %v689_v63 = vadd.f32 %v10646_v57, %v13701_v44  ;;  %v683_v0 = vpop.f32.mrb[29].mxu0 }
 0x12a   : > { %18184 = vst [vmem:[#allocation35_spill] sm:$0xff] %v13921_v56  ;;  %v684_v2 = vadd.f32 %v13701_v44, %v683_v0  ;;  %10697 = vmatprep.mubr.msk.f32.mxu1 %vm777_vm2, %v13921_v56 }
 0x12b   : > { %v13933_v4 = vadd.f32 %v731_v62, %v689_v63  ;;  %10698 = vmatmul.mubr.msk.f32.gmra.mrb[26].mxu1 %vm777_vm2, %v13917_v55 }
 0x12c   : > { %v13937_v8 = vadd.f32 %v730_v1, %v684_v2  ;;  %v10649_v9 = vpop.f32.mrb[30].mxu0 }
 0x12d   : > { %18185 = vst [vmem:[#allocation36_spill] sm:$0xff] %v13933_v4  ;;  %v699_v12 = vadd.f32 %v10649_v9, %v13701_v44  ;;  %v693_v14 = vpop.f32.mrb[31].mxu0 }
 0x12e   : > { %18186 = vst [vmem:[#allocation37_spill] sm:$0xff] %v13937_v8  ;;  %v694_v18 = vadd.f32 %v13701_v44, %v693_v14  ;;  %10700 = vmatprep.mubr.msk.f32.mxu1 %vm777_vm2, %v13937_v8  ;;  %v13962_v44 = vld [vmem:[%s17941_s5] ss:$0 sm:$0xff] }
 0x12f   : > { %v13949_v20 = vadd.f32 %v733_v10, %v699_v12  ;;  %10701 = vmatmul.mubr.msk.f32.gmra.mrb[28].mxu1 %vm777_vm2, %v13933_v4 }
 0x130   : > { %v13953_v21 = vadd.f32 %v732_v15, %v694_v18 }
 0x131   : > { %18187 = vst [vmem:[#allocation38_spill] sm:$0xff] %v13949_v20 }
 0x132   : > { %18188 = vst [vmem:[#allocation39_spill] sm:$0xff] %v13953_v21  ;;  %10703 = vmatprep.mubr.msk.f32.mxu1 %vm777_vm2, %v13953_v21 }
 0x133   : > { %10704 = vmatmul.mubr.msk.f32.gmra.mrb[30].mxu1 %vm777_vm2, %v13949_v20 }
 0x1ca   : > { %v10660_v23 = vpop.f32.mrb[0].mxu1 }
 0x1cb   : > { %v13967_v25 = vadd.f32 %v10660_v23, %v13962_v44  ;;  %v940_v30 = vpop.f32.mrb[1].mxu1 }
 0x1cc   : > { %v13970_v31 = vadd.f32 %v13962_v44, %v940_v30 }
 0x1cd   : > { %18189 = vst [vmem:[#allocation40_spill] sm:$0xff] %v13967_v25  ;;  %v1108_v32 = vmul.f32 %v13964_v24, %v13967_v25 }
 0x1ce   : > { %18190 = vst [vmem:[#allocation41_spill] sm:$0xff] %v13970_v31  ;;  %v10663_v33 = vpop.f32.mrb[2].mxu1  ;;  %10722 = vmatprep.mubr.msk.f32.mxu0 %vm777_vm2, %v13970_v31  ;;  %v1107_v34 = vmul.f32 %v13964_v24, %v13970_v31 }
 0x1cf   : > { %v950_v37 = vpop.f32.mrb[3].mxu1  ;;  %v13980_v54 = vadd.f32 %v10663_v33, %v13962_v44 }
 0x1d0   : > { %v12445_v45 = vpack.i.bf16 %v1108_v32, %v1107_v34  ;;  %v13983_v62 = vadd.f32 %v13962_v44, %v950_v37 }
 0x1d1   : > { %18191 = vst [vmem:[#allocation42_spill] sm:$0xff] %v13980_v54  ;;  %v1110_v12 = vmul.f32 %v13964_v24, %v13980_v54 }
 0x1d2   : > { %v10666_v46 = vpop.f32.mrb[4].mxu1  ;;  %12446 = vrot.lane.b32.xlu0 %v12445_v45, %s13491_s29  ;;  %18192 = vst [vmem:[#allocation43_spill] sm:$0xff] %v13983_v62  ;;  %v1109_v30 = vmul.f32 %v13964_v24, %v13983_v62 }
 0x1d3   : > { %v960_v47 = vpop.f32.mrb[5].mxu1  ;;  %v14000_v14 = vadd.f32 %v10666_v46, %v13962_v44 }
 0x1d4   : > { %v14003_v15 = vadd.f32 %v13962_v44, %v960_v47 }
 0x1d5   : > { %18195 = vst [vmem:[#allocation46_spill] sm:$0xff] %v14000_v14 }
 0x1d6   : > { %v10669_v50 = vpop.f32.mrb[6].mxu1  ;;  %18196 = vst [vmem:[#allocation47_spill] sm:$0xff] %v14003_v15 }
 0x1d7   : > { %v970_v51 = vpop.f32.mrb[7].mxu1 }
 0x1da   : > { %v10672_v57 = vpop.f32.mrb[8].mxu1 }
 0x1db   : > { %v13986_v63 = vadd.f32 %v10672_v57, %v13962_v44  ;;  %v980_v0 = vpop.f32.mrb[9].mxu1  ;;  %v12455_v57 = vpack.i.bf16 %v1110_v12, %v1109_v30 }
 0x1dc   : > { %v13989_v1 = vadd.f32 %v13962_v44, %v980_v0  ;;  %v1111_v0 = vmul.f32 %v13964_v24, %v14003_v15 }
 0x1dd   : > { %18193 = vst [vmem:[#allocation44_spill] sm:$0xff] %v13986_v63  ;;  %v1116_v2 = vmul.f32 %v13964_v24, %v13986_v63 }
 0x1de   : > { %18194 = vst [vmem:[#allocation45_spill] sm:$0xff] %v13989_v1  ;;  %v10675_v9 = vpop.f32.mrb[10].mxu1  ;;  %10750 = vmatprep.mubr.msk.f32.mxu1 %vm777_vm2, %v13989_v1  ;;  %v1115_v10 = vmul.f32 %v13964_v24, %v13989_v1 }
 0x1df   : > { %v14006_v18 = vadd.f32 %v10675_v9, %v13962_v44  ;;  %v990_v23 = vpop.f32.mrb[11].mxu1  ;;  %v14026_v9 = vadd.f32 %v10669_v50, %v13962_v44 }
 0x1e0   : > { %v14011_v32 = vadd.f32 %v13962_v44, %v990_v23  ;;  %v12450_v33 = vpack.i.bf16 %v1116_v2, %v1115_v10  ;;  %v1112_v2 = vmul.f32 %v13964_v24, %v14000_v14  ;;  %v14029_v10 = vadd.f32 %v13962_v44, %v970_v51 }
 0x1e1   : > { %18197 = vst [vmem:[#allocation48_spill] sm:$0xff] %v14006_v18  ;;  %v1118_v34 = vmul.f32 %v13964_v24, %v14006_v18  ;;  %18200 = vst [vmem:[#allocation51_spill] sm:$0xff] %v14026_v9 }
 0x1e2   : > { %18198 = vst [vmem:[#allocation49_spill] sm:$0xff] %v14011_v32  ;;  %v10678_v37 = vpop.f32.mrb[12].mxu1  ;;  %12451 = vrot.lane.b32.xlu1 %v12450_v33, %s13491_s29  ;;  %v1117_v45 = vmul.f32 %v13964_v24, %v14011_v32  ;;  %v12465_v42 = vpack.i.bf16 %v1112_v2, %v1111_v0 }
 0x1e3   : > { %v14019_v46 = vadd.f32 %v10678_v37, %v13962_v44  ;;  %v1000_v47 = vpop.f32.mrb[13].mxu1 }
 0x1e4   : > { %v14032_v23 = vadd.f32 %v13962_v44, %v1000_v47  ;;  %v12460_v33 = vpack.i.bf16 %v1118_v34, %v1117_v45  ;;  %v1113_v45 = vmul.f32 %v13964_v24, %v14029_v10 }
 0x1e5   : > { %18199 = vst [vmem:[#allocation50_spill] sm:$0xff] %v14019_v46  ;;  %v1120_v37 = vmul.f32 %v13964_v24, %v14019_v46 }
 0x1e6   : > { %18201 = vst [vmem:[#allocation52_spill] sm:$0xff] %v14032_v23  ;;  %v10681_v12 = vpop.f32.mrb[14].mxu1  ;;  %12456 = vrot.lane.b32.xlu1 %v12455_v57, %s13491_s29  ;;  %12461 = vrot.lane.b32.xlu0 %v12460_v33, %s13491_s29  ;;  %v1119_v30 = vmul.f32 %v13964_v24, %v14032_v23  ;;  %v1114_v57 = vmul.f32 %v13964_v24, %v14026_v9 }
 0x1e7   : > { %v14041_v50 = vadd.f32 %v10681_v12, %v13962_v44  ;;  %v1010_v51 = vpop.f32.mrb[15].mxu1 }
 0x1e8   : > { %v14044_v47 = vadd.f32 %v13962_v44, %v1010_v51  ;;  %v12470_v34 = vpack.i.bf16 %v1120_v37, %v1119_v30  ;;  %v12475_v30 = vpack.i.bf16 %v1114_v57, %v1113_v45 }
 0x1e9   : > { %18202 = vst [vmem:[#allocation53_spill] sm:$0xff] %v14041_v50  ;;  %v1122_v33 = vmul.f32 %v13964_v24, %v14041_v50 }
 0x1ea   : > { %18203 = vst [vmem:[#allocation54_spill] sm:$0xff] %v14044_v47  ;;  %v10684_v21 = vpop.f32.mrb[16].mxu1  ;;  %12466 = vrot.lane.b32.xlu1 %v12465_v42, %s13491_s29  ;;  %12471 = vrot.lane.b32.xlu0 %v12470_v34, %s13491_s29  ;;  %v1121_v0 = vmul.f32 %v13964_v24, %v14044_v47 }
 0x1eb   : > { %v14057_v2 = vadd.f32 %v10684_v21, %v13962_v44  ;;  %v1020_v37 = vpop.f32.mrb[17].mxu1 }
 0x1ec   : > { %v14060_v12 = vadd.f32 %v13962_v44, %v1020_v37  ;;  %v12480_v51 = vpack.i.bf16 %v1122_v33, %v1121_v0 }
 0x1ed   : > { %v1124_v20 = vmul.f32 %v13964_v24, %v14057_v2 }
 0x1ee   : > { %v10687_v4 = vpop.f32.mrb[18].mxu1  ;;  %12476 = vrot.lane.b32.xlu1 %v12475_v30, %s13491_s29  ;;  %12481 = vrot.lane.b32.xlu0 %v12480_v51, %s13491_s29  ;;  %v1123_v42 = vmul.f32 %v13964_v24, %v14060_v12 }
 0x1ef   : > { %v14069_v21 = vadd.f32 %v10687_v4, %v13962_v44  ;;  %v1030_v34 = vpop.f32.mrb[19].mxu1 }
 0x1f0   : > { %v14072_v37 = vadd.f32 %v13962_v44, %v1030_v34  ;;  %v12485_v45 = vpack.i.bf16 %v1124_v20, %v1123_v42 }
 0x1f1   : > { %18204 = vst [vmem:[#allocation55_spill] sm:$0xff] %v14069_v21  ;;  %v1126_v57 = vmul.f32 %v13964_v24, %v14069_v21 }
 0x1f2   : > { %18205 = vst [vmem:[#allocation56_spill] sm:$0xff] %v14072_v37  ;;  %v10690_v33 = vpop.f32.mrb[20].mxu1  ;;  %12486 = vrot.lane.b32.xlu1 %v12485_v45, %s13491_s29  ;;  %v1125_v0 = vmul.f32 %v13964_v24, %v14072_v37 }
 0x1f3   : > { %v14080_v30 = vadd.f32 %v10690_v33, %v13962_v44  ;;  %v1040_v51 = vpop.f32.mrb[21].mxu1 }
 0x1f4   : > { %v14083_v4 = vadd.f32 %v13962_v44, %v1040_v51  ;;  %v12495_v8 = vpack.i.bf16 %v1126_v57, %v1125_v0 }
 0x1f5   : > { %18206 = vst [vmem:[#allocation57_spill] sm:$0xff] %v14080_v30  ;;  %v1128_v20 = vmul.f32 %v13964_v24, %v14080_v30 }
 0x1f6   : > { %18207 = vst [vmem:[#allocation58_spill] sm:$0xff] %v14083_v4  ;;  %v10693_v42 = vpop.f32.mrb[22].mxu1  ;;  %12496 = vrot.lane.b32.xlu1 %v12495_v8, %s13491_s29  ;;  %v1127_v34 = vmul.f32 %v13964_v24, %v14083_v4 }
 0x1f7   : > { %v14091_v45 = vadd.f32 %v10693_v42, %v13962_v44  ;;  %v1050_v56 = vpop.f32.mrb[23].mxu1 }
 0x1f8   : > { %v14094_v33 = vadd.f32 %v13962_v44, %v1050_v56  ;;  %v12505_v55 = vpack.i.bf16 %v1128_v20, %v1127_v34 }
 0x1f9   : > { %18208 = vst [vmem:[#allocation59_spill] sm:$0xff] %v14091_v45  ;;  %v1130_v57 = vmul.f32 %v13964_v24, %v14091_v45 }
 0x1fa   : > { %18209 = vst [vmem:[#allocation60_spill] sm:$0xff] %v14094_v33  ;;  %v10696_v0 = vpop.f32.mrb[24].mxu1  ;;  %12506 = vrot.lane.b32.xlu1 %v12505_v55, %s13491_s29  ;;  %v1129_v8 = vmul.f32 %v13964_v24, %v14094_v33 }
 0x1fb   : > { %v14102_v51 = vadd.f32 %v10696_v0, %v13962_v44  ;;  %v1060_v26 = vpop.f32.mrb[25].mxu1 }
 0x1fc   : > { %v14105_v42 = vadd.f32 %v13962_v44, %v1060_v26  ;;  %v12515_v39 = vpack.i.bf16 %v1130_v57, %v1129_v8  ;;  %v12525_v26 = vpack.i.bf16 %v13967_v25, %v13970_v31 }
 0x1fd   : > { %v1132_v56 = vmul.f32 %v13964_v24, %v14102_v51 }
 0x1fe   : > { %v10699_v20 = vpop.f32.mrb[26].mxu1  ;;  %12516 = vrot.lane.b32.xlu1 %v12515_v39, %s13491_s29  ;;  %v1131_v55 = vmul.f32 %v13964_v24, %v14105_v42 }
 0x1ff   : > { %v14113_v34 = vadd.f32 %v10699_v20, %v13962_v44  ;;  %v1070_v38 = vpop.f32.mrb[27].mxu1 }
 0x200   : > { %v14116_v0 = vadd.f32 %v13962_v44, %v1070_v38  ;;  %v12490_v57 = vpack.i.bf16 %v1132_v56, %v1131_v55  ;;  %v12535_v56 = vpack.i.bf16 %v13980_v54, %v13983_v62 }
 0x201   : > { %v1134_v8 = vmul.f32 %v13964_v24, %v14113_v34 }
 0x202   : > { %v10702_v29 = vpop.f32.mrb[28].mxu1  ;;  %12526 = vrot.lane.b32.xlu1 %v12525_v26, %s13492_s14  ;;  %12491 = vrot.lane.b32.xlu0 %v12490_v57, %s13491_s29  ;;  %v1133_v39 = vmul.f32 %v13964_v24, %v14116_v0 }
 0x203   : > { %v14127_v20 = vadd.f32 %v10702_v29, %v13962_v44  ;;  %v1080_v38 = vpop.f32.mrb[29].mxu1 }
 0x204   : > { %v14130_v17 = vadd.f32 %v13962_v44, %v1080_v38  ;;  %v12500_v55 = vpack.i.bf16 %v1134_v8, %v1133_v39  ;;  %v12545_v8 = vpack.i.bf16 %v14000_v14, %v14003_v15 }
 0x205   : > { %v1136_v16 = vmul.f32 %v13964_v24, %v14127_v20 }
 0x206   : > { %v10705_v26 = vpop.f32.mrb[30].mxu1  ;;  %12536 = vrot.lane.b32.xlu1 %v12535_v56, %s13492_s14  ;;  %12501 = vrot.lane.b32.xlu0 %v12500_v55, %s13491_s29  ;;  %v1135_v29 = vmul.f32 %v13964_v24, %v14130_v17  ;;  %v2878_v55 = vsub.s32 1, %v13682_v40 }
 0x207   : > { %v14141_v57 = vadd.f32 %v10705_v26, %v13962_v44  ;;  %v1090_v38 = vpop.f32.mrb[31].mxu1 }
 0x208   : > { %v14144_v7 = vadd.f32 %v13962_v44, %v1090_v38  ;;  %v12510_v39 = vpack.i.bf16 %v1136_v16, %v1135_v29  ;;  %v12555_v44 = vpack.i.bf16 %v14026_v9, %v14029_v10  ;;  %v14160_v16 = vrot.slane %v13687_v41, %v2878_v55 }
 0x209   : > { %18210 = vst [vmem:[#allocation61_spill] sm:$0xff] %v14141_v57  ;;  %v1138_v6 = vmul.f32 %v13964_v24, %v14141_v57  ;;  %v12570_v29 = vpack.i.bf16 %v14102_v51, %v14105_v42  ;;  %v12540_v41 = vpack.i.bf16 %v14006_v18, %v14011_v32  ;;  %v12550_v38 = vpack.i.bf16 %v14019_v46, %v14032_v23 }
 0x20a   : > { %18211 = vst [vmem:[#allocation62_spill] sm:$0xff] %v14144_v7  ;;  %12546 = vrot.lane.b32.xlu1 %v12545_v8, %s13492_s14  ;;  %12511 = vrot.lane.b32.xlu0 %v12510_v39, %s13491_s29  ;;  %v1137_v56 = vmul.f32 %v13964_v24, %v14144_v7  ;;  %18212 = vst [vmem:[#allocation63_spill] sm:$0xff] %v14160_v16  ;;  %v12600_v24 = vpack.i.bf16 %v14141_v57, %v14144_v7 }
 0x20b   : > { %v12560_v8 = vpack.i.bf16 %v14041_v50, %v14044_v47  ;;  %v12565_v39 = vpack.i.bf16 %v14057_v2, %v14060_v12  ;;  %v12580_v55 = vpack.i.bf16 %v14113_v34, %v14116_v0 }
 0x20c   : > { %v12520_v26 = vpack.i.bf16 %v1138_v6, %v1137_v56  ;;  %v12530_v6 = vpack.i.bf16 %v13986_v63, %v13989_v1  ;;  %v12575_v56 = vpack.i.bf16 %v14069_v21, %v14072_v37 }
 0x20e   : > { %12556 = vrot.lane.b32.xlu1 %v12555_v44, %s13492_s14  ;;  %12521 = vrot.lane.b32.xlu0 %v12520_v26, %s13491_s29  ;;  %v12585_v44 = vpack.i.bf16 %v14080_v30, %v14083_v4  ;;  %v12590_v26 = vpack.i.bf16 %v14127_v20, %v14130_v17 }
 0x212   : > { %2881 = vrot.lane.b32.xlu0 %v14160_v16, %s13490_s26  ;;  %12571 = vrot.lane.b32.xlu1 %v12570_v29, %s13492_s14  ;;  %v12595_v29 = vpack.i.bf16 %v14091_v45, %v14094_v33 }
 0x216   : > { %12531 = vrot.lane.b32.xlu0 %v12530_v6, %s13492_s14  ;;  %12601 = vrot.lane.b32.xlu1 %v12600_v24, %s13492_s14 }
 0x21a   : > { %12541 = vrot.lane.b32.xlu0 %v12540_v41, %s13492_s14 }
 0x21e   : > { %12551 = vrot.lane.b32.xlu0 %v12550_v38, %s13492_s14  ;;  %v18213_v38 = vmov 0 }
 0x21f   : > { %v18214_v38 = vsel %vm14202_vm3, 4294967295, %v18213_v38 }
 0x220   : > { %18215 = vst [vmem:[#allocation64_spill] sm:$0xff] %v18214_v38 }
 0x222   : > { %12561 = vrot.lane.b32.xlu0 %v12560_v8, %s13492_s14 }
 0x226   : > { %12566 = vrot.lane.b32.xlu0 %v12565_v39, %s13492_s14 }
 0x22a   : > { %12576 = vrot.lane.b32.xlu0 %v12575_v56, %s13492_s14 }
 0x22e   : > { %12581 = vrot.lane.b32.xlu0 %v12580_v55, %s13492_s14 }
 0x232   : > { %12586 = vrot.lane.b32.xlu0 %v12585_v44, %s13492_s14 }
 0x236   : > { %12591 = vrot.lane.b32.xlu0 %v12590_v26, %s13492_s14 }
 0x23a   : > { %12596 = vrot.lane.b32.xlu0 %v12595_v29, %s13492_s14 }
 0x244   : > { %v12447_v24 = vpop.permute.xlu0 %12446 }
 0x245   : > { %v12449_v6 = vunpack.i.h.bf16 %v12447_v24  ;;  %v12448_v41 = vunpack.i.l.bf16 %v12447_v24 }
 0x247   : > { %v11742_v8 = vpack.c.bf16 %v12449_v6, %v12448_v41 }
 0x249   : > { %11744 = vmatprep.subr.msk.bf16.mxu0 %vm14202_vm3, %v11742_v8 }
 0x24a   : > { %11747 = vmatpush3.bf16.xpose.msk.msra.mxu0 %vm14202_vm3, %v11742_v8 }
 0x254   : > { %v12452_v39 = vpop.permute.xlu1 %12451 }
 0x255   : > { %v12454_v56 = vunpack.i.h.bf16 %v12452_v39  ;;  %v12453_v55 = vunpack.i.l.bf16 %v12452_v39 }
 0x257   : > { %v11766_v44 = vpack.c.bf16 %v12454_v56, %v12453_v55 }
 0x258   : > { %v12457_v26 = vpop.permute.xlu1 %12456  ;;  %v12462_v29 = vpop.permute.xlu0 %12461 }
 0x259   : > { %v12459_v24 = vunpack.i.h.bf16 %v12457_v26  ;;  %v12458_v48 = vunpack.i.l.bf16 %v12457_v26  ;;  %v12464_v60 = vunpack.i.h.bf16 %v12462_v29  ;;  %v12463_v49 = vunpack.i.l.bf16 %v12462_v29  ;;  %11768 = vmatprep.subr.msk.bf16.mxu1 %vm14202_vm3, %v11766_v44 }
 0x25a   : > { %11771 = vmatpush3.bf16.xpose.msk.msra.mxu1 %vm14202_vm3, %v11766_v44 }
 0x25b   : > { %v11748_v6 = vpack.c.bf16 %v12459_v24, %v12458_v48  ;;  %v11772_v41 = vpack.c.bf16 %v12464_v60, %v12463_v49 }
 0x25c   : > { %v12467_v58 = vpop.permute.xlu1 %12466  ;;  %v12472_v8 = vpop.permute.xlu0 %12471 }
 0x25d   : > { %v12469_v35 = vunpack.i.h.bf16 %v12467_v58  ;;  %v12468_v36 = vunpack.i.l.bf16 %v12467_v58  ;;  %v12474_v39 = vunpack.i.h.bf16 %v12472_v8  ;;  %v12473_v56 = vunpack.i.l.bf16 %v12472_v8  ;;  %11750 = vmatprep.subr.msk.bf16.mxu0 %vm14202_vm3, %v11748_v6  ;;  %11774 = vmatprep.subr.msk.bf16.mxu1 %vm14202_vm3, %v11772_v41 }
 0x25e   : > { %11753 = vmatpush3.bf16.xpose.msk.msra.mxu0 %vm14202_vm3, %v11748_v6 }
 0x25f   : > { %v11754_v55 = vpack.c.bf16 %v12469_v35, %v12468_v36  ;;  %v11778_v44 = vpack.c.bf16 %v12474_v39, %v12473_v56 }
 0x260   : > { %v12477_v26 = vpop.permute.xlu1 %12476  ;;  %v12482_v58 = vpop.permute.xlu0 %12481 }
 0x261   : > { %v12479_v48 = vunpack.i.h.bf16 %v12477_v26  ;;  %v12478_v49 = vunpack.i.l.bf16 %v12477_v26  ;;  %11756 = vmatprep.subr.msk.bf16.mxu0 %vm14202_vm3, %v11754_v55  ;;  %v12484_v29 = vunpack.i.h.bf16 %v12482_v58  ;;  %v12483_v24 = vunpack.i.l.bf16 %v12482_v58 }
 0x262   : > { %11777 = vmatpush3.bf16.xpose.msk.msra.mxu1 %vm14202_vm3, %v11772_v41 }
 0x263   : > { %11780 = vmatprep.subr.msk.bf16.mxu1 %vm14202_vm3, %v11778_v44  ;;  %v11760_v60 = vpack.c.bf16 %v12479_v48, %v12478_v49  ;;  %v11784_v35 = vpack.c.bf16 %v12484_v29, %v12483_v24 }
 0x264   : > { %v12487_v8 = vpop.permute.xlu1 %12486 }
 0x265   : > { %v12489_v36 = vunpack.i.h.bf16 %v12487_v8  ;;  %v12488_v6 = vunpack.i.l.bf16 %v12487_v8 }
 0x266   : > { %11759 = vmatpush3.bf16.xpose.msk.msra.mxu0 %vm14202_vm3, %v11754_v55 }
 0x267   : > { %11762 = vmatprep.subr.msk.bf16.mxu0 %vm14202_vm3, %v11760_v60  ;;  %v11790_v41 = vpack.c.bf16 %v12489_v36, %v12488_v6 }
 0x268   : > { %v12497_v39 = vpop.permute.xlu1 %12496 }
 0x269   : > { %v12499_v56 = vunpack.i.h.bf16 %v12497_v39  ;;  %v12498_v55 = vunpack.i.l.bf16 %v12497_v39 }
 0x26a   : > { %11783 = vmatpush3.bf16.xpose.msk.msra.mxu1 %vm14202_vm3, %v11778_v44 }
 0x26b   : > { %11786 = vmatprep.subr.msk.bf16.mxu1 %vm14202_vm3, %v11784_v35  ;;  %v11796_v48 = vpack.c.bf16 %v12499_v56, %v12498_v55 }
 0x26c   : > { %v12507_v58 = vpop.permute.xlu1 %12506 }
 0x26d   : > { %v12508_v36 = vunpack.i.l.bf16 %v12507_v58 }
 0x26e   : > { %11765 = vmatpush3.bf16.xpose.msk.msra.mxu0 %vm14202_vm3, %v11760_v60 }
 0x26f   : > { %11792 = vmatprep.subr.msk.bf16.mxu0 %vm14202_vm3, %v11790_v41 }
 0x270   : > { %v12517_v39 = vpop.permute.xlu1 %12516 }
 0x272   : > { %11789 = vmatpush3.bf16.xpose.msk.msra.mxu1 %vm14202_vm3, %v11784_v35  ;;  %v12509_v35 = vunpack.i.h.bf16 %v12507_v58 }
 0x274   : > { %v12492_v26 = vpop.permute.xlu0 %12491  ;;  %v11802_v56 = vpack.c.bf16 %v12509_v35, %v12508_v36 }
 0x275   : > { %v12494_v49 = vunpack.i.h.bf16 %v12492_v26  ;;  %v12493_v44 = vunpack.i.l.bf16 %v12492_v26  ;;  %10723 = vmatmul.mubr.msk.f32.vlgmr.msra.gmra.mrb[32].mxu0 %vm777_vm2, %v13967_v25 }
 0x276   : > { %10725 = vmatprep.mubr.msk.f32.mxu0 %vm777_vm2, %v13983_v62  ;;  %11795 = vmatpush3.bf16.xpose.msk.msra.mxu0 %vm14202_vm3, %v11790_v41 }
 0x277   : > { %v11814_v60 = vpack.c.bf16 %v12494_v49, %v12493_v44  ;;  %11798 = vmatprep.subr.msk.bf16.mxu0 %vm14202_vm3, %v11796_v48  ;;  %v12519_v49 = vunpack.i.h.bf16 %v12517_v39  ;;  %v12518_v44 = vunpack.i.l.bf16 %v12517_v39 }
 0x278   : > { %v12502_v29 = vpop.permute.xlu0 %12501 }
 0x279   : > { %v12504_v24 = vunpack.i.h.bf16 %v12502_v29  ;;  %v12503_v8 = vunpack.i.l.bf16 %v12502_v29  ;;  %10726 = vmatmul.mubr.msk.f32.gmra.mrb[34].mxu0 %vm777_vm2, %v13980_v54  ;;  %10751 = vmatmul.mubr.msk.f32.vlgmr.msra.gmra.mrb[32].mxu1 %vm777_vm2, %v13986_v63 }
 0x27a   : > { %11816 = vmatprep.subr.msk.bf16.mxu1 %vm14202_vm3, %v11814_v60  ;;  %10728 = vmatprep.mubr.msk.f32.mxu0 %vm777_vm2, %v14003_v15 }
 0x27b   : > { %v11820_v6 = vpack.c.bf16 %v12504_v24, %v12503_v8  ;;  %10753 = vmatprep.mubr.msk.f32.mxu1 %vm777_vm2, %v14011_v32  ;;  %11819 = vmatpush3.bf16.xpose.msk.msra.mxu1 %vm14202_vm3, %v11814_v60  ;;  %v12527_v24 = vpop.permute.xlu1 %12526 }
 0x27c   : > { %v12512_v41 = vpop.permute.xlu0 %12511  ;;  %v12529_v28 = vunpack.i.h.bf16 %v12527_v24  ;;  %v12528_v11 = vunpack.i.l.bf16 %v12527_v24 }
 0x27d   : > { %10729 = vmatmul.mubr.msk.f32.gmra.mrb[36].mxu0 %vm777_vm2, %v14000_v14  ;;  %10754 = vmatmul.mubr.msk.f32.gmra.mrb[34].mxu1 %vm777_vm2, %v14006_v18  ;;  %v12514_v55 = vunpack.i.h.bf16 %v12512_v41  ;;  %v12513_v26 = vunpack.i.l.bf16 %v12512_v41 }
 0x27e   : > { %11822 = vmatprep.subr.msk.bf16.mxu1 %vm14202_vm3, %v11820_v6  ;;  %10731 = vmatprep.mubr.msk.f32.mxu0 %vm777_vm2, %v14029_v10  ;;  %v14324_v24 = vpack.c.bf16 %v12529_v28, %v12528_v11 }
 0x27f   : > { %10756 = vmatprep.mubr.msk.f32.mxu1 %vm777_vm2, %v14032_v23  ;;  %11801 = vmatpush3.bf16.xpose.msk.msra.mxu0 %vm14202_vm3, %v11796_v48  ;;  %v11826_v60 = vpack.c.bf16 %v12514_v55, %v12513_v26  ;;  %v11808_v48 = vpack.c.bf16 %v12519_v49, %v12518_v44 }
 0x280   : > { %11804 = vmatprep.subr.msk.bf16.mxu0 %vm14202_vm3, %v11802_v56  ;;  %v12522_v58 = vpop.permute.xlu0 %12521  ;;  %18216 = vst [vmem:[#allocation65_spill] sm:$0xff] %v14324_v24 }
 0x281   : > { %10732 = vmatmul.mubr.msk.f32.gmra.mrb[38].mxu0 %vm777_vm2, %v14026_v9  ;;  %10757 = vmatmul.mubr.msk.f32.gmra.mrb[36].mxu1 %vm777_vm2, %v14019_v46  ;;  %v12524_v41 = vunpack.i.h.bf16 %v12522_v58  ;;  %v12523_v39 = vunpack.i.l.bf16 %v12522_v58 }
 0x282   : > { %10759 = vmatprep.mubr.msk.f32.mxu1 %vm777_vm2, %v14044_v47  ;;  %10778 = vmatprep.mubr.msk.f32.mxu0 %vm777_vm2, %v14060_v12 }
 0x283   : > { %11825 = vmatpush3.bf16.xpose.msk.msra.mxu1 %vm14202_vm3, %v11820_v6  ;;  %v11832_v19 = vpack.c.bf16 %v12524_v41, %v12523_v39 }
 0x284   : > { %11828 = vmatprep.subr.msk.bf16.mxu1 %vm14202_vm3, %v11826_v60  ;;  %v14286_v29 = vpop.permute.xlu0 %2881 }
 0x285   : > { %10760 = vmatmul.mubr.msk.f32.gmra.mrb[38].mxu1 %vm777_vm2, %v14041_v50  ;;  %v2892_v8 = vmul.f32 %v14286_v29, %v13989_v1  ;;  %v2893_v35 = vmul.f32 %v14286_v29, %v13986_v63  ;;  %v2884_v36 = vmul.f32 %v14286_v29, %v13970_v31  ;;  %v2885_v6 = vmul.f32 %v14286_v29, %v13967_v25 }
 0x286   : > { %10806 = vmatprep.mubr.msk.f32.mxu1 %vm777_vm2, %v14105_v42  ;;  %v2886_v55 = vmul.f32 %v14286_v29, %v13983_v62  ;;  %v2887_v26 = vmul.f32 %v14286_v29, %v13980_v54  ;;  %v2894_v27 = vmul.f32 %v14286_v29, %v14011_v32  ;;  %v2895_v58 = vmul.f32 %v14286_v29, %v14006_v18 }
 0x287   : > { %11807 = vmatpush3.bf16.xpose.msk.msra.mxu0 %vm14202_vm3, %v11802_v56  ;;  %v12610_v49 = vpack.i.bf16 %v2893_v35, %v2892_v8  ;;  %v12605_v44 = vpack.i.bf16 %v2885_v6, %v2884_v36  ;;  %v12537_v56 = vpop.permute.xlu1 %12536  ;;  %v2888_v36 = vmul.f32 %v14286_v29, %v14003_v15  ;;  %v2889_v6 = vmul.f32 %v14286_v29, %v14000_v14 }
 0x288   : > { %11810 = vmatprep.subr.msk.bf16.mxu0 %vm14202_vm3, %v11808_v48  ;;  %v12532_v13 = vpop.permute.xlu0 %12531  ;;  %v12615_v8 = vpack.i.bf16 %v2887_v26, %v2886_v55  ;;  %v12620_v35 = vpack.i.bf16 %v2895_v58, %v2894_v27  ;;  %v2896_v39 = vmul.f32 %v14286_v29, %v14032_v23  ;;  %v2897_v55 = vmul.f32 %v14286_v29, %v14019_v46 }
 0x289   : > { %12611 = vrot.lane.b32.xlu1 %v12610_v49, %s13491_s29  ;;  %12606 = vrot.lane.b32.xlu0 %v12605_v44, %s13491_s29  ;;  %v12534_v41 = vunpack.i.h.bf16 %v12532_v13  ;;  %v12625_v27 = vpack.i.bf16 %v2889_v6, %v2888_v36  ;;  %v12539_v11 = vunpack.i.h.bf16 %v12537_v56  ;;  %v12538_v28 = vunpack.i.l.bf16 %v12537_v56 }
 0x28b   : > { %11831 = vmatpush3.bf16.xpose.msk.msra.mxu1 %vm14202_vm3, %v11826_v60  ;;  %v12533_v60 = vunpack.i.l.bf16 %v12532_v13  ;;  %v12547_v44 = vpop.permute.xlu1 %12546  ;;  %v12630_v13 = vpack.i.bf16 %v2897_v55, %v2896_v39 }
 0x28c   : > { %11834 = vmatprep.subr.msk.bf16.mxu1 %vm14202_vm3, %v11832_v19  ;;  %v12542_v49 = vpop.permute.xlu0 %12541  ;;  %v12548_v36 = vunpack.i.l.bf16 %v12547_v44 }
 0x28d   : > { %12616 = vrot.lane.b32.xlu1 %v12615_v8, %s13491_s29  ;;  %12621 = vrot.lane.b32.xlu0 %v12620_v35, %s13491_s29  ;;  %v14334_v58 = vpack.c.bf16 %v12534_v41, %v12533_v60  ;;  %v12549_v35 = vunpack.i.h.bf16 %v12547_v44  ;;  %v12544_v56 = vunpack.i.h.bf16 %v12542_v49  ;;  %v12543_v41 = vunpack.i.l.bf16 %v12542_v49 }
 0x28f   : > { %11813 = vmatpush3.bf16.xpose.msk.msra.mxu0 %vm14202_vm3, %v11808_v48  ;;  %18217 = vst [vmem:[#allocation66_spill] sm:$0xff] %v14334_v58  ;;  %v14340_v48 = vpack.c.bf16 %v12539_v11, %v12538_v28  ;;  %v12557_v6 = vpop.permute.xlu1 %12556  ;;  %v14352_v55 = vpack.c.bf16 %v12549_v35, %v12548_v36  ;;  %v14354_v49 = vpack.c.bf16 %v12544_v56, %v12543_v41 }
 0x290   : > { %11839 = vmatprep.subr.bf16.mxu0 %v14324_v24  ;;  %v12552_v26 = vpop.permute.xlu0 %12551  ;;  %v12558_v60 = vunpack.i.l.bf16 %v12557_v6 }
 0x291   : > { %12626 = vrot.lane.b32.xlu1 %v12625_v27, %s13491_s29  ;;  %18218 = vst [vmem:[#allocation67_spill] sm:$0xff] %v14340_v48  ;;  %v12554_v27 = vunpack.i.h.bf16 %v12552_v26  ;;  %v12553_v39 = vunpack.i.l.bf16 %v12552_v26  ;;  %18219 = vst [vmem:[#allocation68_spill] sm:$0xff] %v14352_v55 }
 0x292   : > { %18220 = vst [vmem:[#allocation69_spill] sm:$0xff] %v14354_v49 }
 0x293   : > { %11837 = vmatpush3.bf16.xpose.msk.msra.mxu1 %vm14202_vm3, %v11832_v19  ;;  %v12559_v19 = vunpack.i.h.bf16 %v12557_v6  ;;  %v14366_v11 = vpack.c.bf16 %v12554_v27, %v12553_v39  ;;  %v12572_v6 = vpop.permute.xlu1 %12571 }
 0x294   : > { %11855 = vmatprep.subr.bf16.mxu1 %v14334_v58  ;;  %v12562_v8 = vpop.permute.xlu0 %12561  ;;  %v12574_v41 = vunpack.i.h.bf16 %v12572_v6 }
 0x295   : > { %12631 = vrot.lane.b32.xlu1 %v12630_v13, %s13491_s29  ;;  %v14364_v26 = vpack.c.bf16 %v12559_v19, %v12558_v60  ;;  %18222 = vst [vmem:[#allocation71_spill] sm:$0xff] %v14366_v11  ;;  %v12564_v28 = vunpack.i.h.bf16 %v12562_v8  ;;  %v12563_v13 = vunpack.i.l.bf16 %v12562_v8  ;;  %v12573_v19 = vunpack.i.l.bf16 %v12572_v6 }
 0x296   : > { %10779 = vmatmul.mubr.msk.f32.vlgmr.msra.gmra.mrb[40].mxu0 %vm777_vm2, %v14057_v2 }
 0x297   : > { %10781 = vmatprep.mubr.msk.f32.mxu0 %vm777_vm2, %v14072_v37  ;;  %11841 = vmatpush3.bf16.msra.mxu0 %v14324_v24  ;;  %18221 = vst [vmem:[#allocation70_spill] sm:$0xff] %v14364_v26  ;;  %v14384_v8 = vpack.c.bf16 %v12564_v28, %v12563_v13  ;;  %v14396_v60 = vpack.c.bf16 %v12574_v41, %v12573_v19 }
 0x298   : > { %11843 = vmatprep.subr.bf16.mxu0 %v14340_v48  ;;  %v12567_v44 = vpop.permute.xlu0 %12566 }
 0x299   : > { %v12569_v35 = vunpack.i.h.bf16 %v12567_v44  ;;  %v12568_v36 = vunpack.i.l.bf16 %v12567_v44  ;;  %18223 = vst [vmem:[#allocation72_spill] sm:$0xff] %v14384_v8  ;;  %18225 = vst [vmem:[#allocation74_spill] sm:$0xff] %v14396_v60 }
 0x29a   : > { %10782 = vmatmul.mubr.msk.f32.gmra.mrb[42].mxu0 %vm777_vm2, %v14069_v21  ;;  %10807 = vmatmul.mubr.msk.f32.vlgmr.msra.gmra.mrb[40].mxu1 %vm777_vm2, %v14102_v51 }
 0x29b   : > { %10784 = vmatprep.mubr.msk.f32.mxu0 %vm777_vm2, %v14083_v4  ;;  %10809 = vmatprep.mubr.msk.f32.mxu1 %vm777_vm2, %v14116_v0  ;;  %v14386_v56 = vpack.c.bf16 %v12569_v35, %v12568_v36 }
 0x29c   : > { %11845 = vmatpush3.bf16.msra.mxu0 %v14340_v48  ;;  %11857 = vmatpush3.bf16.msra.mxu1 %v14334_v58 }
 0x29d   : > { %11847 = vmatprep.subr.bf16.mxu0 %v14352_v55  ;;  %11859 = vmatprep.subr.bf16.mxu1 %v14354_v49  ;;  %18224 = vst [vmem:[#allocation73_spill] sm:$0xff] %v14386_v56 }
 0x29e   : > { %10785 = vmatmul.mubr.msk.f32.gmra.mrb[44].mxu0 %vm777_vm2, %v14080_v30  ;;  %10810 = vmatmul.mubr.msk.f32.gmra.mrb[42].mxu1 %vm777_vm2, %v14113_v34 }
 0x29f   : > { %10787 = vmatprep.mubr.msk.f32.mxu0 %vm777_vm2, %v14094_v33  ;;  %10812 = vmatprep.mubr.msk.f32.mxu1 %vm777_vm2, %v14130_v17 }
 0x2a0   : > { %11849 = vmatpush3.bf16.msra.mxu0 %v14352_v55  ;;  %11861 = vmatpush3.bf16.msra.mxu1 %v14354_v49 }
 0x2a1   : > { %11851 = vmatprep.subr.bf16.mxu0 %v14364_v26  ;;  %11863 = vmatprep.subr.bf16.mxu1 %v14366_v11 }
 0x2a2   : > { %10788 = vmatmul.mubr.msk.f32.gmra.mrb[46].mxu0 %vm777_vm2, %v14091_v45  ;;  %10813 = vmatmul.mubr.msk.f32.gmra.mrb[44].mxu1 %vm777_vm2, %v14127_v20 }
 0x2a3   : > { %10815 = vmatprep.mubr.msk.f32.mxu1 %vm777_vm2, %v14144_v7 }
 0x2a4   : > { %11853 = vmatpush3.bf16.msra.mxu0 %v14364_v26  ;;  %11865 = vmatpush3.bf16.msra.mxu1 %v14366_v11 }
 0x2a5   : > { %11867 = vmatprep.subr.bf16.mxu1 %v14384_v8  ;;  %11871 = vmatprep.subr.bf16.mxu0 %v14386_v56 }
 0x2a6   : > { %10816 = vmatmul.mubr.msk.f32.gmra.mrb[46].mxu1 %vm777_vm2, %v14141_v57 }
 0x2a8   : > { %11869 = vmatpush3.bf16.msra.mxu1 %v14384_v8 }
 0x2a9   : > { %11887 = vmatprep.subr.bf16.mxu1 %v14396_v60 }
 0x348   : > { %v10724_v27 = vpop.f32.mrb[32].mxu0 }
 0x349   : > { %v14400_v39 = vmul.f32 0.35355338, %v10724_v27  ;;  %v1269_v44 = vpop.f32.mrb[33].mxu0 }
 0x34a   : > { %v14402_v28 = vmul.f32 0.35355338, %v1269_v44 }
 0x34b   : > { %v1851_v13 = vsel %vm1847_vm4, %v14400_v39, -inf }
 0x34c   : > { %v10752_v35 = vpop.f32.mrb[32].mxu1  ;;  %1852 = vmax.xlane.f32.xlu0 %v1851_v13  ;;  %v10727_v36 = vpop.f32.mrb[34].mxu0  ;;  %v1848_v6 = vsel %vm1847_vm4, %v14402_v28, -inf }
 0x34d   : > { %v14408_v41 = vmul.f32 0.35355338, %v10727_v36  ;;  %v1438_v19 = vpop.f32.mrb[33].mxu1  ;;  %1849 = vmax.xlane.f32.xlu1 %v1848_v6  ;;  %v1279_v22 = vpop.f32.mrb[35].mxu0 }
 0x34e   : > { %v14410_v5 = vmul.f32 0.35355338, %v1279_v22 }
 0x34f   : > { %v1857_v27 = vsel %vm1847_vm4, %v14408_v41, -inf }
 0x350   : > { %v10730_v44 = vpop.f32.mrb[36].mxu0  ;;  %v10755_v3 = vpop.f32.mrb[34].mxu1  ;;  %v1854_v61 = vsel %vm1847_vm4, %v14410_v5, -inf }
 0x351   : > { %v14416_v13 = vmul.f32 0.35355338, %v10730_v44  ;;  %v1448_v59 = vpop.f32.mrb[35].mxu1  ;;  %1858 = vmax.xlane.f32.xlu1 %v1857_v27  ;;  %1855 = vmax.xlane.f32.xlu0 %v1854_v61  ;;  %v1289_v36 = vpop.f32.mrb[37].mxu0  ;;  %v14430_v27 = vmul.f32 0.35355338, %v10752_v35 }
 0x352   : > { %v14418_v52 = vmul.f32 0.35355338, %v1289_v36  ;;  %v14432_v36 = vmul.f32 0.35355338, %v1438_v19 }
 0x353   : > { %v1863_v22 = vsel %vm1847_vm4, %v14416_v13, -inf }
 0x354   : > { %v10733_v6 = vpop.f32.mrb[38].mxu0  ;;  %v10758_v53 = vpop.f32.mrb[36].mxu1  ;;  %v1860_v16 = vsel %vm1847_vm4, %v14418_v52, -inf  ;;  %v1872_v35 = vsel %vm1847_vm4, %v14432_v36, -inf }
 0x355   : > { %v14424_v43 = vmul.f32 0.35355338, %v10733_v6  ;;  %v1458_v8 = vpop.f32.mrb[37].mxu1  ;;  %1864 = vmax.xlane.f32.xlu1 %v1863_v22  ;;  %1861 = vmax.xlane.f32.xlu0 %v1860_v16  ;;  %v1299_v44 = vpop.f32.mrb[39].mxu0  ;;  %v14436_v6 = vmul.f32 0.35355338, %v10755_v3 }
 0x356   : > { %v14426_v11 = vmul.f32 0.35355338, %v1299_v44  ;;  %v14438_v16 = vmul.f32 0.35355338, %v1448_v59  ;;  %v1875_v22 = vsel %vm1847_vm4, %v14430_v27, -inf }
 0x357   : > { %v1869_v61 = vsel %vm1847_vm4, %v14424_v43, -inf  ;;  %v14444_v19 = vmul.f32 0.35355338, %v10758_v53  ;;  %v14446_v44 = vmul.f32 0.35355338, %v1458_v8 }
 0x358   : > { %v10761_v49 = vpop.f32.mrb[38].mxu1  ;;  %v1866_v26 = vsel %vm1847_vm4, %v14426_v11, -inf  ;;  %v1878_v3 = vsel %vm1847_vm4, %v14438_v16, -inf }
 0x359   : > { %v1468_v58 = vpop.f32.mrb[39].mxu1  ;;  %1870 = vmax.xlane.f32.xlu1 %v1869_v61  ;;  %1867 = vmax.xlane.f32.xlu0 %v1866_v26  ;;  %v1881_v61 = vsel %vm1847_vm4, %v14436_v6, -inf  ;;  %v14452_v59 = vmul.f32 0.35355338, %v10761_v49  ;;  %v1884_v53 = vsel %vm1847_vm4, %v14446_v44, -inf }
 0x35a   : > { %v14454_v26 = vmul.f32 0.35355338, %v1468_v58 }
 0x35b   : > { %v1893_v8 = vsel %vm1847_vm4, %v14452_v59, -inf }
 0x35d   : > { %1876 = vmax.xlane.f32.xlu1 %v1875_v22  ;;  %1873 = vmax.xlane.f32.xlu0 %v1872_v35  ;;  %v1887_v22 = vsel %vm1847_vm4, %v14444_v19, -inf  ;;  %v1890_v35 = vsel %vm1847_vm4, %v14454_v26, -inf }
 0x361   : > { %1882 = vmax.xlane.f32.xlu1 %v1881_v61  ;;  %1879 = vmax.xlane.f32.xlu0 %v1878_v3 }
 0x365   : > { %1888 = vmax.xlane.f32.xlu1 %v1887_v22  ;;  %1885 = vmax.xlane.f32.xlu0 %v1884_v53 }
 0x369   : > { %v10780_v61 = vpop.f32.mrb[40].mxu0  ;;  %1894 = vmax.xlane.f32.xlu1 %v1893_v8  ;;  %1891 = vmax.xlane.f32.xlu0 %v1890_v35 }
 0x36a   : > { %v14464_v49 = vmul.f32 0.35355338, %v10780_v61  ;;  %v1607_v58 = vpop.f32.mrb[41].mxu0 }
 0x36b   : > { %v14466_v3 = vmul.f32 0.35355338, %v1607_v58 }
 0x36c   : > { %v1899_v55 = vsel %vm1847_vm4, %v14464_v49, -inf }
 0x36d   : > { %v10783_v48 = vpop.f32.mrb[42].mxu0  ;;  %v10808_v22 = vpop.f32.mrb[40].mxu1  ;;  %1900 = vmax.xlane.f32.xlu1 %v1899_v55  ;;  %v1896_v53 = vsel %vm1847_vm4, %v14466_v3, -inf }
 0x36e   : > { %v14472_v24 = vmul.f32 0.35355338, %v10783_v48  ;;  %v1776_v46 = vpop.f32.mrb[41].mxu1  ;;  %1897 = vmax.xlane.f32.xlu0 %v1896_v53  ;;  %v1617_v8 = vpop.f32.mrb[43].mxu0 }
 0x36f   : > { %v14474_v35 = vmul.f32 0.35355338, %v1617_v8  ;;  %v14496_v62 = vmul.f32 0.35355338, %v1776_v46 }
 0x370   : > { %v1905_v61 = vsel %vm1847_vm4, %v14472_v24, -inf }
 0x371   : > { %v10786_v58 = vpop.f32.mrb[44].mxu0  ;;  %v10811_v23 = vpop.f32.mrb[42].mxu1  ;;  %1906 = vmax.xlane.f32.xlu1 %v1905_v61  ;;  %v1902_v18 = vsel %vm1847_vm4, %v14474_v35, -inf }
 0x372   : > { %v14480_v55 = vmul.f32 0.35355338, %v10786_v58  ;;  %v1786_v32 = vpop.f32.mrb[43].mxu1  ;;  %1903 = vmax.xlane.f32.xlu0 %v1902_v18  ;;  %v1627_v48 = vpop.f32.mrb[45].mxu0  ;;  %v14492_v18 = vmul.f32 0.35355338, %v10808_v22 }
 0x373   : > { %v14482_v63 = vmul.f32 0.35355338, %v1627_v48  ;;  %v1920_v22 = vsel %vm1847_vm4, %v14496_v62, -inf }
 0x374   : > { %v1911_v53 = vsel %vm1847_vm4, %v14480_v55, -inf }
 0x375   : > { %v10789_v8 = vpop.f32.mrb[46].mxu0  ;;  %v10814_v1 = vpop.f32.mrb[44].mxu1  ;;  %1912 = vmax.xlane.f32.xlu1 %v1911_v53  ;;  %v1908_v14 = vsel %vm1847_vm4, %v14482_v63, -inf }
 0x376   : > { %v14488_v61 = vmul.f32 0.35355338, %v10789_v8  ;;  %v1796_v15 = vpop.f32.mrb[45].mxu1  ;;  %1909 = vmax.xlane.f32.xlu0 %v1908_v14  ;;  %v1637_v58 = vpop.f32.mrb[47].mxu0  ;;  %v14500_v8 = vmul.f32 0.35355338, %v10811_v23 }
 0x377   : > { %v14490_v54 = vmul.f32 0.35355338, %v1637_v58  ;;  %v1923_v14 = vsel %vm1847_vm4, %v14492_v18, -inf  ;;  %v14504_v58 = vmul.f32 0.35355338, %v1786_v32 }
 0x378   : > { %v1917_v48 = vsel %vm1847_vm4, %v14488_v61, -inf  ;;  %v14508_v46 = vmul.f32 0.35355338, %v10814_v1  ;;  %v14512_v60 = vmul.f32 0.35355338, %v1796_v15 }
 0x379   : > { %v10817_v25 = vpop.f32.mrb[46].mxu1  ;;  %1918 = vmax.xlane.f32.xlu1 %v1917_v48  ;;  %v1914_v53 = vsel %vm1847_vm4, %v14490_v54, -inf  ;;  %v1929_v48 = vsel %vm1847_vm4, %v14500_v8, -inf  ;;  %v1926_v23 = vsel %vm1847_vm4, %v14504_v58, -inf }
 0x37a   : > { %v1806_v31 = vpop.f32.mrb[47].mxu1  ;;  %1915 = vmax.xlane.f32.xlu0 %v1914_v53  ;;  %v14516_v53 = vmul.f32 0.35355338, %v10817_v25  ;;  %v1935_v32 = vsel %vm1847_vm4, %v14508_v46, -inf  ;;  %v1932_v1 = vsel %vm1847_vm4, %v14512_v60, -inf  ;;  %v14528_v25 = vpop.permute.xlu0 %12576 }
 0x37b   : > { %18226 = vst [vmem:[#allocation75_spill] sm:$0xff] %v14528_v25 }
 0x37c   : > { %v1941_v15 = vsel %vm1847_vm4, %v14516_v53, -inf }
 0x37d   : > { %1924 = vmax.xlane.f32.xlu1 %v1923_v14  ;;  %v14520_v14 = vmul.f32 0.35355338, %v1806_v31  ;;  %v14534_v31 = vpop.permute.xlu1 %12601 }
 0x37e   : > { %1921 = vmax.xlane.f32.xlu0 %v1920_v22  ;;  %18229 = vst [vmem:[#allocation78_spill] sm:$0xff] %v14534_v31 }
 0x37f   : > { %v1938_v22 = vsel %vm1847_vm4, %v14520_v14, -inf }
 0x381   : > { %1930 = vmax.xlane.f32.xlu1 %v1929_v48  ;;  %v14530_v48 = vpop.permute.xlu0 %12581 }
 0x382   : > { %1927 = vmax.xlane.f32.xlu0 %v1926_v23  ;;  %18227 = vst [vmem:[#allocation76_spill] sm:$0xff] %v14530_v48 }
 0x385   : > { %1936 = vmax.xlane.f32.xlu1 %v1935_v32  ;;  %v14532_v23 = vpop.permute.xlu0 %12586  ;;  %v14536_v32 = vpop.permute.xlu1 %12611 }
 0x386   : > { %1933 = vmax.xlane.f32.xlu0 %v1932_v1  ;;  %18228 = vst [vmem:[#allocation77_spill] sm:$0xff] %v14532_v23  ;;  %18230 = vst [vmem:[#allocation79_spill] sm:$0xff] %v14536_v32 }
 0x389   : > { %1942 = vmax.xlane.f32.xlu1 %v1941_v15  ;;  %v14538_v38 = vpop.permute.xlu0 %12591  ;;  %v14540_v1 = vpop.permute.xlu1 %12616 }
 0x38a   : > { %1939 = vmax.xlane.f32.xlu0 %v1938_v22  ;;  %18231 = vst [vmem:[#allocation80_spill] sm:$0xff] %v14538_v38  ;;  %18232 = vst [vmem:[#allocation81_spill] sm:$0xff] %v14540_v1 }
 0x38d   : > { %v14542_v56 = vpop.permute.xlu0 %12596  ;;  %v14546_v45 = vpop.permute.xlu1 %12626 }
 0x38e   : > { %18233 = vst [vmem:[#allocation82_spill] sm:$0xff] %v14542_v56  ;;  %18235 = vst [vmem:[#allocation84_spill] sm:$0xff] %v14546_v45 }
 0x391   : > { %v14544_v15 = vpop.permute.xlu0 %12606  ;;  %v14550_v25 = vpop.permute.xlu1 %12631 }
 0x392   : > { %18234 = vst [vmem:[#allocation83_spill] sm:$0xff] %v14544_v15  ;;  %18237 = vst [vmem:[#allocation86_spill] sm:$0xff] %v14550_v25 }
 0x395   : > { %v14548_v22 = vpop.permute.xlu0 %12621 }
 0x396   : > { %18236 = vst [vmem:[#allocation85_spill] sm:$0xff] %v14548_v22 }
 0x3d9   : > { %v1853_v48 = vpop.xlane.xlu0 %1852 }
 0x3da   : > { %v1945_v23 = vsub.f32 %v14400_v39, %v1853_v48  ;;  %v1850_v31 = vpop.xlane.xlu1 %1849 }
 0x3db   : > { %v1944_v32 = vsub.f32 %v14402_v28, %v1850_v31 }
 0x3dc   : > { %v1978_v33 = vmul.f32 1.442695, %v1945_v23 }
 0x3dd   : > { %v1976_v38 = vmul.f32 1.442695, %v1944_v32 }
 0x3de   : > { %12845 = vpow2.f32 %v1978_v33  ;;  %v1859_v1 = vpop.xlane.xlu1 %1858  ;;  %v1856_v40 = vpop.xlane.xlu0 %1855 }
 0x3df   : > { %v1947_v56 = vsub.f32 %v14408_v41, %v1859_v1  ;;  %v1946_v15 = vsub.f32 %v14410_v5, %v1856_v40  ;;  %12847 = vpow2.f32 %v1976_v38 }
 0x3e1   : > { %v1982_v45 = vmul.f32 1.442695, %v1947_v56  ;;  %v1980_v22 = vmul.f32 1.442695, %v1946_v15 }
 0x3e2   : > { %v1865_v57 = vpop.xlane.xlu1 %1864  ;;  %v1862_v25 = vpop.xlane.xlu0 %1861 }
 0x3e3   : > { %12849 = vpow2.f32 %v1982_v45  ;;  %v1949_v39 = vsub.f32 %v14416_v13, %v1865_v57  ;;  %v1948_v48 = vsub.f32 %v14418_v52, %v1862_v25 }
 0x3e4   : > { %12851 = vpow2.f32 %v1980_v22 }
 0x3e5   : > { %v1986_v28 = vmul.f32 1.442695, %v1949_v39  ;;  %v1984_v23 = vmul.f32 1.442695, %v1948_v48 }
 0x3e6   : > { %v1871_v33 = vpop.xlane.xlu1 %1870  ;;  %v1868_v31 = vpop.xlane.xlu0 %1867 }
 0x3e7   : > { %12853 = vpow2.f32 %v1986_v28  ;;  %v1951_v41 = vsub.f32 %v14424_v43, %v1871_v33  ;;  %v1950_v40 = vsub.f32 %v14426_v11, %v1868_v31 }
 0x3e8   : > { %v14560_v5 = vpop.eup %12845  ;;  %12855 = vpow2.f32 %v1984_v23 }
 0x3e9   : > { %v1990_v38 = vmul.f32 1.442695, %v1951_v41  ;;  %v1988_v56 = vmul.f32 1.442695, %v1950_v40  ;;  %v2043_v45 = vsel %vm1847_vm4, %v14560_v5, 0.0  ;;  %v14564_v57 = vpop.eup %12847 }
 0x3ea   : > { %v1877_v52 = vpop.xlane.xlu1 %1876  ;;  %v1874_v13 = vpop.xlane.xlu0 %1873  ;;  %2044 = vadd.xlane.f32.xlu1 %v2043_v45  ;;  %v2040_v1 = vsel %vm1847_vm4, %v14564_v57, 0.0 }
 0x3eb   : > { %12857 = vpow2.f32 %v1990_v38  ;;  %v1953_v25 = vsub.f32 %v14430_v27, %v1877_v52  ;;  %v1952_v43 = vsub.f32 %v14432_v36, %v1874_v13 }
 0x3ec   : > { %12859 = vpow2.f32 %v1988_v56 }
 0x3ed   : > { %v14568_v11 = vpop.eup %12849  ;;  %v1994_v32 = vmul.f32 1.442695, %v1953_v25  ;;  %v1992_v27 = vmul.f32 1.442695, %v1952_v43 }
 0x3ee   : > { %v14572_v15 = vpop.eup %12851  ;;  %v1883_v22 = vpop.xlane.xlu1 %1882  ;;  %2041 = vadd.xlane.f32.xlu1 %v2040_v1  ;;  %v2049_v48 = vsel %vm1847_vm4, %v14568_v11, 0.0 }
 0x3ef   : > { %v1880_v39 = vpop.xlane.xlu0 %1879  ;;  %v1955_v28 = vsub.f32 %v14436_v6, %v1883_v22  ;;  %2050 = vadd.xlane.f32.xlu0 %v2049_v48  ;;  %12861 = vpow2.f32 %v1994_v32  ;;  %v2046_v23 = vsel %vm1847_vm4, %v14572_v15, 0.0 }
 0x3f0   : > { %v1954_v31 = vsub.f32 %v14438_v16, %v1880_v39  ;;  %12863 = vpow2.f32 %v1992_v27 }
 0x3f1   : > { %v14577_v36 = vpop.eup %12853  ;;  %v1998_v38 = vmul.f32 1.442695, %v1955_v28 }
 0x3f2   : > { %v14581_v33 = vpop.eup %12855  ;;  %v1889_v41 = vpop.xlane.xlu1 %1888  ;;  %2047 = vadd.xlane.f32.xlu1 %v2046_v23  ;;  %v2055_v13 = vsel %vm1847_vm4, %v14577_v36, 0.0  ;;  %v1996_v16 = vmul.f32 1.442695, %v1954_v31 }
 0x3f3   : > { %v1886_v40 = vpop.xlane.xlu0 %1885  ;;  %v2052_v6 = vsel %vm1847_vm4, %v14581_v33, 0.0  ;;  %12865 = vpow2.f32 %v1998_v38 }
 0x3f4   : > { %v1956_v56 = vsub.f32 %v14446_v44, %v1886_v40  ;;  %2053 = vadd.xlane.f32.xlu0 %v2052_v6  ;;  %v1957_v44 = vsub.f32 %v14444_v19, %v1889_v41 }
 0x3f5   : > { %v14587_v45 = vpop.eup %12857 }
 0x3f6   : > { %v2000_v52 = vmul.f32 1.442695, %v1956_v56  ;;  %v14591_v25 = vpop.eup %12859  ;;  %v1895_v43 = vpop.xlane.xlu1 %1894  ;;  %2056 = vadd.xlane.f32.xlu1 %v2055_v13  ;;  %v2061_v48 = vsel %vm1847_vm4, %v14587_v45, 0.0  ;;  %v2002_v23 = vmul.f32 1.442695, %v1957_v44 }
 0x3f7   : > { %v1892_v32 = vpop.xlane.xlu0 %1891  ;;  %v2058_v22 = vsel %vm1847_vm4, %v14591_v25, 0.0  ;;  %v1959_v31 = vsub.f32 %v14452_v59, %v1895_v43 }
 0x3f8   : > { %v1958_v1 = vsub.f32 %v14454_v26, %v1892_v32  ;;  %12867 = vpow2.f32 %v2000_v52  ;;  %2059 = vadd.xlane.f32.xlu0 %v2058_v22 }
 0x3f9   : > { %v14599_v28 = vpop.eup %12861  ;;  %12869 = vpow2.f32 %v1996_v16  ;;  %v2006_v6 = vmul.f32 1.442695, %v1959_v31 }
 0x3fa   : > { %v2004_v39 = vmul.f32 1.442695, %v1958_v1  ;;  %v1901_v27 = vpop.xlane.xlu1 %1900  ;;  %2062 = vadd.xlane.f32.xlu1 %v2061_v48  ;;  %v2067_v41 = vsel %vm1847_vm4, %v14599_v28, 0.0  ;;  %v14605_v40 = vpop.eup %12863 }
 0x3fb   : > { %v1898_v19 = vpop.xlane.xlu0 %1897  ;;  %v1961_v13 = vsub.f32 %v14464_v49, %v1901_v27 }
 0x3fc   : > { %12871 = vpow2.f32 %v2004_v39  ;;  %v1960_v26 = vsub.f32 %v14466_v3, %v1898_v19  ;;  %v2064_v3 = vsel %vm1847_vm4, %v14605_v40, 0.0 }
 0x3fd   : > { %12873 = vpow2.f32 %v2002_v23  ;;  %v14609_v16 = vpop.eup %12865 }
 0x3fe   : > { %v2008_v38 = vmul.f32 1.442695, %v1960_v26  ;;  %v1907_v56 = vpop.xlane.xlu1 %1906  ;;  %2068 = vadd.xlane.f32.xlu1 %v2067_v41  ;;  %v2073_v23 = vsel %vm1847_vm4, %v14609_v16, 0.0 }
 0x3ff   : > { %v1904_v52 = vpop.xlane.xlu0 %1903  ;;  %v1963_v1 = vsub.f32 %v14472_v24, %v1907_v56 }
 0x400   : > { %12875 = vpow2.f32 %v2008_v38  ;;  %v1962_v59 = vsub.f32 %v14474_v35, %v1904_v52  ;;  %v2010_v35 = vmul.f32 1.442695, %v1961_v13 }
 0x401   : > { %12877 = vpow2.f32 %v2006_v6  ;;  %v2014_v19 = vmul.f32 1.442695, %v1963_v1 }
 0x402   : > { %v14613_v43 = vpop.eup %12867  ;;  %v2012_v32 = vmul.f32 1.442695, %v1962_v59  ;;  %v1913_v44 = vpop.xlane.xlu1 %1912  ;;  %2065 = vadd.xlane.f32.xlu1 %v2064_v3 }
 0x403   : > { %v1965_v22 = vsub.f32 %v14480_v55, %v1913_v44  ;;  %v1910_v39 = vpop.xlane.xlu0 %1909  ;;  %v2076_v49 = vsel %vm1847_vm4, %v14613_v43, 0.0  ;;  %v14619_v48 = vpop.eup %12869 }
 0x404   : > { %12879 = vpow2.f32 %v2012_v32  ;;  %2077 = vadd.xlane.f32.xlu0 %v2076_v49  ;;  %v1964_v24 = vsub.f32 %v14482_v63, %v1910_v39  ;;  %v2070_v6 = vsel %vm1847_vm4, %v14619_v48, 0.0 }
 0x405   : > { %v2018_v27 = vmul.f32 1.442695, %v1965_v22 }
 0x406   : > { %v14623_v31 = vpop.eup %12871  ;;  %2074 = vadd.xlane.f32.xlu1 %v2073_v23  ;;  %v1919_v55 = vpop.xlane.xlu1 %1918  ;;  %v2016_v63 = vmul.f32 1.442695, %v1964_v24 }
 0x407   : > { %12881 = vpow2.f32 %v2018_v27  ;;  %v1916_v26 = vpop.xlane.xlu0 %1915  ;;  %v2082_v41 = vsel %vm1847_vm4, %v14623_v31, 0.0  ;;  %v14629_v56 = vpop.eup %12873  ;;  %v1967_v32 = vsub.f32 %v14488_v61, %v1919_v55 }
 0x408   : > { %12883 = vpow2.f32 %v2010_v35  ;;  %v1966_v38 = vsub.f32 %v14490_v54, %v1916_v26  ;;  %2083 = vadd.xlane.f32.xlu0 %v2082_v41  ;;  %v2079_v22 = vsel %vm1847_vm4, %v14629_v56, 0.0 }
 0x409   : > { %12885 = vpow2.f32 %v2014_v19  ;;  %v2022_v27 = vmul.f32 1.442695, %v1967_v32 }
 0x40a   : > { %v14633_v52 = vpop.eup %12875  ;;  %v2020_v13 = vmul.f32 1.442695, %v1966_v38  ;;  %2071 = vadd.xlane.f32.xlu1 %v2070_v6  ;;  %v1925_v1 = vpop.xlane.xlu1 %1924 }
 0x40b   : > { %v1922_v59 = vpop.xlane.xlu0 %1921  ;;  %v2088_v3 = vsel %vm1847_vm4, %v14633_v52, 0.0  ;;  %v14639_v44 = vpop.eup %12877  ;;  %v1969_v61 = vsub.f32 %v14492_v18, %v1925_v1 }
 0x40c   : > { %12887 = vpow2.f32 %v2020_v13  ;;  %v1968_v54 = vsub.f32 %v14496_v62, %v1922_v59  ;;  %2089 = vadd.xlane.f32.xlu0 %v2088_v3  ;;  %v2085_v23 = vsel %vm1847_vm4, %v14639_v44, 0.0 }
 0x40d   : > { %12889 = vpow2.f32 %v2016_v63  ;;  %v2026_v55 = vmul.f32 1.442695, %v1969_v61  ;;  %v2898_v61 = vmul.f32 %v14286_v29, %v14044_v47 }
 0x40e   : > { %v14643_v39 = vpop.eup %12879  ;;  %v2024_v49 = vmul.f32 1.442695, %v1968_v54  ;;  %2080 = vadd.xlane.f32.xlu1 %v2079_v22 }
 0x40f   : > { %v2094_v35 = vsel %vm1847_vm4, %v14643_v39, 0.0 }
 0x410   : > { %12891 = vpow2.f32 %v2024_v49  ;;  %2095 = vadd.xlane.f32.xlu0 %v2094_v35  ;;  %v2890_v49 = vmul.f32 %v14286_v29, %v14029_v10  ;;  %v2891_v35 = vmul.f32 %v14286_v29, %v14026_v9 }
 0x411   : > { %v14648_v62 = vpop.eup %12881  ;;  %12893 = vpow2.f32 %v2022_v27 }
 0x412   : > { %v14652_v19 = vpop.eup %12883  ;;  %2086 = vadd.xlane.f32.xlu1 %v2085_v23  ;;  %v2103_v24 = vsel %vm1847_vm4, %v14648_v62, 0.0  ;;  %12895 = vpow2.f32 %v2026_v55  ;;  %v12635_v27 = vpack.i.bf16 %v2891_v35, %v2890_v49  ;;  %v2899_v23 = vmul.f32 %v14286_v29, %v14041_v50 }
 0x413   : > { %v14656_v26 = vpop.eup %12885  ;;  %v2091_v18 = vsel %vm1847_vm4, %v14652_v19, 0.0 }
 0x414   : > { %2104 = vadd.xlane.f32.xlu0 %v2103_v24  ;;  %v2097_v13 = vsel %vm1847_vm4, %v14656_v26, 0.0  ;;  %v1931_v24 = vpop.xlane.xlu1 %1930  ;;  %v12640_v55 = vpack.i.bf16 %v2899_v23, %v2898_v61 }
 0x416   : > { %v14660_v41 = vpop.eup %12887  ;;  %2092 = vadd.xlane.f32.xlu1 %v2091_v18  ;;  %v1928_v18 = vpop.xlane.xlu0 %1927 }
 0x417   : > { %v2106_v38 = vsel %vm1847_vm4, %v14660_v41, 0.0  ;;  %v14664_v6 = vpop.eup %12889 }
 0x418   : > { %2107 = vadd.xlane.f32.xlu0 %v2106_v38  ;;  %v2100_v3 = vsel %vm1847_vm4, %v14664_v6, 0.0  ;;  %v1937_v38 = vpop.xlane.xlu1 %1936 }
 0x41a   : > { %v14668_v63 = vpop.eup %12891  ;;  %2098 = vadd.xlane.f32.xlu1 %v2097_v13  ;;  %v1971_v13 = vsub.f32 %v14500_v8, %v1931_v24 }
 0x41b   : > { %v2112_v59 = vsel %vm1847_vm4, %v14668_v63, 0.0  ;;  %v14674_v32 = vpop.eup %12893 }
 0x41c   : > { %2113 = vadd.xlane.f32.xlu0 %v2112_v59  ;;  %v2109_v54 = vsel %vm1847_vm4, %v14674_v32, 0.0  ;;  %v14678_v1 = vpop.eup %12895  ;;  %v1934_v59 = vpop.xlane.xlu0 %1933 }
 0x41d   : > { %v2115_v22 = vsel %vm1847_vm4, %v14678_v1, 0.0  ;;  %v1972_v47 = vsub.f32 %v14512_v60, %v1934_v59 }
 0x41e   : > { %2101 = vadd.xlane.f32.xlu1 %v2100_v3  ;;  %v2030_v3 = vmul.f32 1.442695, %v1971_v13 }
 0x420   : > { %12897 = vpow2.f32 %v2030_v3  ;;  %v1940_v50 = vpop.xlane.xlu0 %1939 }
 0x421   : > { %v1974_v23 = vsub.f32 %v14520_v14, %v1940_v50 }
 0x422   : > { %2110 = vadd.xlane.f32.xlu1 %v2109_v54  ;;  %v1970_v54 = vsub.f32 %v14504_v58, %v1928_v18  ;;  %v2032_v58 = vmul.f32 1.442695, %v1972_v47 }
 0x423   : > { %v2036_v8 = vmul.f32 1.442695, %v1974_v23  ;;  %v2911_v23 = vmul.f32 %v14286_v29, %v14113_v34 }
 0x424   : > { %v2028_v49 = vmul.f32 1.442695, %v1970_v54  ;;  %v2908_v54 = vmul.f32 %v14286_v29, %v14105_v42 }
 0x426   : > { %2116 = vadd.xlane.f32.xlu1 %v2115_v22  ;;  %v1943_v22 = vpop.xlane.xlu1 %1942  ;;  %12899 = vpow2.f32 %v2028_v49  ;;  %v2900_v49 = vmul.f32 %v14286_v29, %v14060_v12 }
 0x427   : > { %v1975_v35 = vsub.f32 %v14516_v53, %v1943_v22  ;;  %v2909_v22 = vmul.f32 %v14286_v29, %v14102_v51 }
 0x429   : > { %v2038_v61 = vmul.f32 1.442695, %v1975_v35  ;;  %v2901_v35 = vmul.f32 %v14286_v29, %v14057_v2 }
 0x42a   : > { %v14698_v24 = vpop.eup %12897 }
 0x42b   : > { %12901 = vpow2.f32 %v2038_v61  ;;  %v2121_v53 = vsel %vm1847_vm4, %v14698_v24, 0.0  ;;  %v2910_v61 = vmul.f32 %v14286_v29, %v14116_v0 }
 0x430   : > { %v14702_v18 = vpop.eup %12899 }
 0x431   : > { %v2118_v50 = vsel %vm1847_vm4, %v14702_v18, 0.0 }
 0x432   : > { %12636 = vrot.lane.b32.xlu0 %v12635_v27, %s13491_s29  ;;  %v1973_v27 = vsub.f32 %v14508_v46, %v1937_v38 }
 0x435   : > { %v14706_v46 = vpop.eup %12901 }
 0x436   : > { %v2133_v14 = vsel %vm1847_vm4, %v14706_v46, 0.0 }
 0x437   : > { %12641 = vrot.lane.b32.xlu1 %v12640_v55, %s13491_s29  ;;  %v2034_v55 = vmul.f32 1.442695, %v1973_v27  ;;  %v12650_v27 = vpack.i.bf16 %v2909_v22, %v2908_v54  ;;  %v2914_v22 = vmul.f32 %v14286_v29, %v14144_v7 }
 0x439   : > { %12903 = vpow2.f32 %v2034_v55  ;;  %v12645_v55 = vpack.i.bf16 %v2901_v35, %v2900_v49  ;;  %v18238_v49 = vld [vmem:[#allocation61_spill] sm:$0xff] }
 0x43a   : > { %12905 = vpow2.f32 %v2036_v8  ;;  %v2902_v8 = vmul.f32 %v14286_v29, %v14072_v37  ;;  %v2915_v35 = vmul.f32 %v14286_v29, %v18238_v49 }
 0x43b   : > { %12907 = vpow2.f32 %v2032_v58  ;;  %v2903_v58 = vmul.f32 %v14286_v29, %v14069_v21 }
 0x443   : > { %v14708_v60 = vpop.eup %12903 }
 0x444   : > { %v14712_v47 = vpop.eup %12905  ;;  %v2127_v38 = vsel %vm1847_vm4, %v14708_v60, 0.0 }
 0x445   : > { %v14716_v13 = vpop.eup %12907  ;;  %v2130_v59 = vsel %vm1847_vm4, %v14712_v47, 0.0 }
 0x446   : > { %v2124_v3 = vsel %vm1847_vm4, %v14716_v13, 0.0 }
 0x451   : > { %2122 = vadd.xlane.f32.xlu0 %v2121_v53  ;;  %v12660_v53 = vpack.i.bf16 %v2911_v23, %v2910_v61  ;;  %v18239_v61 = vld [vmem:[#allocation5_spill] sm:$0xff] }
 0x452   : > { %v4462_v23 = vsub.s32 2, %v18239_v61 }
 0x455   : > { %2119 = vadd.xlane.f32.xlu0 %v2118_v50  ;;  %v2912_v50 = vmul.f32 %v14286_v29, %v14130_v17 }
 0x459   : > { %2134 = vadd.xlane.f32.xlu0 %v2133_v14  ;;  %v2913_v14 = vmul.f32 %v14286_v29, %v14127_v20 }
 0x45b   : > { %2128 = vadd.xlane.f32.xlu1 %v2127_v38  ;;  %v12655_v38 = vpack.i.bf16 %v2903_v58, %v2902_v8  ;;  %v12670_v54 = vpack.i.bf16 %v2913_v14, %v2912_v50  ;;  %v18240_v8 = vld [vmem:[#allocation60_spill] sm:$0xff]  ;;  %v12680_v14 = vpack.i.bf16 %v2915_v35, %v2914_v22 }
 0x45c   : > { %v2906_v58 = vmul.f32 %v14286_v29, %v18240_v8 }
 0x45d   : > { %2131 = vadd.xlane.f32.xlu0 %v2130_v59  ;;  %v2904_v59 = vmul.f32 %v14286_v29, %v14083_v4 }
 0x45f   : > { %2125 = vadd.xlane.f32.xlu1 %v2124_v3  ;;  %v2905_v3 = vmul.f32 %v14286_v29, %v14080_v30 }
 0x470   : > { %12651 = vrot.lane.b32.xlu1 %v12650_v27, %s13491_s29 }
 0x473   : > { %12646 = vrot.lane.b32.xlu0 %v12645_v55, %s13491_s29  ;;  %v12665_v55 = vpack.i.bf16 %v2905_v3, %v2904_v59 }
 0x474   : > { %12661 = vrot.lane.b32.xlu1 %v12660_v53, %s13491_s29  ;;  %v18241_v53 = vld [vmem:[#allocation59_spill] sm:$0xff] }
 0x475   : > { %v2907_v50 = vmul.f32 %v14286_v29, %v18241_v53 }
 0x477   : > { %12656 = vrot.lane.b32.xlu0 %v12655_v38, %s13491_s29  ;;  %v2045_v27 = vpop.xlane.xlu1 %2044  ;;  %v12675_v3 = vpack.i.bf16 %v2907_v50, %v2906_v58 }
 0x478   : > { %12671 = vrot.lane.b32.xlu1 %v12670_v54, %s13491_s29  ;;  %12909 = vrcp.f32 %v2045_v27  ;;  %v13423_v54 = vld [vmem:[%s17944_s8] sm:$0xf] }
 0x479   : > { %v14765_v59 = vrot.slane %v13423_v54, %v4462_v23 }
 0x47b   : > { %12666 = vrot.lane.b32.xlu0 %v12665_v55, %s13491_s29  ;;  %v2042_v7 = vpop.xlane.xlu1 %2041  ;;  %18242 = vst [vmem:[#allocation87_spill] sm:$0xff] %v14765_v59 }
 0x47c   : > { %12911 = vrcp.f32 %v2042_v7  ;;  %12681 = vrot.lane.b32.xlu1 %v12680_v14, %s13491_s29  ;;  %v2051_v38 = vpop.xlane.xlu0 %2050  ;;  %v18243_v14 = vld [vmem:[#allocation75_spill] sm:$0xff] }
 0x47d   : > { %12913 = vrcp.f32 %v2051_v38  ;;  %v12579_v61 = vunpack.i.h.bf16 %v18243_v14  ;;  %v12578_v23 = vunpack.i.l.bf16 %v18243_v14  ;;  %v18245_v14 = vld [vmem:[#allocation73_spill] sm:$0xff] }
 0x47f   : > { %12676 = vrot.lane.b32.xlu0 %v12675_v3, %s13491_s29  ;;  %v2048_v29 = vpop.xlane.xlu1 %2047 }
 0x480   : > { %12915 = vrcp.f32 %v2048_v29  ;;  %4465 = vrot.lane.b32.xlu1 %v14765_v59, %s13490_s26  ;;  %v14775_v29 = vpack.c.bf16 %v12579_v61, %v12578_v23 }
 0x481   : > { %v2054_v22 = vpop.xlane.xlu0 %2053 }
 0x482   : > { %12917 = vrcp.f32 %v2054_v22  ;;  %v12910_v35 = vpop.eup %12909  ;;  %v18244_v22 = vld [vmem:[#allocation77_spill] sm:$0xff] }
 0x483   : > { %v2057_v7 = vpop.xlane.xlu1 %2056  ;;  %v2169_v38 = vmul.f32 %v12910_v35, %v14560_v5  ;;  %v12588_v59 = vunpack.i.l.bf16 %v18244_v22 }
 0x484   : > { %12919 = vrcp.f32 %v2057_v7  ;;  %v12589_v7 = vunpack.i.h.bf16 %v18244_v22 }
 0x485   : > { %v2060_v27 = vpop.xlane.xlu0 %2059 }
 0x486   : > { %v12912_v55 = vpop.eup %12911  ;;  %12921 = vrcp.f32 %v2060_v27  ;;  %v14786_v23 = vpack.c.bf16 %v12589_v7, %v12588_v59  ;;  %v18248_v7 = vld [vmem:[#allocation83_spill] sm:$0xff] }
 0x487   : > { %v2063_v58 = vpop.xlane.xlu1 %2062  ;;  %v2168_v50 = vmul.f32 %v12912_v55, %v14564_v57  ;;  %v12914_v54 = vpop.eup %12913 }
 0x488   : > { %12923 = vrcp.f32 %v2063_v58  ;;  %v2171_v5 = vmul.f32 %v12914_v54, %v14568_v11  ;;  %v18246_v58 = vld [vmem:[#allocation82_spill] sm:$0xff] }
 0x489   : > { %10834 = vmatprep.mubr.msk.f32.mxu0 %vm1847_vm4, %v2168_v50  ;;  %v12599_v50 = vunpack.i.h.bf16 %v18246_v58 }
 0x48a   : > { %v12916_v3 = vpop.eup %12915  ;;  %10835 = vmatmul.mubr.msk.f32.vlgmr.msra.gmra.mrb[48].mxu0 %vm1847_vm4, %v2169_v38  ;;  %v12598_v38 = vunpack.i.l.bf16 %v18246_v58 }
 0x48b   : > { %11873 = vmatpush3.bf16.msra.mxu0 %v18245_v14  ;;  %v2069_v27 = vpop.xlane.xlu1 %2068  ;;  %v2170_v57 = vmul.f32 %v12916_v3, %v14572_v15 }
 0x48c   : > { %v12918_v55 = vpop.eup %12917  ;;  %11875 = vmatprep.subr.bf16.mxu0 %v14775_v29  ;;  %12925 = vrcp.f32 %v2069_v27  ;;  %v14796_v22 = vpack.c.bf16 %v12599_v50, %v12598_v38  ;;  %v12608_v27 = vunpack.i.l.bf16 %v18248_v7  ;;  %v18250_v38 = vld [vmem:[#allocation76_spill] sm:$0xff] }
 0x48d   : > { %10837 = vmatprep.mubr.msk.f32.mxu0 %vm1847_vm4, %v2170_v57  ;;  %v2172_v61 = vmul.f32 %v12918_v55, %v14581_v33  ;;  %v12609_v57 = vunpack.i.h.bf16 %v18248_v7 }
 0x48e   : > { %v12920_v35 = vpop.eup %12919  ;;  %10838 = vmatmul.mubr.msk.f32.gmra.mrb[50].mxu0 %vm1847_vm4, %v2171_v5  ;;  %18247 = vst [vmem:[#allocation75_spill] sm:$0xff] %v14796_v22 }
 0x48f   : > { %11877 = vmatpush3.bf16.msra.mxu0 %v14775_v29  ;;  %v2066_v15 = vpop.xlane.xlu1 %2065  ;;  %10840 = vmatprep.mubr.msk.f32.mxu0 %vm1847_vm4, %v2172_v61  ;;  %v2173_v11 = vmul.f32 %v12920_v35, %v14577_v36 }
 0x490   : > { %v12922_v54 = vpop.eup %12921  ;;  %11879 = vmatprep.subr.bf16.mxu0 %v14786_v23  ;;  %12927 = vrcp.f32 %v2066_v15  ;;  %v12584_v15 = vunpack.i.h.bf16 %v18250_v38 }
 0x491   : > { %v2078_v33 = vpop.xlane.xlu0 %2077  ;;  %v2174_v59 = vmul.f32 %v12922_v54, %v14591_v25  ;;  %v14805_v25 = vpack.c.bf16 %v12609_v57, %v12608_v27 }
 0x492   : > { %v12924_v3 = vpop.eup %12923  ;;  %10841 = vmatmul.mubr.msk.f32.gmra.mrb[52].mxu0 %vm1847_vm4, %v2173_v11  ;;  %v12583_v11 = vunpack.i.l.bf16 %v18250_v38 }
 0x493   : > { %11881 = vmatpush3.bf16.msra.mxu0 %v14786_v23  ;;  %v2075_v55 = vpop.xlane.xlu1 %2074  ;;  %10843 = vmatprep.mubr.msk.f32.mxu0 %vm1847_vm4, %v2174_v59  ;;  %v2175_v36 = vmul.f32 %v12924_v3, %v14587_v45 }
 0x494   : > { %11883 = vmatprep.subr.bf16.mxu0 %v14796_v22  ;;  %12929 = vrcp.f32 %v2075_v55  ;;  %v14817_v57 = vpack.c.bf16 %v12584_v15, %v12583_v11 }
 0x495   : > { %v2084_v5 = vpop.xlane.xlu0 %2083 }
 0x496   : > { %10844 = vmatmul.mubr.msk.f32.gmra.mrb[54].mxu0 %vm1847_vm4, %v2175_v36  ;;  %v12926_v58 = vpop.eup %12925  ;;  %18251 = vst [vmem:[#allocation77_spill] sm:$0xff] %v14817_v57  ;;  %v18253_v36 = vld [vmem:[#allocation74_spill] sm:$0xff] }
 0x497   : > { %11885 = vmatpush3.bf16.msra.mxu0 %v14796_v22  ;;  %v2072_v61 = vpop.xlane.xlu1 %2071  ;;  %v2177_v3 = vmul.f32 %v12926_v58, %v14599_v28 }
 0x498   : > { %11904 = vmatprep.subr.msk.bf16.mxu0 %vm14202_vm3, %v14805_v25  ;;  %12931 = vrcp.f32 %v2072_v61 }
 0x499   : > { %12933 = vrcp.f32 %v2078_v33  ;;  %v2090_v50 = vpop.xlane.xlu0 %2089  ;;  %v18252_v33 = vld [vmem:[#allocation80_spill] sm:$0xff] }
 0x49a   : > { %v12928_v45 = vpop.eup %12927  ;;  %12935 = vrcp.f32 %v2090_v50  ;;  %v12594_v27 = vunpack.i.h.bf16 %v18252_v33  ;;  %v12593_v55 = vunpack.i.l.bf16 %v18252_v33  ;;  %v18255_v50 = vld [vmem:[#allocation78_spill] sm:$0xff] }
 0x49b   : > { %12937 = vrcp.f32 %v2084_v5  ;;  %v2081_v54 = vpop.xlane.xlu1 %2080  ;;  %v2176_v59 = vmul.f32 %v12928_v45, %v14605_v40  ;;  %v12604_v45 = vunpack.i.h.bf16 %v18255_v50  ;;  %v12603_v38 = vunpack.i.l.bf16 %v18255_v50 }
 0x49c   : > { %12939 = vrcp.f32 %v2081_v54  ;;  %v14824_v58 = vpack.c.bf16 %v12594_v27, %v12593_v55 }
 0x49d   : > { %v2096_v7 = vpop.xlane.xlu0 %2095  ;;  %10862 = vmatprep.mubr.msk.f32.mxu1 %vm1847_vm4, %v2176_v59  ;;  %v14834_v50 = vpack.c.bf16 %v12604_v45, %v12603_v38 }
 0x49e   : > { %10863 = vmatmul.mubr.msk.f32.vlgmr.msra.gmra.mrb[48].mxu1 %vm1847_vm4, %v2177_v3  ;;  %v12930_v40 = vpop.eup %12929  ;;  %18254 = vst [vmem:[#allocation73_spill] sm:$0xff] %v14824_v58 }
 0x49f   : > { %11889 = vmatpush3.bf16.msra.mxu1 %v18253_v36  ;;  %v2087_v5 = vpop.xlane.xlu1 %2086  ;;  %v2179_v3 = vmul.f32 %v12930_v40, %v14609_v16  ;;  %18256 = vst [vmem:[#allocation82_spill] sm:$0xff] %v14834_v50 }
 0x4a0   : > { %11891 = vmatprep.subr.bf16.mxu1 %v14817_v57  ;;  %12941 = vrcp.f32 %v2087_v5 }
 0x4a1   : > { %v2105_v28 = vpop.xlane.xlu0 %2104  ;;  %12943 = vrcp.f32 %v2096_v7  ;;  %v18257_v7 = vld [vmem:[#allocation79_spill] sm:$0xff] }
 0x4a2   : > { %v12932_v61 = vpop.eup %12931  ;;  %v12613_v22 = vunpack.i.l.bf16 %v18257_v7 }
 0x4a3   : > { %v12934_v15 = vpop.eup %12933  ;;  %11893 = vmatpush3.bf16.msra.mxu1 %v14817_v57  ;;  %v2093_v11 = vpop.xlane.xlu1 %2092  ;;  %v2178_v54 = vmul.f32 %v12932_v61, %v14619_v48  ;;  %v12614_v57 = vunpack.i.h.bf16 %v18257_v7 }
 0x4a4   : > { %v12936_v59 = vpop.eup %12935  ;;  %11895 = vmatprep.subr.bf16.mxu1 %v14824_v58  ;;  %12945 = vrcp.f32 %v2093_v11  ;;  %v2180_v48 = vmul.f32 %v12934_v15, %v14613_v43  ;;  %v18258_v11 = vld [vmem:[#allocation81_spill] sm:$0xff] }
 0x4a5   : > { %v12938_v33 = vpop.eup %12937  ;;  %v2108_v27 = vpop.xlane.xlu0 %2107  ;;  %10865 = vmatprep.mubr.msk.f32.mxu1 %vm1847_vm4, %v2178_v54  ;;  %v2184_v55 = vmul.f32 %v12936_v59, %v14633_v52  ;;  %v11926_v38 = vpack.c.bf16 %v12614_v57, %v12613_v22  ;;  %v12618_v22 = vunpack.i.l.bf16 %v18258_v11 }
 0x4a6   : > { %v12940_v5 = vpop.eup %12939  ;;  %10866 = vmatmul.mubr.msk.f32.gmra.mrb[50].mxu1 %vm1847_vm4, %v2179_v3  ;;  %v2182_v61 = vmul.f32 %v12938_v33, %v14623_v31  ;;  %v12619_v31 = vunpack.i.h.bf16 %v18258_v11 }
 0x4a7   : > { %10890 = vmatprep.mubr.msk.f32.mxu0 %vm1847_vm4, %v2184_v55  ;;  %11897 = vmatpush3.bf16.msra.mxu1 %v14824_v58  ;;  %v2099_v16 = vpop.xlane.xlu1 %2098  ;;  %v2181_v40 = vmul.f32 %v12940_v5, %v14629_v56 }
 0x4a8   : > { %11899 = vmatprep.subr.bf16.mxu1 %v14834_v50  ;;  %12947 = vrcp.f32 %v2099_v16  ;;  %10868 = vmatprep.mubr.msk.f32.mxu1 %vm1847_vm4, %v2180_v48 }
 0x4a9   : > { %v2114_v52 = vpop.xlane.xlu0 %2113 }
 0x4aa   : > { %v12942_v45 = vpop.eup %12941  ;;  %12949 = vrcp.f32 %v2114_v52  ;;  %10869 = vmatmul.mubr.msk.f32.gmra.mrb[52].mxu1 %vm1847_vm4, %v2181_v40 }
 0x4ab   : > { %12951 = vrcp.f32 %v2105_v28  ;;  %11901 = vmatpush3.bf16.msra.mxu1 %v14834_v50  ;;  %v2102_v43 = vpop.xlane.xlu1 %2101  ;;  %10871 = vmatprep.mubr.msk.f32.mxu1 %vm1847_vm4, %v2182_v61  ;;  %v2183_v56 = vmul.f32 %v12942_v45, %v14639_v44  ;;  %v12944_v15 = vpop.eup %12943  ;;  %v11908_v44 = vpack.c.bf16 %v12619_v31, %v12618_v22 }
 0x4ac   : > { %11928 = vmatprep.subr.msk.bf16.mxu1 %vm14202_vm3, %v11926_v38  ;;  %12953 = vrcp.f32 %v2102_v43  ;;  %v2186_v59 = vmul.f32 %v12944_v15, %v14643_v39  ;;  %v18259_v39 = vld [vmem:[#allocation84_spill] sm:$0xff] }
 0x4ad   : > { %12955 = vrcp.f32 %v2108_v27  ;;  %v12629_v5 = vunpack.i.h.bf16 %v18259_v39  ;;  %v12628_v7 = vunpack.i.l.bf16 %v18259_v39  ;;  %v12637_v45 = vpop.permute.xlu0 %12636  ;;  %v18266_v39 = vld [vmem:[#allocation47_spill] sm:$0xff] }
 0x4ae   : > { %v12946_v57 = vpop.eup %12945  ;;  %10872 = vmatmul.mubr.msk.f32.gmra.mrb[54].mxu1 %vm1847_vm4, %v2183_v56  ;;  %v12639_v15 = vunpack.i.h.bf16 %v12637_v45  ;;  %v12638_v11 = vunpack.i.l.bf16 %v12637_v45 }
 0x4af   : > { %v2185_v28 = vmul.f32 %v12946_v57, %v14652_v19  ;;  %v2111_v54 = vpop.xlane.xlu1 %2110  ;;  %v11914_v52 = vpack.c.bf16 %v12629_v5, %v12628_v7  ;;  %v18267_v5 = vld [vmem:[#allocation46_spill] sm:$0xff] }
 0x4b0   : > { %12957 = vrcp.f32 %v2111_v54 }
 0x4b1   : > { %10891 = vmatmul.mubr.msk.f32.vlgmr.msra.gmra.mrb[56].mxu0 %vm1847_vm4, %v2185_v28  ;;  %v11920_v28 = vpack.c.bf16 %v12639_v15, %v12638_v11 }
 0x4b2   : > { %v12948_v3 = vpop.eup %12947  ;;  %11907 = vmatpush3.bf16.xpose.msk.msra.mxu0 %vm14202_vm3, %v14805_v25  ;;  %10893 = vmatprep.mubr.msk.f32.mxu0 %vm1847_vm4, %v2186_v59 }
 0x4b3   : > { %11910 = vmatprep.subr.msk.bf16.mxu0 %vm14202_vm3, %v11908_v44  ;;  %v2117_v33 = vpop.xlane.xlu1 %2116  ;;  %v2187_v19 = vmul.f32 %v12948_v3, %v14656_v26 }
 0x4b4   : > { %v12950_v27 = vpop.eup %12949  ;;  %12959 = vrcp.f32 %v2117_v33 }
 0x4b5   : > { %v12952_v55 = vpop.eup %12951  ;;  %10894 = vmatmul.mubr.msk.f32.gmra.mrb[58].mxu0 %vm1847_vm4, %v2187_v19  ;;  %v2192_v48 = vmul.f32 %v12950_v27, %v14668_v63  ;;  %v18263_v19 = vld [vmem:[#allocation40_spill] sm:$0xff]  ;;  %v18264_v27 = vld [vmem:[#allocation43_spill] sm:$0xff] }
 0x4b6   : > { %v12954_v25 = vpop.eup %12953  ;;  %v2189_v26 = vmul.f32 %v12952_v55, %v14648_v62  ;;  %v18265_v55 = vld [vmem:[#allocation42_spill] sm:$0xff] }
 0x4b7   : > { %v12956_v16 = vpop.eup %12955  ;;  %10918 = vmatprep.mubr.msk.f32.mxu1 %vm1847_vm4, %v2192_v48  ;;  %v2188_v40 = vmul.f32 %v12954_v25, %v14664_v6  ;;  %v18260_v6 = vld [vmem:[#allocation85_spill] sm:$0xff] }
 0x4b8   : > { %v2190_v43 = vmul.f32 %v12956_v16, %v14660_v41  ;;  %v12624_v56 = vunpack.i.h.bf16 %v18260_v6  ;;  %v12623_v62 = vunpack.i.l.bf16 %v18260_v6  ;;  %v18261_v41 = vld [vmem:[#allocation41_spill] sm:$0xff] }
 0x4b9   : > { %10896 = vmatprep.mubr.msk.f32.mxu0 %vm1847_vm4, %v2188_v40 }
 0x4ba   : > { %v12958_v61 = vpop.eup %12957  ;;  %11913 = vmatpush3.bf16.xpose.msk.msra.mxu0 %vm14202_vm3, %v11908_v44  ;;  %v11932_v57 = vpack.c.bf16 %v12624_v56, %v12623_v62  ;;  %v12642_v44 = vpop.permute.xlu1 %12641 }
 0x4bb   : > { %10897 = vmatmul.mubr.msk.f32.gmra.mrb[60].mxu0 %vm1847_vm4, %v2189_v26  ;;  %11916 = vmatprep.subr.msk.bf16.mxu0 %vm14202_vm3, %v11914_v52  ;;  %v2191_v63 = vmul.f32 %v12958_v61, %v14674_v32  ;;  %v18262_v32 = vld [vmem:[#allocation86_spill] sm:$0xff]  ;;  %v12643_v3 = vunpack.i.l.bf16 %v12642_v44 }
 0x4bc   : > { %10899 = vmatprep.mubr.msk.f32.mxu0 %vm1847_vm4, %v2190_v43  ;;  %v12633_v54 = vunpack.i.l.bf16 %v18262_v32 }
 0x4be   : > { %v12960_v31 = vpop.eup %12959 }
 0x4bf   : > { %v2193_v22 = vmul.f32 %v12960_v31, %v14678_v1  ;;  %10900 = vmatmul.mubr.msk.f32.gmra.mrb[62].mxu0 %vm1847_vm4, %v2191_v63  ;;  %v12634_v1 = vunpack.i.h.bf16 %v18262_v32 }
 0x4c0   : > { %10946 = vmatprep.mubr.msk.f32.mxu0 %vm777_vm2, %v18261_v41 }
 0x4c1   : > { %10919 = vmatmul.mubr.msk.f32.vlgmr.msra.gmra.mrb[56].mxu1 %vm1847_vm4, %v2193_v22  ;;  %v11938_v59 = vpack.c.bf16 %v12634_v1, %v12633_v54 }
 0x4c2   : > { %11919 = vmatpush3.bf16.xpose.msk.msra.mxu0 %vm14202_vm3, %v11914_v52  ;;  %11931 = vmatpush3.bf16.xpose.msk.msra.mxu1 %vm14202_vm3, %v11926_v38  ;;  %v12644_v38 = vunpack.i.h.bf16 %v12642_v44 }
 0x4c3   : > { %11922 = vmatprep.subr.msk.bf16.mxu0 %vm14202_vm3, %v11920_v28  ;;  %11934 = vmatprep.subr.msk.bf16.mxu1 %vm14202_vm3, %v11932_v57 }
 0x4c4   : > { %v11944_v33 = vpack.c.bf16 %v12644_v38, %v12643_v3 }
 0x4ca   : > { %11925 = vmatpush3.bf16.xpose.msk.msra.mxu0 %vm14202_vm3, %v11920_v28  ;;  %11937 = vmatpush3.bf16.xpose.msk.msra.mxu1 %vm14202_vm3, %v11932_v57 }
 0x4cb   : > { %11940 = vmatprep.subr.msk.bf16.mxu1 %vm14202_vm3, %v11938_v59 }
 0x4d1   : > { %10947 = vmatmul.mubr.msk.f32.vlgmr.msra.gmra.mrb[64].mxu0 %vm777_vm2, %v18263_v19 }
 0x4d2   : > { %10949 = vmatprep.mubr.msk.f32.mxu0 %vm777_vm2, %v18264_v27  ;;  %11943 = vmatpush3.bf16.xpose.msk.msra.mxu1 %vm14202_vm3, %v11938_v59 }
 0x4d3   : > { %11946 = vmatprep.subr.msk.bf16.mxu1 %vm14202_vm3, %v11944_v33 }
 0x4d5   : > { %10950 = vmatmul.mubr.msk.f32.gmra.mrb[66].mxu0 %vm777_vm2, %v18265_v55 }
 0x4d6   : > { %10952 = vmatprep.mubr.msk.f32.mxu0 %vm777_vm2, %v18266_v39 }
 0x4d9   : > { %10953 = vmatmul.mubr.msk.f32.gmra.mrb[68].mxu0 %vm777_vm2, %v18267_v5 }
 0x4da   : > { %10955 = vmatprep.mubr.msk.f32.mxu0 %vm777_vm2, %v14029_v10  ;;  %11949 = vmatpush3.bf16.xpose.msk.msra.mxu1 %vm14202_vm3, %v11944_v33 }
 0x4dd   : > { %10956 = vmatmul.mubr.msk.f32.gmra.mrb[70].mxu0 %vm777_vm2, %v14026_v9 }
 0x4de   : > { %v2123_v7 = vpop.xlane.xlu0 %2122  ;;  %11002 = vmatprep.mubr.msk.f32.mxu0 %vm777_vm2, %v14060_v12 }
 0x4df   : > { %12961 = vrcp.f32 %v2123_v7 }
 0x4e2   : > { %v2120_v48 = vpop.xlane.xlu0 %2119 }
 0x4e3   : > { %12963 = vrcp.f32 %v2120_v48 }
 0x4e6   : > { %v2135_v25 = vpop.xlane.xlu0 %2134 }
 0x4e8   : > { %v2129_v16 = vpop.xlane.xlu1 %2128 }
 0x4e9   : > { %12965 = vrcp.f32 %v2129_v16  ;;  %v12962_v52 = vpop.eup %12961 }
 0x4ea   : > { %v2132_v40 = vpop.xlane.xlu0 %2131  ;;  %v2195_v56 = vmul.f32 %v12962_v52, %v14698_v24 }
 0x4eb   : > { %12967 = vrcp.f32 %v2132_v40 }
 0x4ec   : > { %v2126_v26 = vpop.xlane.xlu1 %2125 }
 0x4ed   : > { %v12964_v61 = vpop.eup %12963  ;;  %12969 = vrcp.f32 %v2126_v26 }
 0x4ee   : > { %v12647_v45 = vpop.permute.xlu0 %12646  ;;  %v2194_v43 = vmul.f32 %v12964_v61, %v14702_v18  ;;  %12971 = vrcp.f32 %v2135_v25 }
 0x4ef   : > { %v12649_v63 = vunpack.i.h.bf16 %v12647_v45  ;;  %v12648_v6 = vunpack.i.l.bf16 %v12647_v45 }
 0x4f0   : > { %10921 = vmatprep.mubr.msk.f32.mxu1 %vm1847_vm4, %v2194_v43  ;;  %v12652_v62 = vpop.permute.xlu1 %12651 }
 0x4f1   : > { %v11950_v15 = vpack.c.bf16 %v12649_v63, %v12648_v6  ;;  %v12654_v11 = vunpack.i.h.bf16 %v12652_v62  ;;  %v12653_v31 = vunpack.i.l.bf16 %v12652_v62  ;;  %10922 = vmatmul.mubr.msk.f32.gmra.mrb[58].mxu1 %vm1847_vm4, %v2195_v56  ;;  %v18268_v63 = vld [vmem:[#allocation45_spill] sm:$0xff]  ;;  %v18269_v56 = vld [vmem:[#allocation44_spill] sm:$0xff] }
 0x4f2   : > { %v12657_v22 = vpop.permute.xlu0 %12656 }
 0x4f3   : > { %v11974_v57 = vpack.c.bf16 %v12654_v11, %v12653_v31  ;;  %v12659_v28 = vunpack.i.h.bf16 %v12657_v22  ;;  %v12658_v32 = vunpack.i.l.bf16 %v12657_v22  ;;  %11952 = vmatprep.subr.msk.bf16.mxu0 %vm14202_vm3, %v11950_v15  ;;  %v12966_v18 = vpop.eup %12965 }
 0x4f4   : > { %11955 = vmatpush3.bf16.xpose.msk.msra.mxu0 %vm14202_vm3, %v11950_v15  ;;  %v12662_v24 = vpop.permute.xlu1 %12661  ;;  %v2197_v48 = vmul.f32 %v12966_v18, %v14708_v60  ;;  %v18270_v18 = vld [vmem:[#allocation49_spill] sm:$0xff] }
 0x4f5   : > { %v11956_v1 = vpack.c.bf16 %v12659_v28, %v12658_v32  ;;  %11976 = vmatprep.subr.msk.bf16.mxu1 %vm14202_vm3, %v11974_v57  ;;  %v12968_v54 = vpop.eup %12967  ;;  %v12663_v45 = vunpack.i.l.bf16 %v12662_v24 }
 0x4f6   : > { %v12667_v59 = vpop.permute.xlu0 %12666  ;;  %v2198_v16 = vmul.f32 %v12968_v54, %v14712_v47  ;;  %v12664_v47 = vunpack.i.h.bf16 %v12662_v24  ;;  %v18271_v54 = vld [vmem:[#allocation48_spill] sm:$0xff] }
 0x4f7   : > { %v12970_v44 = vpop.eup %12969  ;;  %v12669_v38 = vunpack.i.h.bf16 %v12667_v59  ;;  %v12668_v3 = vunpack.i.l.bf16 %v12667_v59  ;;  %11958 = vmatprep.subr.msk.bf16.mxu0 %vm14202_vm3, %v11956_v1 }
 0x4f8   : > { %v12672_v33 = vpop.permute.xlu1 %12671  ;;  %v2196_v7 = vmul.f32 %v12970_v44, %v14716_v13  ;;  %v12972_v25 = vpop.eup %12971  ;;  %v11980_v28 = vpack.c.bf16 %v12664_v47, %v12663_v45  ;;  %v18276_v47 = vld [vmem:[#allocation53_spill] sm:$0xff] }
 0x4f9   : > { %v11962_v40 = vpack.c.bf16 %v12669_v38, %v12668_v3  ;;  %v2199_v60 = vmul.f32 %v12972_v25, %v14706_v46  ;;  %v12673_v44 = vunpack.i.l.bf16 %v12672_v33  ;;  %v18272_v38 = vld [vmem:[#allocation52_spill] sm:$0xff] }
 0x4fa   : > { %10924 = vmatprep.mubr.msk.f32.mxu1 %vm1847_vm4, %v2196_v7  ;;  %v12677_v52 = vpop.permute.xlu0 %12676 }
 0x4fb   : > { %10925 = vmatmul.mubr.msk.f32.gmra.mrb[60].mxu1 %vm1847_vm4, %v2197_v48  ;;  %v12679_v13 = vunpack.i.h.bf16 %v12677_v52  ;;  %v12678_v61 = vunpack.i.l.bf16 %v12677_v52  ;;  %v18274_v52 = vld [vmem:[#allocation54_spill] sm:$0xff] }
 0x4fc   : > { %11961 = vmatpush3.bf16.xpose.msk.msra.mxu0 %vm14202_vm3, %v11956_v1  ;;  %v12682_v26 = vpop.permute.xlu1 %12681  ;;  %10927 = vmatprep.mubr.msk.f32.mxu1 %vm1847_vm4, %v2198_v16 }
 0x4fd   : > { %11964 = vmatprep.subr.msk.bf16.mxu0 %vm14202_vm3, %v11962_v40  ;;  %v11968_v11 = vpack.c.bf16 %v12679_v13, %v12678_v61  ;;  %v12684_v13 = vunpack.i.h.bf16 %v12682_v26  ;;  %v12683_v61 = vunpack.i.l.bf16 %v12682_v26  ;;  %v18277_v26 = vld [vmem:[#allocation67_spill] sm:$0xff] }
 0x4ff   : > { %10928 = vmatmul.mubr.msk.f32.gmra.mrb[62].mxu1 %vm1847_vm4, %v2199_v60  ;;  %v18275_v60 = vld [vmem:[#allocation65_spill] sm:$0xff]  ;;  %v11992_v45 = vpack.c.bf16 %v12684_v13, %v12683_v61 }
 0x500   : > { %v14950_v43 = vpop.permute.xlu1 %4465  ;;  %10974 = vmatprep.mubr.msk.f32.mxu1 %vm777_vm2, %v18268_v63 }
 0x501   : > { %v4476_v6 = vmul.f32 %v14950_v43, %v18268_v63  ;;  %v4477_v62 = vmul.f32 %v14950_v43, %v18269_v56  ;;  %v4468_v46 = vmul.f32 %v14950_v43, %v18261_v41  ;;  %v4469_v15 = vmul.f32 %v14950_v43, %v18263_v19 }
 0x502   : > { %v4470_v32 = vmul.f32 %v14950_v43, %v18264_v27  ;;  %v4471_v24 = vmul.f32 %v14950_v43, %v18265_v55  ;;  %v4478_v1 = vmul.f32 %v14950_v43, %v18270_v18  ;;  %v4479_v59 = vmul.f32 %v14950_v43, %v18271_v54 }
 0x503   : > { %10975 = vmatmul.mubr.msk.f32.vlgmr.msra.gmra.mrb[64].mxu1 %vm777_vm2, %v18269_v56  ;;  %v12690_v31 = vpack.i.bf16 %v4477_v62, %v4476_v6  ;;  %v12685_v22 = vpack.i.bf16 %v4469_v15, %v4468_v46  ;;  %v4472_v7 = vmul.f32 %v14950_v43, %v18266_v39  ;;  %v4473_v48 = vmul.f32 %v14950_v43, %v18267_v5  ;;  %v18278_v6 = vld [vmem:[#allocation68_spill] sm:$0xff]  ;;  %v18279_v62 = vld [vmem:[#allocation66_spill] sm:$0xff]  ;;  %v18281_v15 = vld [vmem:[#allocation69_spill] sm:$0xff] }
 0x504   : > { %11967 = vmatpush3.bf16.xpose.msk.msra.mxu0 %vm14202_vm3, %v11962_v40  ;;  %11979 = vmatpush3.bf16.xpose.msk.msra.mxu1 %vm14202_vm3, %v11974_v57  ;;  %v12674_v57 = vunpack.i.h.bf16 %v12672_v33  ;;  %v12695_v3 = vpack.i.bf16 %v4471_v24, %v4470_v32  ;;  %v12700_v25 = vpack.i.bf16 %v4479_v59, %v4478_v1  ;;  %v18273_v33 = vld [vmem:[#allocation50_spill] sm:$0xff] }
 0x505   : > { %10977 = vmatprep.mubr.msk.f32.mxu1 %vm777_vm2, %v18270_v18  ;;  %11970 = vmatprep.subr.msk.bf16.mxu0 %vm14202_vm3, %v11968_v11  ;;  %v12705_v40 = vpack.i.bf16 %v4473_v48, %v4472_v7  ;;  %v18280_v46 = vld [vmem:[#allocation70_spill] sm:$0xff] }
 0x506   : > { %11982 = vmatprep.subr.msk.bf16.mxu1 %vm14202_vm3, %v11980_v28  ;;  %12691 = vrot.lane.b32.xlu1 %v12690_v31, %s13491_s29  ;;  %v11986_v16 = vpack.c.bf16 %v12674_v57, %v12673_v44  ;;  %v18283_v31 = vld [vmem:[#allocation62_spill] sm:$0xff] }
 0x507   : > { %12686 = vrot.lane.b32.xlu0 %v12685_v22, %s13491_s29  ;;  %10978 = vmatmul.mubr.msk.f32.gmra.mrb[66].mxu1 %vm777_vm2, %v18271_v54  ;;  %v18284_v22 = vld [vmem:[#allocation72_spill] sm:$0xff] }
 0x508   : > { %10980 = vmatprep.mubr.msk.f32.mxu1 %vm777_vm2, %v18272_v38 }
 0x50a   : > { %12696 = vrot.lane.b32.xlu1 %v12695_v3, %s13491_s29 }
 0x50b   : > { %12701 = vrot.lane.b32.xlu0 %v12700_v25, %s13491_s29  ;;  %10981 = vmatmul.mubr.msk.f32.gmra.mrb[68].mxu1 %vm777_vm2, %v18273_v33 }
 0x50c   : > { %11973 = vmatpush3.bf16.xpose.msk.msra.mxu0 %vm14202_vm3, %v11968_v11  ;;  %11985 = vmatpush3.bf16.xpose.msk.msra.mxu1 %vm14202_vm3, %v11980_v28  ;;  %v18282_v11 = vld [vmem:[#allocation71_spill] sm:$0xff] }
 0x50d   : > { %10983 = vmatprep.mubr.msk.f32.mxu1 %vm777_vm2, %v18274_v52  ;;  %11988 = vmatprep.subr.msk.bf16.mxu1 %vm14202_vm3, %v11986_v16 }
 0x50e   : > { %11999 = vmatprep.subr.bf16.mxu0 %v18275_v60  ;;  %12706 = vrot.lane.b32.xlu1 %v12705_v40, %s13491_s29 }
 0x50f   : > { %10984 = vmatmul.mubr.msk.f32.gmra.mrb[70].mxu1 %vm777_vm2, %v18276_v47 }
 0x510   : > { %11030 = vmatprep.mubr.msk.f32.mxu1 %vm777_vm2, %v14105_v42 }
 0x513   : > { %11003 = vmatmul.mubr.msk.f32.vlgmr.msra.gmra.mrb[72].mxu0 %vm777_vm2, %v14057_v2 }
 0x514   : > { %11005 = vmatprep.mubr.msk.f32.mxu0 %vm777_vm2, %v14072_v37  ;;  %11991 = vmatpush3.bf16.xpose.msk.msra.mxu1 %vm14202_vm3, %v11986_v16 }
 0x515   : > { %12001 = vmatpush3.bf16.msra.mxu0 %v18275_v60  ;;  %11994 = vmatprep.subr.msk.bf16.mxu1 %vm14202_vm3, %v11992_v45 }
 0x516   : > { %12003 = vmatprep.subr.bf16.mxu0 %v18277_v26 }
 0x517   : > { %11006 = vmatmul.mubr.msk.f32.gmra.mrb[74].mxu0 %vm777_vm2, %v14069_v21 }
 0x518   : > { %11008 = vmatprep.mubr.msk.f32.mxu0 %vm777_vm2, %v14083_v4 }
 0x519   : > { %12005 = vmatpush3.bf16.msra.mxu0 %v18277_v26 }
 0x51a   : > { %12007 = vmatprep.subr.bf16.mxu0 %v18278_v6 }
 0x51b   : > { %11009 = vmatmul.mubr.msk.f32.gmra.mrb[76].mxu0 %vm777_vm2, %v14080_v30 }
 0x51c   : > { %11011 = vmatprep.mubr.msk.f32.mxu0 %vm777_vm2, %v18240_v8  ;;  %11997 = vmatpush3.bf16.xpose.msk.msra.mxu1 %vm14202_vm3, %v11992_v45 }
 0x51d   : > { %12009 = vmatpush3.bf16.msra.mxu0 %v18278_v6  ;;  %12015 = vmatprep.subr.bf16.mxu1 %v18279_v62 }
 0x51e   : > { %12011 = vmatprep.subr.bf16.mxu0 %v18280_v46 }
 0x51f   : > { %11012 = vmatmul.mubr.msk.f32.gmra.mrb[78].mxu0 %vm777_vm2, %v18241_v53 }
 0x521   : > { %12013 = vmatpush3.bf16.msra.mxu0 %v18280_v46 }
 0x522   : > { %12031 = vmatprep.subr.bf16.mxu0 %v18245_v14 }
 0x523   : > { %11031 = vmatmul.mubr.msk.f32.vlgmr.msra.gmra.mrb[72].mxu1 %vm777_vm2, %v14102_v51 }
 0x524   : > { %11033 = vmatprep.mubr.msk.f32.mxu1 %vm777_vm2, %v14116_v0  ;;  %12017 = vmatpush3.bf16.msra.mxu1 %v18279_v62 }
 0x525   : > { %12019 = vmatprep.subr.bf16.mxu1 %v18281_v15 }
 0x527   : > { %11034 = vmatmul.mubr.msk.f32.gmra.mrb[74].mxu1 %vm777_vm2, %v14113_v34 }
 0x528   : > { %11036 = vmatprep.mubr.msk.f32.mxu1 %vm777_vm2, %v14130_v17  ;;  %12021 = vmatpush3.bf16.msra.mxu1 %v18281_v15 }
 0x529   : > { %12023 = vmatprep.subr.bf16.mxu1 %v18282_v11 }
 0x52b   : > { %11037 = vmatmul.mubr.msk.f32.gmra.mrb[76].mxu1 %vm777_vm2, %v14127_v20 }
 0x52c   : > { %11039 = vmatprep.mubr.msk.f32.mxu1 %vm777_vm2, %v18283_v31  ;;  %12025 = vmatpush3.bf16.msra.mxu1 %v18282_v11 }
 0x52d   : > { %12027 = vmatprep.subr.bf16.mxu1 %v18284_v22 }
 0x52f   : > { %11040 = vmatmul.mubr.msk.f32.gmra.mrb[78].mxu1 %vm777_vm2, %v18238_v49 }
 0x530   : > { %12029 = vmatpush3.bf16.msra.mxu1 %v18284_v22 }
 0x531   : > { %12047 = vmatprep.subr.bf16.mxu1 %v18253_v36 }
 0x55d   : > { %v15061_v28 = vpop.f32.mrb[48].mxu0 }
 0x55e   : > { %18285 = vst [vmem:[#allocation83_spill] sm:$0xff] %v15061_v28  ;;  %v15063_v32 = vpop.f32.mrb[49].mxu0 }
 0x55f   : > { %18286 = vst [vmem:[#allocation76_spill] sm:$0xff] %v15063_v32 }
 0x561   : > { %v15065_v24 = vpop.f32.mrb[50].mxu0 }
 0x562   : > { %18287 = vst [vmem:[#allocation80_spill] sm:$0xff] %v15065_v24  ;;  %v15067_v1 = vpop.f32.mrb[51].mxu0 }
 0x563   : > { %18288 = vst [vmem:[#allocation78_spill] sm:$0xff] %v15067_v1 }
 0x565   : > { %v15069_v59 = vpop.f32.mrb[52].mxu0 }
 0x566   : > { %18289 = vst [vmem:[#allocation79_spill] sm:$0xff] %v15069_v59  ;;  %v15071_v57 = vpop.f32.mrb[53].mxu0 }
 0x567   : > { %18290 = vst [vmem:[#allocation81_spill] sm:$0xff] %v15071_v57 }
 0x569   : > { %v15073_v44 = vpop.f32.mrb[54].mxu0 }
 0x56a   : > { %18291 = vst [vmem:[#allocation84_spill] sm:$0xff] %v15073_v44  ;;  %v15075_v3 = vpop.f32.mrb[55].mxu0 }
 0x56b   : > { %18292 = vst [vmem:[#allocation85_spill] sm:$0xff] %v15075_v3 }
 0x571   : > { %v15077_v7 = vpop.f32.mrb[48].mxu1 }
 0x572   : > { %18293 = vst [vmem:[#allocation86_spill] sm:$0xff] %v15077_v7  ;;  %v15079_v48 = vpop.f32.mrb[49].mxu1 }
 0x573   : > { %18294 = vst [vmem:[#allocation62_spill] sm:$0xff] %v15079_v48 }
 0x579   : > { %v15081_v25 = vpop.f32.mrb[50].mxu1 }
 0x57a   : > { %18295 = vst [vmem:[#allocation88_spill] sm:$0xff] %v15081_v25  ;;  %v15083_v16 = vpop.f32.mrb[51].mxu1 }
 0x57b   : > { %18296 = vst [vmem:[#allocation89_spill] sm:$0xff] %v15083_v16 }
 0x57d   : > { %v15085_v40 = vpop.f32.mrb[52].mxu1 }
 0x57e   : > { %18297 = vst [vmem:[#allocation90_spill] sm:$0xff] %v15085_v40  ;;  %v15087_v13 = vpop.f32.mrb[53].mxu1 }
 0x57f   : > { %18298 = vst [vmem:[#allocation91_spill] sm:$0xff] %v15087_v13 }
 0x581   : > { %v15089_v61 = vpop.f32.mrb[54].mxu1 }
 0x582   : > { %18299 = vst [vmem:[#allocation92_spill] sm:$0xff] %v15089_v61  ;;  %v15091_v45 = vpop.f32.mrb[55].mxu1 }
 0x583   : > { %18300 = vst [vmem:[#allocation93_spill] sm:$0xff] %v15091_v45 }
 0x584   : > { %v15093_v57 = vpop.f32.mrb[56].mxu0 }
 0x585   : > { %18301 = vst [vmem:[#allocation94_spill] sm:$0xff] %v15093_v57  ;;  %v15095_v44 = vpop.f32.mrb[57].mxu0 }
 0x586   : > { %18302 = vst [vmem:[#allocation95_spill] sm:$0xff] %v15095_v44 }
 0x588   : > { %v15097_v3 = vpop.f32.mrb[58].mxu0 }
 0x589   : > { %18303 = vst [vmem:[#allocation96_spill] sm:$0xff] %v15097_v3  ;;  %v15099_v7 = vpop.f32.mrb[59].mxu0 }
 0x58a   : > { %18304 = vst [vmem:[#allocation97_spill] sm:$0xff] %v15099_v7 }
 0x58e   : > { %v15101_v48 = vpop.f32.mrb[60].mxu0 }
 0x58f   : > { %18305 = vst [vmem:[#allocation98_spill] sm:$0xff] %v15101_v48  ;;  %v15103_v25 = vpop.f32.mrb[61].mxu0 }
 0x590   : > { %18306 = vst [vmem:[#allocation99_spill] sm:$0xff] %v15103_v25 }
 0x592   : > { %v15105_v16 = vpop.f32.mrb[62].mxu0 }
 0x593   : > { %18307 = vst [vmem:[#allocation100_spill] sm:$0xff] %v15105_v16  ;;  %v15107_v40 = vpop.f32.mrb[63].mxu0 }
 0x594   : > { %18308 = vst [vmem:[#allocation101_spill] sm:$0xff] %v15107_v40  ;;  %v15109_v13 = vpop.f32.mrb[56].mxu1 }
 0x595   : > { %18309 = vst [vmem:[#allocation102_spill] sm:$0xff] %v15109_v13  ;;  %v15111_v61 = vpop.f32.mrb[57].mxu1 }
 0x596   : > { %18310 = vst [vmem:[#allocation103_spill] sm:$0xff] %v15111_v61 }
 0x5a4   : > { %v10948_v45 = vpop.f32.mrb[64].mxu0 }
 0x5a5   : > { %v15113_v57 = vmul.f32 0.35355338, %v10948_v45  ;;  %v3022_v44 = vpop.f32.mrb[65].mxu0 }
 0x5a6   : > { %v15115_v59 = vmul.f32 0.35355338, %v3022_v44 }
 0x5a7   : > { %v3531_v7 = vsel %vm1847_vm4, %v15113_v57, -inf }
 0x5a8   : > { %3532 = vmax.xlane.f32.xlu1 %v3531_v7  ;;  %v10951_v48 = vpop.f32.mrb[66].mxu0  ;;  %v3528_v16 = vsel %vm1847_vm4, %v15115_v59, -inf }
 0x5a9   : > { %v15121_v25 = vmul.f32 0.35355338, %v10951_v48  ;;  %3529 = vmax.xlane.f32.xlu0 %v3528_v16  ;;  %v3032_v13 = vpop.f32.mrb[67].mxu0 }
 0x5aa   : > { %v15123_v40 = vmul.f32 0.35355338, %v3032_v13 }
 0x5ab   : > { %v3537_v45 = vsel %vm1847_vm4, %v15121_v25, -inf }
 0x5ac   : > { %v10954_v61 = vpop.f32.mrb[68].mxu0  ;;  %v3534_v44 = vsel %vm1847_vm4, %v15123_v40, -inf }
 0x5ad   : > { %v15129_v3 = vmul.f32 0.35355338, %v10954_v61  ;;  %3538 = vmax.xlane.f32.xlu0 %v3537_v45  ;;  %3535 = vmax.xlane.f32.xlu1 %v3534_v44  ;;  %v3042_v7 = vpop.f32.mrb[69].mxu0 }
 0x5ae   : > { %v15131_v1 = vmul.f32 0.35355338, %v3042_v7 }
 0x5af   : > { %v3543_v48 = vsel %vm1847_vm4, %v15129_v3, -inf }
 0x5b0   : > { %v10957_v16 = vpop.f32.mrb[70].mxu0  ;;  %v3540_v13 = vsel %vm1847_vm4, %v15131_v1, -inf }
 0x5b1   : > { %v15137_v24 = vmul.f32 0.35355338, %v10957_v16  ;;  %3544 = vmax.xlane.f32.xlu0 %v3543_v48  ;;  %3541 = vmax.xlane.f32.xlu1 %v3540_v13  ;;  %v3052_v32 = vpop.f32.mrb[71].mxu0 }
 0x5b2   : > { %v15139_v28 = vmul.f32 0.35355338, %v3052_v32 }
 0x5b3   : > { %v3549_v61 = vsel %vm1847_vm4, %v15137_v24, -inf }
 0x5b4   : > { %v3546_v45 = vsel %vm1847_vm4, %v15139_v28, -inf }
 0x5b5   : > { %3550 = vmax.xlane.f32.xlu0 %v3549_v61  ;;  %3547 = vmax.xlane.f32.xlu1 %v3546_v45 }
 0x5c4   : > { %v15145_v44 = vpop.f32.mrb[58].mxu1 }
 0x5c5   : > { %18311 = vst [vmem:[#allocation104_spill] sm:$0xff] %v15145_v44  ;;  %v15147_v7 = vpop.f32.mrb[59].mxu1 }
 0x5c6   : > { %18312 = vst [vmem:[#allocation105_spill] sm:$0xff] %v15147_v7 }
 0x5ce   : > { %v15149_v22 = vpop.f32.mrb[60].mxu1 }
 0x5cf   : > { %18313 = vst [vmem:[#allocation106_spill] sm:$0xff] %v15149_v22  ;;  %v15151_v16 = vpop.f32.mrb[61].mxu1 }
 0x5d0   : > { %18314 = vst [vmem:[#allocation107_spill] sm:$0xff] %v15151_v16 }
 0x5d2   : > { %v15153_v48 = vpop.f32.mrb[62].mxu1 }
 0x5d3   : > { %18315 = vst [vmem:[#allocation108_spill] sm:$0xff] %v15153_v48  ;;  %v15155_v32 = vpop.f32.mrb[63].mxu1 }
 0x5d4   : > { %18316 = vst [vmem:[#allocation109_spill] sm:$0xff] %v15155_v32 }
 0x5d6   : > { %v10976_v13 = vpop.f32.mrb[64].mxu1 }
 0x5d7   : > { %v15157_v11 = vmul.f32 0.35355338, %v10976_v13  ;;  %v3167_v15 = vpop.f32.mrb[65].mxu1 }
 0x5d8   : > { %v15159_v46 = vmul.f32 0.35355338, %v3167_v15 }
 0x5d9   : > { %v3555_v61 = vsel %vm1847_vm4, %v15157_v11, -inf }
 0x5da   : > { %v10979_v45 = vpop.f32.mrb[66].mxu1  ;;  %3556 = vmax.xlane.f32.xlu0 %v3555_v61  ;;  %v3552_v48 = vsel %vm1847_vm4, %v15159_v46, -inf }
 0x5db   : > { %v3177_v7 = vpop.f32.mrb[67].mxu1  ;;  %v15165_v22 = vmul.f32 0.35355338, %v10979_v45 }
 0x5dc   : > { %v15163_v44 = vmul.f32 0.35355338, %v3177_v7 }
 0x5dd   : > { %v3561_v7 = vsel %vm1847_vm4, %v15165_v22, -inf }
 0x5de   : > { %v10982_v32 = vpop.f32.mrb[68].mxu1  ;;  %3553 = vmax.xlane.f32.xlu0 %v3552_v48  ;;  %v3558_v13 = vsel %vm1847_vm4, %v15163_v44, -inf }
 0x5df   : > { %v3187_v15 = vpop.f32.mrb[69].mxu1  ;;  %3559 = vmax.xlane.f32.xlu1 %v3558_v13  ;;  %v15173_v6 = vmul.f32 0.35355338, %v10982_v32 }
 0x5e0   : > { %v15171_v16 = vmul.f32 0.35355338, %v3187_v15 }
 0x5e1   : > { %v3567_v13 = vsel %vm1847_vm4, %v15173_v6, -inf }
 0x5e2   : > { %v10985_v61 = vpop.f32.mrb[70].mxu1  ;;  %3562 = vmax.xlane.f32.xlu0 %v3561_v7  ;;  %v3564_v45 = vsel %vm1847_vm4, %v15171_v16, -inf }
 0x5e3   : > { %v3197_v62 = vpop.f32.mrb[71].mxu1  ;;  %3565 = vmax.xlane.f32.xlu1 %v3564_v45  ;;  %v15181_v26 = vmul.f32 0.35355338, %v10985_v61 }
 0x5e4   : > { %v15179_v48 = vmul.f32 0.35355338, %v3197_v62 }
 0x5e5   : > { %v3573_v62 = vsel %vm1847_vm4, %v15181_v26, -inf }
 0x5e6   : > { %v11004_v15 = vpop.f32.mrb[72].mxu0  ;;  %3568 = vmax.xlane.f32.xlu0 %v3567_v13  ;;  %v3570_v32 = vsel %vm1847_vm4, %v15179_v48, -inf }
 0x5e7   : > { %v3312_v60 = vpop.f32.mrb[73].mxu0  ;;  %3571 = vmax.xlane.f32.xlu1 %v3570_v32  ;;  %v15189_v54 = vmul.f32 0.35355338, %v11004_v15 }
 0x5e8   : > { %v15187_v7 = vmul.f32 0.35355338, %v3312_v60 }
 0x5e9   : > { %v3579_v60 = vsel %vm1847_vm4, %v15189_v54, -inf }
 0x5ea   : > { %v11007_v45 = vpop.f32.mrb[74].mxu0  ;;  %3574 = vmax.xlane.f32.xlu0 %v3573_v62  ;;  %v3576_v61 = vsel %vm1847_vm4, %v15187_v7, -inf }
 0x5eb   : > { %v3322_v18 = vpop.f32.mrb[75].mxu0  ;;  %3577 = vmax.xlane.f32.xlu1 %v3576_v61  ;;  %v15197_v56 = vmul.f32 0.35355338, %v11007_v45 }
 0x5ec   : > { %v15195_v13 = vmul.f32 0.35355338, %v3322_v18 }
 0x5ed   : > { %v3585_v18 = vsel %vm1847_vm4, %v15197_v56, -inf }
 0x5ee   : > { %v11010_v32 = vpop.f32.mrb[76].mxu0  ;;  %3580 = vmax.xlane.f32.xlu0 %v3579_v60  ;;  %v3582_v15 = vsel %vm1847_vm4, %v15195_v13, -inf }
 0x5ef   : > { %v3332_v63 = vpop.f32.mrb[77].mxu0  ;;  %3583 = vmax.xlane.f32.xlu1 %v3582_v15  ;;  %v15205_v5 = vmul.f32 0.35355338, %v11010_v32 }
 0x5f0   : > { %v15203_v62 = vmul.f32 0.35355338, %v3332_v63 }
 0x5f1   : > { %v3591_v63 = vsel %vm1847_vm4, %v15205_v5, -inf }
 0x5f2   : > { %v11013_v61 = vpop.f32.mrb[78].mxu0  ;;  %3586 = vmax.xlane.f32.xlu0 %v3585_v18  ;;  %v3588_v45 = vsel %vm1847_vm4, %v15203_v62, -inf }
 0x5f3   : > { %v3342_v39 = vpop.f32.mrb[79].mxu0  ;;  %3589 = vmax.xlane.f32.xlu1 %v3588_v45  ;;  %v15213_v55 = vmul.f32 0.35355338, %v11013_v61 }
 0x5f4   : > { %v15211_v60 = vmul.f32 0.35355338, %v3342_v39 }
 0x5f5   : > { %v3597_v39 = vsel %vm1847_vm4, %v15213_v55, -inf }
 0x5f6   : > { %v11032_v15 = vpop.f32.mrb[72].mxu1  ;;  %3592 = vmax.xlane.f32.xlu0 %v3591_v63  ;;  %v3594_v32 = vsel %vm1847_vm4, %v15211_v60, -inf }
 0x5f7   : > { %v3457_v27 = vpop.f32.mrb[73].mxu1  ;;  %3595 = vmax.xlane.f32.xlu1 %v3594_v32  ;;  %v15221_v19 = vmul.f32 0.35355338, %v11032_v15 }
 0x5f8   : > { %v15219_v18 = vmul.f32 0.35355338, %v3457_v27 }
 0x5f9   : > { %v3603_v50 = vsel %vm1847_vm4, %v15221_v19, -inf }
 0x5fa   : > { %v11035_v45 = vpop.f32.mrb[74].mxu1  ;;  %3598 = vmax.xlane.f32.xlu0 %v3597_v39  ;;  %v3600_v61 = vsel %vm1847_vm4, %v15219_v18, -inf }
 0x5fb   : > { %v3467_v41 = vpop.f32.mrb[75].mxu1  ;;  %3601 = vmax.xlane.f32.xlu1 %v3600_v61  ;;  %v15227_v63 = vmul.f32 0.35355338, %v11035_v45  ;;  %v4480_v61 = vmul.f32 %v14950_v43, %v18272_v38 }
 0x5fc   : > { %v15250_v30 = vmul.f32 0.35355338, %v3467_v41 }
 0x5fd   : > { %v3609_v58 = vsel %vm1847_vm4, %v15227_v63, -inf }
 0x5fe   : > { %v11038_v32 = vpop.f32.mrb[76].mxu1  ;;  %3604 = vmax.xlane.f32.xlu0 %v3603_v50  ;;  %v4481_v50 = vmul.f32 %v14950_v43, %v18273_v33  ;;  %v3606_v33 = vsel %vm1847_vm4, %v15250_v30, -inf }
 0x5ff   : > { %v3477_v27 = vpop.f32.mrb[77].mxu1  ;;  %v15231_v15 = vmul.f32 0.35355338, %v11038_v32 }
 0x600   : > { %v12710_v8 = vpack.i.bf16 %v4481_v50, %v4480_v61  ;;  %v15254_v4 = vmul.f32 0.35355338, %v3477_v27 }
 0x601   : > { %v3615_v45 = vsel %vm1847_vm4, %v15231_v15, -inf }
 0x602   : > { %v11041_v36 = vpop.f32.mrb[78].mxu1  ;;  %3610 = vmax.xlane.f32.xlu0 %v3609_v58  ;;  %v15246_v58 = vpop.permute.xlu1 %12691 }
 0x603   : > { %v3487_v39 = vpop.f32.mrb[79].mxu1  ;;  %v15235_v53 = vmul.f32 0.35355338, %v11041_v36  ;;  %18317 = vst [vmem:[#allocation110_spill] sm:$0xff] %v15246_v58 }
 0x604   : > { %v15262_v61 = vmul.f32 0.35355338, %v3487_v39 }
 0x605   : > { %v3621_v32 = vsel %vm1847_vm4, %v15235_v53, -inf }
 0x606   : > { %3616 = vmax.xlane.f32.xlu0 %v3615_v45  ;;  %v15248_v36 = vpop.permute.xlu1 %12696  ;;  %v15252_v45 = vpop.permute.xlu0 %12686  ;;  %v3618_v58 = vsel %vm1847_vm4, %v15262_v61, -inf }
 0x607   : > { %18318 = vst [vmem:[#allocation111_spill] sm:$0xff] %v15248_v36 }
 0x60a   : > { %3622 = vmax.xlane.f32.xlu0 %v3621_v32  ;;  %v15258_v38 = vpop.permute.xlu1 %12706  ;;  %v15260_v32 = vpop.permute.xlu0 %12701 }
 0x60b   : > { %18319 = vst [vmem:[#allocation112_spill] sm:$0xff] %v15258_v38  ;;  %18320 = vst [vmem:[#allocation113_spill] sm:$0xff] %v15260_v32 }
 0x60c   : > { %12711 = vrot.lane.b32.xlu1 %v12710_v8, %s13491_s29  ;;  %v3612_v8 = vsel %vm1847_vm4, %v15254_v4, -inf }
 0x630   : > { %3607 = vmax.xlane.f32.xlu1 %v3606_v33 }
 0x634   : > { %3613 = vmax.xlane.f32.xlu1 %v3612_v8 }
 0x635   : > { %v3533_v41 = vpop.xlane.xlu1 %3532 }
 0x636   : > { %v3625_v50 = vsub.f32 %v15113_v57, %v3533_v41  ;;  %v3530_v36 = vpop.xlane.xlu0 %3529 }
 0x637   : > { %v3624_v27 = vsub.f32 %v15115_v59, %v3530_v36 }
 0x638   : > { %v3658_v33 = vmul.f32 1.442695, %v3625_v50  ;;  %3619 = vmax.xlane.f32.xlu1 %v3618_v58 }
 0x639   : > { %v3656_v38 = vmul.f32 1.442695, %v3624_v27 }
 0x63a   : > { %12973 = vpow2.f32 %v3658_v33  ;;  %v3539_v32 = vpop.xlane.xlu0 %3538  ;;  %v3536_v39 = vpop.xlane.xlu1 %3535 }
 0x63b   : > { %v3627_v21 = vsub.f32 %v15121_v25, %v3539_v32  ;;  %v3626_v37 = vsub.f32 %v15123_v40, %v3536_v39  ;;  %12975 = vpow2.f32 %v3656_v38 }
 0x63d   : > { %v3662_v8 = vmul.f32 1.442695, %v3627_v21  ;;  %v3660_v35 = vmul.f32 1.442695, %v3626_v37 }
 0x63e   : > { %v3545_v57 = vpop.xlane.xlu0 %3544  ;;  %v3542_v41 = vpop.xlane.xlu1 %3541 }
 0x63f   : > { %12977 = vpow2.f32 %v3662_v8  ;;  %v3629_v59 = vsub.f32 %v15129_v3, %v3545_v57  ;;  %v3628_v36 = vsub.f32 %v15131_v1, %v3542_v41 }
 0x640   : > { %12979 = vpow2.f32 %v3660_v35 }
 0x641   : > { %v3666_v58 = vmul.f32 1.442695, %v3629_v59  ;;  %v3664_v33 = vmul.f32 1.442695, %v3628_v36 }
 0x642   : > { %v3551_v50 = vpop.xlane.xlu0 %3550  ;;  %v3548_v40 = vpop.xlane.xlu1 %3547 }
 0x643   : > { %12981 = vpow2.f32 %v3666_v58  ;;  %v3631_v25 = vsub.f32 %v15137_v24, %v3551_v50  ;;  %v3630_v35 = vsub.f32 %v15139_v28, %v3548_v40 }
 0x644   : > { %v15274_v27 = vpop.eup %12973  ;;  %12983 = vpow2.f32 %v3664_v33 }
 0x645   : > { %v3723_v21 = vsel %vm1847_vm4, %v15274_v27, 0.0  ;;  %v15279_v37 = vpop.eup %12975  ;;  %v3670_v38 = vmul.f32 1.442695, %v3631_v25  ;;  %v3668_v39 = vmul.f32 1.442695, %v3630_v35 }
 0x646   : > { %3724 = vadd.xlane.f32.xlu0 %v3723_v21  ;;  %v3720_v3 = vsel %vm1847_vm4, %v15279_v37, 0.0 }
 0x647   : > { %12985 = vpow2.f32 %v3670_v38 }
 0x648   : > { %12987 = vpow2.f32 %v3668_v39 }
 0x649   : > { %v15282_v1 = vpop.eup %12977 }
 0x64a   : > { %v15286_v32 = vpop.eup %12979  ;;  %3721 = vadd.xlane.f32.xlu0 %v3720_v3  ;;  %v3729_v8 = vsel %vm1847_vm4, %v15282_v1, 0.0 }
 0x64b   : > { %v3726_v24 = vsel %vm1847_vm4, %v15286_v32, 0.0 }
 0x64c   : > { %3727 = vadd.xlane.f32.xlu1 %v3726_v24 }
 0x64d   : > { %v15292_v57 = vpop.eup %12981 }
 0x64e   : > { %3730 = vadd.xlane.f32.xlu0 %v3729_v8  ;;  %v3735_v28 = vsel %vm1847_vm4, %v15292_v57, 0.0  ;;  %v15296_v41 = vpop.eup %12983 }
 0x64f   : > { %v3732_v59 = vsel %vm1847_vm4, %v15296_v41, 0.0 }
 0x651   : > { %v15300_v36 = vpop.eup %12985 }
 0x652   : > { %3736 = vadd.xlane.f32.xlu0 %v3735_v28  ;;  %18321 = vst [vmem:[#allocation114_spill] sm:$0xff] %v15300_v36  ;;  %v3741_v58 = vsel %vm1847_vm4, %v15300_v36, 0.0  ;;  %v15304_v50 = vpop.eup %12987 }
 0x653   : > { %v3738_v33 = vsel %vm1847_vm4, %v15304_v50, 0.0 }
 0x656   : > { %3733 = vadd.xlane.f32.xlu0 %v3732_v59 }
 0x65a   : > { %3742 = vadd.xlane.f32.xlu0 %v3741_v58 }
 0x65e   : > { %3739 = vadd.xlane.f32.xlu0 %v3738_v33 }
 0x667   : > { %v3557_v25 = vpop.xlane.xlu0 %3556 }
 0x668   : > { %v3633_v40 = vsub.f32 %v15157_v11, %v3557_v25 }
 0x66a   : > { %v3674_v21 = vmul.f32 1.442695, %v3633_v40 }
 0x66b   : > { %v3554_v38 = vpop.xlane.xlu0 %3553 }
 0x66c   : > { %12989 = vpow2.f32 %v3674_v21  ;;  %v3632_v35 = vsub.f32 %v15159_v46, %v3554_v38  ;;  %v3560_v3 = vpop.xlane.xlu1 %3559 }
 0x66d   : > { %v3634_v39 = vsub.f32 %v15163_v44, %v3560_v3 }
 0x66e   : > { %v3672_v24 = vmul.f32 1.442695, %v3632_v35 }
 0x66f   : > { %v3563_v8 = vpop.xlane.xlu0 %3562  ;;  %v3676_v58 = vmul.f32 1.442695, %v3634_v39 }
 0x670   : > { %12991 = vpow2.f32 %v3672_v24  ;;  %v3635_v28 = vsub.f32 %v15165_v22, %v3563_v8  ;;  %v3566_v59 = vpop.xlane.xlu1 %3565 }
 0x671   : > { %v3636_v46 = vsub.f32 %v15171_v16, %v3566_v59 }
 0x672   : > { %v3678_v36 = vmul.f32 1.442695, %v3635_v28 }
 0x673   : > { %v3569_v33 = vpop.xlane.xlu0 %3568  ;;  %v3680_v24 = vmul.f32 1.442695, %v3636_v46 }
 0x674   : > { %12993 = vpow2.f32 %v3678_v36  ;;  %v3637_v11 = vsub.f32 %v15173_v6, %v3569_v33  ;;  %v3572_v25 = vpop.xlane.xlu1 %3571 }
 0x675   : > { %v3638_v40 = vsub.f32 %v15179_v48, %v3572_v25  ;;  %12995 = vpow2.f32 %v3676_v58 }
 0x676   : > { %v15314_v21 = vpop.eup %12989  ;;  %v3682_v44 = vmul.f32 1.442695, %v3637_v11 }
 0x677   : > { %v3684_v38 = vmul.f32 1.442695, %v3638_v40  ;;  %v3575_v35 = vpop.xlane.xlu0 %3574  ;;  %v3747_v22 = vsel %vm1847_vm4, %v15314_v21, 0.0 }
 0x678   : > { %v3578_v3 = vpop.xlane.xlu1 %3577  ;;  %3748 = vadd.xlane.f32.xlu0 %v3747_v22  ;;  %v3639_v48 = vsub.f32 %v15181_v26, %v3575_v35 }
 0x679   : > { %12997 = vpow2.f32 %v3684_v38  ;;  %v3640_v36 = vsub.f32 %v15187_v7, %v3578_v3 }
 0x67a   : > { %v15320_v6 = vpop.eup %12991  ;;  %12999 = vpow2.f32 %v3682_v44  ;;  %v3686_v7 = vmul.f32 1.442695, %v3639_v48 }
 0x67b   : > { %v3688_v39 = vmul.f32 1.442695, %v3640_v36  ;;  %v3581_v8 = vpop.xlane.xlu0 %3580  ;;  %v3744_v16 = vsel %vm1847_vm4, %v15320_v6, 0.0 }
 0x67c   : > { %v3584_v28 = vpop.xlane.xlu1 %3583  ;;  %3745 = vadd.xlane.f32.xlu0 %v3744_v16  ;;  %v3641_v33 = vsub.f32 %v15189_v54, %v3581_v8 }
 0x67d   : > { %13001 = vpow2.f32 %v3688_v39  ;;  %v3642_v59 = vsub.f32 %v15195_v13, %v3584_v28 }
 0x67e   : > { %v15326_v58 = vpop.eup %12993  ;;  %13003 = vpow2.f32 %v3680_v24  ;;  %v3690_v13 = vmul.f32 1.442695, %v3641_v33 }
 0x67f   : > { %v3692_v11 = vmul.f32 1.442695, %v3642_v59  ;;  %v3587_v25 = vpop.xlane.xlu0 %3586  ;;  %v3753_v26 = vsel %vm1847_vm4, %v15326_v58, 0.0  ;;  %v15331_v40 = vpop.eup %12995 }
 0x680   : > { %v3590_v46 = vpop.xlane.xlu1 %3589  ;;  %3754 = vadd.xlane.f32.xlu0 %v3753_v26  ;;  %v3643_v38 = vsub.f32 %v15197_v56, %v3587_v25  ;;  %v3750_v3 = vsel %vm1847_vm4, %v15331_v40, 0.0 }
 0x681   : > { %13005 = vpow2.f32 %v3692_v11  ;;  %v3644_v44 = vsub.f32 %v15203_v62, %v3590_v46 }
 0x682   : > { %13007 = vpow2.f32 %v3686_v7  ;;  %v3694_v56 = vmul.f32 1.442695, %v3643_v38 }
 0x683   : > { %v15335_v35 = vpop.eup %12997  ;;  %v3696_v22 = vmul.f32 1.442695, %v3644_v44  ;;  %v3593_v54 = vpop.xlane.xlu0 %3592 }
 0x684   : > { %v15339_v36 = vpop.eup %12999  ;;  %3751 = vadd.xlane.f32.xlu0 %v3750_v3  ;;  %v3596_v24 = vpop.xlane.xlu1 %3595  ;;  %v3762_v48 = vsel %vm1847_vm4, %v15335_v35, 0.0  ;;  %v3645_v62 = vsub.f32 %v15205_v5, %v3593_v54 }
 0x685   : > { %13009 = vpow2.f32 %v3696_v22  ;;  %3763 = vadd.xlane.f32.xlu1 %v3762_v48  ;;  %v3759_v16 = vsel %vm1847_vm4, %v15339_v36, 0.0  ;;  %v3646_v25 = vsub.f32 %v15211_v60, %v3596_v24 }
 0x686   : > { %13011 = vpow2.f32 %v3690_v13  ;;  %v3698_v11 = vmul.f32 1.442695, %v3645_v62 }
 0x687   : > { %v15344_v39 = vpop.eup %13001  ;;  %v3599_v8 = vpop.xlane.xlu0 %3598  ;;  %13013 = vpow2.f32 %v3694_v56 }
 0x688   : > { %v15348_v28 = vpop.eup %13003  ;;  %v3647_v59 = vsub.f32 %v15213_v55, %v3599_v8  ;;  %3760 = vadd.xlane.f32.xlu0 %v3759_v16  ;;  %v3602_v7 = vpop.xlane.xlu1 %3601  ;;  %v3768_v33 = vsel %vm1847_vm4, %v15344_v39, 0.0 }
 0x689   : > { %v3648_v5 = vsub.f32 %v15219_v18, %v3602_v7  ;;  %3769 = vadd.xlane.f32.xlu1 %v3768_v33  ;;  %v3756_v55 = vsel %vm1847_vm4, %v15348_v28, 0.0  ;;  %v3700_v18 = vmul.f32 1.442695, %v3646_v25 }
 0x68a   : > { %v3702_v26 = vmul.f32 1.442695, %v3647_v59 }
 0x68b   : > { %v15355_v46 = vpop.eup %13005  ;;  %v3704_v44 = vmul.f32 1.442695, %v3648_v5  ;;  %v3605_v13 = vpop.xlane.xlu0 %3604 }
 0x68c   : > { %v15359_v38 = vpop.eup %13007  ;;  %13015 = vpow2.f32 %v3702_v26  ;;  %3757 = vadd.xlane.f32.xlu0 %v3756_v55  ;;  %v3774_v22 = vsel %vm1847_vm4, %v15355_v46, 0.0  ;;  %v3649_v60 = vsub.f32 %v15221_v19, %v3605_v13  ;;  %v4482_v55 = vmul.f32 %v14950_v43, %v18274_v52 }
 0x68d   : > { %13017 = vpow2.f32 %v3698_v11  ;;  %3775 = vadd.xlane.f32.xlu1 %v3774_v22  ;;  %v3765_v3 = vsel %vm1847_vm4, %v15359_v38, 0.0  ;;  %v4483_v22 = vmul.f32 %v14950_v43, %v18276_v47 }
 0x68e   : > { %13019 = vpow2.f32 %v3704_v44  ;;  %v3706_v62 = vmul.f32 1.442695, %v3649_v60  ;;  %v4474_v60 = vmul.f32 %v14950_v43, %v14029_v10 }
 0x68f   : > { %v15364_v54 = vpop.eup %13009  ;;  %13021 = vpow2.f32 %v3700_v18  ;;  %v12720_v18 = vpack.i.bf16 %v4483_v22, %v4482_v55 }
 0x690   : > { %v15368_v24 = vpop.eup %13011  ;;  %3766 = vadd.xlane.f32.xlu0 %v3765_v3  ;;  %v3780_v48 = vsel %vm1847_vm4, %v15364_v54, 0.0  ;;  %13023 = vpow2.f32 %v3706_v62  ;;  %v4475_v3 = vmul.f32 %v14950_v43, %v14026_v9 }
 0x691   : > { %3781 = vadd.xlane.f32.xlu1 %v3780_v48  ;;  %v3771_v56 = vsel %vm1847_vm4, %v15368_v24, 0.0  ;;  %v15374_v8 = vpop.eup %13013  ;;  %v3611_v48 = vpop.xlane.xlu0 %3610 }
 0x692   : > { %v3777_v59 = vsel %vm1847_vm4, %v15374_v8, 0.0  ;;  %v12715_v62 = vpack.i.bf16 %v4475_v3, %v4474_v60  ;;  %v3651_v55 = vsub.f32 %v15227_v63, %v3611_v48 }
 0x694   : > { %3772 = vadd.xlane.f32.xlu0 %v3771_v56  ;;  %v15407_v56 = vpop.permute.xlu1 %12711  ;;  %v3710_v60 = vmul.f32 1.442695, %v3651_v55 }
 0x696   : > { %v15376_v19 = vpop.eup %13015 }
 0x697   : > { %v15378_v16 = vpop.eup %13017  ;;  %v3789_v7 = vsel %vm1847_vm4, %v15376_v19, 0.0 }
 0x698   : > { %v15384_v33 = vpop.eup %13019  ;;  %3778 = vadd.xlane.f32.xlu0 %v3777_v59  ;;  %3790 = vadd.xlane.f32.xlu1 %v3789_v7  ;;  %v3783_v11 = vsel %vm1847_vm4, %v15378_v16, 0.0  ;;  %v3617_v59 = vpop.xlane.xlu0 %3616 }
 0x699   : > { %v3792_v5 = vsel %vm1847_vm4, %v15384_v33, 0.0  ;;  %v15390_v25 = vpop.eup %13021 }
 0x69a   : > { %v3786_v26 = vsel %vm1847_vm4, %v15390_v25, 0.0  ;;  %v15394_v44 = vpop.eup %13023 }
 0x69b   : > { %v3795_v13 = vsel %vm1847_vm4, %v15394_v44, 0.0 }
 0x69c   : > { %3784 = vadd.xlane.f32.xlu0 %v3783_v11  ;;  %3793 = vadd.xlane.f32.xlu1 %v3792_v5  ;;  %v3653_v5 = vsub.f32 %v15231_v15, %v3617_v59  ;;  %v3623_v47 = vpop.xlane.xlu0 %3622 }
 0x69d   : > { %v3655_v3 = vsub.f32 %v15235_v53, %v3623_v47 }
 0x69e   : > { %v3714_v22 = vmul.f32 1.442695, %v3653_v5 }
 0x69f   : > { %v3718_v9 = vmul.f32 1.442695, %v3655_v3 }
 0x6a0   : > { %3787 = vadd.xlane.f32.xlu0 %v3786_v26 }
 0x6a4   : > { %3796 = vadd.xlane.f32.xlu0 %v3795_v13 }
 0x6ad   : > { %12721 = vrot.lane.b32.xlu1 %v12720_v18, %s13491_s29 }
 0x6ba   : > { %12716 = vrot.lane.b32.xlu0 %v12715_v62, %s13491_s29 }
 0x6bd   : > { %v3608_v7 = vpop.xlane.xlu1 %3607 }
 0x6be   : > { %v3650_v11 = vsub.f32 %v15250_v30, %v3608_v7 }
 0x6c0   : > { %v3708_v26 = vmul.f32 1.442695, %v3650_v11 }
 0x6c1   : > { %v3614_v13 = vpop.xlane.xlu1 %3613 }
 0x6c2   : > { %13025 = vpow2.f32 %v3708_v26  ;;  %v3652_v18 = vsub.f32 %v15254_v4, %v3614_v13 }
 0x6c3   : > { %13027 = vpow2.f32 %v3714_v22 }
 0x6c4   : > { %v3712_v62 = vmul.f32 1.442695, %v3652_v18  ;;  %13029 = vpow2.f32 %v3710_v60 }
 0x6c5   : > { %v3620_v52 = vpop.xlane.xlu1 %3619 }
 0x6c6   : > { %13031 = vpow2.f32 %v3712_v62  ;;  %v3654_v30 = vsub.f32 %v15262_v61, %v3620_v52 }
 0x6c7   : > { %13033 = vpow2.f32 %v3718_v9 }
 0x6c8   : > { %v3716_v63 = vmul.f32 1.442695, %v3654_v30 }
 0x6ca   : > { %13035 = vpow2.f32 %v3716_v63 }
 0x6cc   : > { %v15416_v15 = vpop.eup %13025 }
 0x6cd   : > { %v3798_v48 = vsel %vm1847_vm4, %v15416_v15, 0.0  ;;  %v15420_v4 = vpop.eup %13027 }
 0x6ce   : > { %v15422_v53 = vpop.eup %13029  ;;  %v3807_v47 = vsel %vm1847_vm4, %v15420_v4, 0.0 }
 0x6cf   : > { %v3801_v9 = vsel %vm1847_vm4, %v15422_v53, 0.0 }
 0x6d0   : > { %v15426_v7 = vpop.eup %13031 }
 0x6d1   : > { %3799 = vadd.xlane.f32.xlu1 %v3798_v48  ;;  %v3804_v61 = vsel %vm1847_vm4, %v15426_v7, 0.0  ;;  %v15432_v11 = vpop.eup %13033 }
 0x6d2   : > { %v3813_v13 = vsel %vm1847_vm4, %v15432_v11, 0.0 }
 0x6d3   : > { %v3725_v59 = vpop.xlane.xlu0 %3724 }
 0x6d4   : > { %13037 = vrcp.f32 %v3725_v59  ;;  %v15436_v55 = vpop.eup %13035  ;;  %v4492_v59 = vmul.f32 %v14950_v43, %v14105_v42 }
 0x6d5   : > { %3808 = vadd.xlane.f32.xlu1 %v3807_v47  ;;  %v3810_v18 = vsel %vm1847_vm4, %v15436_v55, 0.0  ;;  %v4493_v47 = vmul.f32 %v14950_v43, %v14102_v51 }
 0x6d7   : > { %v3722_v52 = vpop.xlane.xlu0 %3721 }
 0x6d8   : > { %13039 = vrcp.f32 %v3722_v52 }
 0x6d9   : > { %v3728_v5 = vpop.xlane.xlu1 %3727  ;;  %3802 = vadd.xlane.f32.xlu0 %v3801_v9  ;;  %3805 = vadd.xlane.f32.xlu1 %v3804_v61  ;;  %v12730_v61 = vpack.i.bf16 %v4493_v47, %v4492_v59  ;;  %v4498_v47 = vmul.f32 %v14950_v43, %v18283_v31 }
 0x6da   : > { %13041 = vrcp.f32 %v3728_v5  ;;  %v4494_v5 = vmul.f32 %v14950_v43, %v14116_v0 }
 0x6db   : > { %v3731_v26 = vpop.xlane.xlu0 %3730 }
 0x6dc   : > { %13043 = vrcp.f32 %v3731_v26  ;;  %v4495_v26 = vmul.f32 %v14950_v43, %v14113_v34 }
 0x6dd   : > { %3814 = vadd.xlane.f32.xlu0 %v3813_v13  ;;  %v4496_v13 = vmul.f32 %v14950_v43, %v14130_v17 }
 0x6de   : > { %v13038_v60 = vpop.eup %13037 }
 0x6df   : > { %v3737_v22 = vpop.xlane.xlu0 %3736  ;;  %v3849_v48 = vmul.f32 %v13038_v60, %v15274_v27 }
 0x6e0   : > { %13045 = vrcp.f32 %v3737_v22  ;;  %v4497_v22 = vmul.f32 %v14950_v43, %v14127_v20 }
 0x6e1   : > { %3811 = vadd.xlane.f32.xlu0 %v3810_v18 }
 0x6e2   : > { %v13040_v3 = vpop.eup %13039  ;;  %v12750_v59 = vpack.i.bf16 %v4497_v22, %v4496_v13  ;;  %v18326_v13 = vld [vmem:[#allocation55_spill] sm:$0xff] }
 0x6e3   : > { %v3734_v62 = vpop.xlane.xlu0 %3733  ;;  %v3848_v30 = vmul.f32 %v13040_v3, %v15279_v37  ;;  %v12689_v3 = vunpack.i.h.bf16 %v15252_v45  ;;  %v4487_v22 = vmul.f32 %v14950_v43, %v18326_v13 }
 0x6e4   : > { %v13042_v63 = vpop.eup %13041  ;;  %13047 = vrcp.f32 %v3734_v62  ;;  %v12688_v62 = vunpack.i.l.bf16 %v15252_v45  ;;  %v4484_v45 = vmul.f32 %v14950_v43, %v14060_v12 }
 0x6e5   : > { %11058 = vmatprep.mubr.msk.f32.mxu0 %vm1847_vm4, %v3848_v30  ;;  %v3850_v52 = vmul.f32 %v13042_v63, %v15286_v32  ;;  %v18322_v63 = vld [vmem:[#allocation75_spill] sm:$0xff] }
 0x6e6   : > { %v13044_v9 = vpop.eup %13043  ;;  %11059 = vmatmul.mubr.msk.f32.vlgmr.msra.gmra.mrb[80].mxu0 %vm1847_vm4, %v3849_v48 }
 0x6e7   : > { %12033 = vmatpush3.bf16.msra.mxu0 %v18245_v14  ;;  %v3743_v37 = vpop.xlane.xlu0 %3742  ;;  %11061 = vmatprep.mubr.msk.f32.mxu0 %vm1847_vm4, %v3850_v52  ;;  %v3851_v27 = vmul.f32 %v13044_v9, %v15282_v1  ;;  %v12740_v1 = vpack.i.bf16 %v4495_v26, %v4494_v5  ;;  %v4499_v52 = vmul.f32 %v14950_v43, %v18238_v49 }
 0x6e8   : > { %12035 = vmatprep.subr.bf16.mxu0 %v14775_v29  ;;  %13049 = vrcp.f32 %v3743_v37  ;;  %v4485_v9 = vmul.f32 %v14950_v43, %v14057_v2 }
 0x6ea   : > { %11062 = vmatmul.mubr.msk.f32.gmra.mrb[82].mxu0 %vm1847_vm4, %v3851_v27  ;;  %12731 = vrot.lane.b32.xlu1 %v12730_v61, %s13491_s29  ;;  %v13046_v18 = vpop.eup %13045  ;;  %v12760_v61 = vpack.i.bf16 %v4499_v52, %v4498_v47  ;;  %v12725_v26 = vpack.i.bf16 %v4485_v9, %v4484_v45  ;;  %v18329_v47 = vld [vmem:[#allocation58_spill] sm:$0xff]  ;;  %v18330_v45 = vld [vmem:[#allocation57_spill] sm:$0xff] }
 0x6eb   : > { %12037 = vmatpush3.bf16.msra.mxu0 %v14775_v29  ;;  %v3740_v32 = vpop.xlane.xlu0 %3739  ;;  %v3853_v48 = vmul.f32 %v13046_v18, %v15292_v57  ;;  %v18323_v57 = vld [vmem:[#allocation5_spill] sm:$0xff]  ;;  %v4488_v52 = vmul.f32 %v14950_v43, %v18329_v47  ;;  %v4489_v9 = vmul.f32 %v14950_v43, %v18330_v45 }
 0x6ec   : > { %12039 = vmatprep.subr.bf16.mxu0 %v14786_v23  ;;  %13051 = vrcp.f32 %v3740_v32  ;;  %v6046_v37 = vsub.s32 3, %v18323_v57  ;;  %v18325_v32 = vld [vmem:[#allocation56_spill] sm:$0xff] }
 0x6ee   : > { %v13048_v60 = vpop.eup %13047  ;;  %12741 = vrot.lane.b32.xlu1 %v12740_v1, %s13491_s29  ;;  %v4486_v1 = vmul.f32 %v14950_v43, %v18325_v32 }
 0x6ef   : > { %12041 = vmatpush3.bf16.msra.mxu0 %v14786_v23  ;;  %v3852_v30 = vmul.f32 %v13048_v60, %v15296_v41  ;;  %v15481_v41 = vpack.c.bf16 %v12689_v3, %v12688_v62  ;;  %v13424_v60 = vld [vmem:[%s17944_s8] sm:$0xf] }
 0x6f0   : > { %12043 = vmatprep.subr.bf16.mxu0 %v18322_v63  ;;  %v15498_v3 = vrot.slane %v13424_v60, %v6046_v37  ;;  %v12745_v37 = vpack.i.bf16 %v4489_v9, %v4488_v52 }
 0x6f1   : > { %11064 = vmatprep.mubr.msk.f32.mxu0 %vm1847_vm4, %v3852_v30  ;;  %v18328_v30 = vld [vmem:[#allocation114_spill] sm:$0xff] }
 0x6f2   : > { %11065 = vmatmul.mubr.msk.f32.gmra.mrb[84].mxu0 %vm1847_vm4, %v3853_v48  ;;  %12751 = vrot.lane.b32.xlu1 %v12750_v59, %s13491_s29  ;;  %v13050_v5 = vpop.eup %13049  ;;  %18327 = vst [vmem:[#allocation75_spill] sm:$0xff] %v15498_v3  ;;  %v12735_v59 = vpack.i.bf16 %v4487_v22, %v4486_v1 }
 0x6f3   : > { %12045 = vmatpush3.bf16.msra.mxu0 %v18322_v63  ;;  %v3855_v48 = vmul.f32 %v13050_v5, %v18328_v30  ;;  %v18332_v5 = vld [vmem:[#allocation59_spill] sm:$0xff] }
 0x6f4   : > { %12064 = vmatprep.subr.msk.bf16.mxu0 %vm14202_vm3, %v15481_v41 }
 0x6f6   : > { %v13052_v18 = vpop.eup %13051  ;;  %12761 = vrot.lane.b32.xlu1 %v12760_v61, %s13491_s29 }
 0x6f7   : > { %12726 = vrot.lane.b32.xlu0 %v12725_v26, %s13491_s29  ;;  %v3854_v62 = vmul.f32 %v13052_v18, %v15304_v50  ;;  %v18331_v50 = vld [vmem:[#allocation60_spill] sm:$0xff]  ;;  %v4491_v26 = vmul.f32 %v14950_v43, %v18332_v5 }
 0x6f8   : > { %v4490_v61 = vmul.f32 %v14950_v43, %v18331_v50 }
 0x6f9   : > { %11067 = vmatprep.mubr.msk.f32.mxu0 %vm1847_vm4, %v3854_v62 }
 0x6fa   : > { %11068 = vmatmul.mubr.msk.f32.gmra.mrb[86].mxu0 %vm1847_vm4, %v3855_v48  ;;  %6049 = vrot.lane.b32.xlu1 %v15498_v3, %s13490_s26  ;;  %v12755_v1 = vpack.i.bf16 %v4491_v26, %v4490_v61  ;;  %v18333_v61 = vld [vmem:[#allocation74_spill] sm:$0xff]  ;;  %v18370_v3 = vld [vmem:[#allocation80_spill] sm:$0xff]  ;;  %s324_s26 = sand.u32 1, %s13480_s10  }
 0x6fb   : > { %12736 = vrot.lane.b32.xlu0 %v12735_v59, %s13491_s29  ;;  %s9371_s23 = sshll.u32 %s324_s26, 8  ;;  %s17895_s13 = scalar_lea.sflag [#allocation3], %s324_s26 }
 0x6fc   : > { %s17820_s27 = scalar_lea.vmem [#allocation2], %s9371_s23  ;;  %s13430_s23 = sshll.u32 %s13496_s22, 4  ;;  %s13431_s23 = int_to_ptr.vmem [resolvable:$false] %s13430_s23 }
 0x6fd   : > { %s13432_s24 = scalar_lea.vmem %s13431_s23, 8192 }
 0x6ff   : > { %12746 = vrot.lane.b32.xlu0 %v12745_v37, %s13491_s29 }
 0x703   : > { %12756 = vrot.lane.b32.xlu0 %v12755_v1, %s13491_s29  ;;  %v18334_v1 = vld [vmem:[#allocation77_spill] sm:$0xff] }
 0x705   : > { %v3749_v22 = vpop.xlane.xlu0 %3748 }
 0x706   : > { %13053 = vrcp.f32 %v3749_v22 }
 0x709   : > { %v3746_v18 = vpop.xlane.xlu0 %3745 }
 0x70a   : > { %13055 = vrcp.f32 %v3746_v18 }
 0x70d   : > { %v3755_v60 = vpop.xlane.xlu0 %3754 }
 0x70e   : > { %13057 = vrcp.f32 %v3755_v60 }
 0x710   : > { %v13054_v48 = vpop.eup %13053 }
 0x711   : > { %v3752_v62 = vpop.xlane.xlu0 %3751  ;;  %v3857_v43 = vmul.f32 %v13054_v48, %v15314_v21  ;;  %v18336_v48 = vld [vmem:[#allocation110_spill] sm:$0xff] }
 0x712   : > { %13059 = vrcp.f32 %v3752_v62  ;;  %v3764_v30 = vpop.xlane.xlu1 %3763  ;;  %v18335_v62 = vld [vmem:[#allocation73_spill] sm:$0xff] }
 0x714   : > { %v13056_v59 = vpop.eup %13055 }
 0x715   : > { %v3761_v52 = vpop.xlane.xlu0 %3760  ;;  %v3856_v9 = vmul.f32 %v13056_v59, %v15320_v6  ;;  %v12694_v59 = vunpack.i.h.bf16 %v18336_v48 }
 0x716   : > { %v3770_v37 = vpop.xlane.xlu1 %3769 }
 0x717   : > { %13061 = vrcp.f32 %v3770_v37  ;;  %11086 = vmatprep.mubr.msk.f32.mxu1 %vm1847_vm4, %v3856_v9 }
 0x718   : > { %13063 = vrcp.f32 %v3764_v30  ;;  %11087 = vmatmul.mubr.msk.f32.vlgmr.msra.gmra.mrb[80].mxu1 %vm1847_vm4, %v3857_v43  ;;  %v13058_v22 = vpop.eup %13057 }
 0x719   : > { %13065 = vrcp.f32 %v3761_v52  ;;  %12049 = vmatpush3.bf16.msra.mxu1 %v18333_v61  ;;  %v3758_v26 = vpop.xlane.xlu0 %3757  ;;  %v3859_v30 = vmul.f32 %v13058_v22, %v15326_v58  ;;  %v12693_v52 = vunpack.i.l.bf16 %v18336_v48 }
 0x71a   : > { %12051 = vmatprep.subr.bf16.mxu1 %v18334_v1  ;;  %13067 = vrcp.f32 %v3758_v26  ;;  %v3776_v18 = vpop.xlane.xlu1 %3775  ;;  %v18337_v26 = vld [vmem:[#allocation82_spill] sm:$0xff] }
 0x71c   : > { %v13060_v60 = vpop.eup %13059 }
 0x71d   : > { %12053 = vmatpush3.bf16.msra.mxu1 %v18334_v1  ;;  %v3767_v21 = vpop.xlane.xlu0 %3766  ;;  %v3858_v6 = vmul.f32 %v13060_v60, %v15331_v40 }
 0x71e   : > { %12055 = vmatprep.subr.bf16.mxu1 %v18335_v62  ;;  %13069 = vrcp.f32 %v3767_v21  ;;  %v3782_v43 = vpop.xlane.xlu1 %3781  ;;  %v15535_v21 = vpack.c.bf16 %v12694_v59, %v12693_v52 }
 0x71f   : > { %11089 = vmatprep.mubr.msk.f32.mxu1 %vm1847_vm4, %v3858_v6  ;;  %13071 = vrcp.f32 %v3776_v18 }
 0x720   : > { %11090 = vmatmul.mubr.msk.f32.gmra.mrb[82].mxu1 %vm1847_vm4, %v3859_v30 }
 0x721   : > { %v13062_v9 = vpop.eup %13061  ;;  %12057 = vmatpush3.bf16.msra.mxu1 %v18335_v62  ;;  %v3773_v37 = vpop.xlane.xlu0 %3772 }
 0x722   : > { %v13064_v40 = vpop.eup %13063  ;;  %12059 = vmatprep.subr.bf16.mxu1 %v18337_v26  ;;  %13073 = vrcp.f32 %v3773_v37  ;;  %v3864_v58 = vmul.f32 %v13062_v9, %v15344_v39  ;;  %v18338_v37 = vld [vmem:[#allocation111_spill] sm:$0xff] }
 0x723   : > { %v13066_v22 = vpop.eup %13065  ;;  %13075 = vrcp.f32 %v3782_v43  ;;  %v3862_v48 = vmul.f32 %v13064_v40, %v15335_v35 }
 0x724   : > { %v13068_v60 = vpop.eup %13067  ;;  %11114 = vmatprep.mubr.msk.f32.mxu0 %vm1847_vm4, %v3864_v58  ;;  %v3861_v39 = vmul.f32 %v13066_v22, %v15339_v36  ;;  %v12699_v58 = vunpack.i.h.bf16 %v18338_v37 }
 0x725   : > { %12061 = vmatpush3.bf16.msra.mxu1 %v18337_v26  ;;  %v3779_v18 = vpop.xlane.xlu0 %3778  ;;  %v3791_v6 = vpop.xlane.xlu1 %3790  ;;  %v3860_v30 = vmul.f32 %v13068_v60, %v15348_v28  ;;  %v12698_v60 = vunpack.i.l.bf16 %v18338_v37 }
 0x726   : > { %12088 = vmatprep.subr.msk.bf16.mxu1 %vm14202_vm3, %v15535_v21  ;;  %13077 = vrcp.f32 %v3779_v18 }
 0x727   : > { %11092 = vmatprep.mubr.msk.f32.mxu1 %vm1847_vm4, %v3860_v30  ;;  %v12068_v30 = vpack.c.bf16 %v12699_v58, %v12698_v60  ;;  %v18340_v60 = vld [vmem:[#allocation113_spill] sm:$0xff] }
 0x728   : > { %v13070_v59 = vpop.eup %13069  ;;  %11093 = vmatmul.mubr.msk.f32.gmra.mrb[84].mxu1 %vm1847_vm4, %v3861_v39  ;;  %v18339_v39 = vld [vmem:[#allocation112_spill] sm:$0xff] }
 0x729   : > { %v3785_v52 = vpop.xlane.xlu0 %3784  ;;  %11095 = vmatprep.mubr.msk.f32.mxu1 %vm1847_vm4, %v3862_v48  ;;  %v3794_v9 = vpop.xlane.xlu1 %3793  ;;  %v3863_v28 = vmul.f32 %v13070_v59, %v15359_v38  ;;  %v12709_v48 = vunpack.i.h.bf16 %v18339_v39  ;;  %v12708_v59 = vunpack.i.l.bf16 %v18339_v39 }
 0x72a   : > { %13079 = vrcp.f32 %v3785_v52  ;;  %v13072_v43 = vpop.eup %13071 }
 0x72b   : > { %13081 = vrcp.f32 %v3794_v9  ;;  %v3866_v22 = vmul.f32 %v13072_v43, %v15355_v46  ;;  %v12074_v37 = vpack.c.bf16 %v12709_v48, %v12708_v59  ;;  %v18342_v48 = vld [vmem:[#allocation40_spill] sm:$0xff]  ;;  %v18343_v59 = vld [vmem:[#allocation43_spill] sm:$0xff] }
 0x72c   : > { %v13074_v36 = vpop.eup %13073  ;;  %11096 = vmatmul.mubr.msk.f32.gmra.mrb[86].mxu1 %vm1847_vm4, %v3863_v28  ;;  %13083 = vrcp.f32 %v3791_v6 }
 0x72d   : > { %v3865_v35 = vmul.f32 %v13074_v36, %v15368_v24  ;;  %v3788_v40 = vpop.xlane.xlu0 %3787  ;;  %v13076_v18 = vpop.eup %13075  ;;  %v12703_v36 = vunpack.i.l.bf16 %v18340_v60 }
 0x72e   : > { %13085 = vrcp.f32 %v3788_v40  ;;  %v3868_v46 = vmul.f32 %v13076_v18, %v15364_v54 }
 0x72f   : > { %11115 = vmatmul.mubr.msk.f32.vlgmr.msra.gmra.mrb[88].mxu0 %vm1847_vm4, %v3865_v35 }
 0x730   : > { %v13078_v38 = vpop.eup %13077  ;;  %12067 = vmatpush3.bf16.xpose.msk.msra.mxu0 %vm14202_vm3, %v15481_v41  ;;  %11117 = vmatprep.mubr.msk.f32.mxu0 %vm1847_vm4, %v3866_v22 }
 0x731   : > { %12070 = vmatprep.subr.msk.bf16.mxu0 %vm14202_vm3, %v12068_v30  ;;  %v3797_v24 = vpop.xlane.xlu0 %3796  ;;  %v3867_v6 = vmul.f32 %v13078_v38, %v15374_v8 }
 0x732   : > { %13087 = vrcp.f32 %v3797_v24 }
 0x733   : > { %11118 = vmatmul.mubr.msk.f32.gmra.mrb[90].mxu0 %vm1847_vm4, %v3867_v6  ;;  %v12722_v6 = vpop.permute.xlu1 %12721 }
 0x734   : > { %v13080_v52 = vpop.eup %13079  ;;  %11120 = vmatprep.mubr.msk.f32.mxu0 %vm1847_vm4, %v3868_v46  ;;  %v12723_v46 = vunpack.i.l.bf16 %v12722_v6 }
 0x735   : > { %v13082_v41 = vpop.eup %13081  ;;  %v3869_v9 = vmul.f32 %v13080_v52, %v15378_v16  ;;  %v12717_v54 = vpop.permute.xlu0 %12716  ;;  %v18345_v52 = vld [vmem:[#allocation47_spill] sm:$0xff] }
 0x736   : > { %v3872_v28 = vmul.f32 %v13082_v41, %v15384_v33  ;;  %v13084_v43 = vpop.eup %13083  ;;  %v12704_v33 = vunpack.i.h.bf16 %v18340_v60  ;;  %v12719_v35 = vunpack.i.h.bf16 %v12717_v54  ;;  %v12718_v40 = vunpack.i.l.bf16 %v12717_v54  ;;  %v18346_v41 = vld [vmem:[#allocation46_spill] sm:$0xff] }
 0x737   : > { %11121 = vmatmul.mubr.msk.f32.gmra.mrb[92].mxu0 %vm1847_vm4, %v3869_v9  ;;  %v3871_v16 = vmul.f32 %v13084_v43, %v15376_v19  ;;  %v12714_v19 = vunpack.i.h.bf16 %v15407_v56  ;;  %v18347_v9 = vld [vmem:[#allocation51_spill] sm:$0xff] }
 0x738   : > { %v13086_v8 = vpop.eup %13085  ;;  %11142 = vmatprep.mubr.msk.f32.mxu1 %vm1847_vm4, %v3872_v28  ;;  %12073 = vmatpush3.bf16.xpose.msk.msra.mxu0 %vm14202_vm3, %v12068_v30  ;;  %v18341_v30 = vld [vmem:[#allocation41_spill] sm:$0xff]  ;;  %v12092_v38 = vpack.c.bf16 %v12704_v33, %v12703_v36 }
 0x739   : > { %12076 = vmatprep.subr.msk.bf16.mxu0 %vm14202_vm3, %v12074_v37  ;;  %v3870_v58 = vmul.f32 %v13086_v8, %v15390_v25  ;;  %v12080_v25 = vpack.c.bf16 %v12719_v35, %v12718_v40 }
 0x73b   : > { %11123 = vmatprep.mubr.msk.f32.mxu0 %vm1847_vm4, %v3870_v58 }
 0x73c   : > { %v13088_v22 = vpop.eup %13087  ;;  %11124 = vmatmul.mubr.msk.f32.gmra.mrb[94].mxu0 %vm1847_vm4, %v3871_v16 }
 0x73d   : > { %v3873_v18 = vmul.f32 %v13088_v22, %v15394_v44  ;;  %11170 = vmatprep.mubr.msk.f32.mxu0 %vm777_vm2, %v18341_v30  ;;  %v12713_v44 = vunpack.i.l.bf16 %v15407_v56  ;;  %v18344_v56 = vld [vmem:[#allocation42_spill] sm:$0xff] }
 0x73f   : > { %11143 = vmatmul.mubr.msk.f32.vlgmr.msra.gmra.mrb[88].mxu1 %vm1847_vm4, %v3873_v18  ;;  %v12098_v24 = vpack.c.bf16 %v12714_v19, %v12713_v44 }
 0x740   : > { %12079 = vmatpush3.bf16.xpose.msk.msra.mxu0 %vm14202_vm3, %v12074_v37  ;;  %12091 = vmatpush3.bf16.xpose.msk.msra.mxu1 %vm14202_vm3, %v15535_v21  ;;  %v12724_v21 = vunpack.i.h.bf16 %v12722_v6 }
 0x741   : > { %12082 = vmatprep.subr.msk.bf16.mxu0 %vm14202_vm3, %v12080_v25  ;;  %12094 = vmatprep.subr.msk.bf16.mxu1 %vm14202_vm3, %v12092_v38 }
 0x742   : > { %v12104_v39 = vpack.c.bf16 %v12724_v21, %v12723_v46 }
 0x748   : > { %12085 = vmatpush3.bf16.xpose.msk.msra.mxu0 %vm14202_vm3, %v12080_v25  ;;  %12097 = vmatpush3.bf16.xpose.msk.msra.mxu1 %vm14202_vm3, %v12092_v38 }
 0x749   : > { %12100 = vmatprep.subr.msk.bf16.mxu1 %vm14202_vm3, %v12098_v24 }
 0x74f   : > { %11171 = vmatmul.mubr.msk.f32.vlgmr.msra.gmra.mrb[96].mxu0 %vm777_vm2, %v18342_v48 }
 0x750   : > { %11173 = vmatprep.mubr.msk.f32.mxu0 %vm777_vm2, %v18343_v59  ;;  %12103 = vmatpush3.bf16.xpose.msk.msra.mxu1 %vm14202_vm3, %v12098_v24 }
 0x751   : > { %12106 = vmatprep.subr.msk.bf16.mxu1 %vm14202_vm3, %v12104_v39 }
 0x753   : > { %11174 = vmatmul.mubr.msk.f32.gmra.mrb[98].mxu0 %vm777_vm2, %v18344_v56 }
 0x754   : > { %11176 = vmatprep.mubr.msk.f32.mxu0 %vm777_vm2, %v18345_v52 }
 0x757   : > { %11177 = vmatmul.mubr.msk.f32.gmra.mrb[100].mxu0 %vm777_vm2, %v18346_v41 }
 0x758   : > { %11179 = vmatprep.mubr.msk.f32.mxu0 %vm777_vm2, %v14029_v10  ;;  %12109 = vmatpush3.bf16.xpose.msk.msra.mxu1 %vm14202_vm3, %v12104_v39 }
 0x75b   : > { %11180 = vmatmul.mubr.msk.f32.gmra.mrb[102].mxu0 %vm777_vm2, %v18347_v9 }
 0x75c   : > { %11226 = vmatprep.mubr.msk.f32.mxu0 %vm777_vm2, %v14060_v12 }
 0x75e   : > { %v3800_v28 = vpop.xlane.xlu1 %3799 }
 0x75f   : > { %13089 = vrcp.f32 %v3800_v28 }
 0x762   : > { %v3809_v43 = vpop.xlane.xlu1 %3808 }
 0x766   : > { %v3803_v37 = vpop.xlane.xlu0 %3802  ;;  %v3806_v8 = vpop.xlane.xlu1 %3805 }
 0x767   : > { %13091 = vrcp.f32 %v3803_v37 }
 0x768   : > { %13093 = vrcp.f32 %v3806_v8 }
 0x769   : > { %v13090_v54 = vpop.eup %13089  ;;  %13095 = vrcp.f32 %v3809_v43 }
 0x76a   : > { %v3815_v58 = vpop.xlane.xlu0 %3814  ;;  %v12732_v16 = vpop.permute.xlu1 %12731  ;;  %v3874_v60 = vmul.f32 %v13090_v54, %v15416_v15 }
 0x76b   : > { %v12734_v33 = vunpack.i.h.bf16 %v12732_v16  ;;  %v12733_v36 = vunpack.i.l.bf16 %v12732_v16  ;;  %13097 = vrcp.f32 %v3815_v58 }
 0x76c   : > { %11145 = vmatprep.mubr.msk.f32.mxu1 %vm1847_vm4, %v3874_v60 }
 0x76d   : > { %v12134_v35 = vpack.c.bf16 %v12734_v33, %v12733_v36 }
 0x76e   : > { %v3812_v40 = vpop.xlane.xlu0 %3811  ;;  %v12742_v22 = vpop.permute.xlu1 %12741 }
 0x76f   : > { %13099 = vrcp.f32 %v3812_v40  ;;  %12136 = vmatprep.subr.msk.bf16.mxu1 %vm14202_vm3, %v12134_v35  ;;  %v18348_v40 = vld [vmem:[#allocation45_spill] sm:$0xff] }
 0x771   : > { %v13092_v18 = vpop.eup %13091 }
 0x772   : > { %v13094_v38 = vpop.eup %13093  ;;  %v12727_v25 = vpop.permute.xlu0 %12726  ;;  %v3875_v44 = vmul.f32 %v13092_v18, %v15422_v53 }
 0x773   : > { %v15628_v19 = vpop.permute.xlu1 %12751  ;;  %v13096_v15 = vpop.eup %13095  ;;  %v12729_v24 = vunpack.i.h.bf16 %v12727_v25  ;;  %v12728_v6 = vunpack.i.l.bf16 %v12727_v25  ;;  %v3876_v21 = vmul.f32 %v13094_v38, %v15426_v7  ;;  %v18349_v38 = vld [vmem:[#allocation44_spill] sm:$0xff] }
 0x774   : > { %11146 = vmatmul.mubr.msk.f32.gmra.mrb[90].mxu1 %vm1847_vm4, %v3875_v44  ;;  %v3877_v43 = vmul.f32 %v13096_v15, %v15420_v4  ;;  %v12744_v44 = vunpack.i.h.bf16 %v12742_v22  ;;  %v12743_v15 = vunpack.i.l.bf16 %v12742_v22 }
 0x775   : > { %v12110_v46 = vpack.c.bf16 %v12729_v24, %v12728_v6  ;;  %11148 = vmatprep.mubr.msk.f32.mxu1 %vm1847_vm4, %v3876_v21  ;;  %v13098_v37 = vpop.eup %13097 }
 0x776   : > { %v12737_v39 = vpop.permute.xlu0 %12736  ;;  %v3879_v4 = vmul.f32 %v13098_v37, %v15432_v11 }
 0x777   : > { %v15634_v28 = vpop.permute.xlu1 %12761  ;;  %v12739_v8 = vunpack.i.h.bf16 %v12737_v39  ;;  %v12738_v54 = vunpack.i.l.bf16 %v12737_v39  ;;  %12112 = vmatprep.subr.msk.bf16.mxu0 %vm14202_vm3, %v12110_v46 }
 0x778   : > { %11149 = vmatmul.mubr.msk.f32.gmra.mrb[92].mxu1 %vm1847_vm4, %v3877_v43  ;;  %12115 = vmatpush3.bf16.xpose.msk.msra.mxu0 %vm14202_vm3, %v12110_v46  ;;  %v18350_v46 = vld [vmem:[#allocation49_spill] sm:$0xff]  ;;  %v18351_v43 = vld [vmem:[#allocation48_spill] sm:$0xff] }
 0x779   : > { %v13100_v53 = vpop.eup %13099  ;;  %v12116_v7 = vpack.c.bf16 %v12739_v8, %v12738_v54  ;;  %v12140_v54 = vpack.c.bf16 %v12744_v44, %v12743_v15  ;;  %v18352_v44 = vld [vmem:[#allocation52_spill] sm:$0xff] }
 0x77a   : > { %v12747_v58 = vpop.permute.xlu0 %12746  ;;  %v3878_v60 = vmul.f32 %v13100_v53, %v15436_v55 }
 0x77b   : > { %v15642_v16 = vpop.permute.xlu1 %6049  ;;  %v12749_v33 = vunpack.i.h.bf16 %v12747_v58  ;;  %v12748_v36 = vunpack.i.l.bf16 %v12747_v58  ;;  %12118 = vmatprep.subr.msk.bf16.mxu0 %vm14202_vm3, %v12116_v7 }
 0x77c   : > { %v6060_v18 = vmul.f32 %v15642_v16, %v18348_v40  ;;  %v6061_v25 = vmul.f32 %v15642_v16, %v18349_v38  ;;  %11151 = vmatprep.mubr.msk.f32.mxu1 %vm1847_vm4, %v3878_v60  ;;  %v6052_v55 = vmul.f32 %v15642_v16, %v18341_v30  ;;  %v6053_v11 = vmul.f32 %v15642_v16, %v18342_v48 }
 0x77d   : > { %11152 = vmatmul.mubr.msk.f32.gmra.mrb[94].mxu1 %vm1847_vm4, %v3879_v4  ;;  %v6054_v6 = vmul.f32 %v15642_v16, %v18343_v59  ;;  %v6055_v21 = vmul.f32 %v15642_v16, %v18344_v56  ;;  %v6062_v39 = vmul.f32 %v15642_v16, %v18350_v46  ;;  %v6063_v37 = vmul.f32 %v15642_v16, %v18351_v43 }
 0x77e   : > { %v12770_v24 = vpack.i.bf16 %v6061_v25, %v6060_v18  ;;  %11198 = vmatprep.mubr.msk.f32.mxu1 %vm777_vm2, %v18348_v40  ;;  %v12765_v22 = vpack.i.bf16 %v6053_v11, %v6052_v55  ;;  %v12122_v8 = vpack.c.bf16 %v12749_v33, %v12748_v36  ;;  %v12757_v53 = vpop.permute.xlu0 %12756  ;;  %v6056_v60 = vmul.f32 %v15642_v16, %v18345_v52  ;;  %v18353_v11 = vld [vmem:[#allocation50_spill] sm:$0xff] }
 0x77f   : > { %v12775_v58 = vpack.i.bf16 %v6055_v21, %v6054_v6  ;;  %v6057_v4 = vmul.f32 %v15642_v16, %v18346_v41  ;;  %v12759_v33 = vunpack.i.h.bf16 %v12757_v53  ;;  %v12758_v36 = vunpack.i.l.bf16 %v12757_v53  ;;  %v18355_v21 = vld [vmem:[#allocation53_spill] sm:$0xff] }
 0x780   : > { %12771 = vrot.lane.b32.xlu1 %v12770_v24, %s13491_s29  ;;  %12766 = vrot.lane.b32.xlu0 %v12765_v22, %s13491_s29  ;;  %v12754_v18 = vunpack.i.h.bf16 %v15628_v19  ;;  %v12753_v25 = vunpack.i.l.bf16 %v15628_v19  ;;  %v18354_v19 = vld [vmem:[#allocation54_spill] sm:$0xff]  ;;  %v12764_v24 = vunpack.i.h.bf16 %v15634_v28  ;;  %v12763_v6 = vunpack.i.l.bf16 %v15634_v28  ;;  %v18357_v28 = vld [vmem:[#allocation67_spill] sm:$0xff]  ;;  %v18361_v53 = vld [vmem:[#allocation69_spill] sm:$0xff] }
 0x781   : > { %12121 = vmatpush3.bf16.xpose.msk.msra.mxu0 %vm14202_vm3, %v12116_v7  ;;  %11199 = vmatmul.mubr.msk.f32.vlgmr.msra.gmra.mrb[96].mxu1 %vm777_vm2, %v18349_v38  ;;  %v12780_v7 = vpack.i.bf16 %v6063_v37, %v6062_v39  ;;  %v12128_v15 = vpack.c.bf16 %v12759_v33, %v12758_v36  ;;  %v18356_v39 = vld [vmem:[#allocation65_spill] sm:$0xff]  ;;  %v18358_v37 = vld [vmem:[#allocation66_spill] sm:$0xff]  ;;  %v18365_v33 = vld [vmem:[#allocation83_spill] sm:$0xff] }
 0x782   : > { %12124 = vmatprep.subr.msk.bf16.mxu0 %vm14202_vm3, %v12122_v8  ;;  %12139 = vmatpush3.bf16.xpose.msk.msra.mxu1 %vm14202_vm3, %v12134_v35  ;;  %v12785_v35 = vpack.i.bf16 %v6057_v4, %v6056_v60  ;;  %v12146_v55 = vpack.c.bf16 %v12754_v18, %v12753_v25  ;;  %v12152_v22 = vpack.c.bf16 %v12764_v24, %v12763_v6  ;;  %v18363_v60 = vld [vmem:[#allocation72_spill] sm:$0xff]  ;;  %v18366_v18 = vld [vmem:[#allocation63_spill] sm:$0xff] }
 0x783   : > { %11201 = vmatprep.mubr.msk.f32.mxu1 %vm777_vm2, %v18350_v46  ;;  %12142 = vmatprep.subr.msk.bf16.mxu1 %vm14202_vm3, %v12140_v54 }
 0x784   : > { %12776 = vrot.lane.b32.xlu1 %v12775_v58, %s13491_s29  ;;  %12781 = vrot.lane.b32.xlu0 %v12780_v7, %s13491_s29  ;;  %v18362_v58 = vld [vmem:[#allocation71_spill] sm:$0xff] }
 0x785   : > { %11202 = vmatmul.mubr.msk.f32.gmra.mrb[98].mxu1 %vm777_vm2, %v18351_v43  ;;  %v18364_v7 = vld [vmem:[#allocation7_spill] sm:$0xff] }
 0x786   : > { %11204 = vmatprep.mubr.msk.f32.mxu1 %vm777_vm2, %v18352_v44  ;;  %v2813_v36 = vmul.f32 %v18365_v33, %v18364_v7  ;;  %v18371_v33 = vld [vmem:[#allocation78_spill] sm:$0xff] }
 0x788   : > { %12786 = vrot.lane.b32.xlu1 %v12785_v35, %s13491_s29 }
 0x789   : > { %12127 = vmatpush3.bf16.xpose.msk.msra.mxu0 %vm14202_vm3, %v12122_v8  ;;  %11205 = vmatmul.mubr.msk.f32.gmra.mrb[100].mxu1 %vm777_vm2, %v18353_v11  ;;  %v18359_v8 = vld [vmem:[#allocation68_spill] sm:$0xff] }
 0x78a   : > { %12130 = vmatprep.subr.msk.bf16.mxu0 %vm14202_vm3, %v12128_v15  ;;  %12145 = vmatpush3.bf16.xpose.msk.msra.mxu1 %vm14202_vm3, %v12140_v54  ;;  %v18360_v54 = vld [vmem:[#allocation70_spill] sm:$0xff] }
 0x78b   : > { %11207 = vmatprep.mubr.msk.f32.mxu1 %vm777_vm2, %v18354_v19  ;;  %12148 = vmatprep.subr.msk.bf16.mxu1 %vm14202_vm3, %v12146_v55 }
 0x78d   : > { %11208 = vmatmul.mubr.msk.f32.gmra.mrb[102].mxu1 %vm777_vm2, %v18355_v21 }
 0x78e   : > { %11254 = vmatprep.mubr.msk.f32.mxu1 %vm777_vm2, %v14105_v42 }
 0x791   : > { %12133 = vmatpush3.bf16.xpose.msk.msra.mxu0 %vm14202_vm3, %v12128_v15  ;;  %v18367_v15 = vld [vmem:[#allocation76_spill] sm:$0xff] }
 0x792   : > { %12159 = vmatprep.subr.bf16.mxu0 %v18356_v39  ;;  %12151 = vmatpush3.bf16.xpose.msk.msra.mxu1 %vm14202_vm3, %v12146_v55  ;;  %v2812_v55 = vmul.f32 %v18367_v15, %v18364_v7 }
 0x793   : > { %12154 = vmatprep.subr.msk.bf16.mxu1 %vm14202_vm3, %v12152_v22 }
 0x798   : > { %11227 = vmatmul.mubr.msk.f32.vlgmr.msra.gmra.mrb[104].mxu0 %vm777_vm2, %v14057_v2 }
 0x799   : > { %11229 = vmatprep.mubr.msk.f32.mxu0 %vm777_vm2, %v18325_v32  ;;  %12161 = vmatpush3.bf16.msra.mxu0 %v18356_v39 }
 0x79a   : > { %12163 = vmatprep.subr.bf16.mxu0 %v18357_v28  ;;  %12157 = vmatpush3.bf16.xpose.msk.msra.mxu1 %vm14202_vm3, %v12152_v22 }
 0x79b   : > { %12175 = vmatprep.subr.bf16.mxu1 %v18358_v37 }
 0x79c   : > { %11230 = vmatmul.mubr.msk.f32.gmra.mrb[106].mxu0 %vm777_vm2, %v18326_v13 }
 0x79d   : > { %11232 = vmatprep.mubr.msk.f32.mxu0 %vm777_vm2, %v18329_v47  ;;  %12165 = vmatpush3.bf16.msra.mxu0 %v18357_v28 }
 0x79e   : > { %12167 = vmatprep.subr.bf16.mxu0 %v18359_v8 }
 0x7a0   : > { %11233 = vmatmul.mubr.msk.f32.gmra.mrb[108].mxu0 %vm777_vm2, %v18330_v45 }
 0x7a1   : > { %11235 = vmatprep.mubr.msk.f32.mxu0 %vm777_vm2, %v18331_v50  ;;  %12169 = vmatpush3.bf16.msra.mxu0 %v18359_v8 }
 0x7a2   : > { %11255 = vmatmul.mubr.msk.f32.vlgmr.msra.gmra.mrb[104].mxu1 %vm777_vm2, %v14102_v51  ;;  %12171 = vmatprep.subr.bf16.mxu0 %v18360_v54 }
 0x7a3   : > { %11257 = vmatprep.mubr.msk.f32.mxu1 %vm777_vm2, %v14116_v0  ;;  %12177 = vmatpush3.bf16.msra.mxu1 %v18358_v37 }
 0x7a4   : > { %12179 = vmatprep.subr.bf16.mxu1 %v18361_v53  ;;  %11236 = vmatmul.mubr.msk.f32.gmra.mrb[110].mxu0 %vm777_vm2, %v18332_v5 }
 0x7a5   : > { %12173 = vmatpush3.bf16.msra.mxu0 %v18360_v54 }
 0x7a6   : > { %11258 = vmatmul.mubr.msk.f32.gmra.mrb[106].mxu1 %vm777_vm2, %v14113_v34  ;;  %12191 = vmatprep.subr.bf16.mxu0 %v18245_v14 }
 0x7a7   : > { %11260 = vmatprep.mubr.msk.f32.mxu1 %vm777_vm2, %v14130_v17  ;;  %12181 = vmatpush3.bf16.msra.mxu1 %v18361_v53 }
 0x7a8   : > { %12183 = vmatprep.subr.bf16.mxu1 %v18362_v58 }
 0x7aa   : > { %11261 = vmatmul.mubr.msk.f32.gmra.mrb[108].mxu1 %vm777_vm2, %v14127_v20 }
 0x7ab   : > { %11263 = vmatprep.mubr.msk.f32.mxu1 %vm777_vm2, %v18283_v31  ;;  %12185 = vmatpush3.bf16.msra.mxu1 %v18362_v58 }
 0x7ac   : > { %12187 = vmatprep.subr.bf16.mxu1 %v18363_v60 }
 0x7ae   : > { %11264 = vmatmul.mubr.msk.f32.gmra.mrb[110].mxu1 %vm777_vm2, %v18238_v49 }
 0x7af   : > { %12189 = vmatpush3.bf16.msra.mxu1 %v18363_v60  ;;  %v2815_v60 = vmul.f32 %v18370_v3, %v18364_v7  ;;  %v18375_v3 = vld [vmem:[#allocation81_spill] sm:$0xff] }
 0x7b0   : > { %12207 = vmatprep.subr.bf16.mxu1 %v18333_v61 }
 0x7b9   : > { %v11060_v4 = vpop.f32.mrb[80].mxu0 }
 0x7ba   : > { %v4397_v25 = vmul.f32 %v11060_v4, %v18366_v18  ;;  %v3970_v35 = vpop.f32.mrb[81].mxu0  ;;  %v2814_v4 = vmul.f32 %v18371_v33, %v18364_v7 }
 0x7bb   : > { %v4396_v24 = vmul.f32 %v3970_v35, %v18366_v18 }
 0x7bc   : > { %v15773_v6 = vadd.f32 %v4397_v25, %v2813_v36  ;;  %v18374_v25 = vld [vmem:[#allocation79_spill] sm:$0xff] }
 0x7bd   : > { %v15775_v22 = vadd.f32 %v4396_v24, %v2812_v55  ;;  %v11063_v57 = vpop.f32.mrb[82].mxu0  ;;  %v2817_v35 = vmul.f32 %v18374_v25, %v18364_v7  ;;  %v18379_v25 = vld [vmem:[#allocation85_spill] sm:$0xff] }
 0x7be   : > { %18368 = vst [vmem:[#allocation114_spill] sm:$0xff] %v15773_v6  ;;  %v4399_v58 = vmul.f32 %v11063_v57, %v18366_v18  ;;  %v3980_v53 = vpop.f32.mrb[83].mxu0  ;;  %v2816_v57 = vmul.f32 %v18375_v3, %v18364_v7 }
 0x7bf   : > { %18369 = vst [vmem:[#allocation110_spill] sm:$0xff] %v15775_v22  ;;  %v4398_v54 = vmul.f32 %v3980_v53, %v18366_v18 }
 0x7c0   : > { %v15783_v8 = vadd.f32 %v4399_v58, %v2815_v60 }
 0x7c1   : > { %v15785_v15 = vadd.f32 %v4398_v54, %v2814_v4  ;;  %v18378_v54 = vld [vmem:[#allocation84_spill] sm:$0xff] }
 0x7c2   : > { %18372 = vst [vmem:[#allocation111_spill] sm:$0xff] %v15783_v8  ;;  %v2819_v58 = vmul.f32 %v18378_v54, %v18364_v7  ;;  %v18383_v54 = vld [vmem:[#allocation62_spill] sm:$0xff] }
 0x7c3   : > { %18373 = vst [vmem:[#allocation112_spill] sm:$0xff] %v15785_v15 }
 0x7c5   : > { %v11066_v36 = vpop.f32.mrb[84].mxu0 }
 0x7c6   : > { %v4401_v55 = vmul.f32 %v11066_v36, %v18366_v18  ;;  %v3990_v24 = vpop.f32.mrb[85].mxu0  ;;  %v2818_v36 = vmul.f32 %v18379_v25, %v18364_v7 }
 0x7c7   : > { %v4400_v22 = vmul.f32 %v3990_v24, %v18366_v18 }
 0x7c8   : > { %v15793_v6 = vadd.f32 %v4401_v55, %v2817_v35 }
 0x7c9   : > { %v15795_v33 = vadd.f32 %v4400_v22, %v2816_v57  ;;  %v18382_v22 = vld [vmem:[#allocation86_spill] sm:$0xff] }
 0x7ca   : > { %18376 = vst [vmem:[#allocation113_spill] sm:$0xff] %v15793_v6  ;;  %v2821_v55 = vmul.f32 %v18382_v22, %v18364_v7  ;;  %v18387_v22 = vld [vmem:[#allocation89_spill] sm:$0xff] }
 0x7cb   : > { %18377 = vst [vmem:[#allocation51_spill] sm:$0xff] %v15795_v33 }
 0x7cd   : > { %v11069_v53 = vpop.f32.mrb[86].mxu0 }
 0x7ce   : > { %v4403_v60 = vmul.f32 %v11069_v53, %v18366_v18  ;;  %v4000_v4 = vpop.f32.mrb[87].mxu0  ;;  %v2820_v53 = vmul.f32 %v18383_v54, %v18364_v7 }
 0x7cf   : > { %v4402_v15 = vmul.f32 %v4000_v4, %v18366_v18 }
 0x7d0   : > { %v15803_v8 = vadd.f32 %v4403_v60, %v2819_v58 }
 0x7d1   : > { %v15805_v3 = vadd.f32 %v4402_v15, %v2818_v36  ;;  %v18386_v15 = vld [vmem:[#allocation88_spill] sm:$0xff] }
 0x7d2   : > { %18380 = vst [vmem:[#allocation7_spill] sm:$0xff] %v15803_v8  ;;  %v2823_v60 = vmul.f32 %v18386_v15, %v18364_v7  ;;  %v18391_v15 = vld [vmem:[#allocation91_spill] sm:$0xff] }
 0x7d3   : > { %18381 = vst [vmem:[#allocation83_spill] sm:$0xff] %v15805_v3 }
 0x7eb   : > { %v11088_v35 = vpop.f32.mrb[80].mxu1 }
 0x7ec   : > { %v4405_v24 = vmul.f32 %v11088_v35, %v18366_v18  ;;  %v4099_v57 = vpop.f32.mrb[81].mxu1  ;;  %v2822_v35 = vmul.f32 %v18387_v22, %v18364_v7 }
 0x7ed   : > { %v4404_v33 = vmul.f32 %v4099_v57, %v18366_v18 }
 0x7ee   : > { %v15813_v6 = vadd.f32 %v4405_v24, %v2821_v55 }
 0x7ef   : > { %v15815_v25 = vadd.f32 %v4404_v33, %v2820_v53  ;;  %v18390_v33 = vld [vmem:[#allocation90_spill] sm:$0xff] }
 0x7f0   : > { %18384 = vst [vmem:[#allocation63_spill] sm:$0xff] %v15813_v6  ;;  %v2825_v24 = vmul.f32 %v18390_v33, %v18364_v7  ;;  %v18395_v33 = vld [vmem:[#allocation93_spill] sm:$0xff] }
 0x7f1   : > { %18385 = vst [vmem:[#allocation76_spill] sm:$0xff] %v15815_v25 }
 0x7f2   : > { %v16052_v47 = vpop.permute.xlu0 %12766 }
 0x7f3   : > { %v11091_v58 = vpop.f32.mrb[82].mxu1 }
 0x7f4   : > { %v4407_v4 = vmul.f32 %v11091_v58, %v18366_v18  ;;  %v4109_v36 = vpop.f32.mrb[83].mxu1  ;;  %v2824_v58 = vmul.f32 %v18391_v15, %v18364_v7 }
 0x7f5   : > { %v4406_v3 = vmul.f32 %v4109_v36, %v18366_v18 }
 0x7f6   : > { %v15823_v8 = vadd.f32 %v4407_v4, %v2823_v60 }
 0x7f7   : > { %v15825_v54 = vadd.f32 %v4406_v3, %v2822_v35  ;;  %v18394_v3 = vld [vmem:[#allocation92_spill] sm:$0xff] }
 0x7f8   : > { %18388 = vst [vmem:[#allocation80_spill] sm:$0xff] %v15823_v8  ;;  %v2827_v4 = vmul.f32 %v18394_v3, %v18364_v7  ;;  %v18399_v3 = vld [vmem:[#allocation95_spill] sm:$0xff] }
 0x7f9   : > { %18389 = vst [vmem:[#allocation78_spill] sm:$0xff] %v15825_v54 }
 0x7fb   : > { %v11094_v55 = vpop.f32.mrb[84].mxu1 }
 0x7fc   : > { %v4409_v57 = vmul.f32 %v11094_v55, %v18366_v18  ;;  %v4119_v53 = vpop.f32.mrb[85].mxu1  ;;  %v2826_v55 = vmul.f32 %v18395_v33, %v18364_v7 }
 0x7fd   : > { %v4408_v25 = vmul.f32 %v4119_v53, %v18366_v18 }
 0x7fe   : > { %v15833_v6 = vadd.f32 %v4409_v57, %v2825_v24  ;;  %v18397_v24 = vld [vmem:[#allocation94_spill] sm:$0xff] }
 0x7ff   : > { %v15835_v22 = vadd.f32 %v4408_v25, %v2824_v58  ;;  %v11097_v60 = vpop.f32.mrb[86].mxu1  ;;  %v2829_v57 = vmul.f32 %v18397_v24, %v18364_v7 }
 0x800   : > { %18392 = vst [vmem:[#allocation79_spill] sm:$0xff] %v15833_v6  ;;  %v4411_v36 = vmul.f32 %v11097_v60, %v18366_v18  ;;  %v4129_v35 = vpop.f32.mrb[87].mxu1  ;;  %v2828_v60 = vmul.f32 %v18399_v3, %v18364_v7 }
 0x801   : > { %18393 = vst [vmem:[#allocation81_spill] sm:$0xff] %v15835_v22  ;;  %v4410_v54 = vmul.f32 %v4129_v35, %v18366_v18 }
 0x802   : > { %v15843_v8 = vadd.f32 %v4411_v36, %v2827_v4  ;;  %v11116_v15 = vpop.f32.mrb[88].mxu0  ;;  %v18402_v36 = vld [vmem:[#allocation96_spill] sm:$0xff] }
 0x803   : > { %v15847_v25 = vadd.f32 %v4410_v54, %v2826_v55  ;;  %v4413_v53 = vmul.f32 %v11116_v15, %v18366_v18  ;;  %v4228_v58 = vpop.f32.mrb[89].mxu0  ;;  %v2831_v35 = vmul.f32 %v18402_v36, %v18364_v7  ;;  %v18403_v55 = vld [vmem:[#allocation97_spill] sm:$0xff]  ;;  %v18407_v36 = vld [vmem:[#allocation99_spill] sm:$0xff] }
 0x804   : > { %18396 = vst [vmem:[#allocation84_spill] sm:$0xff] %v15843_v8  ;;  %v4412_v22 = vmul.f32 %v4228_v58, %v18366_v18  ;;  %v2830_v15 = vmul.f32 %v18403_v55, %v18364_v7 }
 0x805   : > { %18398 = vst [vmem:[#allocation85_spill] sm:$0xff] %v15847_v25  ;;  %v15853_v6 = vadd.f32 %v4413_v53, %v2829_v57 }
 0x806   : > { %v15855_v33 = vadd.f32 %v4412_v22, %v2828_v60  ;;  %v11119_v4 = vpop.f32.mrb[90].mxu0  ;;  %v18406_v22 = vld [vmem:[#allocation98_spill] sm:$0xff] }
 0x807   : > { %18400 = vst [vmem:[#allocation86_spill] sm:$0xff] %v15853_v6  ;;  %v4415_v24 = vmul.f32 %v11119_v4, %v18366_v18  ;;  %v4238_v54 = vpop.f32.mrb[91].mxu0  ;;  %v2833_v53 = vmul.f32 %v18406_v22, %v18364_v7  ;;  %v2832_v4 = vmul.f32 %v18407_v36, %v18364_v7  ;;  %v18411_v22 = vld [vmem:[#allocation101_spill] sm:$0xff] }
 0x808   : > { %18401 = vst [vmem:[#allocation62_spill] sm:$0xff] %v15855_v33  ;;  %v4414_v25 = vmul.f32 %v4238_v54, %v18366_v18 }
 0x809   : > { %v15863_v8 = vadd.f32 %v4415_v24, %v2831_v35 }
 0x80a   : > { %v15865_v3 = vadd.f32 %v4414_v25, %v2830_v15  ;;  %v11122_v57 = vpop.f32.mrb[92].mxu0  ;;  %v18410_v25 = vld [vmem:[#allocation100_spill] sm:$0xff] }
 0x80b   : > { %18404 = vst [vmem:[#allocation88_spill] sm:$0xff] %v15863_v8  ;;  %v4417_v58 = vmul.f32 %v11122_v57, %v18366_v18  ;;  %v4248_v60 = vpop.f32.mrb[93].mxu0  ;;  %v2835_v24 = vmul.f32 %v18410_v25, %v18364_v7  ;;  %v2834_v57 = vmul.f32 %v18411_v22, %v18364_v7  ;;  %v18415_v25 = vld [vmem:[#allocation103_spill] sm:$0xff] }
 0x80c   : > { %18405 = vst [vmem:[#allocation89_spill] sm:$0xff] %v15865_v3  ;;  %v4416_v33 = vmul.f32 %v4248_v60, %v18366_v18 }
 0x80d   : > { %v15873_v6 = vadd.f32 %v4417_v58, %v2833_v53  ;;  %v18413_v53 = vld [vmem:[#allocation102_spill] sm:$0xff] }
 0x80e   : > { %v15875_v55 = vadd.f32 %v4416_v33, %v2832_v4  ;;  %v2837_v58 = vmul.f32 %v18413_v53, %v18364_v7 }
 0x80f   : > { %18408 = vst [vmem:[#allocation90_spill] sm:$0xff] %v15873_v6  ;;  %v11125_v35 = vpop.f32.mrb[94].mxu0 }
 0x810   : > { %18409 = vst [vmem:[#allocation91_spill] sm:$0xff] %v15875_v55  ;;  %v4419_v54 = vmul.f32 %v11125_v35, %v18366_v18  ;;  %v4258_v15 = vpop.f32.mrb[95].mxu0  ;;  %v2836_v35 = vmul.f32 %v18415_v25, %v18364_v7 }
 0x811   : > { %v4418_v3 = vmul.f32 %v4258_v15, %v18366_v18 }
 0x812   : > { %v15883_v8 = vadd.f32 %v4419_v54, %v2835_v24  ;;  %v11144_v36 = vpop.f32.mrb[88].mxu1 }
 0x813   : > { %v15887_v33 = vadd.f32 %v4418_v3, %v2834_v57  ;;  %v4421_v60 = vmul.f32 %v11144_v36, %v18366_v18  ;;  %v4357_v4 = vpop.f32.mrb[89].mxu1 }
 0x814   : > { %18412 = vst [vmem:[#allocation92_spill] sm:$0xff] %v15883_v8  ;;  %v4420_v55 = vmul.f32 %v4357_v4, %v18366_v18 }
 0x815   : > { %18414 = vst [vmem:[#allocation93_spill] sm:$0xff] %v15887_v33  ;;  %v15893_v6 = vadd.f32 %v4421_v60, %v2837_v58 }
 0x816   : > { %v15895_v22 = vadd.f32 %v4420_v55, %v2836_v35 }
 0x817   : > { %18416 = vst [vmem:[#allocation94_spill] sm:$0xff] %v15893_v6 }
 0x818   : > { %18417 = vst [vmem:[#allocation95_spill] sm:$0xff] %v15895_v22 }
 0x822   : > { %v11172_v24 = vpop.f32.mrb[96].mxu0 }
 0x823   : > { %v15897_v54 = vmul.f32 0.35355338, %v11172_v24  ;;  %v4606_v15 = vpop.f32.mrb[97].mxu0 }
 0x824   : > { %v15899_v8 = vmul.f32 0.35355338, %v4606_v15 }
 0x825   : > { %v5115_v3 = vsel %vm1847_vm4, %v15897_v54, -inf }
 0x826   : > { %v11175_v57 = vpop.f32.mrb[98].mxu0  ;;  %5116 = vmax.xlane.f32.xlu1 %v5115_v3  ;;  %v5112_v36 = vsel %vm1847_vm4, %v15899_v8, -inf }
 0x827   : > { %v15905_v53 = vmul.f32 0.35355338, %v11175_v57  ;;  %v4616_v58 = vpop.f32.mrb[99].mxu0  ;;  %5113 = vmax.xlane.f32.xlu0 %v5112_v36 }
 0x828   : > { %v15907_v55 = vmul.f32 0.35355338, %v4616_v58 }
 0x829   : > { %v5121_v60 = vsel %vm1847_vm4, %v15905_v53, -inf }
 0x82a   : > { %v11178_v4 = vpop.f32.mrb[100].mxu0  ;;  %v5118_v25 = vsel %vm1847_vm4, %v15907_v55, -inf }
 0x82b   : > { %v15913_v35 = vmul.f32 0.35355338, %v11178_v4  ;;  %v4626_v24 = vpop.f32.mrb[101].mxu0  ;;  %5119 = vmax.xlane.f32.xlu1 %v5118_v25  ;;  %5122 = vmax.xlane.f32.xlu0 %v5121_v60 }
 0x82c   : > { %v15915_v15 = vmul.f32 0.35355338, %v4626_v24  ;;  %v18418_v24 = vld [vmem:[#allocation104_spill] sm:$0xff] }
 0x82d   : > { %v5127_v3 = vsel %vm1847_vm4, %v15913_v35, -inf  ;;  %v2839_v33 = vmul.f32 %v18418_v24, %v18364_v7  ;;  %v18423_v24 = vld [vmem:[#allocation107_spill] sm:$0xff] }
 0x82e   : > { %v11181_v57 = vpop.f32.mrb[102].mxu0  ;;  %v5124_v36 = vsel %vm1847_vm4, %v15915_v15, -inf }
 0x82f   : > { %v15921_v58 = vmul.f32 0.35355338, %v11181_v57  ;;  %v4636_v22 = vpop.f32.mrb[103].mxu0  ;;  %5125 = vmax.xlane.f32.xlu1 %v5124_v36  ;;  %5128 = vmax.xlane.f32.xlu0 %v5127_v3  ;;  %v18419_v36 = vld [vmem:[#allocation105_spill] sm:$0xff] }
 0x830   : > { %v15923_v6 = vmul.f32 0.35355338, %v4636_v22  ;;  %v2838_v3 = vmul.f32 %v18419_v36, %v18364_v7 }
 0x831   : > { %v5133_v4 = vsel %vm1847_vm4, %v15921_v58, -inf }
 0x832   : > { %v5130_v60 = vsel %vm1847_vm4, %v15923_v6, -inf }
 0x833   : > { %5131 = vmax.xlane.f32.xlu1 %v5130_v60  ;;  %5134 = vmax.xlane.f32.xlu0 %v5133_v4  ;;  %v18422_v60 = vld [vmem:[#allocation106_spill] sm:$0xff] }
 0x834   : > { %v2841_v4 = vmul.f32 %v18422_v60, %v18364_v7  ;;  %v18427_v60 = vld [vmem:[#allocation109_spill] sm:$0xff] }
 0x847   : > { %v11147_v25 = vpop.f32.mrb[90].mxu1 }
 0x848   : > { %v4423_v57 = vmul.f32 %v11147_v25, %v18366_v18  ;;  %v4367_v37 = vpop.f32.mrb[91].mxu1  ;;  %v2840_v25 = vmul.f32 %v18423_v24, %v18364_v7 }
 0x849   : > { %v4422_v22 = vmul.f32 %v4367_v37, %v18366_v18 }
 0x84a   : > { %v15935_v28 = vadd.f32 %v4423_v57, %v2839_v33  ;;  %v18426_v33 = vld [vmem:[#allocation108_spill] sm:$0xff] }
 0x84b   : > { %v15937_v39 = vadd.f32 %v4422_v22, %v2838_v3  ;;  %v11150_v43 = vpop.f32.mrb[92].mxu1  ;;  %v2843_v57 = vmul.f32 %v18426_v33, %v18364_v7 }
 0x84c   : > { %18420 = vst [vmem:[#allocation96_spill] sm:$0xff] %v15935_v28  ;;  %v4425_v46 = vmul.f32 %v11150_v43, %v18366_v18  ;;  %v4377_v38 = vpop.f32.mrb[93].mxu1  ;;  %v2842_v43 = vmul.f32 %v18427_v60, %v18364_v7 }
 0x84d   : > { %18421 = vst [vmem:[#allocation97_spill] sm:$0xff] %v15937_v39  ;;  %v4424_v40 = vmul.f32 %v4377_v38, %v18366_v18 }
 0x84e   : > { %v15945_v41 = vadd.f32 %v4425_v46, %v2841_v4 }
 0x84f   : > { %v15947_v36 = vadd.f32 %v4424_v40, %v2840_v25 }
 0x850   : > { %18424 = vst [vmem:[#allocation98_spill] sm:$0xff] %v15945_v41  ;;  %v11153_v37 = vpop.f32.mrb[94].mxu1 }
 0x851   : > { %18425 = vst [vmem:[#allocation99_spill] sm:$0xff] %v15947_v36  ;;  %v4427_v3 = vmul.f32 %v11153_v37, %v18366_v18  ;;  %v4387_v22 = vpop.f32.mrb[95].mxu1 }
 0x852   : > { %v4426_v39 = vmul.f32 %v4387_v22, %v18366_v18 }
 0x853   : > { %v15955_v28 = vadd.f32 %v4427_v3, %v2843_v57 }
 0x854   : > { %v15957_v24 = vadd.f32 %v4426_v39, %v2842_v43  ;;  %v11200_v38 = vpop.f32.mrb[96].mxu1 }
 0x855   : > { %18428 = vst [vmem:[#allocation100_spill] sm:$0xff] %v15955_v28  ;;  %v15959_v46 = vmul.f32 0.35355338, %v11200_v38  ;;  %v4751_v40 = vpop.f32.mrb[97].mxu1 }
 0x856   : > { %18429 = vst [vmem:[#allocation101_spill] sm:$0xff] %v15957_v24  ;;  %v15961_v4 = vmul.f32 0.35355338, %v4751_v40 }
 0x857   : > { %v5139_v25 = vsel %vm1847_vm4, %v15959_v46, -inf }
 0x858   : > { %5140 = vmax.xlane.f32.xlu0 %v5139_v25  ;;  %v11203_v37 = vpop.f32.mrb[98].mxu1  ;;  %v5136_v39 = vsel %vm1847_vm4, %v15961_v4, -inf }
 0x859   : > { %v4761_v33 = vpop.f32.mrb[99].mxu1  ;;  %v15967_v7 = vmul.f32 0.35355338, %v11203_v37 }
 0x85a   : > { %v15965_v36 = vmul.f32 0.35355338, %v4761_v33 }
 0x85b   : > { %v5145_v43 = vsel %vm1847_vm4, %v15967_v7, -inf }
 0x85c   : > { %5137 = vmax.xlane.f32.xlu0 %v5136_v39  ;;  %v11206_v18 = vpop.f32.mrb[100].mxu1  ;;  %v5142_v57 = vsel %vm1847_vm4, %v15965_v36, -inf }
 0x85d   : > { %5143 = vmax.xlane.f32.xlu1 %v5142_v57  ;;  %v4771_v3 = vpop.f32.mrb[101].mxu1  ;;  %v15975_v60 = vmul.f32 0.35355338, %v11206_v18 }
 0x85e   : > { %v15973_v22 = vmul.f32 0.35355338, %v4771_v3 }
 0x85f   : > { %v5151_v39 = vsel %vm1847_vm4, %v15975_v60, -inf }
 0x860   : > { %5146 = vmax.xlane.f32.xlu0 %v5145_v43  ;;  %v11209_v38 = vpop.f32.mrb[102].mxu1  ;;  %v5148_v40 = vsel %vm1847_vm4, %v15973_v22, -inf }
 0x861   : > { %5149 = vmax.xlane.f32.xlu1 %v5148_v40  ;;  %v4781_v25 = vpop.f32.mrb[103].mxu1  ;;  %v15983_v33 = vmul.f32 0.35355338, %v11209_v38 }
 0x862   : > { %v15981_v37 = vmul.f32 0.35355338, %v4781_v25 }
 0x863   : > { %v5157_v57 = vsel %vm1847_vm4, %v15983_v33, -inf }
 0x864   : > { %5152 = vmax.xlane.f32.xlu0 %v5151_v39  ;;  %v5154_v18 = vsel %vm1847_vm4, %v15981_v37, -inf }
 0x865   : > { %5155 = vmax.xlane.f32.xlu1 %v5154_v18 }
 0x868   : > { %5158 = vmax.xlane.f32.xlu0 %v5157_v57 }
 0x86b   : > { %v11228_v3 = vpop.f32.mrb[104].mxu0 }
 0x86c   : > { %v15991_v43 = vmul.f32 0.35355338, %v11228_v3  ;;  %v4896_v40 = vpop.f32.mrb[105].mxu0 }
 0x86d   : > { %v15993_v25 = vmul.f32 0.35355338, %v4896_v40 }
 0x86e   : > { %v5163_v38 = vsel %vm1847_vm4, %v15991_v43, -inf }
 0x86f   : > { %v11231_v24 = vpop.f32.mrb[106].mxu0  ;;  %5164 = vmax.xlane.f32.xlu0 %v5163_v38  ;;  %v5160_v39 = vsel %vm1847_vm4, %v15993_v25, -inf }
 0x870   : > { %v15999_v28 = vmul.f32 0.35355338, %v11231_v24  ;;  %v4906_v18 = vpop.f32.mrb[107].mxu0  ;;  %5161 = vmax.xlane.f32.xlu1 %v5160_v39 }
 0x871   : > { %v16001_v41 = vmul.f32 0.35355338, %v4906_v18 }
 0x872   : > { %v5169_v57 = vsel %vm1847_vm4, %v15999_v28, -inf }
 0x873   : > { %v11234_v3 = vpop.f32.mrb[108].mxu0  ;;  %5170 = vmax.xlane.f32.xlu0 %v5169_v57  ;;  %v5166_v40 = vsel %vm1847_vm4, %v16001_v41, -inf }
 0x874   : > { %v16007_v52 = vmul.f32 0.35355338, %v11234_v3  ;;  %v4916_v38 = vpop.f32.mrb[109].mxu0  ;;  %5167 = vmax.xlane.f32.xlu1 %v5166_v40 }
 0x875   : > { %v16009_v56 = vmul.f32 0.35355338, %v4916_v38  ;;  %v11256_v24 = vpop.f32.mrb[104].mxu1 }
 0x876   : > { %v5041_v59 = vpop.f32.mrb[105].mxu1  ;;  %v5175_v39 = vsel %vm1847_vm4, %v16007_v52, -inf  ;;  %v16019_v40 = vmul.f32 0.35355338, %v11256_v24 }
 0x877   : > { %v11237_v18 = vpop.f32.mrb[110].mxu0  ;;  %5176 = vmax.xlane.f32.xlu0 %v5175_v39  ;;  %v5172_v48 = vsel %vm1847_vm4, %v16009_v56, -inf  ;;  %v16023_v1 = vmul.f32 0.35355338, %v5041_v59 }
 0x878   : > { %v16015_v57 = vmul.f32 0.35355338, %v11237_v18  ;;  %v4926_v30 = vpop.f32.mrb[111].mxu0  ;;  %5173 = vmax.xlane.f32.xlu1 %v5172_v48 }
 0x879   : > { %v16017_v3 = vmul.f32 0.35355338, %v4926_v30  ;;  %v11259_v26 = vpop.f32.mrb[106].mxu1  ;;  %v5187_v30 = vsel %vm1847_vm4, %v16019_v40, -inf  ;;  %v5184_v24 = vsel %vm1847_vm4, %v16023_v1, -inf }
 0x87a   : > { %v5051_v38 = vpop.f32.mrb[107].mxu1  ;;  %v5181_v62 = vsel %vm1847_vm4, %v16015_v57, -inf  ;;  %v16027_v61 = vmul.f32 0.35355338, %v11259_v26 }
 0x87b   : > { %5182 = vmax.xlane.f32.xlu0 %v5181_v62  ;;  %v5178_v39 = vsel %vm1847_vm4, %v16017_v3, -inf  ;;  %v16056_v13 = vmul.f32 0.35355338, %v5051_v38 }
 0x87c   : > { %5179 = vmax.xlane.f32.xlu1 %v5178_v39  ;;  %v5193_v50 = vsel %vm1847_vm4, %v16027_v61, -inf }
 0x87d   : > { %v11262_v18 = vpop.f32.mrb[108].mxu1 }
 0x87e   : > { %v5061_v48 = vpop.f32.mrb[109].mxu1  ;;  %v16033_v59 = vmul.f32 0.35355338, %v11262_v18  ;;  %v6065_v18 = vmul.f32 %v15642_v16, %v18353_v11 }
 0x87f   : > { %5188 = vmax.xlane.f32.xlu0 %v5187_v30  ;;  %v16060_v32 = vmul.f32 0.35355338, %v5061_v48 }
 0x880   : > { %5185 = vmax.xlane.f32.xlu1 %v5184_v24  ;;  %v5199_v26 = vsel %vm1847_vm4, %v16033_v59, -inf  ;;  %v6064_v24 = vmul.f32 %v15642_v16, %v18352_v44 }
 0x881   : > { %v11265_v5 = vpop.f32.mrb[110].mxu1  ;;  %v5196_v38 = vsel %vm1847_vm4, %v16060_v32, -inf }
 0x882   : > { %v5071_v62 = vpop.f32.mrb[111].mxu1  ;;  %v16037_v39 = vmul.f32 0.35355338, %v11265_v5  ;;  %v12790_v45 = vpack.i.bf16 %v6065_v18, %v6064_v24  ;;  %v5190_v24 = vsel %vm1847_vm4, %v16056_v13, -inf }
 0x883   : > { %5194 = vmax.xlane.f32.xlu0 %v5193_v50  ;;  %v16048_v50 = vpop.permute.xlu1 %12771 }
 0x884   : > { %v5205_v30 = vsel %vm1847_vm4, %v16037_v39, -inf  ;;  %18430 = vst [vmem:[#allocation102_spill] sm:$0xff] %v16048_v50  ;;  %v16066_v50 = vmul.f32 0.35355338, %v5071_v62 }
 0x887   : > { %5200 = vmax.xlane.f32.xlu0 %v5199_v26  ;;  %v16050_v5 = vpop.permute.xlu1 %12776 }
 0x888   : > { %18431 = vst [vmem:[#allocation103_spill] sm:$0xff] %v16050_v5 }
 0x88b   : > { %5206 = vmax.xlane.f32.xlu0 %v5205_v30  ;;  %v16054_v26 = vpop.permute.xlu1 %12786  ;;  %v16058_v30 = vpop.permute.xlu0 %12781 }
 0x88c   : > { %18432 = vst [vmem:[#allocation104_spill] sm:$0xff] %v16054_v26  ;;  %18433 = vst [vmem:[#allocation105_spill] sm:$0xff] %v16058_v30 }
 0x891   : > { %12791 = vrot.lane.b32.xlu1 %v12790_v45, %s13491_s29 }
 0x8b3   : > { %v5117_v44 = vpop.xlane.xlu1 %5116 }
 0x8b4   : > { %v5209_v45 = vsub.f32 %v15897_v54, %v5117_v44  ;;  %v5114_v18 = vpop.xlane.xlu0 %5113 }
 0x8b5   : > { %5191 = vmax.xlane.f32.xlu1 %v5190_v24  ;;  %v5208_v11 = vsub.f32 %v15899_v8, %v5114_v18  ;;  %v5202_v8 = vsel %vm1847_vm4, %v16066_v50, -inf }
 0x8b6   : > { %v5242_v5 = vmul.f32 1.442695, %v5209_v45 }
 0x8b7   : > { %v5240_v26 = vmul.f32 1.442695, %v5208_v11 }
 0x8b8   : > { %13101 = vpow2.f32 %v5242_v5  ;;  %v5120_v48 = vpop.xlane.xlu1 %5119  ;;  %v5123_v30 = vpop.xlane.xlu0 %5122 }
 0x8b9   : > { %5197 = vmax.xlane.f32.xlu1 %v5196_v38  ;;  %v5210_v27 = vsub.f32 %v15907_v55, %v5120_v48  ;;  %v5211_v49 = vsub.f32 %v15905_v53, %v5123_v30  ;;  %13103 = vpow2.f32 %v5240_v26 }
 0x8bb   : > { %v5244_v44 = vmul.f32 1.442695, %v5210_v27  ;;  %v5246_v54 = vmul.f32 1.442695, %v5211_v49 }
 0x8bc   : > { %v5126_v62 = vpop.xlane.xlu1 %5125  ;;  %v5129_v24 = vpop.xlane.xlu0 %5128 }
 0x8bd   : > { %5203 = vmax.xlane.f32.xlu1 %v5202_v8  ;;  %13105 = vpow2.f32 %v5244_v44  ;;  %v5213_v11 = vsub.f32 %v15913_v35, %v5129_v24  ;;  %v5212_v5 = vsub.f32 %v15915_v15, %v5126_v62 }
 0x8be   : > { %13107 = vpow2.f32 %v5246_v54 }
 0x8bf   : > { %v5250_v45 = vmul.f32 1.442695, %v5213_v11  ;;  %v5248_v53 = vmul.f32 1.442695, %v5212_v5 }
 0x8c0   : > { %v5135_v18 = vpop.xlane.xlu0 %5134  ;;  %v5132_v27 = vpop.xlane.xlu1 %5131 }
 0x8c1   : > { %13109 = vpow2.f32 %v5250_v45  ;;  %v5215_v49 = vsub.f32 %v15921_v58, %v5135_v18  ;;  %v5214_v35 = vsub.f32 %v15923_v6, %v5132_v27 }
 0x8c2   : > { %v16076_v55 = vpop.eup %13101  ;;  %13111 = vpow2.f32 %v5248_v53 }
 0x8c3   : > { %v5307_v26 = vsel %vm1847_vm4, %v16076_v55, 0.0  ;;  %v16081_v30 = vpop.eup %13103  ;;  %v5254_v38 = vmul.f32 1.442695, %v5215_v49  ;;  %v5252_v54 = vmul.f32 1.442695, %v5214_v35 }
 0x8c4   : > { %5308 = vadd.xlane.f32.xlu0 %v5307_v26  ;;  %v5304_v48 = vsel %vm1847_vm4, %v16081_v30, 0.0 }
 0x8c5   : > { %13113 = vpow2.f32 %v5254_v38 }
 0x8c6   : > { %13115 = vpow2.f32 %v5252_v54 }
 0x8c7   : > { %v16084_v15 = vpop.eup %13105 }
 0x8c8   : > { %v16088_v44 = vpop.eup %13107  ;;  %5305 = vadd.xlane.f32.xlu0 %v5304_v48  ;;  %v5310_v58 = vsel %vm1847_vm4, %v16084_v15, 0.0 }
 0x8c9   : > { %5311 = vadd.xlane.f32.xlu1 %v5310_v58  ;;  %v5313_v8 = vsel %vm1847_vm4, %v16088_v44, 0.0 }
 0x8cb   : > { %v16094_v62 = vpop.eup %13109 }
 0x8cc   : > { %5314 = vadd.xlane.f32.xlu0 %v5313_v8  ;;  %v5319_v6 = vsel %vm1847_vm4, %v16094_v62, 0.0  ;;  %v16098_v24 = vpop.eup %13111 }
 0x8cd   : > { %v5316_v11 = vsel %vm1847_vm4, %v16098_v24, 0.0 }
 0x8cf   : > { %v16102_v5 = vpop.eup %13113 }
 0x8d0   : > { %5320 = vadd.xlane.f32.xlu0 %v5319_v6  ;;  %18434 = vst [vmem:[#allocation106_spill] sm:$0xff] %v16102_v5  ;;  %v5325_v45 = vsel %vm1847_vm4, %v16102_v5, 0.0  ;;  %v16106_v18 = vpop.eup %13115 }
 0x8d1   : > { %v5322_v53 = vsel %vm1847_vm4, %v16106_v18, 0.0 }
 0x8d4   : > { %5317 = vadd.xlane.f32.xlu0 %v5316_v11 }
 0x8d8   : > { %5326 = vadd.xlane.f32.xlu0 %v5325_v45 }
 0x8dc   : > { %5323 = vadd.xlane.f32.xlu0 %v5322_v53 }
 0x8e5   : > { %v5141_v49 = vpop.xlane.xlu0 %5140 }
 0x8e6   : > { %v5217_v27 = vsub.f32 %v15959_v46, %v5141_v49 }
 0x8e8   : > { %v5258_v26 = vmul.f32 1.442695, %v5217_v27 }
 0x8e9   : > { %v5138_v35 = vpop.xlane.xlu0 %5137 }
 0x8ea   : > { %13117 = vpow2.f32 %v5258_v26  ;;  %v5216_v38 = vsub.f32 %v15961_v4, %v5138_v35  ;;  %v5144_v48 = vpop.xlane.xlu1 %5143 }
 0x8eb   : > { %v5218_v54 = vsub.f32 %v15965_v36, %v5144_v48 }
 0x8ec   : > { %v5256_v58 = vmul.f32 1.442695, %v5216_v38 }
 0x8ed   : > { %v5147_v8 = vpop.xlane.xlu0 %5146  ;;  %v5260_v45 = vmul.f32 1.442695, %v5218_v54 }
 0x8ee   : > { %13119 = vpow2.f32 %v5256_v58  ;;  %v5219_v6 = vsub.f32 %v15967_v7, %v5147_v8  ;;  %v5150_v11 = vpop.xlane.xlu1 %5149 }
 0x8ef   : > { %v5220_v4 = vsub.f32 %v15973_v22, %v5150_v11 }
 0x8f0   : > { %v5262_v5 = vmul.f32 1.442695, %v5219_v6 }
 0x8f1   : > { %v5153_v53 = vpop.xlane.xlu0 %5152 }
 0x8f2   : > { %13121 = vpow2.f32 %v5262_v5  ;;  %v5221_v46 = vsub.f32 %v15975_v60, %v5153_v53  ;;  %v5156_v49 = vpop.xlane.xlu1 %5155  ;;  %v5264_v5 = vmul.f32 1.442695, %v5220_v4 }
 0x8f3   : > { %v5222_v27 = vsub.f32 %v15981_v37, %v5156_v49  ;;  %13123 = vpow2.f32 %v5260_v45 }
 0x8f4   : > { %v16116_v26 = vpop.eup %13117  ;;  %v5266_v36 = vmul.f32 1.442695, %v5221_v46 }
 0x8f5   : > { %v5268_v35 = vmul.f32 1.442695, %v5222_v27  ;;  %v5159_v38 = vpop.xlane.xlu0 %5158  ;;  %v5331_v7 = vsel %vm1847_vm4, %v16116_v26, 0.0 }
 0x8f6   : > { %5332 = vadd.xlane.f32.xlu0 %v5331_v7  ;;  %v5223_v60 = vsub.f32 %v15983_v33, %v5159_v38 }
 0x8f7   : > { %13125 = vpow2.f32 %v5268_v35 }
 0x8f8   : > { %v16121_v48 = vpop.eup %13119  ;;  %13127 = vpow2.f32 %v5266_v36  ;;  %v5270_v54 = vmul.f32 1.442695, %v5223_v60 }
 0x8f9   : > { %v5328_v37 = vsel %vm1847_vm4, %v16121_v48, 0.0  ;;  %13129 = vpow2.f32 %v5264_v5 }
 0x8fa   : > { %5329 = vadd.xlane.f32.xlu0 %v5328_v37  ;;  %13131 = vpow2.f32 %v5270_v54 }
 0x8fc   : > { %v5165_v58 = vpop.xlane.xlu0 %5164  ;;  %v16126_v22 = vpop.eup %13121 }
 0x8fd   : > { %v5225_v8 = vsub.f32 %v15991_v43, %v5165_v58  ;;  %v5162_v6 = vpop.xlane.xlu1 %5161  ;;  %v5337_v45 = vsel %vm1847_vm4, %v16126_v22, 0.0  ;;  %v16132_v53 = vpop.eup %13123 }
 0x8fe   : > { %v5224_v11 = vsub.f32 %v15993_v25, %v5162_v6  ;;  %5338 = vadd.xlane.f32.xlu0 %v5337_v45  ;;  %v5334_v25 = vsel %vm1847_vm4, %v16132_v53, 0.0 }
 0x8ff   : > { %v5274_v49 = vmul.f32 1.442695, %v5225_v8 }
 0x900   : > { %v5272_v33 = vmul.f32 1.442695, %v5224_v11  ;;  %v5171_v46 = vpop.xlane.xlu0 %5170 }
 0x901   : > { %v5227_v27 = vsub.f32 %v15999_v28, %v5171_v46  ;;  %v5168_v4 = vpop.xlane.xlu1 %5167  ;;  %v16135_v36 = vpop.eup %13125 }
 0x902   : > { %13133 = vpow2.f32 %v5272_v33  ;;  %v5226_v43 = vsub.f32 %v16001_v41, %v5168_v4  ;;  %v16140_v35 = vpop.eup %13127  ;;  %5335 = vadd.xlane.f32.xlu0 %v5334_v25  ;;  %v5346_v38 = vsel %vm1847_vm4, %v16135_v36, 0.0 }
 0x903   : > { %5347 = vadd.xlane.f32.xlu1 %v5346_v38  ;;  %13135 = vpow2.f32 %v5274_v49  ;;  %v5278_v28 = vmul.f32 1.442695, %v5227_v27  ;;  %v5343_v58 = vsel %vm1847_vm4, %v16140_v35, 0.0  ;;  %v16148_v54 = vpop.eup %13129 }
 0x904   : > { %v5276_v7 = vmul.f32 1.442695, %v5226_v43  ;;  %v5177_v5 = vpop.xlane.xlu0 %5176  ;;  %v5340_v46 = vsel %vm1847_vm4, %v16148_v54, 0.0 }
 0x905   : > { %v5229_v60 = vsub.f32 %v16007_v52, %v5177_v5  ;;  %v5174_v37 = vpop.xlane.xlu1 %5173 }
 0x906   : > { %13137 = vpow2.f32 %v5276_v7  ;;  %v5228_v41 = vsub.f32 %v16009_v56, %v5174_v37  ;;  %5344 = vadd.xlane.f32.xlu0 %v5343_v58  ;;  %v16154_v56 = vpop.eup %13131 }
 0x907   : > { %v5282_v8 = vmul.f32 1.442695, %v5229_v60  ;;  %13139 = vpow2.f32 %v5278_v28  ;;  %v5349_v7 = vsel %vm1847_vm4, %v16154_v56, 0.0 }
 0x908   : > { %v5280_v6 = vmul.f32 1.442695, %v5228_v41  ;;  %v5183_v11 = vpop.xlane.xlu0 %5182 }
 0x909   : > { %v5231_v45 = vsub.f32 %v16015_v57, %v5183_v11  ;;  %v5180_v33 = vpop.xlane.xlu1 %5179 }
 0x90a   : > { %13141 = vpow2.f32 %v5280_v6  ;;  %v5230_v52 = vsub.f32 %v16017_v3, %v5180_v33  ;;  %5341 = vadd.xlane.f32.xlu0 %v5340_v46 }
 0x90b   : > { %v5286_v49 = vmul.f32 1.442695, %v5231_v45  ;;  %13143 = vpow2.f32 %v5282_v8 }
 0x90c   : > { %v16156_v27 = vpop.eup %13133  ;;  %v5189_v4 = vpop.xlane.xlu0 %5188  ;;  %v5284_v43 = vmul.f32 1.442695, %v5230_v52 }
 0x90d   : > { %13145 = vpow2.f32 %v5286_v49  ;;  %v5233_v25 = vsub.f32 %v16019_v40, %v5189_v4  ;;  %v5186_v57 = vpop.xlane.xlu1 %5185  ;;  %v5352_v38 = vsel %vm1847_vm4, %v16156_v27, 0.0  ;;  %v16164_v5 = vpop.eup %13135 }
 0x90e   : > { %v5232_v3 = vsub.f32 %v16023_v1, %v5186_v57  ;;  %5353 = vadd.xlane.f32.xlu1 %v5352_v38  ;;  %5350 = vadd.xlane.f32.xlu0 %v5349_v7  ;;  %13147 = vpow2.f32 %v5284_v43  ;;  %v5355_v1 = vsel %vm1847_vm4, %v16164_v5, 0.0  ;;  %v6066_v38 = vmul.f32 %v15642_v16, %v18354_v19 }
 0x90f   : > { %v5290_v37 = vmul.f32 1.442695, %v5233_v25 }
 0x910   : > { %v16166_v28 = vpop.eup %13137  ;;  %v5288_v60 = vmul.f32 1.442695, %v5232_v3  ;;  %v6067_v3 = vmul.f32 %v15642_v16, %v18355_v21 }
 0x911   : > { %v5358_v40 = vsel %vm1847_vm4, %v16166_v28, 0.0  ;;  %v16172_v41 = vpop.eup %13139 }
 0x912   : > { %13149 = vpow2.f32 %v5288_v60  ;;  %5359 = vadd.xlane.f32.xlu1 %v5358_v40  ;;  %5356 = vadd.xlane.f32.xlu0 %v5355_v1  ;;  %v5361_v11 = vsel %vm1847_vm4, %v16172_v41, 0.0  ;;  %v12800_v7 = vpack.i.bf16 %v6067_v3, %v6066_v38  ;;  %v6058_v60 = vmul.f32 %v15642_v16, %v14029_v10  ;;  %v5195_v40 = vpop.xlane.xlu0 %5194 }
 0x913   : > { %13151 = vpow2.f32 %v5290_v37  ;;  %v6059_v37 = vmul.f32 %v15642_v16, %v18347_v9 }
 0x914   : > { %v16174_v58 = vpop.eup %13141 }
 0x915   : > { %v5364_v8 = vsel %vm1847_vm4, %v16174_v58, 0.0  ;;  %v16178_v6 = vpop.eup %13143  ;;  %v12795_v1 = vpack.i.bf16 %v6059_v37, %v6058_v60 }
 0x916   : > { %5365 = vadd.xlane.f32.xlu1 %v5364_v8  ;;  %5362 = vadd.xlane.f32.xlu0 %v5361_v11  ;;  %v5367_v52 = vsel %vm1847_vm4, %v16178_v6, 0.0  ;;  %v5201_v8 = vpop.xlane.xlu0 %5200  ;;  %v16210_v11 = vpop.permute.xlu1 %12791 }
 0x917   : > { %v16182_v45 = vpop.eup %13145 }
 0x918   : > { %v5373_v33 = vsel %vm1847_vm4, %v16182_v45, 0.0  ;;  %v16188_v46 = vpop.eup %13147 }
 0x919   : > { %v5370_v43 = vsel %vm1847_vm4, %v16188_v46, 0.0 }
 0x91a   : > { %5374 = vadd.xlane.f32.xlu1 %v5373_v33  ;;  %5368 = vadd.xlane.f32.xlu0 %v5367_v52  ;;  %v5237_v33 = vsub.f32 %v16033_v59, %v5201_v8  ;;  %v5235_v52 = vsub.f32 %v16027_v61, %v5195_v40 }
 0x91c   : > { %v16190_v49 = vpop.eup %13149  ;;  %v5298_v38 = vmul.f32 1.442695, %v5237_v33 }
 0x91d   : > { %v5376_v4 = vsel %vm1847_vm4, %v16190_v49, 0.0  ;;  %v16196_v25 = vpop.eup %13151 }
 0x91e   : > { %5377 = vadd.xlane.f32.xlu1 %v5376_v4  ;;  %5371 = vadd.xlane.f32.xlu0 %v5370_v43  ;;  %v5379_v57 = vsel %vm1847_vm4, %v16196_v25, 0.0  ;;  %v5207_v43 = vpop.xlane.xlu0 %5206 }
 0x91f   : > { %v5239_v21 = vsub.f32 %v16037_v39, %v5207_v43 }
 0x922   : > { %5380 = vadd.xlane.f32.xlu0 %v5379_v57 }
 0x92f   : > { %12801 = vrot.lane.b32.xlu1 %v12800_v7, %s13491_s29  ;;  %v5294_v7 = vmul.f32 1.442695, %v5235_v52 }
 0x938   : > { %12796 = vrot.lane.b32.xlu0 %v12795_v1, %s13491_s29  ;;  %v5302_v1 = vmul.f32 1.442695, %v5239_v21 }
 0x942   : > { %v5192_v4 = vpop.xlane.xlu1 %5191 }
 0x943   : > { %v5234_v57 = vsub.f32 %v16056_v13, %v5192_v4 }
 0x945   : > { %v5292_v3 = vmul.f32 1.442695, %v5234_v57 }
 0x946   : > { %v5198_v19 = vpop.xlane.xlu1 %5197 }
 0x947   : > { %13153 = vpow2.f32 %v5292_v3  ;;  %v5236_v60 = vsub.f32 %v16060_v32, %v5198_v19 }
 0x948   : > { %13155 = vpow2.f32 %v5298_v38 }
 0x949   : > { %v5296_v37 = vmul.f32 1.442695, %v5236_v60  ;;  %13157 = vpow2.f32 %v5294_v7 }
 0x94a   : > { %v5204_v59 = vpop.xlane.xlu1 %5203 }
 0x94b   : > { %v5238_v61 = vsub.f32 %v16066_v50, %v5204_v59  ;;  %13159 = vpow2.f32 %v5296_v37 }
 0x94c   : > { %13161 = vpow2.f32 %v5302_v1 }
 0x94d   : > { %v5300_v40 = vmul.f32 1.442695, %v5238_v61 }
 0x94f   : > { %13163 = vpow2.f32 %v5300_v40 }
 0x951   : > { %v16218_v13 = vpop.eup %13153  ;;  %v5309_v8 = vpop.xlane.xlu0 %5308 }
 0x952   : > { %v5382_v39 = vsel %vm1847_vm4, %v16218_v13, 0.0  ;;  %v16222_v33 = vpop.eup %13155  ;;  %13165 = vrcp.f32 %v5309_v8 }
 0x953   : > { %5383 = vadd.xlane.f32.xlu1 %v5382_v39  ;;  %v16224_v32 = vpop.eup %13157  ;;  %v5391_v21 = vsel %vm1847_vm4, %v16222_v33, 0.0 }
 0x954   : > { %v5385_v4 = vsel %vm1847_vm4, %v16224_v32, 0.0 }
 0x955   : > { %v5306_v19 = vpop.xlane.xlu0 %5305  ;;  %v16228_v50 = vpop.eup %13159 }
 0x956   : > { %13167 = vrcp.f32 %v5306_v19  ;;  %v5312_v52 = vpop.xlane.xlu1 %5311  ;;  %v16232_v43 = vpop.eup %13161  ;;  %v5388_v38 = vsel %vm1847_vm4, %v16228_v50, 0.0 }
 0x957   : > { %5392 = vadd.xlane.f32.xlu1 %v5391_v21  ;;  %13169 = vrcp.f32 %v5312_v52  ;;  %5386 = vadd.xlane.f32.xlu0 %v5385_v4  ;;  %v5397_v3 = vsel %vm1847_vm4, %v16232_v43, 0.0 }
 0x959   : > { %v5315_v57 = vpop.xlane.xlu0 %5314  ;;  %v16238_v7 = vpop.eup %13163 }
 0x95a   : > { %13171 = vrcp.f32 %v5315_v57  ;;  %v5394_v37 = vsel %vm1847_vm4, %v16238_v7, 0.0 }
 0x95b   : > { %5389 = vadd.xlane.f32.xlu1 %v5388_v38  ;;  %5398 = vadd.xlane.f32.xlu0 %v5397_v3  ;;  %v6078_v38 = vmul.f32 %v15642_v16, %v14116_v0 }
 0x95c   : > { %v13166_v1 = vpop.eup %13165 }
 0x95d   : > { %v5321_v60 = vpop.xlane.xlu0 %5320  ;;  %v5433_v39 = vmul.f32 %v13166_v1, %v16076_v55  ;;  %v6077_v55 = vmul.f32 %v15642_v16, %v14102_v51  ;;  %v12768_v1 = vunpack.i.l.bf16 %v16052_v47 }
 0x95e   : > { %13173 = vrcp.f32 %v5321_v60 }
 0x95f   : > { %5395 = vadd.xlane.f32.xlu0 %v5394_v37  ;;  %v12769_v37 = vunpack.i.h.bf16 %v16052_v47  ;;  %v6068_v47 = vmul.f32 %v15642_v16, %v14060_v12 }
 0x960   : > { %v13168_v59 = vpop.eup %13167 }
 0x961   : > { %v13170_v61 = vpop.eup %13169  ;;  %v5318_v40 = vpop.xlane.xlu0 %5317  ;;  %v5432_v8 = vmul.f32 %v13168_v59, %v16081_v30  ;;  %v6076_v30 = vmul.f32 %v15642_v16, %v14105_v42 }
 0x962   : > { %13175 = vrcp.f32 %v5318_v40  ;;  %v5434_v19 = vmul.f32 %v13170_v61, %v16084_v15  ;;  %v6080_v40 = vmul.f32 %v15642_v16, %v14130_v17 }
 0x963   : > { %11282 = vmatprep.mubr.msk.f32.mxu0 %vm1847_vm4, %v5432_v8  ;;  %v12810_v57 = vpack.i.bf16 %v6077_v55, %v6076_v30  ;;  %v6081_v8 = vmul.f32 %v15642_v16, %v14127_v20  ;;  %v18470_v30 = vld [vmem:[#allocation70_spill] sm:$0xff] }
 0x964   : > { %v13172_v21 = vpop.eup %13171  ;;  %11283 = vmatmul.mubr.msk.f32.vlgmr.msra.gmra.mrb[112].mxu0 %vm1847_vm4, %v5433_v39 }
 0x965   : > { %12193 = vmatpush3.bf16.msra.mxu0 %v18245_v14  ;;  %v5327_v52 = vpop.xlane.xlu0 %5326  ;;  %11285 = vmatprep.mubr.msk.f32.mxu0 %vm1847_vm4, %v5434_v19  ;;  %v5435_v4 = vmul.f32 %v13172_v21, %v16088_v44  ;;  %v6079_v44 = vmul.f32 %v15642_v16, %v14113_v34  ;;  %v16279_v19 = vpack.c.bf16 %v12769_v37, %v12768_v1 }
 0x966   : > { %12195 = vmatprep.subr.bf16.mxu0 %v14775_v29  ;;  %13177 = vrcp.f32 %v5327_v52  ;;  %v12830_v21 = vpack.i.bf16 %v6081_v8, %v6080_v40  ;;  %v18435_v52 = vld [vmem:[#allocation61_spill] sm:$0xff]  ;;  %v18440_v8 = vld [vmem:[#allocation58_spill] sm:$0xff] }
 0x967   : > { %v12820_v61 = vpack.i.bf16 %v6079_v44, %v6078_v38  ;;  %v18438_v44 = vld [vmem:[#allocation55_spill] sm:$0xff] }
 0x968   : > { %11286 = vmatmul.mubr.msk.f32.gmra.mrb[114].mxu0 %vm1847_vm4, %v5435_v4  ;;  %v13174_v3 = vpop.eup %13173  ;;  %v6083_v4 = vmul.f32 %v15642_v16, %v18435_v52 }
 0x969   : > { %12197 = vmatpush3.bf16.msra.mxu0 %v14775_v29  ;;  %v5324_v15 = vpop.xlane.xlu0 %5323  ;;  %v5437_v39 = vmul.f32 %v13174_v3, %v16094_v62  ;;  %v6082_v62 = vmul.f32 %v15642_v16, %v18283_v31  ;;  %v6071_v3 = vmul.f32 %v15642_v16, %v18438_v44 }
 0x96a   : > { %12199 = vmatprep.subr.bf16.mxu0 %v14786_v23  ;;  %13179 = vrcp.f32 %v5324_v15 }
 0x96b   : > { %v12840_v1 = vpack.i.bf16 %v6083_v4, %v6082_v62  ;;  %v18443_v4 = vld [vmem:[#allocation59_spill] sm:$0xff] }
 0x96c   : > { %12811 = vrot.lane.b32.xlu1 %v12810_v57, %s13491_s29  ;;  %v13176_v60 = vpop.eup %13175  ;;  %v18437_v57 = vld [vmem:[#allocation56_spill] sm:$0xff] }
 0x96d   : > { %12201 = vmatpush3.bf16.msra.mxu0 %v14786_v23  ;;  %v5436_v59 = vmul.f32 %v13176_v60, %v16098_v24  ;;  %v6069_v24 = vmul.f32 %v15642_v16, %v14057_v2  ;;  %v6070_v38 = vmul.f32 %v15642_v16, %v18437_v57 }
 0x96e   : > { %12203 = vmatprep.subr.bf16.mxu0 %v18322_v63 }
 0x96f   : > { %11288 = vmatprep.mubr.msk.f32.mxu0 %vm1847_vm4, %v5436_v59  ;;  %v12805_v15 = vpack.i.bf16 %v6069_v24, %v6068_v47  ;;  %v18439_v59 = vld [vmem:[#allocation106_spill] sm:$0xff]  ;;  %v12815_v40 = vpack.i.bf16 %v6071_v3, %v6070_v38  ;;  %v18441_v47 = vld [vmem:[#allocation57_spill] sm:$0xff] }
 0x970   : > { %12821 = vrot.lane.b32.xlu1 %v12820_v61, %s13491_s29  ;;  %11289 = vmatmul.mubr.msk.f32.gmra.mrb[116].mxu0 %vm1847_vm4, %v5437_v39  ;;  %v13178_v55 = vpop.eup %13177  ;;  %v6072_v39 = vmul.f32 %v15642_v16, %v18440_v8  ;;  %v6073_v24 = vmul.f32 %v15642_v16, %v18441_v47 }
 0x971   : > { %12205 = vmatpush3.bf16.msra.mxu0 %v18322_v63  ;;  %v5439_v61 = vmul.f32 %v13178_v55, %v18439_v59  ;;  %v6075_v55 = vmul.f32 %v15642_v16, %v18443_v4 }
 0x972   : > { %12224 = vmatprep.subr.msk.bf16.mxu0 %vm14202_vm3, %v16279_v19 }
 0x974   : > { %12831 = vrot.lane.b32.xlu1 %v12830_v21, %s13491_s29  ;;  %v13180_v60 = vpop.eup %13179  ;;  %v12825_v21 = vpack.i.bf16 %v6073_v24, %v6072_v39  ;;  %v18444_v24 = vld [vmem:[#allocation74_spill] sm:$0xff] }
 0x975   : > { %12806 = vrot.lane.b32.xlu0 %v12805_v15, %s13491_s29  ;;  %v5438_v37 = vmul.f32 %v13180_v60, %v16106_v18  ;;  %v18442_v18 = vld [vmem:[#allocation60_spill] sm:$0xff] }
 0x976   : > { %v6074_v62 = vmul.f32 %v15642_v16, %v18442_v18 }
 0x977   : > { %11291 = vmatprep.mubr.msk.f32.mxu0 %vm1847_vm4, %v5438_v37 }
 0x978   : > { %12841 = vrot.lane.b32.xlu1 %v12840_v1, %s13491_s29  ;;  %11292 = vmatmul.mubr.msk.f32.gmra.mrb[118].mxu0 %vm1847_vm4, %v5439_v61  ;;  %v12835_v15 = vpack.i.bf16 %v6075_v55, %v6074_v62  ;;  %v18445_v62 = vld [vmem:[#allocation77_spill] sm:$0xff] }
 0x979   : > { %12816 = vrot.lane.b32.xlu0 %v12815_v40, %s13491_s29 }
 0x97d   : > { %12826 = vrot.lane.b32.xlu0 %v12825_v21, %s13491_s29 }
 0x981   : > { %12836 = vrot.lane.b32.xlu0 %v12835_v15, %s13491_s29  ;;  %s9305_s29 = sshll.u32 %s17820_s27, 4  ;;  %s17888_s29 = int_to_ptr.vmem [resolvable:$true] %s9305_s29 }
 0x982   : > { %s13426_s21 = scalar_lea.vmem %s17888_s29, 4096  ;;  %p13433_p0 = scmp.lt.s32.totalorder %s17888_s29, %s13431_s23 }
 0x983   : > { %v5333_v38 = vpop.xlane.xlu0 %5332  ;;  %p13427_p11 = scmp.ne.s32.totalorder %s17888_s29, %s13426_s21  ;;  %p13434_p1 = scmp.lt.s32.totalorder %s13432_s24, %s13426_s21 }
 0x984   : > { %13181 = vrcp.f32 %v5333_v38 }
 0x985   : > { %p13428_p12 = pnand %p13427_p11, %p13587_p5  ;;  %p13435_p2 = por %p13434_p1, %p13433_p0 }
 0x987   : > { %v5330_v3 = vpop.xlane.xlu0 %5329  ;;  %p13429_p13 = pneg %p13428_p12 }
 0x988   : > { %13183 = vrcp.f32 %v5330_v3  ;;  %v18446_v3 = vld [vmem:[#allocation73_spill] sm:$0xff] }
 0x989   : > { %p13436_p3 = pnand %p13435_p2, %p13429_p13 }
 0x98b   : > { %v5339_v60 = vpop.xlane.xlu0 %5338 }
 0x98c   : > { %13185 = vrcp.f32 %v5339_v60 }
 0x98e   : > { %v13182_v1 = vpop.eup %13181 }
 0x98f   : > { %v5336_v37 = vpop.xlane.xlu0 %5335  ;;  %v5441_v16 = vmul.f32 %v13182_v1, %v16116_v26 }
 0x990   : > { %13187 = vrcp.f32 %v5336_v37  ;;  %v5348_v61 = vpop.xlane.xlu1 %5347  ;;  %v18447_v37 = vld [vmem:[#allocation102_spill] sm:$0xff] }
 0x991   : > { %13189 = vrcp.f32 %v5348_v61  ;;  %v12774_v1 = vunpack.i.h.bf16 %v18447_v37 }
 0x992   : > { %v13184_v59 = vpop.eup %13183 }
 0x993   : > { %v5345_v40 = vpop.xlane.xlu0 %5344  ;;  %v5440_v39 = vmul.f32 %v13184_v59, %v16121_v48  ;;  %v12773_v59 = vunpack.i.l.bf16 %v18447_v37 }
 0x994   : > { %13191 = vrcp.f32 %v5345_v40 }
 0x995   : > { %11310 = vmatprep.mubr.msk.f32.mxu1 %vm1847_vm4, %v5440_v39 }
 0x996   : > { %11311 = vmatmul.mubr.msk.f32.vlgmr.msra.gmra.mrb[112].mxu1 %vm1847_vm4, %v5441_v16  ;;  %v13186_v55 = vpop.eup %13185 }
 0x997   : > { %12209 = vmatpush3.bf16.msra.mxu1 %v18444_v24  ;;  %v5342_v21 = vpop.xlane.xlu0 %5341  ;;  %v5443_v60 = vmul.f32 %v13186_v55, %v16126_v22  ;;  %v16328_v22 = vpack.c.bf16 %v12774_v1, %v12773_v59 }
 0x998   : > { %12211 = vmatprep.subr.bf16.mxu1 %v18445_v62  ;;  %13193 = vrcp.f32 %v5342_v21 }
 0x99a   : > { %v13188_v15 = vpop.eup %13187 }
 0x99b   : > { %v5354_v38 = vpop.xlane.xlu1 %5353  ;;  %12213 = vmatpush3.bf16.msra.mxu1 %v18445_v62  ;;  %v5351_v48 = vpop.xlane.xlu0 %5350  ;;  %v5442_v26 = vmul.f32 %v13188_v15, %v16132_v53  ;;  %v18448_v53 = vld [vmem:[#allocation82_spill] sm:$0xff] }
 0x99c   : > { %13195 = vrcp.f32 %v5354_v38  ;;  %12215 = vmatprep.subr.bf16.mxu1 %v18446_v3  ;;  %v13190_v39 = vpop.eup %13189 }
 0x99d   : > { %13197 = vrcp.f32 %v5351_v48  ;;  %11313 = vmatprep.mubr.msk.f32.mxu1 %vm1847_vm4, %v5442_v26 }
 0x99e   : > { %11314 = vmatmul.mubr.msk.f32.gmra.mrb[114].mxu1 %vm1847_vm4, %v5443_v60  ;;  %v13192_v16 = vpop.eup %13191  ;;  %v5446_v60 = vmul.f32 %v13190_v39, %v16135_v36 }
 0x99f   : > { %v5360_v61 = vpop.xlane.xlu1 %5359  ;;  %12217 = vmatpush3.bf16.msra.mxu1 %v18446_v3  ;;  %v5357_v40 = vpop.xlane.xlu0 %5356  ;;  %v5445_v48 = vmul.f32 %v13192_v16, %v16140_v35 }
 0x9a0   : > { %13199 = vrcp.f32 %v5360_v61  ;;  %12219 = vmatprep.subr.bf16.mxu1 %v18448_v53 }
 0x9a1   : > { %13201 = vrcp.f32 %v5357_v40  ;;  %v18449_v40 = vld [vmem:[#allocation103_spill] sm:$0xff] }
 0x9a2   : > { %v13194_v21 = vpop.eup %13193  ;;  %v12779_v16 = vunpack.i.h.bf16 %v18449_v40 }
 0x9a3   : > { %v5366_v55 = vpop.xlane.xlu1 %5365  ;;  %12221 = vmatpush3.bf16.msra.mxu1 %v18448_v53  ;;  %v5363_v15 = vpop.xlane.xlu0 %5362  ;;  %v5444_v38 = vmul.f32 %v13194_v21, %v16148_v54  ;;  %v12778_v21 = vunpack.i.l.bf16 %v18449_v40 }
 0x9a4   : > { %13203 = vrcp.f32 %v5366_v55  ;;  %12248 = vmatprep.subr.msk.bf16.mxu1 %vm14202_vm3, %v16328_v22 }
 0x9a5   : > { %13205 = vrcp.f32 %v5363_v15  ;;  %11316 = vmatprep.mubr.msk.f32.mxu1 %vm1847_vm4, %v5444_v38  ;;  %v12228_v38 = vpack.c.bf16 %v12779_v16, %v12778_v21  ;;  %v18451_v21 = vld [vmem:[#allocation105_spill] sm:$0xff] }
 0x9a6   : > { %v13196_v26 = vpop.eup %13195  ;;  %11317 = vmatmul.mubr.msk.f32.gmra.mrb[116].mxu1 %vm1847_vm4, %v5445_v48 }
 0x9a7   : > { %v13198_v37 = vpop.eup %13197  ;;  %v5375_v1 = vpop.xlane.xlu1 %5374  ;;  %v5448_v59 = vmul.f32 %v13196_v26, %v16156_v27  ;;  %11319 = vmatprep.mubr.msk.f32.mxu1 %vm1847_vm4, %v5446_v60  ;;  %v18450_v60 = vld [vmem:[#allocation104_spill] sm:$0xff] }
 0x9a8   : > { %v5369_v61 = vpop.xlane.xlu0 %5368  ;;  %v5447_v54 = vmul.f32 %v13198_v37, %v16154_v56  ;;  %v12789_v37 = vunpack.i.h.bf16 %v18450_v60 }
 0x9a9   : > { %13207 = vrcp.f32 %v5369_v61  ;;  %11338 = vmatprep.mubr.msk.f32.mxu0 %vm1847_vm4, %v5448_v59 }
 0x9aa   : > { %v13200_v35 = vpop.eup %13199  ;;  %13209 = vrcp.f32 %v5375_v1  ;;  %11320 = vmatmul.mubr.msk.f32.gmra.mrb[118].mxu1 %vm1847_vm4, %v5447_v54  ;;  %v12788_v1 = vunpack.i.l.bf16 %v18450_v60  ;;  %v18453_v60 = vld [vmem:[#allocation40_spill] sm:$0xff] }
 0x9ab   : > { %v13202_v36 = vpop.eup %13201  ;;  %v5378_v39 = vpop.xlane.xlu1 %5377  ;;  %v5450_v56 = vmul.f32 %v13200_v35, %v16166_v28 }
 0x9ac   : > { %v5449_v27 = vmul.f32 %v13202_v36, %v16164_v5  ;;  %13211 = vrcp.f32 %v5378_v39  ;;  %v5372_v55 = vpop.xlane.xlu0 %5371  ;;  %v12234_v35 = vpack.c.bf16 %v12789_v37, %v12788_v1  ;;  %v12784_v36 = vunpack.i.h.bf16 %v18451_v21  ;;  %v18454_v37 = vld [vmem:[#allocation43_spill] sm:$0xff] }
 0x9ad   : > { %13213 = vrcp.f32 %v5372_v55  ;;  %v12783_v39 = vunpack.i.l.bf16 %v18451_v21  ;;  %v18456_v1 = vld [vmem:[#allocation47_spill] sm:$0xff] }
 0x9ae   : > { %v13204_v15 = vpop.eup %13203  ;;  %11339 = vmatmul.mubr.msk.f32.vlgmr.msra.gmra.mrb[120].mxu0 %vm1847_vm4, %v5449_v27 }
 0x9af   : > { %v13206_v48 = vpop.eup %13205  ;;  %12227 = vmatpush3.bf16.xpose.msk.msra.mxu0 %vm14202_vm3, %v16279_v19  ;;  %11341 = vmatprep.mubr.msk.f32.mxu0 %vm1847_vm4, %v5450_v56  ;;  %v5452_v28 = vmul.f32 %v13204_v15, %v16174_v58  ;;  %v18452_v15 = vld [vmem:[#allocation41_spill] sm:$0xff] }
 0x9b0   : > { %12230 = vmatprep.subr.msk.bf16.mxu0 %vm14202_vm3, %v12228_v38  ;;  %v5381_v5 = vpop.xlane.xlu0 %5380  ;;  %v5451_v26 = vmul.f32 %v13206_v48, %v16172_v41 }
 0x9b1   : > { %13215 = vrcp.f32 %v5381_v5  ;;  %v12802_v5 = vpop.permute.xlu1 %12801 }
 0x9b2   : > { %11342 = vmatmul.mubr.msk.f32.gmra.mrb[122].mxu0 %vm1847_vm4, %v5451_v26  ;;  %v12803_v26 = vunpack.i.l.bf16 %v12802_v5 }
 0x9b3   : > { %v13208_v59 = vpop.eup %13207  ;;  %11344 = vmatprep.mubr.msk.f32.mxu0 %vm1847_vm4, %v5452_v28 }
 0x9b4   : > { %v5453_v19 = vmul.f32 %v13208_v59, %v16178_v6  ;;  %v13210_v61 = vpop.eup %13209  ;;  %v12797_v40 = vpop.permute.xlu0 %12796  ;;  %v18457_v59 = vld [vmem:[#allocation46_spill] sm:$0xff] }
 0x9b5   : > { %v5455_v6 = vmul.f32 %v13210_v61, %v16182_v45  ;;  %v12799_v27 = vunpack.i.h.bf16 %v12797_v40  ;;  %v12798_v55 = vunpack.i.l.bf16 %v12797_v40  ;;  %v12794_v45 = vunpack.i.h.bf16 %v16210_v11 }
 0x9b6   : > { %v13212_v54 = vpop.eup %13211  ;;  %11345 = vmatmul.mubr.msk.f32.gmra.mrb[124].mxu0 %vm1847_vm4, %v5453_v19 }
 0x9b7   : > { %v13214_v41 = vpop.eup %13213  ;;  %12233 = vmatpush3.bf16.xpose.msk.msra.mxu0 %vm14202_vm3, %v12228_v38  ;;  %v5456_v58 = vmul.f32 %v13212_v54, %v16190_v49  ;;  %v12240_v38 = vpack.c.bf16 %v12799_v27, %v12798_v55 }
 0x9b8   : > { %12236 = vmatprep.subr.msk.bf16.mxu0 %vm14202_vm3, %v12234_v35  ;;  %v5454_v16 = vmul.f32 %v13214_v41, %v16188_v46  ;;  %v12252_v46 = vpack.c.bf16 %v12784_v36, %v12783_v39 }
 0x9b9   : > { %11366 = vmatprep.mubr.msk.f32.mxu1 %vm1847_vm4, %v5456_v58 }
 0x9ba   : > { %11347 = vmatprep.mubr.msk.f32.mxu0 %vm1847_vm4, %v5454_v16 }
 0x9bb   : > { %v13216_v56 = vpop.eup %13215  ;;  %11348 = vmatmul.mubr.msk.f32.gmra.mrb[126].mxu0 %vm1847_vm4, %v5455_v6 }
 0x9bc   : > { %v5457_v49 = vmul.f32 %v13216_v56, %v16196_v25  ;;  %11394 = vmatprep.mubr.msk.f32.mxu0 %vm777_vm2, %v18452_v15  ;;  %v12793_v25 = vunpack.i.l.bf16 %v16210_v11  ;;  %v18455_v11 = vld [vmem:[#allocation42_spill] sm:$0xff] }
 0x9be   : > { %11367 = vmatmul.mubr.msk.f32.vlgmr.msra.gmra.mrb[120].mxu1 %vm1847_vm4, %v5457_v49  ;;  %v12258_v48 = vpack.c.bf16 %v12794_v45, %v12793_v25 }
 0x9bf   : > { %12239 = vmatpush3.bf16.xpose.msk.msra.mxu0 %vm14202_vm3, %v12234_v35  ;;  %12251 = vmatpush3.bf16.xpose.msk.msra.mxu1 %vm14202_vm3, %v16328_v22  ;;  %v12804_v22 = vunpack.i.h.bf16 %v12802_v5 }
 0x9c0   : > { %12242 = vmatprep.subr.msk.bf16.mxu0 %vm14202_vm3, %v12240_v38  ;;  %12254 = vmatprep.subr.msk.bf16.mxu1 %vm14202_vm3, %v12252_v46 }
 0x9c1   : > { %v12264_v28 = vpack.c.bf16 %v12804_v22, %v12803_v26 }
 0x9c7   : > { %12245 = vmatpush3.bf16.xpose.msk.msra.mxu0 %vm14202_vm3, %v12240_v38  ;;  %12257 = vmatpush3.bf16.xpose.msk.msra.mxu1 %vm14202_vm3, %v12252_v46 }
 0x9c8   : > { %12260 = vmatprep.subr.msk.bf16.mxu1 %vm14202_vm3, %v12258_v48 }
 0x9ce   : > { %11395 = vmatmul.mubr.msk.f32.vlgmr.msra.gmra.mrb[128].mxu0 %vm777_vm2, %v18453_v60 }
 0x9cf   : > { %11397 = vmatprep.mubr.msk.f32.mxu0 %vm777_vm2, %v18454_v37  ;;  %12263 = vmatpush3.bf16.xpose.msk.msra.mxu1 %vm14202_vm3, %v12258_v48 }
 0x9d0   : > { %12266 = vmatprep.subr.msk.bf16.mxu1 %vm14202_vm3, %v12264_v28 }
 0x9d2   : > { %11398 = vmatmul.mubr.msk.f32.gmra.mrb[130].mxu0 %vm777_vm2, %v18455_v11 }
 0x9d3   : > { %11400 = vmatprep.mubr.msk.f32.mxu0 %vm777_vm2, %v18456_v1  ;;  %v18458_v1 = vld [vmem:[#allocation45_spill] sm:$0xff] }
 0x9d6   : > { %11401 = vmatmul.mubr.msk.f32.gmra.mrb[132].mxu0 %vm777_vm2, %v18457_v59 }
 0x9d7   : > { %11403 = vmatprep.mubr.msk.f32.mxu0 %vm777_vm2, %v14029_v10  ;;  %12269 = vmatpush3.bf16.xpose.msk.msra.mxu1 %vm14202_vm3, %v12264_v28 }
 0x9da   : > { %11404 = vmatmul.mubr.msk.f32.gmra.mrb[134].mxu0 %vm777_vm2, %v18347_v9 }
 0x9db   : > { %11450 = vmatprep.mubr.msk.f32.mxu0 %vm777_vm2, %v14060_v12 }
 0x9e0   : > { %v5384_v19 = vpop.xlane.xlu1 %5383 }
 0x9e1   : > { %13217 = vrcp.f32 %v5384_v19 }
 0x9e4   : > { %v5393_v61 = vpop.xlane.xlu1 %5392  ;;  %v5387_v54 = vpop.xlane.xlu0 %5386 }
 0x9e5   : > { %13219 = vrcp.f32 %v5387_v54  ;;  %v18460_v54 = vld [vmem:[#allocation49_spill] sm:$0xff] }
 0x9e6   : > { %13221 = vrcp.f32 %v5393_v61  ;;  %v18459_v61 = vld [vmem:[#allocation44_spill] sm:$0xff] }
 0x9e8   : > { %v5390_v35 = vpop.xlane.xlu1 %5389  ;;  %v5399_v41 = vpop.xlane.xlu0 %5398 }
 0x9e9   : > { %13223 = vrcp.f32 %v5390_v35 }
 0x9ea   : > { %13225 = vrcp.f32 %v5399_v41 }
 0x9eb   : > { %v13218_v40 = vpop.eup %13217 }
 0x9ec   : > { %v12812_v10 = vpop.permute.xlu1 %12811  ;;  %v5458_v58 = vmul.f32 %v13218_v40, %v16218_v13  ;;  %v5396_v9 = vpop.xlane.xlu0 %5395 }
 0x9ed   : > { %v12814_v16 = vunpack.i.h.bf16 %v12812_v10  ;;  %v12813_v6 = vunpack.i.l.bf16 %v12812_v10  ;;  %13227 = vrcp.f32 %v5396_v9 }
 0x9ee   : > { %11369 = vmatprep.mubr.msk.f32.mxu1 %vm1847_vm4, %v5458_v58  ;;  %v18461_v58 = vld [vmem:[#allocation48_spill] sm:$0xff] }
 0x9ef   : > { %v12294_v12 = vpack.c.bf16 %v12814_v16, %v12813_v6  ;;  %v13220_v21 = vpop.eup %13219  ;;  %v18462_v16 = vld [vmem:[#allocation52_spill] sm:$0xff] }
 0x9f0   : > { %v12807_v36 = vpop.permute.xlu0 %12806  ;;  %v5459_v39 = vmul.f32 %v13220_v21, %v16224_v32  ;;  %v13222_v27 = vpop.eup %13221 }
 0x9f1   : > { %12296 = vmatprep.subr.msk.bf16.mxu1 %vm14202_vm3, %v12294_v12  ;;  %v12809_v55 = vunpack.i.h.bf16 %v12807_v36  ;;  %v12808_v56 = vunpack.i.l.bf16 %v12807_v36  ;;  %v5461_v38 = vmul.f32 %v13222_v27, %v16222_v33  ;;  %v12822_v22 = vpop.permute.xlu1 %12821  ;;  %v18464_v36 = vld [vmem:[#allocation54_spill] sm:$0xff] }
 0x9f2   : > { %11370 = vmatmul.mubr.msk.f32.gmra.mrb[122].mxu1 %vm1847_vm4, %v5459_v39  ;;  %v12824_v37 = vunpack.i.h.bf16 %v12822_v22  ;;  %v12823_v11 = vunpack.i.l.bf16 %v12822_v22 }
 0x9f3   : > { %v13224_v49 = vpop.eup %13223  ;;  %v12270_v13 = vpack.c.bf16 %v12809_v55, %v12808_v56  ;;  %v18465_v55 = vld [vmem:[#allocation53_spill] sm:$0xff] }
 0x9f4   : > { %v5460_v15 = vmul.f32 %v13224_v49, %v16228_v50  ;;  %v12817_v46 = vpop.permute.xlu0 %12816  ;;  %v13226_v32 = vpop.eup %13225  ;;  %v18466_v49 = vld [vmem:[#allocation65_spill] sm:$0xff] }
 0x9f5   : > { %v12819_v45 = vunpack.i.h.bf16 %v12817_v46  ;;  %v12818_v25 = vunpack.i.l.bf16 %v12817_v46  ;;  %12272 = vmatprep.subr.msk.bf16.mxu0 %vm14202_vm3, %v12270_v13  ;;  %v5463_v60 = vmul.f32 %v13226_v32, %v16232_v43  ;;  %v12832_v43 = vpop.permute.xlu1 %12831  ;;  %v18478_v32 = vld [vmem:[#allocation112_spill] sm:$0xff] }
 0x9f6   : > { %11372 = vmatprep.mubr.msk.f32.mxu1 %vm1847_vm4, %v5460_v15  ;;  %12275 = vmatpush3.bf16.xpose.msk.msra.mxu0 %vm14202_vm3, %v12270_v13  ;;  %v12834_v40 = vunpack.i.h.bf16 %v12832_v43  ;;  %v12833_v10 = vunpack.i.l.bf16 %v12832_v43  ;;  %v18468_v13 = vld [vmem:[#allocation66_spill] sm:$0xff]  ;;  %v18482_v43 = vld [vmem:[#allocation83_spill] sm:$0xff] }
 0x9f7   : > { %11373 = vmatmul.mubr.msk.f32.gmra.mrb[124].mxu1 %vm1847_vm4, %v5461_v38  ;;  %v13228_v48 = vpop.eup %13227  ;;  %v12276_v5 = vpack.c.bf16 %v12819_v45, %v12818_v25  ;;  %v18477_v45 = vld [vmem:[#allocation111_spill] sm:$0xff] }
 0x9f8   : > { %v12827_v50 = vpop.permute.xlu0 %12826  ;;  %v5462_v26 = vmul.f32 %v13228_v48, %v16238_v7  ;;  %v12300_v7 = vpack.c.bf16 %v12824_v37, %v12823_v11  ;;  %v12306_v9 = vpack.c.bf16 %v12834_v40, %v12833_v10 }
 0x9f9   : > { %v12829_v33 = vunpack.i.h.bf16 %v12827_v50  ;;  %v12828_v28 = vunpack.i.l.bf16 %v12827_v50  ;;  %12278 = vmatprep.subr.msk.bf16.mxu0 %vm14202_vm3, %v12276_v5  ;;  %v12842_v21 = vpop.permute.xlu1 %12841 }
 0x9fa   : > { %11375 = vmatprep.mubr.msk.f32.mxu1 %vm1847_vm4, %v5462_v26  ;;  %v12844_v39 = vunpack.i.h.bf16 %v12842_v21  ;;  %v12843_v27 = vunpack.i.l.bf16 %v12842_v21 }
 0x9fb   : > { %11376 = vmatmul.mubr.msk.f32.gmra.mrb[126].mxu1 %vm1847_vm4, %v5463_v60  ;;  %v12282_v59 = vpack.c.bf16 %v12829_v33, %v12828_v28  ;;  %v18479_v33 = vld [vmem:[#allocation113_spill] sm:$0xff]  ;;  %v18480_v60 = vld [vmem:[#allocation51_spill] sm:$0xff] }
 0x9fc   : > { %11422 = vmatprep.mubr.msk.f32.mxu1 %vm777_vm2, %v18458_v1  ;;  %v12837_v19 = vpop.permute.xlu0 %12836  ;;  %v12312_v56 = vpack.c.bf16 %v12844_v39, %v12843_v27  ;;  %v18485_v27 = vld [vmem:[#allocation80_spill] sm:$0xff] }
 0x9fd   : > { %v12839_v35 = vunpack.i.h.bf16 %v12837_v19  ;;  %v12838_v41 = vunpack.i.l.bf16 %v12837_v19 }
 0x9fe   : > { %12281 = vmatpush3.bf16.xpose.msk.msra.mxu0 %vm14202_vm3, %v12276_v5 }
 0x9ff   : > { %11423 = vmatmul.mubr.msk.f32.vlgmr.msra.gmra.mrb[128].mxu1 %vm777_vm2, %v18459_v61  ;;  %12284 = vmatprep.subr.msk.bf16.mxu0 %vm14202_vm3, %v12282_v59  ;;  %v12288_v6 = vpack.c.bf16 %v12839_v35, %v12838_v41 }
 0xa00   : > { %12299 = vmatpush3.bf16.xpose.msk.msra.mxu1 %vm14202_vm3, %v12294_v12  ;;  %11425 = vmatprep.mubr.msk.f32.mxu1 %vm777_vm2, %v18460_v54  ;;  %v18463_v12 = vld [vmem:[#allocation50_spill] sm:$0xff] }
 0xa01   : > { %12302 = vmatprep.subr.msk.bf16.mxu1 %vm14202_vm3, %v12300_v7 }
 0xa03   : > { %11426 = vmatmul.mubr.msk.f32.gmra.mrb[130].mxu1 %vm777_vm2, %v18461_v58  ;;  %v18483_v58 = vld [vmem:[#allocation63_spill] sm:$0xff] }
 0xa04   : > { %11428 = vmatprep.mubr.msk.f32.mxu1 %vm777_vm2, %v18462_v16 }
 0xa06   : > { %12287 = vmatpush3.bf16.xpose.msk.msra.mxu0 %vm14202_vm3, %v12282_v59 }
 0xa07   : > { %11429 = vmatmul.mubr.msk.f32.gmra.mrb[132].mxu1 %vm777_vm2, %v18463_v12  ;;  %12290 = vmatprep.subr.msk.bf16.mxu0 %vm14202_vm3, %v12288_v6 }
 0xa08   : > { %12305 = vmatpush3.bf16.xpose.msk.msra.mxu1 %vm14202_vm3, %v12300_v7  ;;  %11431 = vmatprep.mubr.msk.f32.mxu1 %vm777_vm2, %v18464_v36  ;;  %v18481_v7 = vld [vmem:[#allocation7_spill] sm:$0xff] }
 0xa09   : > { %12308 = vmatprep.subr.msk.bf16.mxu1 %vm14202_vm3, %v12306_v9 }
 0xa0b   : > { %11432 = vmatmul.mubr.msk.f32.gmra.mrb[134].mxu1 %vm777_vm2, %v18465_v55 }
 0xa0c   : > { %11478 = vmatprep.mubr.msk.f32.mxu1 %vm777_vm2, %v14105_v42  ;;  %v18467_v42 = vld [vmem:[#allocation67_spill] sm:$0xff] }
 0xa0e   : > { %12293 = vmatpush3.bf16.xpose.msk.msra.mxu0 %vm14202_vm3, %v12288_v6  ;;  %v18484_v6 = vld [vmem:[#allocation76_spill] sm:$0xff] }
 0xa0f   : > { %12319 = vmatprep.subr.bf16.mxu0 %v18466_v49 }
 0xa10   : > { %12311 = vmatpush3.bf16.xpose.msk.msra.mxu1 %vm14202_vm3, %v12306_v9 }
 0xa11   : > { %12314 = vmatprep.subr.msk.bf16.mxu1 %vm14202_vm3, %v12312_v56 }
 0xa15   : > { %11451 = vmatmul.mubr.msk.f32.vlgmr.msra.gmra.mrb[136].mxu0 %vm777_vm2, %v14057_v2  ;;  %v18469_v2 = vld [vmem:[#allocation68_spill] sm:$0xff] }
 0xa16   : > { %11453 = vmatprep.mubr.msk.f32.mxu0 %vm777_vm2, %v18437_v57  ;;  %12321 = vmatpush3.bf16.msra.mxu0 %v18466_v49  ;;  %v18471_v57 = vld [vmem:[#allocation69_spill] sm:$0xff] }
 0xa17   : > { %12323 = vmatprep.subr.bf16.mxu0 %v18467_v42 }
 0xa18   : > { %12317 = vmatpush3.bf16.xpose.msk.msra.mxu1 %vm14202_vm3, %v12312_v56  ;;  %v18487_v56 = vld [vmem:[#allocation78_spill] sm:$0xff] }
 0xa19   : > { %12335 = vmatprep.subr.bf16.mxu1 %v18468_v13  ;;  %11454 = vmatmul.mubr.msk.f32.gmra.mrb[138].mxu0 %vm777_vm2, %v18438_v44 }
 0xa1a   : > { %11456 = vmatprep.mubr.msk.f32.mxu0 %vm777_vm2, %v18440_v8  ;;  %12325 = vmatpush3.bf16.msra.mxu0 %v18467_v42 }
 0xa1b   : > { %12327 = vmatprep.subr.bf16.mxu0 %v18469_v2 }
 0xa1d   : > { %11457 = vmatmul.mubr.msk.f32.gmra.mrb[140].mxu0 %vm777_vm2, %v18441_v47  ;;  %v18475_v47 = vld [vmem:[#allocation114_spill] sm:$0xff] }
 0xa1e   : > { %11459 = vmatprep.mubr.msk.f32.mxu0 %vm777_vm2, %v18442_v18  ;;  %12329 = vmatpush3.bf16.msra.mxu0 %v18469_v2 }
 0xa1f   : > { %11479 = vmatmul.mubr.msk.f32.vlgmr.msra.gmra.mrb[136].mxu1 %vm777_vm2, %v14102_v51  ;;  %12331 = vmatprep.subr.bf16.mxu0 %v18470_v30  ;;  %v18472_v51 = vld [vmem:[#allocation71_spill] sm:$0xff] }
 0xa20   : > { %11481 = vmatprep.mubr.msk.f32.mxu1 %vm777_vm2, %v14116_v0  ;;  %12337 = vmatpush3.bf16.msra.mxu1 %v18468_v13  ;;  %v18473_v0 = vld [vmem:[#allocation72_spill] sm:$0xff] }
 0xa21   : > { %12339 = vmatprep.subr.bf16.mxu1 %v18471_v57  ;;  %11460 = vmatmul.mubr.msk.f32.gmra.mrb[142].mxu0 %vm777_vm2, %v18443_v4 }
 0xa22   : > { %12333 = vmatpush3.bf16.msra.mxu0 %v18470_v30 }
 0xa23   : > { %11482 = vmatmul.mubr.msk.f32.gmra.mrb[138].mxu1 %vm777_vm2, %v14113_v34  ;;  %12351 = vmatprep.subr.bf16.mxu0 %v18245_v14  ;;  %v18474_v34 = vld [vmem:[#allocation87_spill] sm:$0xff] }
 0xa24   : > { %11484 = vmatprep.mubr.msk.f32.mxu1 %vm777_vm2, %v14130_v17  ;;  %12341 = vmatpush3.bf16.msra.mxu1 %v18471_v57  ;;  %v18489_v57 = vld [vmem:[#allocation79_spill] sm:$0xff] }
 0xa25   : > { %12343 = vmatprep.subr.bf16.mxu1 %v18472_v51 }
 0xa27   : > { %11485 = vmatmul.mubr.msk.f32.gmra.mrb[140].mxu1 %vm777_vm2, %v14127_v20 }
 0xa28   : > { %11487 = vmatprep.mubr.msk.f32.mxu1 %vm777_vm2, %v18283_v31  ;;  %12345 = vmatpush3.bf16.msra.mxu1 %v18472_v51  ;;  %v18476_v31 = vld [vmem:[#allocation110_spill] sm:$0xff] }
 0xa29   : > { %12347 = vmatprep.subr.bf16.mxu1 %v18473_v0 }
 0xa2b   : > { %11488 = vmatmul.mubr.msk.f32.gmra.mrb[142].mxu1 %vm777_vm2, %v18435_v52 }
 0xa2c   : > { %12349 = vmatpush3.bf16.msra.mxu1 %v18473_v0  ;;  %v18491_v0 = vld [vmem:[#allocation81_spill] sm:$0xff] }
 0xa2d   : > { %12367 = vmatprep.subr.bf16.mxu1 %v18444_v24 }
 0xa37   : > { %v11284_v17 = vpop.f32.mrb[112].mxu0 }
 0xa38   : > { %v5981_v44 = vmul.f32 %v11284_v17, %v18474_v34  ;;  %v5554_v8 = vpop.f32.mrb[113].mxu0 }
 0xa39   : > { %v5980_v20 = vmul.f32 %v5554_v8, %v18474_v34 }
 0xa3a   : > { %v16529_v18 = vadd.f32 %v5981_v44, %v18475_v47 }
 0xa3b   : > { %v16532_v4 = vadd.f32 %v5980_v20, %v18476_v31  ;;  %v11287_v15 = vpop.f32.mrb[114].mxu0  ;;  %v18493_v31 = vld [vmem:[#allocation84_spill] sm:$0xff] }
 0xa3c   : > { %v5983_v46 = vmul.f32 %v11287_v15, %v18474_v34  ;;  %v5564_v52 = vpop.f32.mrb[115].mxu0 }
 0xa3d   : > { %v5982_v38 = vmul.f32 %v5564_v52, %v18474_v34  ;;  %v18495_v52 = vld [vmem:[#allocation85_spill] sm:$0xff] }
 0xa3e   : > { %v16537_v25 = vadd.f32 %v5983_v46, %v18477_v45 }
 0xa3f   : > { %v16540_v48 = vadd.f32 %v5982_v38, %v18478_v32 }
 0xa43   : > { %v11290_v5 = vpop.f32.mrb[116].mxu0 }
 0xa44   : > { %v5985_v22 = vmul.f32 %v11290_v5, %v18474_v34  ;;  %v5574_v50 = vpop.f32.mrb[117].mxu0 }
 0xa45   : > { %v5984_v26 = vmul.f32 %v5574_v50, %v18474_v34 }
 0xa46   : > { %v16545_v28 = vadd.f32 %v5985_v22, %v18479_v33  ;;  %v18497_v22 = vld [vmem:[#allocation86_spill] sm:$0xff] }
 0xa47   : > { %v16548_v37 = vadd.f32 %v5984_v26, %v18480_v60  ;;  %v18499_v26 = vld [vmem:[#allocation62_spill] sm:$0xff] }
 0xa4b   : > { %v11293_v11 = vpop.f32.mrb[118].mxu0 }
 0xa4c   : > { %v5987_v1 = vmul.f32 %v11293_v11, %v18474_v34  ;;  %v5584_v59 = vpop.f32.mrb[119].mxu0 }
 0xa4d   : > { %v5986_v19 = vmul.f32 %v5584_v59, %v18474_v34 }
 0xa4e   : > { %v16553_v61 = vadd.f32 %v5987_v1, %v18481_v7 }
 0xa4f   : > { %v16556_v54 = vadd.f32 %v5986_v19, %v18482_v43  ;;  %v18501_v19 = vld [vmem:[#allocation88_spill] sm:$0xff]  ;;  %v18503_v43 = vld [vmem:[#allocation89_spill] sm:$0xff] }
 0xa69   : > { %v11312_v35 = vpop.f32.mrb[112].mxu1 }
 0xa6a   : > { %v5989_v41 = vmul.f32 %v11312_v35, %v18474_v34  ;;  %v5683_v40 = vpop.f32.mrb[113].mxu1 }
 0xa6b   : > { %v5988_v10 = vmul.f32 %v5683_v40, %v18474_v34 }
 0xa6c   : > { %v16561_v16 = vadd.f32 %v5989_v41, %v18483_v58 }
 0xa6d   : > { %v16564_v9 = vadd.f32 %v5988_v10, %v18484_v6  ;;  %v18505_v6 = vld [vmem:[#allocation90_spill] sm:$0xff] }
 0xa71   : > { %v11315_v12 = vpop.f32.mrb[114].mxu1 }
 0xa72   : > { %v5991_v21 = vmul.f32 %v11315_v12, %v18474_v34  ;;  %v5693_v36 = vpop.f32.mrb[115].mxu1 }
 0xa73   : > { %v5990_v39 = vmul.f32 %v5693_v36, %v18474_v34 }
 0xa74   : > { %v16569_v55 = vadd.f32 %v5991_v21, %v18485_v27  ;;  %v18507_v21 = vld [vmem:[#allocation91_spill] sm:$0xff] }
 0xa75   : > { %v16572_v49 = vadd.f32 %v5990_v39, %v18487_v56 }
 0xa76   : > { %18486 = vst [vmem:[#allocation107_spill] sm:$0xff] %v16569_v55 }
 0xa77   : > { %18488 = vst [vmem:[#allocation108_spill] sm:$0xff] %v16572_v49 }
 0xa79   : > { %v11318_v42 = vpop.f32.mrb[116].mxu1 }
 0xa7a   : > { %v5993_v13 = vmul.f32 %v11318_v42, %v18474_v34  ;;  %v5703_v2 = vpop.f32.mrb[117].mxu1 }
 0xa7b   : > { %v5992_v30 = vmul.f32 %v5703_v2, %v18474_v34 }
 0xa7c   : > { %v16577_v51 = vadd.f32 %v5993_v13, %v18489_v57  ;;  %v18509_v13 = vld [vmem:[#allocation92_spill] sm:$0xff]  ;;  %v18511_v57 = vld [vmem:[#allocation93_spill] sm:$0xff] }
 0xa7d   : > { %v16580_v17 = vadd.f32 %v5992_v30, %v18491_v0  ;;  %v11321_v44 = vpop.f32.mrb[118].mxu1 }
 0xa7e   : > { %18490 = vst [vmem:[#allocation109_spill] sm:$0xff] %v16577_v51  ;;  %v5995_v8 = vmul.f32 %v11321_v44, %v18474_v34  ;;  %v5713_v20 = vpop.f32.mrb[119].mxu1 }
 0xa7f   : > { %18492 = vst [vmem:[#allocation61_spill] sm:$0xff] %v16580_v17  ;;  %v5994_v47 = vmul.f32 %v5713_v20, %v18474_v34 }
 0xa80   : > { %v16585_v15 = vadd.f32 %v5995_v8, %v18493_v31 }
 0xa81   : > { %v11340_v46 = vpop.f32.mrb[120].mxu0  ;;  %v16588_v38 = vadd.f32 %v5994_v47, %v18495_v52  ;;  %v18513_v47 = vld [vmem:[#allocation94_spill] sm:$0xff] }
 0xa82   : > { %18494 = vst [vmem:[#allocation64_spill] sm:$0xff] %v16585_v15  ;;  %v5997_v45 = vmul.f32 %v11340_v46, %v18474_v34  ;;  %v5812_v32 = vpop.f32.mrb[121].mxu0  ;;  %v18515_v46 = vld [vmem:[#allocation95_spill] sm:$0xff] }
 0xa83   : > { %18496 = vst [vmem:[#allocation56_spill] sm:$0xff] %v16588_v38  ;;  %v5996_v5 = vmul.f32 %v5812_v32, %v18474_v34 }
 0xa84   : > { %v16593_v50 = vadd.f32 %v5997_v45, %v18497_v22 }
 0xa85   : > { %v16596_v33 = vadd.f32 %v5996_v5, %v18499_v26  ;;  %v11343_v60 = vpop.f32.mrb[122].mxu0 }
 0xa86   : > { %18498 = vst [vmem:[#allocation55_spill] sm:$0xff] %v16593_v50  ;;  %v5999_v11 = vmul.f32 %v11343_v60, %v18474_v34  ;;  %v5822_v1 = vpop.f32.mrb[123].mxu0 }
 0xa87   : > { %18500 = vst [vmem:[#allocation106_spill] sm:$0xff] %v16596_v33  ;;  %v5998_v59 = vmul.f32 %v5822_v1, %v18474_v34 }
 0xa88   : > { %v16601_v7 = vadd.f32 %v5999_v11, %v18501_v19 }
 0xa89   : > { %v16604_v35 = vadd.f32 %v5998_v59, %v18503_v43  ;;  %v11346_v41 = vpop.f32.mrb[124].mxu0 }
 0xa8a   : > { %18502 = vst [vmem:[#allocation58_spill] sm:$0xff] %v16601_v7  ;;  %v6001_v40 = vmul.f32 %v11346_v41, %v18474_v34  ;;  %v5832_v10 = vpop.f32.mrb[125].mxu0 }
 0xa8b   : > { %18504 = vst [vmem:[#allocation57_spill] sm:$0xff] %v16604_v35  ;;  %v6000_v58 = vmul.f32 %v5832_v10, %v18474_v34 }
 0xa8c   : > { %v16609_v12 = vadd.f32 %v6001_v40, %v18505_v6 }
 0xa8d   : > { %v16612_v36 = vadd.f32 %v6000_v58, %v18507_v21 }
 0xa8e   : > { %18506 = vst [vmem:[#allocation60_spill] sm:$0xff] %v16609_v12  ;;  %v11349_v39 = vpop.f32.mrb[126].mxu0 }
 0xa8f   : > { %18508 = vst [vmem:[#allocation59_spill] sm:$0xff] %v16612_v36  ;;  %v6003_v27 = vmul.f32 %v11349_v39, %v18474_v34  ;;  %v5842_v56 = vpop.f32.mrb[127].mxu0 }
 0xa90   : > { %v6002_v42 = vmul.f32 %v5842_v56, %v18474_v34 }
 0xa91   : > { %v16617_v2 = vadd.f32 %v6003_v27, %v18509_v13  ;;  %v11368_v30 = vpop.f32.mrb[120].mxu1 }
 0xa92   : > { %v16620_v0 = vadd.f32 %v6002_v42, %v18511_v57  ;;  %v6005_v44 = vmul.f32 %v11368_v30, %v18474_v34  ;;  %v5941_v8 = vpop.f32.mrb[121].mxu1 }
 0xa93   : > { %18510 = vst [vmem:[#allocation74_spill] sm:$0xff] %v16617_v2  ;;  %v6004_v20 = vmul.f32 %v5941_v8, %v18474_v34 }
 0xa94   : > { %18512 = vst [vmem:[#allocation77_spill] sm:$0xff] %v16620_v0  ;;  %v16625_v31 = vadd.f32 %v6005_v44, %v18513_v47 }
 0xa95   : > { %v16628_v52 = vadd.f32 %v6004_v20, %v18515_v46  ;;  %v18517_v46 = vld [vmem:[#allocation96_spill] sm:$0xff] }
 0xa96   : > { %18514 = vst [vmem:[#allocation73_spill] sm:$0xff] %v16625_v31 }
 0xa97   : > { %18516 = vst [vmem:[#allocation102_spill] sm:$0xff] %v16628_v52 }
 0xaa1   : > { %v11396_v45 = vpop.f32.mrb[128].mxu0 }
 0xaa2   : > { %v16630_v32 = vmul.f32 0.35355338, %v11396_v45  ;;  %v6190_v5 = vpop.f32.mrb[129].mxu0 }
 0xaa3   : > { %v16632_v22 = vmul.f32 0.35355338, %v6190_v5  ;;  %v18519_v5 = vld [vmem:[#allocation97_spill] sm:$0xff] }
 0xaa4   : > { %v6699_v26 = vsel %vm1847_vm4, %v16630_v32, -inf }
 0xaa5   : > { %6700 = vmax.xlane.f32.xlu1 %v6699_v26  ;;  %v11399_v60 = vpop.f32.mrb[130].mxu0  ;;  %v6696_v11 = vsel %vm1847_vm4, %v16632_v22, -inf }
 0xaa6   : > { %v16638_v1 = vmul.f32 0.35355338, %v11399_v60  ;;  %6697 = vmax.xlane.f32.xlu0 %v6696_v11  ;;  %v6200_v59 = vpop.f32.mrb[131].mxu0 }
 0xaa7   : > { %v16640_v19 = vmul.f32 0.35355338, %v6200_v59 }
 0xaa8   : > { %v6705_v43 = vsel %vm1847_vm4, %v16638_v1, -inf }
 0xaa9   : > { %v11402_v41 = vpop.f32.mrb[132].mxu0  ;;  %v6702_v40 = vsel %vm1847_vm4, %v16640_v19, -inf }
 0xaaa   : > { %v16646_v10 = vmul.f32 0.35355338, %v11402_v41  ;;  %6706 = vmax.xlane.f32.xlu0 %v6705_v43  ;;  %6703 = vmax.xlane.f32.xlu1 %v6702_v40  ;;  %v6210_v58 = vpop.f32.mrb[133].mxu0  ;;  %v18521_v41 = vld [vmem:[#allocation98_spill] sm:$0xff] }
 0xaab   : > { %v16648_v6 = vmul.f32 0.35355338, %v6210_v58  ;;  %v18523_v58 = vld [vmem:[#allocation99_spill] sm:$0xff] }
 0xaac   : > { %v6711_v21 = vsel %vm1847_vm4, %v16646_v10, -inf }
 0xaad   : > { %v11405_v39 = vpop.f32.mrb[134].mxu0  ;;  %v6708_v27 = vsel %vm1847_vm4, %v16648_v6, -inf }
 0xaae   : > { %v16654_v56 = vmul.f32 0.35355338, %v11405_v39  ;;  %6712 = vmax.xlane.f32.xlu0 %v6711_v21  ;;  %6709 = vmax.xlane.f32.xlu1 %v6708_v27  ;;  %v6220_v42 = vpop.f32.mrb[135].mxu0 }
 0xaaf   : > { %v16656_v13 = vmul.f32 0.35355338, %v6220_v42 }
 0xab0   : > { %v6717_v30 = vsel %vm1847_vm4, %v16654_v56, -inf }
 0xab1   : > { %v6714_v57 = vsel %vm1847_vm4, %v16656_v13, -inf }
 0xab2   : > { %6718 = vmax.xlane.f32.xlu0 %v6717_v30  ;;  %6715 = vmax.xlane.f32.xlu1 %v6714_v57  ;;  %v18525_v57 = vld [vmem:[#allocation100_spill] sm:$0xff] }
 0xac5   : > { %v11371_v44 = vpop.f32.mrb[122].mxu1 }
 0xac6   : > { %v6007_v8 = vmul.f32 %v11371_v44, %v18474_v34  ;;  %v5951_v20 = vpop.f32.mrb[123].mxu1 }
 0xac7   : > { %v6006_v47 = vmul.f32 %v5951_v20, %v18474_v34 }
 0xac8   : > { %v16665_v45 = vadd.f32 %v6007_v8, %v18517_v46  ;;  %v18527_v8 = vld [vmem:[#allocation101_spill] sm:$0xff] }
 0xac9   : > { %v16668_v26 = vadd.f32 %v6006_v47, %v18519_v5 }
 0xaca   : > { %18518 = vst [vmem:[#allocation82_spill] sm:$0xff] %v16665_v45  ;;  %v11374_v60 = vpop.f32.mrb[124].mxu1 }
 0xacb   : > { %18520 = vst [vmem:[#allocation103_spill] sm:$0xff] %v16668_v26  ;;  %v6009_v11 = vmul.f32 %v11374_v60, %v18474_v34  ;;  %v5961_v59 = vpop.f32.mrb[125].mxu1 }
 0xacc   : > { %v6008_v43 = vmul.f32 %v5961_v59, %v18474_v34 }
 0xacd   : > { %v16673_v40 = vadd.f32 %v6009_v11, %v18521_v41 }
 0xace   : > { %v16676_v21 = vadd.f32 %v6008_v43, %v18523_v58  ;;  %v11377_v39 = vpop.f32.mrb[126].mxu1 }
 0xacf   : > { %18522 = vst [vmem:[#allocation104_spill] sm:$0xff] %v16673_v40  ;;  %v6011_v27 = vmul.f32 %v11377_v39, %v18474_v34  ;;  %v5971_v42 = vpop.f32.mrb[127].mxu1 }
 0xad0   : > { %18524 = vst [vmem:[#allocation105_spill] sm:$0xff] %v16676_v21  ;;  %v6010_v30 = vmul.f32 %v5971_v42, %v18474_v34 }
 0xad1   : > { %v16681_v44 = vadd.f32 %v6011_v27, %v18525_v57 }
 0xad2   : > { %v16684_v20 = vadd.f32 %v6010_v30, %v18527_v8  ;;  %v11424_v47 = vpop.f32.mrb[128].mxu1 }
 0xad3   : > { %18526 = vst [vmem:[#allocation41_spill] sm:$0xff] %v16681_v44  ;;  %v16686_v46 = vmul.f32 0.35355338, %v11424_v47  ;;  %v6335_v5 = vpop.f32.mrb[129].mxu1 }
 0xad4   : > { %18528 = vst [vmem:[#allocation40_spill] sm:$0xff] %v16684_v20  ;;  %v16688_v60 = vmul.f32 0.35355338, %v6335_v5 }
 0xad5   : > { %v6723_v11 = vsel %vm1847_vm4, %v16686_v46, -inf }
 0xad6   : > { %6724 = vmax.xlane.f32.xlu0 %v6723_v11  ;;  %v11427_v59 = vpop.f32.mrb[130].mxu1  ;;  %v6720_v58 = vsel %vm1847_vm4, %v16688_v60, -inf }
 0xad7   : > { %v6345_v43 = vpop.f32.mrb[131].mxu1  ;;  %v16694_v34 = vmul.f32 0.35355338, %v11427_v59 }
 0xad8   : > { %v16692_v41 = vmul.f32 0.35355338, %v6345_v43 }
 0xad9   : > { %v6729_v8 = vsel %vm1847_vm4, %v16694_v34, -inf }
 0xada   : > { %6721 = vmax.xlane.f32.xlu0 %v6720_v58  ;;  %v11430_v39 = vpop.f32.mrb[132].mxu1  ;;  %v6726_v27 = vsel %vm1847_vm4, %v16692_v41, -inf }
 0xadb   : > { %6727 = vmax.xlane.f32.xlu1 %v6726_v27  ;;  %v6355_v42 = vpop.f32.mrb[133].mxu1  ;;  %v16702_v57 = vmul.f32 0.35355338, %v11430_v39 }
 0xadc   : > { %v16700_v30 = vmul.f32 0.35355338, %v6355_v42 }
 0xadd   : > { %v6735_v58 = vsel %vm1847_vm4, %v16702_v57, -inf }
 0xade   : > { %6730 = vmax.xlane.f32.xlu0 %v6729_v8  ;;  %v11433_v47 = vpop.f32.mrb[134].mxu1  ;;  %v6732_v5 = vsel %vm1847_vm4, %v16700_v30, -inf }
 0xadf   : > { %6733 = vmax.xlane.f32.xlu1 %v6732_v5  ;;  %v6365_v11 = vpop.f32.mrb[135].mxu1  ;;  %v16710_v43 = vmul.f32 0.35355338, %v11433_v47 }
 0xae0   : > { %v16708_v59 = vmul.f32 0.35355338, %v6365_v11 }
 0xae1   : > { %v6741_v27 = vsel %vm1847_vm4, %v16710_v43, -inf }
 0xae2   : > { %6736 = vmax.xlane.f32.xlu0 %v6735_v58  ;;  %v6738_v39 = vsel %vm1847_vm4, %v16708_v59, -inf }
 0xae3   : > { %6739 = vmax.xlane.f32.xlu1 %v6738_v39 }
 0xae6   : > { %6742 = vmax.xlane.f32.xlu0 %v6741_v27 }
 0xae8   : > { %v11452_v42 = vpop.f32.mrb[136].mxu0 }
 0xae9   : > { %v16718_v8 = vmul.f32 0.35355338, %v11452_v42  ;;  %v6480_v5 = vpop.f32.mrb[137].mxu0 }
 0xaea   : > { %v16720_v11 = vmul.f32 0.35355338, %v6480_v5 }
 0xaeb   : > { %v6747_v47 = vsel %vm1847_vm4, %v16718_v8, -inf }
 0xaec   : > { %v11455_v20 = vpop.f32.mrb[138].mxu0  ;;  %6748 = vmax.xlane.f32.xlu0 %v6747_v47  ;;  %v6744_v58 = vsel %vm1847_vm4, %v16720_v11, -inf }
 0xaed   : > { %v16726_v44 = vmul.f32 0.35355338, %v11455_v20  ;;  %v6490_v39 = vpop.f32.mrb[139].mxu0  ;;  %6745 = vmax.xlane.f32.xlu1 %v6744_v58 }
 0xaee   : > { %v16728_v21 = vmul.f32 0.35355338, %v6490_v39 }
 0xaef   : > { %v6753_v27 = vsel %vm1847_vm4, %v16726_v44, -inf }
 0xaf0   : > { %v11458_v42 = vpop.f32.mrb[140].mxu0  ;;  %6754 = vmax.xlane.f32.xlu0 %v6753_v27  ;;  %v6750_v5 = vsel %vm1847_vm4, %v16728_v21, -inf }
 0xaf1   : > { %v16734_v40 = vmul.f32 0.35355338, %v11458_v42  ;;  %v6500_v47 = vpop.f32.mrb[141].mxu0  ;;  %6751 = vmax.xlane.f32.xlu1 %v6750_v5 }
 0xaf2   : > { %v16736_v26 = vmul.f32 0.35355338, %v6500_v47  ;;  %v11480_v20 = vpop.f32.mrb[136].mxu1 }
 0xaf3   : > { %v6625_v45 = vpop.f32.mrb[137].mxu1  ;;  %v6759_v58 = vsel %vm1847_vm4, %v16734_v40, -inf  ;;  %v16746_v5 = vmul.f32 0.35355338, %v11480_v20 }
 0xaf4   : > { %v11461_v39 = vpop.f32.mrb[142].mxu0  ;;  %6760 = vmax.xlane.f32.xlu0 %v6759_v58  ;;  %v6756_v52 = vsel %vm1847_vm4, %v16736_v26, -inf  ;;  %v16750_v36 = vmul.f32 0.35355338, %v6625_v45 }
 0xaf5   : > { %v16742_v27 = vmul.f32 0.35355338, %v11461_v39  ;;  %v6510_v31 = vpop.f32.mrb[143].mxu0  ;;  %6757 = vmax.xlane.f32.xlu1 %v6756_v52 }
 0xaf6   : > { %v16744_v42 = vmul.f32 0.35355338, %v6510_v31  ;;  %v11483_v0 = vpop.f32.mrb[138].mxu1  ;;  %v6771_v31 = vsel %vm1847_vm4, %v16746_v5, -inf  ;;  %v6768_v35 = vsel %vm1847_vm4, %v16750_v36, -inf }
 0xaf7   : > { %v6635_v47 = vpop.f32.mrb[139].mxu1  ;;  %v6765_v2 = vsel %vm1847_vm4, %v16742_v27, -inf  ;;  %v16754_v12 = vmul.f32 0.35355338, %v11483_v0 }
 0xaf8   : > { %6766 = vmax.xlane.f32.xlu0 %v6765_v2  ;;  %v6762_v58 = vsel %vm1847_vm4, %v16744_v42, -inf  ;;  %v16758_v20 = vmul.f32 0.35355338, %v6635_v47 }
 0xaf9   : > { %6763 = vmax.xlane.f32.xlu1 %v6762_v58  ;;  %v6777_v58 = vsel %vm1847_vm4, %v16754_v12, -inf }
 0xafa   : > { %v11486_v39 = vpop.f32.mrb[140].mxu1  ;;  %v6774_v33 = vsel %vm1847_vm4, %v16758_v20, -inf }
 0xafb   : > { %v6645_v52 = vpop.f32.mrb[141].mxu1  ;;  %v16762_v2 = vmul.f32 0.35355338, %v11486_v39 }
 0xafc   : > { %6772 = vmax.xlane.f32.xlu0 %v6771_v31  ;;  %v16766_v0 = vmul.f32 0.35355338, %v6645_v52 }
 0xafd   : > { %6769 = vmax.xlane.f32.xlu1 %v6768_v35  ;;  %v6783_v31 = vsel %vm1847_vm4, %v16762_v2, -inf }
 0xafe   : > { %v11489_v45 = vpop.f32.mrb[142].mxu1  ;;  %v6780_v39 = vsel %vm1847_vm4, %v16766_v0, -inf }
 0xaff   : > { %v6655_v7 = vpop.f32.mrb[143].mxu1  ;;  %v16770_v47 = vmul.f32 0.35355338, %v11489_v45 }
 0xb00   : > { %6778 = vmax.xlane.f32.xlu0 %v6777_v58  ;;  %v16774_v35 = vmul.f32 0.35355338, %v6655_v7 }
 0xb01   : > { %6775 = vmax.xlane.f32.xlu1 %v6774_v33  ;;  %v6789_v52 = vsel %vm1847_vm4, %v16770_v47, -inf }
 0xb02   : > { %v6786_v58 = vsel %vm1847_vm4, %v16774_v35, -inf }
 0xb04   : > { %6784 = vmax.xlane.f32.xlu0 %v6783_v31 }
 0xb05   : > { %6781 = vmax.xlane.f32.xlu1 %v6780_v39 }
 0xb08   : > { %6790 = vmax.xlane.f32.xlu0 %v6789_v52 }
 0xb09   : > { %6787 = vmax.xlane.f32.xlu1 %v6786_v58 }
 0xb32   : > { %v6701_v33 = vpop.xlane.xlu1 %6700 }
 0xb33   : > { %v6793_v45 = vsub.f32 %v16630_v32, %v6701_v33  ;;  %v6698_v50 = vpop.xlane.xlu0 %6697 }
 0xb34   : > { %v6792_v7 = vsub.f32 %v16632_v22, %v6698_v50 }
 0xb35   : > { %v6826_v38 = vmul.f32 1.442695, %v6793_v45 }
 0xb36   : > { %v6824_v31 = vmul.f32 1.442695, %v6792_v7 }
 0xb37   : > { %13229 = vpow2.f32 %v6826_v38  ;;  %v6707_v15 = vpop.xlane.xlu0 %6706  ;;  %v6704_v17 = vpop.xlane.xlu1 %6703 }
 0xb38   : > { %13231 = vpow2.f32 %v6824_v31  ;;  %v6795_v39 = vsub.f32 %v16638_v1, %v6707_v15  ;;  %v6794_v52 = vsub.f32 %v16640_v19, %v6704_v17 }
 0xb3a   : > { %v6830_v51 = vmul.f32 1.442695, %v6795_v39  ;;  %v6828_v49 = vmul.f32 1.442695, %v6794_v52 }
 0xb3b   : > { %v6713_v55 = vpop.xlane.xlu0 %6712  ;;  %v6710_v58 = vpop.xlane.xlu1 %6709 }
 0xb3c   : > { %13233 = vpow2.f32 %v6830_v51  ;;  %v6797_v32 = vsub.f32 %v16646_v10, %v6713_v55  ;;  %v6796_v33 = vsub.f32 %v16648_v6, %v6710_v58 }
 0xb3d   : > { %13235 = vpow2.f32 %v6828_v49 }
 0xb3e   : > { %v6834_v50 = vmul.f32 1.442695, %v6797_v32  ;;  %v6832_v22 = vmul.f32 1.442695, %v6796_v33 }
 0xb3f   : > { %v6719_v38 = vpop.xlane.xlu0 %6718  ;;  %v6716_v45 = vpop.xlane.xlu1 %6715 }
 0xb40   : > { %13237 = vpow2.f32 %v6834_v50  ;;  %v6799_v7 = vsub.f32 %v16654_v56, %v6719_v38  ;;  %v6798_v15 = vsub.f32 %v16656_v13, %v6716_v45 }
 0xb41   : > { %v16790_v17 = vpop.eup %13229  ;;  %13239 = vpow2.f32 %v6832_v22 }
 0xb42   : > { %v16792_v1 = vpop.eup %13231  ;;  %v6838_v51 = vmul.f32 1.442695, %v6799_v7  ;;  %v6836_v19 = vmul.f32 1.442695, %v6798_v15  ;;  %v6891_v55 = vsel %vm1847_vm4, %v16790_v17, 0.0 }
 0xb43   : > { %6892 = vadd.xlane.f32.xlu0 %v6891_v55  ;;  %v6888_v49 = vsel %vm1847_vm4, %v16792_v1, 0.0 }
 0xb44   : > { %13241 = vpow2.f32 %v6838_v51  ;;  %6889 = vadd.xlane.f32.xlu1 %v6888_v49 }
 0xb45   : > { %13243 = vpow2.f32 %v6836_v19 }
 0xb46   : > { %v16798_v10 = vpop.eup %13233 }
 0xb47   : > { %v16800_v6 = vpop.eup %13235  ;;  %v6897_v56 = vsel %vm1847_vm4, %v16798_v10, 0.0 }
 0xb48   : > { %6898 = vadd.xlane.f32.xlu0 %v6897_v56  ;;  %v6894_v13 = vsel %vm1847_vm4, %v16800_v6, 0.0 }
 0xb49   : > { %6895 = vadd.xlane.f32.xlu1 %v6894_v13 }
 0xb4a   : > { %v16806_v31 = vpop.eup %13237 }
 0xb4b   : > { %v16808_v39 = vpop.eup %13239  ;;  %v6903_v52 = vsel %vm1847_vm4, %v16806_v31, 0.0 }
 0xb4c   : > { %6904 = vadd.xlane.f32.xlu0 %v6903_v52  ;;  %v6900_v58 = vsel %vm1847_vm4, %v16808_v39, 0.0 }
 0xb4d   : > { %6901 = vadd.xlane.f32.xlu1 %v6900_v58 }
 0xb4e   : > { %v16814_v32 = vpop.eup %13241 }
 0xb4f   : > { %v16816_v33 = vpop.eup %13243  ;;  %v6909_v50 = vsel %vm1847_vm4, %v16814_v32, 0.0 }
 0xb50   : > { %6910 = vadd.xlane.f32.xlu0 %v6909_v50  ;;  %v6906_v22 = vsel %vm1847_vm4, %v16816_v33, 0.0 }
 0xb51   : > { %6907 = vadd.xlane.f32.xlu1 %v6906_v22 }
 0xb63   : > { %v6725_v38 = vpop.xlane.xlu0 %6724 }
 0xb64   : > { %v6801_v45 = vsub.f32 %v16686_v46, %v6725_v38 }
 0xb66   : > { %v6842_v7 = vmul.f32 1.442695, %v6801_v45 }
 0xb67   : > { %v6722_v15 = vpop.xlane.xlu0 %6721 }
 0xb68   : > { %13245 = vpow2.f32 %v6842_v7  ;;  %v6800_v51 = vsub.f32 %v16688_v60, %v6722_v15  ;;  %v6728_v19 = vpop.xlane.xlu1 %6727 }
 0xb69   : > { %v6802_v55 = vsub.f32 %v16692_v41, %v6728_v19 }
 0xb6a   : > { %v6840_v49 = vmul.f32 1.442695, %v6800_v51 }
 0xb6b   : > { %v6844_v56 = vmul.f32 1.442695, %v6802_v55  ;;  %v6731_v13 = vpop.xlane.xlu0 %6730 }
 0xb6c   : > { %13247 = vpow2.f32 %v6840_v49  ;;  %v6803_v52 = vsub.f32 %v16694_v34, %v6731_v13  ;;  %v6734_v58 = vpop.xlane.xlu1 %6733 }
 0xb6d   : > { %v6804_v50 = vsub.f32 %v16700_v30, %v6734_v58  ;;  %13249 = vpow2.f32 %v6844_v56 }
 0xb6e   : > { %v6846_v22 = vmul.f32 1.442695, %v6803_v52 }
 0xb6f   : > { %v6848_v46 = vmul.f32 1.442695, %v6804_v50  ;;  %v6737_v38 = vpop.xlane.xlu0 %6736 }
 0xb70   : > { %13251 = vpow2.f32 %v6846_v22  ;;  %v6805_v45 = vsub.f32 %v16702_v57, %v6737_v38  ;;  %v6740_v60 = vpop.xlane.xlu1 %6739 }
 0xb71   : > { %v6806_v7 = vsub.f32 %v16708_v59, %v6740_v60  ;;  %13253 = vpow2.f32 %v6848_v46 }
 0xb72   : > { %v16829_v41 = vpop.eup %13245  ;;  %v6850_v15 = vmul.f32 1.442695, %v6805_v45 }
 0xb73   : > { %v6852_v51 = vmul.f32 1.442695, %v6806_v7  ;;  %v6743_v19 = vpop.xlane.xlu0 %6742  ;;  %v6915_v34 = vsel %vm1847_vm4, %v16829_v41, 0.0 }
 0xb74   : > { %13255 = vpow2.f32 %v6850_v15  ;;  %v6807_v30 = vsub.f32 %v16710_v43, %v6743_v19  ;;  %6916 = vadd.xlane.f32.xlu0 %v6915_v34 }
 0xb75   : > { %13257 = vpow2.f32 %v6852_v51 }
 0xb76   : > { %v16834_v55 = vpop.eup %13247  ;;  %v6854_v57 = vmul.f32 1.442695, %v6807_v30 }
 0xb77   : > { %v6912_v59 = vsel %vm1847_vm4, %v16834_v55, 0.0  ;;  %v16838_v49 = vpop.eup %13249 }
 0xb78   : > { %13259 = vpow2.f32 %v6854_v57  ;;  %6913 = vadd.xlane.f32.xlu1 %v6912_v59  ;;  %v6918_v22 = vsel %vm1847_vm4, %v16838_v49, 0.0 }
 0xb79   : > { %v6749_v56 = vpop.xlane.xlu0 %6748 }
 0xb7a   : > { %v16840_v13 = vpop.eup %13251  ;;  %v6809_v52 = vsub.f32 %v16718_v8, %v6749_v56  ;;  %v6746_v58 = vpop.xlane.xlu1 %6745 }
 0xb7b   : > { %v6808_v43 = vsub.f32 %v16720_v11, %v6746_v58  ;;  %v6921_v50 = vsel %vm1847_vm4, %v16840_v13, 0.0  ;;  %v16848_v46 = vpop.eup %13253 }
 0xb7c   : > { %v6858_v38 = vmul.f32 1.442695, %v6809_v52  ;;  %6922 = vadd.xlane.f32.xlu0 %v6921_v50  ;;  %6919 = vadd.xlane.f32.xlu1 %v6918_v22  ;;  %v6924_v19 = vsel %vm1847_vm4, %v16848_v46, 0.0 }
 0xb7d   : > { %v6856_v45 = vmul.f32 1.442695, %v6808_v43  ;;  %v6755_v60 = vpop.xlane.xlu0 %6754 }
 0xb7e   : > { %v16850_v7 = vpop.eup %13255  ;;  %13261 = vpow2.f32 %v6858_v38  ;;  %v6811_v8 = vsub.f32 %v16726_v44, %v6755_v60  ;;  %v6752_v15 = vpop.xlane.xlu1 %6751 }
 0xb7f   : > { %13263 = vpow2.f32 %v6856_v45  ;;  %v6810_v11 = vsub.f32 %v16728_v21, %v6752_v15  ;;  %v6927_v51 = vsel %vm1847_vm4, %v16850_v7, 0.0  ;;  %v16858_v34 = vpop.eup %13257 }
 0xb80   : > { %v6862_v30 = vmul.f32 1.442695, %v6811_v8  ;;  %6928 = vadd.xlane.f32.xlu0 %v6927_v51  ;;  %6925 = vadd.xlane.f32.xlu1 %v6924_v19  ;;  %v6930_v43 = vsel %vm1847_vm4, %v16858_v34, 0.0 }
 0xb81   : > { %v6860_v57 = vmul.f32 1.442695, %v6810_v11  ;;  %v6761_v59 = vpop.xlane.xlu0 %6760 }
 0xb82   : > { %v16860_v56 = vpop.eup %13259  ;;  %13265 = vpow2.f32 %v6862_v30  ;;  %v6813_v44 = vsub.f32 %v16734_v40, %v6761_v59  ;;  %v6758_v52 = vpop.xlane.xlu1 %6757 }
 0xb83   : > { %13267 = vpow2.f32 %v6860_v57  ;;  %v6812_v21 = vsub.f32 %v16736_v26, %v6758_v52  ;;  %v6933_v58 = vsel %vm1847_vm4, %v16860_v56, 0.0 }
 0xb84   : > { %v6866_v50 = vmul.f32 1.442695, %v6813_v44  ;;  %6934 = vadd.xlane.f32.xlu0 %v6933_v58  ;;  %6931 = vadd.xlane.f32.xlu1 %v6930_v43 }
 0xb85   : > { %v6864_v22 = vmul.f32 1.442695, %v6812_v21  ;;  %v6767_v38 = vpop.xlane.xlu0 %6766 }
 0xb86   : > { %13269 = vpow2.f32 %v6866_v50  ;;  %v6815_v45 = vsub.f32 %v16742_v27, %v6767_v38  ;;  %v6764_v60 = vpop.xlane.xlu1 %6763 }
 0xb87   : > { %13271 = vpow2.f32 %v6864_v22  ;;  %v6814_v40 = vsub.f32 %v16744_v42, %v6764_v60 }
 0xb88   : > { %v16870_v8 = vpop.eup %13261  ;;  %v6870_v26 = vmul.f32 1.442695, %v6815_v45 }
 0xb89   : > { %v16872_v15 = vpop.eup %13263  ;;  %v6868_v11 = vmul.f32 1.442695, %v6814_v40  ;;  %v6773_v51 = vpop.xlane.xlu0 %6772  ;;  %v6939_v19 = vsel %vm1847_vm4, %v16870_v8, 0.0 }
 0xb8a   : > { %13273 = vpow2.f32 %v6870_v26  ;;  %v6817_v30 = vsub.f32 %v16746_v5, %v6773_v51  ;;  %v6770_v57 = vpop.xlane.xlu1 %6769  ;;  %6940 = vadd.xlane.f32.xlu0 %v6939_v19  ;;  %v6936_v27 = vsel %vm1847_vm4, %v16872_v15, 0.0 }
 0xb8b   : > { %13275 = vpow2.f32 %v6868_v11  ;;  %v6816_v42 = vsub.f32 %v16750_v36, %v6770_v57  ;;  %6937 = vadd.xlane.f32.xlu1 %v6936_v27 }
 0xb8c   : > { %v16880_v59 = vpop.eup %13265  ;;  %v6874_v44 = vmul.f32 1.442695, %v6817_v30 }
 0xb8d   : > { %v16882_v52 = vpop.eup %13267  ;;  %v6872_v21 = vmul.f32 1.442695, %v6816_v42  ;;  %v6779_v58 = vpop.xlane.xlu0 %6778  ;;  %v6945_v43 = vsel %vm1847_vm4, %v16880_v59, 0.0 }
 0xb8e   : > { %13277 = vpow2.f32 %v6874_v44  ;;  %v6819_v5 = vsub.f32 %v16754_v12, %v6779_v58  ;;  %v6776_v50 = vpop.xlane.xlu1 %6775  ;;  %6946 = vadd.xlane.f32.xlu0 %v6945_v43  ;;  %v6942_v22 = vsel %vm1847_vm4, %v16882_v52, 0.0 }
 0xb8f   : > { %13279 = vpow2.f32 %v6872_v21  ;;  %v6818_v36 = vsub.f32 %v16758_v20, %v6776_v50  ;;  %6943 = vadd.xlane.f32.xlu1 %v6942_v22 }
 0xb90   : > { %v16890_v38 = vpop.eup %13269  ;;  %v6878_v45 = vmul.f32 1.442695, %v6819_v5 }
 0xb91   : > { %v16892_v60 = vpop.eup %13271  ;;  %v6876_v40 = vmul.f32 1.442695, %v6818_v36  ;;  %v6785_v26 = vpop.xlane.xlu0 %6784  ;;  %v6951_v11 = vsel %vm1847_vm4, %v16890_v38, 0.0 }
 0xb92   : > { %13281 = vpow2.f32 %v6878_v45  ;;  %v6821_v12 = vsub.f32 %v16762_v2, %v6785_v26  ;;  %v6782_v51 = vpop.xlane.xlu1 %6781  ;;  %6952 = vadd.xlane.f32.xlu0 %v6951_v11  ;;  %v6948_v19 = vsel %vm1847_vm4, %v16892_v60, 0.0 }
 0xb93   : > { %13283 = vpow2.f32 %v6876_v40  ;;  %v6820_v20 = vsub.f32 %v16766_v0, %v6782_v51  ;;  %6949 = vadd.xlane.f32.xlu1 %v6948_v19 }
 0xb94   : > { %v16900_v30 = vpop.eup %13273  ;;  %v6882_v57 = vmul.f32 1.442695, %v6821_v12 }
 0xb95   : > { %v16902_v27 = vpop.eup %13275  ;;  %v6880_v42 = vmul.f32 1.442695, %v6820_v20  ;;  %v6791_v44 = vpop.xlane.xlu0 %6790  ;;  %v6957_v21 = vsel %vm1847_vm4, %v16900_v30, 0.0 }
 0xb96   : > { %13285 = vpow2.f32 %v6882_v57  ;;  %v6823_v2 = vsub.f32 %v16770_v47, %v6791_v44  ;;  %6958 = vadd.xlane.f32.xlu0 %v6957_v21  ;;  %v6788_v58 = vpop.xlane.xlu1 %6787  ;;  %v6954_v43 = vsel %vm1847_vm4, %v16902_v27, 0.0 }
 0xb97   : > { %13287 = vpow2.f32 %v6880_v42  ;;  %v6822_v0 = vsub.f32 %v16774_v35, %v6788_v58  ;;  %6955 = vadd.xlane.f32.xlu1 %v6954_v43 }
 0xb98   : > { %v16910_v5 = vpop.eup %13277  ;;  %v6886_v50 = vmul.f32 1.442695, %v6823_v2 }
 0xb99   : > { %v16912_v22 = vpop.eup %13279  ;;  %v6884_v36 = vmul.f32 1.442695, %v6822_v0  ;;  %v6963_v45 = vsel %vm1847_vm4, %v16910_v5, 0.0 }
 0xb9a   : > { %13289 = vpow2.f32 %v6886_v50  ;;  %6964 = vadd.xlane.f32.xlu0 %v6963_v45  ;;  %v6960_v47 = vsel %vm1847_vm4, %v16912_v22, 0.0 }
 0xb9b   : > { %13291 = vpow2.f32 %v6884_v36  ;;  %6961 = vadd.xlane.f32.xlu1 %v6960_v47 }
 0xb9c   : > { %v16918_v40 = vpop.eup %13281 }
 0xb9d   : > { %v16920_v35 = vpop.eup %13283  ;;  %v6969_v26 = vsel %vm1847_vm4, %v16918_v40, 0.0 }
 0xb9e   : > { %6970 = vadd.xlane.f32.xlu0 %v6969_v26  ;;  %v6966_v11 = vsel %vm1847_vm4, %v16920_v35, 0.0 }
 0xb9f   : > { %6967 = vadd.xlane.f32.xlu1 %v6966_v11 }
 0xba0   : > { %v16926_v12 = vpop.eup %13285 }
 0xba1   : > { %v16928_v51 = vpop.eup %13287  ;;  %v6975_v19 = vsel %vm1847_vm4, %v16926_v12, 0.0 }
 0xba2   : > { %6976 = vadd.xlane.f32.xlu0 %v6975_v19  ;;  %v6972_v20 = vsel %vm1847_vm4, %v16928_v51, 0.0 }
 0xba3   : > { %6973 = vadd.xlane.f32.xlu1 %v6972_v20 }
 0xba4   : > { %v16934_v57 = vpop.eup %13289 }
 0xba5   : > { %v16936_v42 = vpop.eup %13291  ;;  %v6981_v44 = vsel %vm1847_vm4, %v16934_v57, 0.0 }
 0xba6   : > { %6982 = vadd.xlane.f32.xlu0 %v6981_v44  ;;  %v6978_v21 = vsel %vm1847_vm4, %v16936_v42, 0.0 }
 0xba7   : > { %6979 = vadd.xlane.f32.xlu1 %v6978_v21 }
 0xbd0   : > { %v6893_v2 = vpop.xlane.xlu0 %6892 }
 0xbd1   : > { %13293 = vrcp.f32 %v6893_v2  ;;  %v6890_v58 = vpop.xlane.xlu1 %6889 }
 0xbd2   : > { %13295 = vrcp.f32 %v6890_v58 }
 0xbd5   : > { %v6899_v43 = vpop.xlane.xlu0 %6898 }
 0xbd6   : > { %13297 = vrcp.f32 %v6899_v43  ;;  %v6896_v0 = vpop.xlane.xlu1 %6895 }
 0xbd7   : > { %13299 = vrcp.f32 %v6896_v0 }
 0xbd9   : > { %v6905_v50 = vpop.xlane.xlu0 %6904 }
 0xbda   : > { %13301 = vrcp.f32 %v6905_v50  ;;  %v6902_v36 = vpop.xlane.xlu1 %6901 }
 0xbdb   : > { %v13294_v45 = vpop.eup %13293  ;;  %13303 = vrcp.f32 %v6902_v36 }
 0xbdc   : > { %v13296_v47 = vpop.eup %13295  ;;  %v7017_v19 = vmul.f32 %v13294_v45, %v16790_v17 }
 0xbdd   : > { %v6911_v26 = vpop.xlane.xlu0 %6910  ;;  %v7016_v11 = vmul.f32 %v13296_v47, %v16792_v1 }
 0xbde   : > { %13305 = vrcp.f32 %v6911_v26  ;;  %v6908_v20 = vpop.xlane.xlu1 %6907 }
 0xbdf   : > { %13307 = vrcp.f32 %v6908_v20  ;;  %11506 = vmatprep.mubr.msk.f32.mxu0 %vm1847_vm4, %v7016_v11 }
 0xbe0   : > { %v13298_v44 = vpop.eup %13297  ;;  %11507 = vmatmul.mubr.msk.f32.vlgmr.msra.gmra.mrb[144].mxu0 %vm1847_vm4, %v7017_v19 }
 0xbe1   : > { %v13300_v21 = vpop.eup %13299  ;;  %12353 = vmatpush3.bf16.msra.mxu0 %v18245_v14  ;;  %v7019_v2 = vmul.f32 %v13298_v44, %v16798_v10 }
 0xbe2   : > { %12355 = vmatprep.subr.bf16.mxu0 %v14775_v29  ;;  %v7018_v58 = vmul.f32 %v13300_v21, %v16800_v6 }
 0xbe4   : > { %v13302_v1 = vpop.eup %13301  ;;  %11509 = vmatprep.mubr.msk.f32.mxu0 %vm1847_vm4, %v7018_v58 }
 0xbe5   : > { %v13304_v17 = vpop.eup %13303  ;;  %11510 = vmatmul.mubr.msk.f32.gmra.mrb[146].mxu0 %vm1847_vm4, %v7019_v2  ;;  %v7021_v43 = vmul.f32 %v13302_v1, %v16806_v31 }
 0xbe6   : > { %12357 = vmatpush3.bf16.msra.mxu0 %v14775_v29  ;;  %v7020_v0 = vmul.f32 %v13304_v17, %v16808_v39 }
 0xbe7   : > { %12359 = vmatprep.subr.bf16.mxu0 %v14786_v23 }
 0xbe8   : > { %v13306_v14 = vpop.eup %13305  ;;  %11512 = vmatprep.mubr.msk.f32.mxu0 %vm1847_vm4, %v7020_v0 }
 0xbe9   : > { %v13308_v10 = vpop.eup %13307  ;;  %11513 = vmatmul.mubr.msk.f32.gmra.mrb[148].mxu0 %vm1847_vm4, %v7021_v43  ;;  %v7023_v6 = vmul.f32 %v13306_v14, %v16814_v32 }
 0xbea   : > { %12361 = vmatpush3.bf16.msra.mxu0 %v14786_v23  ;;  %v7022_v50 = vmul.f32 %v13308_v10, %v16816_v33 }
 0xbeb   : > { %12363 = vmatprep.subr.bf16.mxu0 %v18322_v63 }
 0xbec   : > { %11515 = vmatprep.mubr.msk.f32.mxu0 %vm1847_vm4, %v7022_v50 }
 0xbed   : > { %11516 = vmatmul.mubr.msk.f32.gmra.mrb[150].mxu0 %vm1847_vm4, %v7023_v6 }
 0xbee   : > { %12365 = vmatpush3.bf16.msra.mxu0 %v18322_v63 }
 0xc01   : > { %v6917_v29 = vpop.xlane.xlu0 %6916 }
 0xc02   : > { %13309 = vrcp.f32 %v6917_v29 }
 0xc05   : > { %v6914_v31 = vpop.xlane.xlu1 %6913 }
 0xc06   : > { %13311 = vrcp.f32 %v6914_v31 }
 0xc09   : > { %v6923_v39 = vpop.xlane.xlu0 %6922  ;;  %v6920_v36 = vpop.xlane.xlu1 %6919 }
 0xc0a   : > { %13313 = vrcp.f32 %v6923_v39 }
 0xc0b   : > { %13315 = vrcp.f32 %v6920_v36 }
 0xc0c   : > { %v13310_v33 = vpop.eup %13309 }
 0xc0d   : > { %v6929_v32 = vpop.xlane.xlu0 %6928  ;;  %v6926_v23 = vpop.xlane.xlu1 %6925  ;;  %v7025_v63 = vmul.f32 %v13310_v33, %v16829_v41 }
 0xc0e   : > { %13317 = vrcp.f32 %v6929_v32 }
 0xc0f   : > { %13319 = vrcp.f32 %v6926_v23 }
 0xc10   : > { %v13312_v45 = vpop.eup %13311 }
 0xc11   : > { %v6935_v47 = vpop.xlane.xlu0 %6934  ;;  %v6932_v26 = vpop.xlane.xlu1 %6931  ;;  %v7024_v11 = vmul.f32 %v13312_v45, %v16834_v55 }
 0xc12   : > { %13321 = vrcp.f32 %v6935_v47 }
 0xc13   : > { %13323 = vrcp.f32 %v6932_v26  ;;  %11534 = vmatprep.mubr.msk.f32.mxu1 %vm1847_vm4, %v7024_v11 }
 0xc14   : > { %v13314_v19 = vpop.eup %13313  ;;  %11535 = vmatmul.mubr.msk.f32.vlgmr.msra.gmra.mrb[144].mxu1 %vm1847_vm4, %v7025_v63 }
 0xc15   : > { %v13316_v20 = vpop.eup %13315  ;;  %12369 = vmatpush3.bf16.msra.mxu1 %v18444_v24  ;;  %v7027_v44 = vmul.f32 %v13314_v19, %v16840_v13 }
 0xc16   : > { %12371 = vmatprep.subr.bf16.mxu1 %v18445_v62  ;;  %v7026_v21 = vmul.f32 %v13316_v20, %v16838_v49 }
 0xc17   : > { %v6941_v2 = vpop.xlane.xlu0 %6940 }
 0xc18   : > { %v13318_v55 = vpop.eup %13317  ;;  %13325 = vrcp.f32 %v6941_v2  ;;  %11537 = vmatprep.mubr.msk.f32.mxu1 %vm1847_vm4, %v7026_v21  ;;  %v6938_v41 = vpop.xlane.xlu1 %6937 }
 0xc19   : > { %v13320_v58 = vpop.eup %13319  ;;  %11538 = vmatmul.mubr.msk.f32.gmra.mrb[146].mxu1 %vm1847_vm4, %v7027_v44  ;;  %13327 = vrcp.f32 %v6938_v41  ;;  %v7029_v1 = vmul.f32 %v13318_v55, %v16850_v7 }
 0xc1a   : > { %12373 = vmatpush3.bf16.msra.mxu1 %v18445_v62  ;;  %v7028_v24 = vmul.f32 %v13320_v58, %v16848_v46 }
 0xc1b   : > { %12375 = vmatprep.subr.bf16.mxu1 %v18446_v3  ;;  %v6947_v13 = vpop.xlane.xlu0 %6946 }
 0xc1c   : > { %v13322_v49 = vpop.eup %13321  ;;  %13329 = vrcp.f32 %v6947_v13  ;;  %11540 = vmatprep.mubr.msk.f32.mxu1 %vm1847_vm4, %v7028_v24  ;;  %v6944_v17 = vpop.xlane.xlu1 %6943  ;;  %v18148_v13 = vmov 0.0  }
 0xc1d   : > { %v13324_v43 = vpop.eup %13323  ;;  %11541 = vmatmul.mubr.msk.f32.gmra.mrb[148].mxu1 %vm1847_vm4, %v7029_v1  ;;  %13331 = vrcp.f32 %v6944_v17  ;;  %v7031_v0 = vmul.f32 %v13322_v49, %v16860_v56  ;;  %11602 = vmatprep.subr.mxu0 %v18148_v13 }
 0xc1e   : > { %12377 = vmatpush3.bf16.msra.mxu1 %v18446_v3  ;;  %v7030_v62 = vmul.f32 %v13324_v43, %v16858_v34 }
 0xc1f   : > { %12379 = vmatprep.subr.bf16.mxu1 %v18448_v53  ;;  %v6953_v46 = vpop.xlane.xlu0 %6952 }
 0xc20   : > { %13333 = vrcp.f32 %v6953_v46  ;;  %11543 = vmatprep.mubr.msk.f32.mxu1 %vm1847_vm4, %v7030_v62  ;;  %v6950_v7 = vpop.xlane.xlu1 %6949 }
 0xc21   : > { %11544 = vmatmul.mubr.msk.f32.gmra.mrb[150].mxu1 %vm1847_vm4, %v7031_v0  ;;  %13335 = vrcp.f32 %v6950_v7 }
 0xc22   : > { %v13326_v14 = vpop.eup %13325  ;;  %12381 = vmatpush3.bf16.msra.mxu1 %v18448_v53 }
 0xc23   : > { %v13328_v10 = vpop.eup %13327  ;;  %v6959_v6 = vpop.xlane.xlu0 %6958  ;;  %v7033_v34 = vmul.f32 %v13326_v14, %v16870_v8  ;;  %11612 = vmatprep.subr.mxu1 %v18148_v13 }
 0xc24   : > { %13337 = vrcp.f32 %v6959_v6  ;;  %v6956_v56 = vpop.xlane.xlu1 %6955  ;;  %v7032_v3 = vmul.f32 %v13328_v10, %v16872_v15 }
 0xc25   : > { %13339 = vrcp.f32 %v6956_v56 }
 0xc26   : > { %v13330_v50 = vpop.eup %13329  ;;  %11562 = vmatprep.mubr.msk.f32.mxu0 %vm1847_vm4, %v7032_v3 }
 0xc27   : > { %v13332_v29 = vpop.eup %13331  ;;  %v6965_v31 = vpop.xlane.xlu0 %6964  ;;  %11563 = vmatmul.mubr.msk.f32.vlgmr.msra.gmra.mrb[152].mxu0 %vm1847_vm4, %v7033_v34  ;;  %v7035_v36 = vmul.f32 %v13330_v50, %v16880_v59 }
 0xc28   : > { %13341 = vrcp.f32 %v6965_v31  ;;  %v6962_v39 = vpop.xlane.xlu1 %6961  ;;  %v7034_v53 = vmul.f32 %v13332_v29, %v16882_v52 }
 0xc29   : > { %13343 = vrcp.f32 %v6962_v39 }
 0xc2a   : > { %v13334_v32 = vpop.eup %13333  ;;  %11565 = vmatprep.mubr.msk.f32.mxu0 %vm1847_vm4, %v7034_v53 }
 0xc2b   : > { %v13336_v15 = vpop.eup %13335  ;;  %v6971_v8 = vpop.xlane.xlu0 %6970  ;;  %11566 = vmatmul.mubr.msk.f32.gmra.mrb[154].mxu0 %vm1847_vm4, %v7035_v36  ;;  %v7037_v45 = vmul.f32 %v13334_v32, %v16890_v38  ;;  %v18530_v36 = vld [vmem:[#allocation9_spill] sm:$0xff] }
 0xc2c   : > { %13345 = vrcp.f32 %v6971_v8  ;;  %v6968_v23 = vpop.xlane.xlu1 %6967  ;;  %v7036_v33 = vmul.f32 %v13336_v15, %v16892_v60  ;;  %v18531_v15 = vld [vmem:[#allocation8_spill] sm:$0xff] }
 0xc2d   : > { %13347 = vrcp.f32 %v6968_v23 }
 0xc2e   : > { %v13338_v47 = vpop.eup %13337  ;;  %11568 = vmatprep.mubr.msk.f32.mxu0 %vm1847_vm4, %v7036_v33 }
 0xc2f   : > { %v13340_v52 = vpop.eup %13339  ;;  %v6977_v26 = vpop.xlane.xlu0 %6976  ;;  %11569 = vmatmul.mubr.msk.f32.gmra.mrb[156].mxu0 %vm1847_vm4, %v7037_v45  ;;  %v7039_v63 = vmul.f32 %v13338_v47, %v16900_v30 }
 0xc30   : > { %13349 = vrcp.f32 %v6977_v26  ;;  %v6974_v59 = vpop.xlane.xlu1 %6973  ;;  %v7038_v11 = vmul.f32 %v13340_v52, %v16902_v27  ;;  %v18533_v52 = vld [vmem:[#allocation11_spill] sm:$0xff] }
 0xc31   : > { %13351 = vrcp.f32 %v6974_v59 }
 0xc32   : > { %v13342_v19 = vpop.eup %13341  ;;  %11571 = vmatprep.mubr.msk.f32.mxu0 %vm1847_vm4, %v7038_v11 }
 0xc33   : > { %v13344_v60 = vpop.eup %13343  ;;  %v6983_v20 = vpop.xlane.xlu0 %6982  ;;  %11572 = vmatmul.mubr.msk.f32.gmra.mrb[158].mxu0 %vm1847_vm4, %v7039_v63  ;;  %v7041_v21 = vmul.f32 %v13342_v19, %v16910_v5  ;;  %v18534_v63 = vld [vmem:[#allocation12_spill] sm:$0xff] }
 0xc34   : > { %13353 = vrcp.f32 %v6983_v20  ;;  %v6980_v38 = vpop.xlane.xlu1 %6979  ;;  %v7040_v44 = vmul.f32 %v13344_v60, %v16912_v22  ;;  %11604 = vmatprep.mubr.msk.f32.mxu0 %vm13494_vm5, %v18148_v13 }
 0xc35   : > { %13355 = vrcp.f32 %v6980_v38 }
 0xc36   : > { %v13346_v2 = vpop.eup %13345  ;;  %11590 = vmatprep.mubr.msk.f32.mxu1 %vm1847_vm4, %v7040_v44 }
 0xc37   : > { %v13348_v27 = vpop.eup %13347  ;;  %11591 = vmatmul.mubr.msk.f32.vlgmr.msra.gmra.mrb[152].mxu1 %vm1847_vm4, %v7041_v21  ;;  %v7043_v55 = vmul.f32 %v13346_v2, %v16918_v40 }
 0xc38   : > { %v7042_v30 = vmul.f32 %v13348_v27, %v16920_v35 }
 0xc3a   : > { %v13350_v41 = vpop.eup %13349  ;;  %11593 = vmatprep.mubr.msk.f32.mxu1 %vm1847_vm4, %v7042_v30 }
 0xc3b   : > { %v13352_v58 = vpop.eup %13351  ;;  %11594 = vmatmul.mubr.msk.f32.gmra.mrb[154].mxu1 %vm1847_vm4, %v7043_v55  ;;  %v7045_v5 = vmul.f32 %v13350_v41, %v16926_v12  ;;  %v17026_v12 = vld [vmem:[%s17944_s8] sm:$0xf] }
 0xc3c   : > { %v7044_v22 = vmul.f32 %v13352_v58, %v16928_v51  ;;  %11603 = vmatpush3.xpose.msk.msra.mxu0 %vm777_vm2, %v17026_v12  ;;  %11613 = vmatpush3.msk.msra.mxu1 %vm8034_vm9, %v17026_v12 }
 0xc3d   : > { %11607 = vmatprep.subr.mxu0 %v18148_v13 }
 0xc3e   : > { %v13354_v1 = vpop.eup %13353  ;;  %11596 = vmatprep.mubr.msk.f32.mxu1 %vm1847_vm4, %v7044_v22 }
 0xc3f   : > { %v13356_v24 = vpop.eup %13355  ;;  %11597 = vmatmul.mubr.msk.f32.gmra.mrb[156].mxu1 %vm1847_vm4, %v7045_v5  ;;  %v7047_v40 = vmul.f32 %v13354_v1, %v16934_v57  ;;  %v18529_v57 = vld [vmem:[#allocation75_spill] sm:$0xff] }
 0xc40   : > { %v7046_v35 = vmul.f32 %v13356_v24, %v16936_v42  ;;  %v18535_v24 = vld [vmem:[#allocation13_spill] sm:$0xff] }
 0xc42   : > { %11599 = vmatprep.mubr.msk.f32.mxu1 %vm1847_vm4, %v7046_v35 }
 0xc43   : > { %11600 = vmatmul.mubr.msk.f32.gmra.mrb[158].mxu1 %vm1847_vm4, %v7047_v40 }
 0xc44   : > { %11614 = vmatprep.mubr.msk.f32.mxu1 %vm13494_vm5, %v18148_v13 }
 0xcb3   : > { %v11508_v51 = vpop.f32.mrb[144].mxu0 }
 0xcb4   : > { %v7565_v42 = vmul.f32 %v11508_v51, %v18529_v57  ;;  %v7138_v49 = vpop.f32.mrb[145].mxu0 }
 0xcb5   : > { %v7564_v17 = vmul.f32 %v7138_v49, %v18529_v57 }
 0xcb6   : > { %v7597_v43 = vadd.f32 %v7565_v42, %v16529_v18 }
 0xcb7   : > { %v7596_v0 = vadd.f32 %v7564_v17, %v16532_v4 }
 0xcb8   : > { %v11511_v62 = vpop.f32.mrb[146].mxu0  ;;  %v17053_v32 = vadd.f32 %v7597_v43, %v18530_v36 }
 0xcb9   : > { %v7567_v46 = vmul.f32 %v11511_v62, %v18529_v57  ;;  %v7148_v7 = vpop.f32.mrb[147].mxu0  ;;  %v17056_v8 = vadd.f32 %v7596_v0, %v18531_v15  ;;  %v18536_v0 = vld [vmem:[#allocation17_spill] sm:$0xff]  ;;  %v18537_v62 = vld [vmem:[#allocation16_spill] sm:$0xff]  ;;  %v18541_v15 = vld [vmem:[#allocation19_spill] sm:$0xff] }
 0xcba   : > { %v7566_v14 = vmul.f32 %v7148_v7, %v18529_v57  ;;  %v18538_v7 = vld [vmem:[#allocation14_spill] sm:$0xff] }
 0xcbb   : > { %v7599_v10 = vadd.f32 %v7567_v46, %v16537_v25  ;;  %v7660_v33 = vsel %vm777_vm2, %v17056_v8, 0.0  ;;  %v7744_v47 = vmul.f32 %v17056_v8, %v17056_v8 }
 0xcbc   : > { %v7598_v6 = vadd.f32 %v7566_v14, %v16540_v48  ;;  %v11514_v56 = vpop.f32.mrb[148].mxu0 }
 0xcbd   : > { %v7569_v3 = vmul.f32 %v11514_v56, %v18529_v57  ;;  %v7158_v34 = vpop.f32.mrb[149].mxu0  ;;  %v17072_v26 = vadd.f32 %v7599_v10, %v18533_v52  ;;  %v7776_v38 = vsel %vm777_vm2, %v7744_v47, 0.0  ;;  %v18539_v10 = vld [vmem:[#allocation107_spill] sm:$0xff] }
 0xcbe   : > { %v7568_v50 = vmul.f32 %v7158_v34, %v18529_v57  ;;  %v18540_v34 = vld [vmem:[#allocation108_spill] sm:$0xff] }
 0xcbf   : > { %v7601_v18 = vadd.f32 %v7569_v3, %v16545_v28  ;;  %v18532_v28 = vld [vmem:[#allocation10_spill] sm:$0xff]  ;;  %v7665_v44 = vsel %vm777_vm2, %v17072_v26, 0.0  ;;  %v7747_v1 = vmul.f32 %v17072_v26, %v17072_v26 }
 0xcc0   : > { %v7600_v4 = vadd.f32 %v7568_v50, %v16548_v37  ;;  %v11517_v29 = vpop.f32.mrb[150].mxu0  ;;  %v17059_v23 = vadd.f32 %v7598_v6, %v18532_v28  ;;  %v7661_v37 = vsel %vm777_vm2, %v17053_v32, 0.0 }
 0xcc1   : > { %v7571_v31 = vmul.f32 %v11517_v29, %v18529_v57  ;;  %v7168_v39 = vpop.f32.mrb[151].mxu0  ;;  %v7662_v45 = vadd.f32 %v7661_v37, %v7660_v33  ;;  %v17093_v35 = vadd.f32 %v7601_v18, %v18535_v24  ;;  %v7781_v56 = vsel %vm777_vm2, %v7747_v1, 0.0 }
 0xcc2   : > { %v7570_v53 = vmul.f32 %v7168_v39, %v18529_v57  ;;  %v7746_v11 = vmul.f32 %v17059_v23, %v17059_v23  ;;  %v17077_v19 = vadd.f32 %v7600_v4, %v18534_v63 }
 0xcc3   : > { %v17049_v25 = vadd.f32 %v7571_v31, %v16553_v61  ;;  %v7663_v61 = vsel %vm777_vm2, %v17059_v23, 0.0  ;;  %v7669_v3 = vsel %vm777_vm2, %v17093_v35, 0.0  ;;  %v7749_v47 = vmul.f32 %v17093_v35, %v17093_v35 }
 0xcc4   : > { %v7602_v48 = vadd.f32 %v7570_v53, %v16556_v54  ;;  %v7745_v54 = vmul.f32 %v17053_v32, %v17053_v32  ;;  %v7664_v59 = vadd.f32 %v7663_v61, %v7662_v45  ;;  %v7779_v55 = vsel %vm777_vm2, %v7746_v11, 0.0  ;;  %v18542_v45 = vld [vmem:[#allocation109_spill] sm:$0xff] }
 0xcc5   : > { %v7667_v41 = vsel %vm777_vm2, %v17077_v19, 0.0  ;;  %v7748_v49 = vmul.f32 %v17077_v19, %v17077_v19  ;;  %v18543_v11 = vld [vmem:[#allocation61_spill] sm:$0xff] }
 0xcc6   : > { %v7777_v20 = vsel %vm777_vm2, %v7745_v54, 0.0  ;;  %v7666_v27 = vadd.f32 %v7665_v44, %v7664_v59  ;;  %v17106_v14 = vadd.f32 %v7602_v48, %v18538_v7 }
 0xcc7   : > { %v7778_v22 = vadd.f32 %v7777_v20, %v7776_v38  ;;  %v7783_v29 = vsel %vm777_vm2, %v7748_v49, 0.0  ;;  %v18544_v38 = vld [vmem:[#allocation15_spill] sm:$0xff] }
 0xcc8   : > { %v7668_v42 = vadd.f32 %v7667_v41, %v7666_v27  ;;  %v7671_v33 = vsel %vm777_vm2, %v17106_v14, 0.0  ;;  %v17137_v44 = vadd.f32 %v17049_v25, %v18544_v38 }
 0xcc9   : > { %v7780_v51 = vadd.f32 %v7779_v55, %v7778_v22  ;;  %v18545_v55 = vld [vmem:[#allocation18_spill] sm:$0xff] }
 0xcca   : > { %v7670_v31 = vadd.f32 %v7669_v3, %v7668_v42  ;;  %v18547_v42 = vld [vmem:[#allocation64_spill] sm:$0xff] }
 0xccb   : > { %v7782_v4 = vadd.f32 %v7781_v56, %v7780_v51 }
 0xccd   : > { %v7784_v20 = vadd.f32 %v7783_v29, %v7782_v4 }
 0xce7   : > { %v11536_v60 = vpop.f32.mrb[144].mxu1 }
 0xce8   : > { %v7573_v21 = vmul.f32 %v11536_v60, %v18529_v57  ;;  %v7267_v2 = vpop.f32.mrb[145].mxu1 }
 0xce9   : > { %v7572_v30 = vmul.f32 %v7267_v2, %v18529_v57 }
 0xcea   : > { %v7605_v58 = vadd.f32 %v7573_v21, %v16561_v16 }
 0xceb   : > { %v7604_v5 = vadd.f32 %v7572_v30, %v16564_v9  ;;  %v7672_v30 = vadd.f32 %v7671_v33, %v7670_v31 }
 0xcec   : > { %v11539_v40 = vpop.f32.mrb[146].mxu1  ;;  %v17099_v16 = vadd.f32 %v7605_v58, %v18536_v0  ;;  %v7785_v0 = vsel %vm777_vm2, %v7749_v47, 0.0 }
 0xced   : > { %v7575_v17 = vmul.f32 %v11539_v40, %v18529_v57  ;;  %v7277_v43 = vpop.f32.mrb[147].mxu1  ;;  %v17102_v9 = vadd.f32 %v7604_v5, %v18537_v62  ;;  %v7750_v5 = vmul.f32 %v17106_v14, %v17106_v14  ;;  %v18546_v40 = vld [vmem:[#allocation21_spill] sm:$0xff]  ;;  %v7673_v62 = vsel %vm777_vm2, %v17137_v44, 0.0 }
 0xcee   : > { %v7574_v46 = vmul.f32 %v7277_v43, %v18529_v57  ;;  %v7682_v48 = vsel %vm777_vm2, %v17099_v16, 0.0  ;;  %v7753_v61 = vmul.f32 %v17099_v16, %v17099_v16  ;;  %v17160_v7 = vadd.f32 %v7673_v62, %v7672_v30 }
 0xcef   : > { %v7607_v6 = vadd.f32 %v7575_v17, %v18539_v10  ;;  %v7681_v36 = vsel %vm777_vm2, %v17102_v9, 0.0  ;;  %v7752_v52 = vmul.f32 %v17102_v9, %v17102_v9  ;;  %v18548_v17 = vld [vmem:[#allocation56_spill] sm:$0xff]  ;;  %v7786_v10 = vadd.f32 %v7785_v0, %v7784_v20  ;;  %v18556_v0 = vld [vmem:[#allocation57_spill] sm:$0xff] }
 0xcf0   : > { %v7606_v50 = vadd.f32 %v7574_v46, %v18540_v34  ;;  %v11542_v18 = vpop.f32.mrb[148].mxu1  ;;  %v7683_v21 = vadd.f32 %v7682_v48, %v7681_v36  ;;  %v7798_v1 = vsel %vm777_vm2, %v7753_v61, 0.0  ;;  %v7751_v46 = vmul.f32 %v17137_v44, %v17137_v44 }
 0xcf1   : > { %v7577_v39 = vmul.f32 %v11542_v18, %v18529_v57  ;;  %v7287_v53 = vpop.f32.mrb[149].mxu1  ;;  %v17141_v41 = vadd.f32 %v7607_v6, %v18545_v55  ;;  %v7797_v24 = vsel %vm777_vm2, %v7752_v52, 0.0  ;;  %v7787_v34 = vsel %vm777_vm2, %v7750_v5, 0.0 }
 0xcf2   : > { %v17120_v28 = vadd.f32 %v7606_v50, %v18541_v15  ;;  %v7576_v37 = vmul.f32 %v7287_v53, %v18529_v57  ;;  %v7799_v50 = vadd.f32 %v7798_v1, %v7797_v24  ;;  %v18550_v15 = vld [vmem:[#allocation55_spill] sm:$0xff]  ;;  %v17177_v61 = vsel %vm777_vm2, %v7751_v46, 0.0  ;;  %v18554_v24 = vld [vmem:[#allocation25_spill] sm:$0xff] }
 0xcf3   : > { %v7609_v54 = vadd.f32 %v7577_v39, %v18542_v45  ;;  %v7686_v6 = vsel %vm777_vm2, %v17141_v41, 0.0  ;;  %v7755_v31 = vmul.f32 %v17141_v41, %v17141_v41  ;;  %v18549_v39 = vld [vmem:[#allocation20_spill] sm:$0xff]  ;;  %v17180_v47 = vadd.f32 %v7787_v34, %v7786_v10 }
 0xcf4   : > { %v7684_v59 = vsel %vm777_vm2, %v17120_v28, 0.0  ;;  %v7608_v63 = vadd.f32 %v7576_v37, %v18543_v11  ;;  %v11545_v60 = vpop.f32.mrb[150].mxu1  ;;  %v7754_v58 = vmul.f32 %v17120_v28, %v17120_v28  ;;  %v18551_v11 = vld [vmem:[#allocation24_spill] sm:$0xff] }
 0xcf5   : > { %v7579_v2 = vmul.f32 %v11545_v60, %v18529_v57  ;;  %v7297_v27 = vpop.f32.mrb[151].mxu1  ;;  %v7685_v25 = vadd.f32 %v7684_v59, %v7683_v21  ;;  %v17170_v53 = vadd.f32 %v7609_v54, %v18549_v39  ;;  %v18552_v60 = vld [vmem:[#allocation106_spill] sm:$0xff]  ;;  %v7802_v21 = vsel %vm777_vm2, %v7755_v31, 0.0  ;;  %v18559_v31 = vld [vmem:[#allocation27_spill] sm:$0xff] }
 0xcf6   : > { %v7578_v22 = vmul.f32 %v7297_v27, %v18529_v57  ;;  %v17151_v51 = vadd.f32 %v7608_v63, %v18546_v40  ;;  %v7800_v56 = vsel %vm777_vm2, %v7754_v58, 0.0 }
 0xcf7   : > { %v7611_v49 = vadd.f32 %v7579_v2, %v18547_v42  ;;  %v7687_v18 = vadd.f32 %v7686_v6, %v7685_v25  ;;  %v7801_v36 = vadd.f32 %v7800_v56, %v7799_v50  ;;  %v7690_v2 = vsel %vm777_vm2, %v17170_v53, 0.0  ;;  %v18555_v42 = vld [vmem:[#allocation58_spill] sm:$0xff] }
 0xcf8   : > { %v7610_v43 = vadd.f32 %v7578_v22, %v18548_v17  ;;  %v7688_v48 = vsel %vm777_vm2, %v17151_v51, 0.0  ;;  %v7756_v54 = vmul.f32 %v17151_v51, %v17151_v51  ;;  %v7757_v55 = vmul.f32 %v17170_v53, %v17170_v53  ;;  %v18553_v22 = vld [vmem:[#allocation23_spill] sm:$0xff]  ;;  %v18557_v6 = vld [vmem:[#allocation22_spill] sm:$0xff] }
 0xcf9   : > { %v7689_v59 = vadd.f32 %v7688_v48, %v7687_v18  ;;  %v7803_v58 = vadd.f32 %v7802_v21, %v7801_v36  ;;  %v17209_v56 = vadd.f32 %v7611_v49, %v18557_v6 }
 0xcfa   : > { %v11564_v3 = vpop.f32.mrb[152].mxu0  ;;  %v17196_v5 = vadd.f32 %v7610_v43, %v18553_v22  ;;  %v7804_v10 = vsel %vm777_vm2, %v7756_v54, 0.0  ;;  %v7806_v48 = vsel %vm777_vm2, %v7757_v55, 0.0 }
 0xcfb   : > { %v7581_v4 = vmul.f32 %v11564_v3, %v18529_v57  ;;  %v7396_v29 = vpop.f32.mrb[153].mxu0  ;;  %v7691_v43 = vadd.f32 %v7690_v2, %v7689_v59 }
 0xcfc   : > { %v7580_v33 = vmul.f32 %v7396_v29, %v18529_v57  ;;  %v7692_v49 = vsel %vm777_vm2, %v17196_v5, 0.0 }
 0xcfd   : > { %v7613_v37 = vadd.f32 %v7581_v4, %v18550_v15  ;;  %v18558_v4 = vld [vmem:[#allocation26_spill] sm:$0xff]  ;;  %v18560_v15 = vld [vmem:[#allocation60_spill] sm:$0xff] }
 0xcfe   : > { %v11567_v52 = vpop.f32.mrb[154].mxu0  ;;  %v7612_v20 = vadd.f32 %v7580_v33, %v18552_v60  ;;  %v7805_v33 = vadd.f32 %v7804_v10, %v7803_v58  ;;  %v7694_v60 = vsel %vm777_vm2, %v17209_v56, 0.0 }
 0xcff   : > { %v17185_v63 = vadd.f32 %v7613_v37, %v18551_v11  ;;  %v7406_v38 = vpop.f32.mrb[155].mxu0  ;;  %v7583_v27 = vmul.f32 %v11567_v52, %v18529_v57 }
 0xd00   : > { %v7582_v30 = vmul.f32 %v7406_v38, %v18529_v57  ;;  %v17203_v40 = vadd.f32 %v7612_v20, %v18554_v24  ;;  %v7759_v20 = vmul.f32 %v17209_v56, %v17209_v56  ;;  %v7758_v38 = vmul.f32 %v17196_v5, %v17196_v5 }
 0xd01   : > { %v7703_v1 = vsel %vm777_vm2, %v17185_v63, 0.0  ;;  %v7761_v25 = vmul.f32 %v17185_v63, %v17185_v63  ;;  %v7615_v17 = vadd.f32 %v7583_v27, %v18555_v42  ;;  %v7693_v27 = vadd.f32 %v7692_v49, %v7691_v43 }
 0xd02   : > { %v7614_v62 = vadd.f32 %v7582_v30, %v18556_v0  ;;  %v11570_v46 = vpop.f32.mrb[156].mxu0  ;;  %v7702_v50 = vsel %vm777_vm2, %v17203_v40, 0.0  ;;  %v7760_v18 = vmul.f32 %v17203_v40, %v17203_v40  ;;  %v7807_v49 = vadd.f32 %v7806_v48, %v7805_v33 }
 0xd03   : > { %v7585_v3 = vmul.f32 %v11570_v46, %v18529_v57  ;;  %v7416_v34 = vpop.f32.mrb[157].mxu0  ;;  %v17217_v29 = vadd.f32 %v7615_v17, %v18558_v4  ;;  %v7704_v36 = vadd.f32 %v7703_v1, %v7702_v50  ;;  %v7819_v52 = vsel %vm777_vm2, %v7761_v25, 0.0  ;;  %v18561_v17 = vld [vmem:[#allocation28_spill] sm:$0xff]  ;;  %v18564_v50 = vld [vmem:[#allocation77_spill] sm:$0xff] }
 0xd04   : > { %v17220_v39 = vadd.f32 %v7614_v62, %v18559_v31  ;;  %v7818_v59 = vsel %vm777_vm2, %v7760_v18, 0.0  ;;  %v7584_v58 = vmul.f32 %v7416_v34, %v18529_v57  ;;  %v18562_v62 = vld [vmem:[#allocation59_spill] sm:$0xff] }
 0xd05   : > { %v7617_v37 = vadd.f32 %v7585_v3, %v18560_v15  ;;  %v7763_v30 = vmul.f32 %v17217_v29, %v17217_v29  ;;  %v7820_v22 = vadd.f32 %v7819_v52, %v7818_v59  ;;  %v7707_v1 = vsel %vm777_vm2, %v17217_v29, 0.0  ;;  %v18563_v3 = vld [vmem:[#allocation74_spill] sm:$0xff]  ;;  %v18565_v15 = vld [vmem:[#allocation29_spill] sm:$0xff] }
 0xd06   : > { %v7705_v54 = vsel %vm777_vm2, %v17220_v39, 0.0  ;;  %v11573_v11 = vpop.f32.mrb[158].mxu0  ;;  %v7762_v55 = vmul.f32 %v17220_v39, %v17220_v39  ;;  %v7616_v46 = vadd.f32 %v7584_v58, %v18562_v62  ;;  %v17258_v59 = vadd.f32 %v7694_v60, %v7693_v27 }
 0xd07   : > { %v7706_v21 = vadd.f32 %v7705_v54, %v7704_v36  ;;  %v7426_v2 = vpop.f32.mrb[159].mxu0  ;;  %v7587_v25 = vmul.f32 %v11573_v11, %v18529_v57  ;;  %v17247_v0 = vadd.f32 %v7617_v37, %v18561_v17  ;;  %v7823_v36 = vsel %vm777_vm2, %v7763_v30, 0.0  ;;  %v18566_v11 = vld [vmem:[#allocation31_spill] sm:$0xff]  ;;  %v18568_v30 = vld [vmem:[#allocation102_spill] sm:$0xff] }
 0xd08   : > { %v7586_v24 = vmul.f32 %v7426_v2, %v18529_v57  ;;  %v7821_v42 = vsel %vm777_vm2, %v7762_v55, 0.0  ;;  %v17255_v52 = vadd.f32 %v7616_v46, %v18565_v15  ;;  %v18567_v2 = vld [vmem:[#allocation73_spill] sm:$0xff]  ;;  %v7808_v60 = vsel %vm777_vm2, %v7758_v38, 0.0  ;;  %v18569_v46 = vld [vmem:[#allocation32_spill] sm:$0xff] }
 0xd09   : > { %v7708_v10 = vadd.f32 %v7707_v1, %v7706_v21  ;;  %v7822_v43 = vadd.f32 %v7821_v42, %v7820_v22  ;;  %v7619_v34 = vadd.f32 %v7587_v25, %v18563_v3  ;;  %v7765_v58 = vmul.f32 %v17247_v0, %v17247_v0 }
 0xd0a   : > { %v11592_v6 = vpop.f32.mrb[152].mxu1  ;;  %v7618_v18 = vadd.f32 %v7586_v24, %v18564_v50  ;;  %v7709_v48 = vsel %vm777_vm2, %v17255_v52, 0.0  ;;  %v7764_v33 = vmul.f32 %v17255_v52, %v17255_v52  ;;  %v7711_v27 = vsel %vm777_vm2, %v17247_v0, 0.0  ;;  %v18572_v50 = vld [vmem:[#allocation30_spill] sm:$0xff] }
 0xd0b   : > { %v7589_v4 = vmul.f32 %v11592_v6, %v18529_v57  ;;  %v7525_v31 = vpop.f32.mrb[153].mxu1  ;;  %v7824_v54 = vadd.f32 %v7823_v36, %v7822_v43  ;;  %v7710_v25 = vadd.f32 %v7709_v48, %v7708_v10  ;;  %v18571_v43 = vld [vmem:[#allocation33_spill] sm:$0xff]  ;;  %v7696_v36 = vrot.slane %v17258_v59, 4 }
 0xd0c   : > { %v7588_v37 = vmul.f32 %v7525_v31, %v18529_v57  ;;  %v17261_v21 = vadd.f32 %v7618_v18, %v18566_v11  ;;  %v7825_v17 = vsel %vm777_vm2, %v7764_v33, 0.0  ;;  %v17286_v18 = vadd.f32 %v7619_v34, %v18572_v50 }
 0xd0d   : > { %v7621_v55 = vadd.f32 %v7589_v4, %v18567_v2  ;;  %v7826_v38 = vadd.f32 %v7825_v17, %v7824_v54  ;;  %v7712_v10 = vadd.f32 %v7711_v27, %v7710_v25  ;;  %v7810_v31 = vsel %vm777_vm2, %v7759_v20, 0.0 }
 0xd0e   : > { %v7620_v22 = vadd.f32 %v7588_v37, %v18568_v30  ;;  %v11595_v1 = vpop.f32.mrb[154].mxu1  ;;  %v7713_v24 = vsel %vm777_vm2, %v17261_v21, 0.0  ;;  %v7766_v62 = vmul.f32 %v17261_v21, %v17261_v21  ;;  %v7809_v15 = vadd.f32 %v7808_v60, %v7807_v49  ;;  %v18573_v30 = vld [vmem:[#allocation82_spill] sm:$0xff] }
 0xd0f   : > { %v7535_v42 = vpop.f32.mrb[155].mxu1  ;;  %v17280_v6 = vadd.f32 %v7621_v55, %v18569_v46  ;;  %v7591_v4 = vmul.f32 %v11595_v1, %v18529_v57  ;;  %v7827_v37 = vsel %vm777_vm2, %v7765_v58, 0.0  ;;  %v7714_v2 = vadd.f32 %v7713_v24, %v7712_v10  ;;  %v18574_v24 = vld [vmem:[#allocation34_spill] sm:$0xff]  ;;  %v18576_v46 = vld [vmem:[#allocation104_spill] sm:$0xff] }
 0xd10   : > { %v17283_v3 = vadd.f32 %v7620_v22, %v18571_v43  ;;  %v7828_v55 = vadd.f32 %v7827_v37, %v7826_v38  ;;  %v7829_v48 = vsel %vm777_vm2, %v7766_v62, 0.0  ;;  %v7590_v20 = vmul.f32 %v7535_v42, %v18529_v57  ;;  %v18575_v42 = vld [vmem:[#allocation103_spill] sm:$0xff] }
 0xd11   : > { %18570 = vst [vmem:[#allocation43_spill] sm:$0xff] %v17280_v6  ;;  %v7769_v54 = vmul.f32 %v17280_v6, %v17280_v6  ;;  %v7623_v22 = vadd.f32 %v7591_v4, %v18573_v30  ;;  %v7715_v58 = vsel %vm777_vm2, %v17286_v18, 0.0  ;;  %v7767_v1 = vmul.f32 %v17286_v18, %v17286_v18  ;;  %v18577_v4 = vld [vmem:[#allocation105_spill] sm:$0xff] }
 0xd12   : > { %v11598_v11 = vpop.f32.mrb[156].mxu1  ;;  %v7768_v33 = vmul.f32 %v17283_v3, %v17283_v3  ;;  %v7724_v60 = vsel %vm777_vm2, %v17280_v6, 0.0  ;;  %v7723_v25 = vsel %vm777_vm2, %v17283_v3, 0.0  ;;  %v7622_v62 = vadd.f32 %v7590_v20, %v18575_v42  ;;  %v18578_v6 = vld [vmem:[#allocation35_spill] sm:$0xff] }
 0xd13   : > { %v7545_v34 = vpop.f32.mrb[157].mxu1  ;;  %v7593_v49 = vmul.f32 %v11598_v11, %v18529_v57  ;;  %v17310_v17 = vadd.f32 %v7623_v22, %v18574_v24  ;;  %v7716_v50 = vadd.f32 %v7715_v58, %v7714_v2  ;;  %v7830_v10 = vadd.f32 %v7829_v48, %v7828_v55  ;;  %v18580_v2 = vld [vmem:[#allocation41_spill] sm:$0xff] }
 0xd14   : > { %v7592_v27 = vmul.f32 %v7545_v34, %v18529_v57  ;;  %v7811_v13 = vadd.f32 %v7810_v31, %v7809_v15  ;;  %v7840_v34 = vsel %vm777_vm2, %v7769_v54, 0.0  ;;  %v7839_v45 = vsel %vm777_vm2, %v7768_v33, 0.0  ;;  %v18581_v54 = vld [vmem:[#allocation36_spill] sm:$0xff] }
 0xd15   : > { %v7625_v43 = vadd.f32 %v7593_v49, %v18576_v46  ;;  %v17319_v22 = vadd.f32 %v7622_v62, %v18578_v6  ;;  %v7831_v20 = vsel %vm777_vm2, %v7767_v1, 0.0  ;;  %v7725_v24 = vadd.f32 %v7724_v60, %v7723_v25  ;;  %v18579_v49 = vld [vmem:[#allocation37_spill] sm:$0xff] }
 0xd16   : > { %v11601_v38 = vpop.f32.mrb[158].mxu1  ;;  %v7624_v37 = vadd.f32 %v7592_v27, %v18577_v4  ;;  %v7771_v48 = vmul.f32 %v17310_v17, %v17310_v17  ;;  %v7717_v33 = vrot.slane %v7716_v50, 4  ;;  %v7832_v58 = vadd.f32 %v7831_v20, %v7830_v10 }
 0xd17   : > { %v7595_v11 = vmul.f32 %v11601_v38, %v18529_v57  ;;  %v7555_v30 = vpop.f32.mrb[159].mxu1  ;;  %v7726_v31 = vsel %vm777_vm2, %v17319_v22, 0.0  ;;  %v7770_v15 = vmul.f32 %v17319_v22, %v17319_v22  ;;  %v17333_v6 = vadd.f32 %v7625_v43, %v18581_v54 }
 0xd18   : > { %v17323_v42 = vadd.f32 %v7624_v37, %v18579_v49  ;;  %v7841_v1 = vadd.f32 %v7840_v34, %v7839_v45  ;;  %v7727_v60 = vadd.f32 %v7726_v31, %v7725_v24  ;;  %v7728_v27 = vsel %vm777_vm2, %v17310_v17, 0.0 }
 0xd19   : > { %v7627_v55 = vadd.f32 %v7595_v11, %v18580_v2  ;;  %v7842_v25 = vsel %vm777_vm2, %v7770_v15, 0.0  ;;  %v7790_v38 = vadd.f32 %v17177_v61, %v17180_v47  ;;  %v7697_v43 = vadd.f32 %v7696_v36, %v17258_v59  ;;  %v18582_v47 = vld [vmem:[#allocation38_spill] sm:$0xff]  ;;  %v18584_v36 = vld [vmem:[#allocation40_spill] sm:$0xff] }
 0xd1a   : > { %v7730_v62 = vsel %vm777_vm2, %v17323_v42, 0.0  ;;  %v7772_v46 = vmul.f32 %v17323_v42, %v17323_v42  ;;  %v7843_v4 = vadd.f32 %v7842_v25, %v7841_v1  ;;  %v7729_v10 = vadd.f32 %v7728_v27, %v7727_v60 }
 0xd1b   : > { %v7844_v45 = vsel %vm777_vm2, %v7771_v48, 0.0  ;;  %v7773_v37 = vmul.f32 %v17333_v6, %v17333_v6  ;;  %v7594_v34 = vmul.f32 %v7555_v30, %v18529_v57  ;;  %v7812_v20 = vrot.slane %v7811_v13, 4  ;;  %v18586_v30 = vld [vmem:[#allocation39_spill] sm:$0xff] }
 0xd1c   : > { %v7846_v11 = vsel %vm777_vm2, %v7772_v46, 0.0  ;;  %v7718_v24 = vadd.f32 %v7717_v33, %v7716_v50  ;;  %v7731_v49 = vadd.f32 %v7730_v62, %v7729_v10  ;;  %v7845_v2 = vadd.f32 %v7844_v45, %v7843_v4 }
 0xd1d   : > { %v7833_v31 = vrot.slane %v7832_v58, 4  ;;  %v7732_v61 = vsel %vm777_vm2, %v17333_v6, 0.0  ;;  %v17353_v59 = vadd.f32 %v7627_v55, %v18582_v47  ;;  %v7626_v48 = vadd.f32 %v7594_v34, %v18584_v36 }
 0xd1e   : > { %v18585_v15 = vrot.slane %v17160_v7, 4  ;;  %v7791_v1 = vrot.slane %v7790_v38, 4  ;;  %v7847_v60 = vadd.f32 %v7846_v11, %v7845_v2  ;;  %v7733_v57 = vadd.f32 %v7732_v61, %v7731_v49 }
 0xd1f   : > { %18583 = vst [vmem:[#allocation42_spill] sm:$0xff] %v17353_v59  ;;  %v7848_v50 = vsel %vm777_vm2, %v7773_v37, 0.0  ;;  %v17361_v33 = vadd.f32 %v7626_v48, %v18586_v30  ;;  %v7698_v27 = vrot.slane %v7697_v43, 2  ;;  %v7813_v25 = vadd.f32 %v7812_v20, %v7811_v13 }
 0xd20   : > { %v7676_v54 = vadd.f32 %v18585_v15, %v17160_v7  ;;  %v7719_v62 = vrot.slane %v7718_v24, 2  ;;  %v7849_v46 = vadd.f32 %v7848_v50, %v7847_v60  ;;  %v7834_v55 = vadd.f32 %v7833_v31, %v7832_v58 }
 0xd21   : > { %v7775_v4 = vmul.f32 %v17353_v59, %v17353_v59  ;;  %v7734_v10 = vsel %vm777_vm2, %v17361_v33, 0.0  ;;  %v7774_v7 = vmul.f32 %v17361_v33, %v17361_v33  ;;  %v7792_v11 = vadd.f32 %v7791_v1, %v7790_v38 }
 0xd22   : > { %v7677_v45 = vrot.slane %v7676_v54, 2  ;;  %v7735_v37 = vadd.f32 %v7734_v10, %v7733_v57  ;;  %v7736_v34 = vsel %vm777_vm2, %v17353_v59, 0.0  ;;  %v7699_v20 = vadd.f32 %v7698_v27, %v7697_v43 }
 0xd23   : > { %v7850_v13 = vsel %vm777_vm2, %v7774_v7, 0.0  ;;  %v7814_v49 = vrot.slane %v7813_v25, 2  ;;  %v7720_v31 = vadd.f32 %v7719_v62, %v7718_v24  ;;  %v7852_v61 = vsel %vm777_vm2, %v7775_v4, 0.0 }
 0xd24   : > { %v7737_v58 = vadd.f32 %v7736_v34, %v7735_v37  ;;  %v7851_v2 = vadd.f32 %v7850_v13, %v7849_v46  ;;  %v7835_v47 = vrot.slane %v7834_v55, 2  ;;  %v7678_v36 = vadd.f32 %v7677_v45, %v7676_v54 }
 0xd25   : > { %v7793_v48 = vrot.slane %v7792_v11, 2  ;;  %v7700_v50 = vrot.slane %v7699_v20, 1  ;;  %v7815_v57 = vadd.f32 %v7814_v49, %v7813_v25  ;;  %v7721_v30 = vrot.slane %v7720_v31, 1 }
 0xd26   : > { %v7738_v15 = vrot.slane %v7737_v58, 4  ;;  %v7853_v60 = vadd.f32 %v7852_v61, %v7851_v2  ;;  %v7836_v10 = vadd.f32 %v7835_v47, %v7834_v55  ;;  %v7679_v59 = vrot.slane %v7678_v36, 1 }
 0xd27   : > { %v7794_v43 = vadd.f32 %v7793_v48, %v7792_v11  ;;  %v7701_v37 = vadd.f32 %v7700_v50, %v7699_v20  ;;  %v7816_v24 = vrot.slane %v7815_v57, 1  ;;  %v7722_v4 = vadd.f32 %v7721_v30, %v7720_v31 }
 0xd28   : > { %v7739_v38 = vadd.f32 %v7738_v15, %v7737_v58  ;;  %v7854_v1 = vrot.slane %v7853_v60, 4  ;;  %v7837_v54 = vrot.slane %v7836_v10, 1  ;;  %v7680_v45 = vadd.f32 %v7679_v59, %v7678_v36 }
 0xd29   : > { %v7795_v13 = vrot.slane %v7794_v43, 1  ;;  %v7817_v49 = vadd.f32 %v7816_v24, %v7815_v57  ;;  %v18587_v59 = vmov 0.0  }
 0xd2a   : > { %v7740_v7 = vrot.slane %v7739_v38, 2  ;;  %v7855_v27 = vadd.f32 %v7854_v1, %v7853_v60  ;;  %v7865_v55 = vsel %vm7864_vm6, %v7701_v37, %v7680_v45  ;;  %v7838_v20 = vadd.f32 %v7837_v54, %v7836_v10  ;;  %v8406_v37 = vld [vmem:[%s17939_s3] sm:$0xff] }
 0xd2b   : > { %v7867_v11 = vsel %vm7866_vm7, %v7722_v4, %v7865_v55  ;;  %v7796_v47 = vadd.f32 %v7795_v13, %v7794_v43  ;;  %v13495_v54 = vmov 1966171168  }
 0xd2c   : > { %v7741_v46 = vadd.f32 %v7740_v7, %v7739_v38  ;;  %v7856_v62 = vrot.slane %v7855_v27, 2  ;;  %v8182_v45 = vunpack.c.l.s4 %v13495_v54 }
 0xd2d   : > { %v7949_v36 = vsel %vm7864_vm6, %v7817_v49, %v7796_v47  ;;  %v18589_v47 = vld [vmem:[#allocation6_spill] sm:$0xff] }
 0xd2e   : > { %v7742_v34 = vrot.slane %v7741_v46, 1  ;;  %v7857_v58 = vadd.f32 %v7856_v62, %v7855_v27  ;;  %v7950_v48 = vsel %vm7866_vm7, %v7838_v20, %v7949_v36  ;;  %v8409_v62 = vld [vmem:[%s17939_s3 + $0x18] sm:$0xff]  ;;  %v8183_v13 = vunpack.c.0.s8 %v8182_v45 }
 0xd30   : > { %v7743_v25 = vadd.f32 %v7742_v34, %v7741_v46  ;;  %v7858_v2 = vrot.slane %v7857_v58, 1  ;;  %v8408_v46 = vld [vmem:[%s17939_s3 + $0x10] sm:$0xff] }
 0xd31   : > { %v12386_v4 = vpack.c.bf16 %v8409_v62, %v8408_v46  ;;  %v17424_v46 = vld [vmem:[%s17944_s8 + $0x5] ss:$0 sm:$0xff] }
 0xd32   : > { %v7869_v61 = vsel %vm7868_vm8, %v7743_v25, %v7867_v11  ;;  %v7859_v31 = vadd.f32 %v7858_v2, %v7857_v58  ;;  %v18588_v25 = vld [vmem:[#allocation5_spill] sm:$0xff] }
 0xd33   : > { %11605 = vmatmul.mubr.msk.f32.vlgmr.msra.gmra.mrb[160].mxu0 %vm777_vm2, %v7869_v61  ;;  %v8186_v55 = vsub.s32 %v8183_v13, %v18588_v25 }
 0xd34   : > { %11608 = vmatpush3.xpose.msk.msra.mxu0 %vm777_vm2, %v17026_v12  ;;  %11609 = vmatprep.mubr.msk.f32.mxu0 %vm13494_vm5, %v18587_v59  ;;  %v7951_v15 = vsel %vm7868_vm8, %v7859_v31, %v7950_v48 }
 0xd35   : > { %11617 = vmatprep.subr.mxu0 %v18587_v59 }
 0xd37   : > { %11610 = vmatmul.mubr.msk.f32.vlgmr.msra.gmra.mrb[162].mxu0 %vm777_vm2, %v7951_v15 }
 0xd38   : > { %11619 = vmatprep.mubr.msk.f32.mxu0 %vm13494_vm5, %v18587_v59  ;;  %11618 = vmatpush3.msk.msra.mxu0 %vm8034_vm9, %v17026_v12  ;;  %v8407_v12 = vld [vmem:[%s17939_s3 + $0x8] sm:$0xff] }
 0xd39   : > { %v12382_v24 = vpack.c.bf16 %v8407_v12, %v8406_v37 }
 0xd3b   : > { %12383 = vmatprep.subr.bf16.mxu1 %v12382_v24 }
 0xe06   : > { %v7941_v60 = vpop.f32.mrb[160].mxu0 }
 0xe07   : > { %v8024_v50 = vmul.f32 0.001953125, %v7941_v60  ;;  %v11606_v38 = vpop.f32.mrb[161].mxu0 }
 0xe09   : > { %11615 = vmatmul.mubr.msk.f32.vlgmr.msra.gmra.mrb[160].mxu1 %vm8030_vm10, %v8024_v50  ;;  %v8026_v57 = vmul.f32 %v8024_v50, %v8024_v50 }
 0xe0a   : > { %v8020_v1 = vpop.f32.mrb[162].mxu0  ;;  %12385 = vmatpush3.bf16.msra.mxu1 %v12382_v24 }
 0xe0b   : > { %v8025_v30 = vmul.f32 0.001953125, %v8020_v1  ;;  %v11611_v10 = vpop.f32.mrb[163].mxu0  ;;  %12387 = vmatprep.subr.bf16.mxu1 %v12386_v4 }
 0xe0d   : > { %v8027_v7 = vsub.f32 %v8025_v30, %v8026_v57 }
 0xe0e   : > { %12389 = vmatpush3.bf16.msra.mxu1 %v12386_v4  ;;  %v17438_v4 = vld [vmem:[%s17944_s8 + $0x6] ss:$0 sm:$0xff] }
 0xe0f   : > { %v8028_v43 = vadd.f32 1e-05, %v8027_v7 }
 0xe11   : > { %13357 = vrsqrt.f32 %v8028_v43 }
 0xe1b   : > { %v13358_v27 = vpop.eup %13357 }
 0xe1c   : > { %11620 = vmatmul.mubr.msk.f32.vlgmr.msra.gmra.mrb[164].mxu0 %vm8030_vm10, %v13358_v27 }
 0xedc   : > { %v8103_v34 = vpop.f32.mrb[160].mxu1 }
 0xedd   : > { %v11616_v58 = vpop.f32.mrb[161].mxu1  ;;  %v8187_v49 = vrot.slane %v8103_v34, %v8186_v55 }
 0xedf   : > { %v8188_v2 = vcombine.high %v8187_v49, %v8187_v49  ;;  %v8195_v11 = vrot.slane %v8187_v49, %v8186_v55 }
 0xee1   : > { %v8202_v20 = vrot.slane %v8188_v2, %v8186_v55  ;;  %v8203_v61 = vcombine.high %v8195_v11, %v8195_v11  ;;  %v8208_v31 = vrot.slane %v8195_v11, %v18589_v47 }
 0xee3   : > { %v8204_v15 = vcombine.high %v8202_v20, %v8202_v20  ;;  %v17405_v60 = vrot.slane %v8202_v20, %v18589_v47  ;;  %v17408_v1 = vrot.slane %v8203_v61, %v18589_v47  ;;  %v8225_v57 = vsub.f32 %v17056_v8, %v8208_v31 }
 0xee4   : > { %v8226_v30 = vsub.f32 %v17053_v32, %v8208_v31  ;;  %v8227_v10 = vsub.f32 %v17059_v23, %v8208_v31  ;;  %v8228_v27 = vsub.f32 %v17072_v26, %v8208_v31  ;;  %v8229_v37 = vsub.f32 %v17077_v19, %v8208_v31 }
 0xee5   : > { %v17419_v12 = vrot.slane %v8204_v15, %v18589_v47  ;;  %v8230_v32 = vsub.f32 %v17093_v35, %v8208_v31  ;;  %v8231_v8 = vsub.f32 %v17106_v14, %v8208_v31  ;;  %v8232_v23 = vsub.f32 %v17137_v44, %v8208_v31 }
 0xee6   : > { %v8233_v26 = vsub.f32 %v17102_v9, %v17405_v60  ;;  %v8234_v19 = vsub.f32 %v17099_v16, %v17405_v60  ;;  %v8235_v62 = vsub.f32 %v17120_v28, %v17405_v60  ;;  %v8236_v58 = vsub.f32 %v17141_v41, %v17405_v60 }
 0xee7   : > { %v8237_v25 = vsub.f32 %v17151_v51, %v17405_v60  ;;  %v8238_v11 = vsub.f32 %v17170_v53, %v17405_v60  ;;  %v8239_v31 = vsub.f32 %v17196_v5, %v17405_v60  ;;  %v8240_v41 = vsub.f32 %v17209_v56, %v17405_v60 }
 0xeef   : > { %v8176_v59 = vpop.f32.mrb[164].mxu0 }
 0xef0   : > { %v8264_v36 = vrot.slane %v8176_v59, %v8186_v55  ;;  %v11621_v48 = vpop.f32.mrb[165].mxu0 }
 0xef2   : > { %v8265_v50 = vcombine.high %v8264_v36, %v8264_v36  ;;  %v8272_v38 = vrot.slane %v8264_v36, %v8186_v55 }
 0xef4   : > { %v17413_v7 = vrot.slane %v8265_v50, %v8186_v55  ;;  %v8285_v43 = vrot.slane %v8272_v38, %v18589_v47  ;;  %v8280_v55 = vcombine.high %v8272_v38, %v8272_v38 }
 0xef6   : > { %v8302_v24 = vmul.f32 %v8285_v43, %v8225_v57  ;;  %v8303_v35 = vmul.f32 %v8285_v43, %v8226_v30  ;;  %v8304_v54 = vmul.f32 %v8285_v43, %v8227_v10  ;;  %v8305_v14 = vmul.f32 %v8285_v43, %v8228_v27 }
 0xef7   : > { %v8306_v45 = vmul.f32 %v8285_v43, %v8229_v37  ;;  %v8289_v44 = vrot.slane %v17413_v7, %v18589_v47  ;;  %v8307_v34 = vmul.f32 %v8285_v43, %v8230_v32  ;;  %v8308_v13 = vmul.f32 %v8285_v43, %v8231_v8 }
 0xef8   : > { %v8338_v9 = vmul.f32 %v17424_v46, %v8302_v24  ;;  %v8339_v16 = vmul.f32 %v17424_v46, %v8303_v35  ;;  %v8340_v28 = vmul.f32 %v17424_v46, %v8304_v54  ;;  %v8309_v2 = vmul.f32 %v8285_v43, %v8232_v23 }
 0xef9   : > { %v8341_v61 = vmul.f32 %v17424_v46, %v8305_v14  ;;  %v8281_v51 = vcombine.high %v17413_v7, %v17413_v7  ;;  %v8342_v36 = vmul.f32 %v17424_v46, %v8306_v45  ;;  %v8310_v53 = vmul.f32 %v8289_v44, %v8233_v26 }
 0xefa   : > { %v8374_v49 = vadd.f32 %v17438_v4, %v8338_v9  ;;  %v8375_v20 = vadd.f32 %v17438_v4, %v8339_v16  ;;  %v8376_v59 = vadd.f32 %v17438_v4, %v8340_v28  ;;  %v8311_v48 = vmul.f32 %v8289_v44, %v8234_v19 }
 0xefb   : > { %v8312_v15 = vmul.f32 %v8289_v44, %v8235_v62  ;;  %v8313_v50 = vmul.f32 %v8289_v44, %v8236_v58  ;;  %v8314_v38 = vmul.f32 %v8289_v44, %v8237_v25  ;;  %v8293_v5 = vrot.slane %v8280_v55, %v18589_v47 }
 0xefc   : > { %11630 = vmatprep.mubr.msk.f32.mxu1 %vm777_vm2, %v8374_v49  ;;  %v8343_v56 = vmul.f32 %v17424_v46, %v8307_v34  ;;  %v8315_v60 = vmul.f32 %v8289_v44, %v8238_v11  ;;  %v8316_v57 = vmul.f32 %v8289_v44, %v8239_v31  ;;  %v8377_v30 = vadd.f32 %v17438_v4, %v8341_v61 }
 0xefd   : > { %11631 = vmatmul.mubr.msk.f32.vlgmr.msra.gmra.mrb[162].mxu1 %vm777_vm2, %v8375_v20  ;;  %v8241_v10 = vsub.f32 %v17203_v40, %v17408_v1  ;;  %v8242_v7 = vsub.f32 %v17185_v63, %v17408_v1  ;;  %v8243_v43 = vsub.f32 %v17220_v39, %v17408_v1  ;;  %v8378_v27 = vadd.f32 %v17438_v4, %v8342_v36 }
 0xefe   : > { %11633 = vmatprep.mubr.msk.f32.mxu1 %vm777_vm2, %v8376_v59  ;;  %v8344_v37 = vmul.f32 %v17424_v46, %v8308_v13  ;;  %v8317_v32 = vmul.f32 %v8289_v44, %v8240_v41  ;;  %v8244_v8 = vsub.f32 %v17217_v29, %v17408_v1  ;;  %v8245_v23 = vsub.f32 %v17255_v52, %v17408_v1 }
 0xeff   : > { %v8246_v40 = vsub.f32 %v17247_v0, %v17408_v1  ;;  %v8247_v63 = vsub.f32 %v17261_v21, %v17408_v1  ;;  %v8248_v39 = vsub.f32 %v17286_v18, %v17408_v1  ;;  %v8297_v24 = vrot.slane %v8281_v51, %v18589_v47  ;;  %v18590_v1 = vld [vmem:[#allocation43_spill] sm:$0xff] }
 0xf00   : > { %v8379_v29 = vadd.f32 %v17438_v4, %v8343_v56  ;;  %v8345_v26 = vmul.f32 %v17424_v46, %v8309_v2  ;;  %v8318_v19 = vmul.f32 %v8293_v5, %v8241_v10  ;;  %v8319_v62 = vmul.f32 %v8293_v5, %v8242_v7 }
 0xf01   : > { %11634 = vmatmul.mubr.msk.f32.gmra.mrb[164].mxu1 %vm777_vm2, %v8377_v30  ;;  %v8320_v52 = vmul.f32 %v8293_v5, %v8243_v43  ;;  %v8321_v35 = vmul.f32 %v8293_v5, %v8244_v8  ;;  %v8322_v54 = vmul.f32 %v8293_v5, %v8245_v23  ;;  %v8380_v0 = vadd.f32 %v17438_v4, %v8344_v37 }
 0xf02   : > { %11636 = vmatprep.mubr.msk.f32.mxu1 %vm777_vm2, %v8378_v27  ;;  %v8346_v21 = vmul.f32 %v17424_v46, %v8310_v53  ;;  %v8323_v14 = vmul.f32 %v8293_v5, %v8246_v40  ;;  %v8324_v45 = vmul.f32 %v8293_v5, %v8247_v63  ;;  %v8249_v18 = vsub.f32 %v17283_v3, %v17419_v12 }
 0xf03   : > { %v8325_v47 = vmul.f32 %v8293_v5, %v8248_v39  ;;  %v8250_v44 = vsub.f32 %v18590_v1, %v17419_v12  ;;  %v8251_v9 = vsub.f32 %v17319_v22, %v17419_v12  ;;  %v8252_v34 = vsub.f32 %v17310_v17, %v17419_v12 }
 0xf04   : > { %v8381_v13 = vadd.f32 %v17438_v4, %v8345_v26  ;;  %v8347_v16 = vmul.f32 %v17424_v46, %v8311_v48  ;;  %v8253_v28 = vsub.f32 %v17323_v42, %v17419_v12  ;;  %v8254_v3 = vsub.f32 %v17333_v6, %v17419_v12  ;;  %v18591_v6 = vld [vmem:[#allocation42_spill] sm:$0xff] }
 0xf05   : > { %11637 = vmatmul.mubr.msk.f32.gmra.mrb[166].mxu1 %vm777_vm2, %v8379_v29  ;;  %v8382_v58 = vadd.f32 %v17438_v4, %v8346_v21  ;;  %v8348_v25 = vmul.f32 %v17424_v46, %v8312_v15  ;;  %v8326_v55 = vmul.f32 %v8297_v24, %v8249_v18  ;;  %v8255_v22 = vsub.f32 %v17361_v33, %v17419_v12 }
 0xf06   : > { %11639 = vmatprep.mubr.msk.f32.mxu1 %vm777_vm2, %v8380_v0  ;;  %v8327_v17 = vmul.f32 %v8297_v24, %v8250_v44  ;;  %v8328_v49 = vmul.f32 %v8297_v24, %v8251_v9  ;;  %v8329_v2 = vmul.f32 %v8297_v24, %v8252_v34  ;;  %v8330_v11 = vmul.f32 %v8297_v24, %v8253_v28  ;;  %v8927_v34 = vld [vmem:[%s17940_s4] sm:$0xff] }
 0xf07   : > { %v8331_v42 = vmul.f32 %v8297_v24, %v8254_v3  ;;  %v8332_v20 = vmul.f32 %v8297_v24, %v8255_v22  ;;  %v8256_v61 = vsub.f32 %v18591_v6, %v17419_v12  ;;  %v8383_v31 = vadd.f32 %v17438_v4, %v8347_v16  ;;  %v17599_v3 = vld [vmem:[%s17944_s8 + $0x7] ss:$0 sm:$0xff] }
 0xf08   : > { %v8349_v41 = vmul.f32 %v17424_v46, %v8313_v50  ;;  %v8384_v51 = vadd.f32 %v17438_v4, %v8348_v25  ;;  %v8350_v33 = vmul.f32 %v17424_v46, %v8314_v38  ;;  %v8351_v53 = vmul.f32 %v17424_v46, %v8315_v60 }
 0xf09   : > { %11640 = vmatmul.mubr.msk.f32.gmra.mrb[168].mxu1 %vm777_vm2, %v8381_v13  ;;  %v8333_v59 = vmul.f32 %v8297_v24, %v8256_v61  ;;  %v8352_v12 = vmul.f32 %v17424_v46, %v8316_v57  ;;  %v8353_v50 = vmul.f32 %v17424_v46, %v8317_v32  ;;  %v8354_v5 = vmul.f32 %v17424_v46, %v8318_v19  ;;  %v8928_v13 = vld [vmem:[%s17940_s4 + $0x8] sm:$0xff] }
 0xf0a   : > { %11642 = vmatprep.mubr.msk.f32.mxu1 %vm777_vm2, %v8382_v58  ;;  %v8385_v36 = vadd.f32 %v17438_v4, %v8349_v41  ;;  %v8386_v48 = vadd.f32 %v17438_v4, %v8350_v33  ;;  %v8387_v15 = vadd.f32 %v17438_v4, %v8351_v53  ;;  %v8355_v60 = vmul.f32 %v17424_v46, %v8319_v62 }
 0xf0b   : > { %v8388_v38 = vadd.f32 %v17438_v4, %v8352_v12  ;;  %v8389_v56 = vadd.f32 %v17438_v4, %v8353_v50  ;;  %v8390_v57 = vadd.f32 %v17438_v4, %v8354_v5  ;;  %v8356_v30 = vmul.f32 %v17424_v46, %v8320_v52 }
 0xf0c   : > { %v8391_v10 = vadd.f32 %v17438_v4, %v8355_v60  ;;  %v8357_v7 = vmul.f32 %v17424_v46, %v8321_v35  ;;  %v8358_v27 = vmul.f32 %v17424_v46, %v8322_v54  ;;  %v8359_v32 = vmul.f32 %v17424_v46, %v8323_v14 }
 0xf0d   : > { %11643 = vmatmul.mubr.msk.f32.gmra.mrb[170].mxu1 %vm777_vm2, %v8383_v31  ;;  %v8392_v43 = vadd.f32 %v17438_v4, %v8356_v30  ;;  %v8360_v23 = vmul.f32 %v17424_v46, %v8324_v45  ;;  %v8361_v63 = vmul.f32 %v17424_v46, %v8325_v47  ;;  %v8362_v24 = vmul.f32 %v17424_v46, %v8326_v55 }
 0xf0e   : > { %11645 = vmatprep.mubr.msk.f32.mxu1 %vm777_vm2, %v8384_v51  ;;  %v8393_v37 = vadd.f32 %v17438_v4, %v8357_v7  ;;  %v8394_v8 = vadd.f32 %v17438_v4, %v8358_v27  ;;  %v8395_v40 = vadd.f32 %v17438_v4, %v8359_v32  ;;  %v8363_v26 = vmul.f32 %v17424_v46, %v8327_v17 }
 0xf0f   : > { %v8396_v39 = vadd.f32 %v17438_v4, %v8360_v23  ;;  %v8397_v29 = vadd.f32 %v17438_v4, %v8361_v63  ;;  %v8398_v19 = vadd.f32 %v17438_v4, %v8362_v24  ;;  %v8364_v62 = vmul.f32 %v17424_v46, %v8328_v49 }
 0xf10   : > { %v8399_v52 = vadd.f32 %v17438_v4, %v8363_v26  ;;  %v8365_v35 = vmul.f32 %v17424_v46, %v8329_v2  ;;  %v8366_v0 = vmul.f32 %v17424_v46, %v8330_v11  ;;  %v8367_v14 = vmul.f32 %v17424_v46, %v8331_v42 }
 0xf11   : > { %11646 = vmatmul.mubr.msk.f32.gmra.mrb[172].mxu1 %vm777_vm2, %v8385_v36  ;;  %v8400_v54 = vadd.f32 %v17438_v4, %v8364_v62  ;;  %v8368_v18 = vmul.f32 %v17424_v46, %v8332_v20  ;;  %v8369_v1 = vmul.f32 %v17424_v46, %v8333_v59  ;;  %v12390_v16 = vpack.c.bf16 %v8928_v13, %v8927_v34  ;;  %v8929_v46 = vld [vmem:[%s17940_s4 + $0x10] sm:$0xff] }
 0xf12   : > { %11648 = vmatprep.mubr.msk.f32.mxu1 %vm777_vm2, %v8386_v48  ;;  %v8401_v21 = vadd.f32 %v17438_v4, %v8365_v35  ;;  %v8402_v45 = vadd.f32 %v17438_v4, %v8366_v0  ;;  %v8403_v47 = vadd.f32 %v17438_v4, %v8367_v14 }
 0xf13   : > { %v8404_v44 = vadd.f32 %v17438_v4, %v8368_v18  ;;  %v8405_v9 = vadd.f32 %v17438_v4, %v8369_v1  ;;  %12391 = vmatprep.subr.bf16.mxu0 %v12390_v16  ;;  %v8930_v4 = vld [vmem:[%s17940_s4 + $0x18] sm:$0xff] }
 0xf14   : > { %12393 = vmatpush3.bf16.msra.mxu0 %v12390_v16  ;;  %v12394_v28 = vpack.c.bf16 %v8930_v4, %v8929_v46 }
 0xf15   : > { %11649 = vmatmul.mubr.msk.f32.gmra.mrb[174].mxu1 %vm777_vm2, %v8387_v15 }
 0xf16   : > { %11651 = vmatprep.mubr.msk.f32.mxu1 %vm777_vm2, %v8388_v38  ;;  %12395 = vmatprep.subr.bf16.mxu0 %v12394_v28 }
 0xf18   : > { %12397 = vmatpush3.bf16.msra.mxu0 %v12394_v28 }
 0xf19   : > { %11652 = vmatmul.mubr.msk.f32.gmra.mrb[176].mxu1 %vm777_vm2, %v8389_v56 }
 0xf1a   : > { %11654 = vmatprep.mubr.msk.f32.mxu1 %vm777_vm2, %v8390_v57 }
 0xf1d   : > { %11655 = vmatmul.mubr.msk.f32.gmra.mrb[178].mxu1 %vm777_vm2, %v8391_v10 }
 0xf1e   : > { %11657 = vmatprep.mubr.msk.f32.mxu1 %vm777_vm2, %v8392_v43 }
 0xf21   : > { %11658 = vmatmul.mubr.msk.f32.gmra.mrb[180].mxu1 %vm777_vm2, %v8393_v37 }
 0xf22   : > { %11660 = vmatprep.mubr.msk.f32.mxu1 %vm777_vm2, %v8394_v8 }
 0xf25   : > { %11661 = vmatmul.mubr.msk.f32.gmra.mrb[182].mxu1 %vm777_vm2, %v8395_v40 }
 0xf26   : > { %11663 = vmatprep.mubr.msk.f32.mxu1 %vm777_vm2, %v8396_v39 }
 0xf29   : > { %11664 = vmatmul.mubr.msk.f32.gmra.mrb[184].mxu1 %vm777_vm2, %v8397_v29 }
 0xf2a   : > { %11666 = vmatprep.mubr.msk.f32.mxu1 %vm777_vm2, %v8398_v19 }
 0xf2d   : > { %11667 = vmatmul.mubr.msk.f32.gmra.mrb[186].mxu1 %vm777_vm2, %v8399_v52 }
 0xf2e   : > { %11669 = vmatprep.mubr.msk.f32.mxu1 %vm777_vm2, %v8400_v54 }
 0xf31   : > { %11670 = vmatmul.mubr.msk.f32.gmra.mrb[188].mxu1 %vm777_vm2, %v8401_v21 }
 0xf32   : > { %11672 = vmatprep.mubr.msk.f32.mxu1 %vm777_vm2, %v8402_v45 }
 0xf35   : > { %11673 = vmatmul.mubr.msk.f32.gmra.mrb[190].mxu1 %vm777_vm2, %v8403_v47 }
 0xf36   : > { %11675 = vmatprep.mubr.msk.f32.mxu1 %vm777_vm2, %v8404_v44 }
 0xf39   : > { %11676 = vmatmul.mubr.msk.f32.gmra.mrb[192].mxu1 %vm777_vm2, %v8405_v9 }
 0xfd0   : > { %v11632_v58 = vpop.f32.mrb[162].mxu1 }
 0xfd1   : > { %v8582_v25 = vadd.f32 %v11632_v58, %v17599_v3  ;;  %v8576_v55 = vpop.f32.mrb[163].mxu1 }
 0xfd2   : > { %v8577_v22 = vadd.f32 %v17599_v3, %v8576_v55 }
 0xfd3   : > { %v8768_v17 = vmin.f32 %v8582_v25, 0.0  ;;  %vm8736_vm12 = vcmp.gt.f32.partialorder %v8582_v25, 0.0 }
 0xfd4   : > { %v8767_v49 = vmin.f32 %v8577_v22, 0.0  ;;  %v11635_v2 = vpop.f32.mrb[164].mxu1  ;;  %vm8735_vm11 = vcmp.gt.f32.partialorder %v8577_v22, 0.0 }
 0xfd5   : > { %v8801_v11 = vmul.f32 1.442695, %v8768_v17  ;;  %v17604_v42 = vadd.f32 %v11635_v2, %v17599_v3  ;;  %v8586_v20 = vpop.f32.mrb[165].mxu1 }
 0xfd6   : > { %v8799_v6 = vmul.f32 1.442695, %v8767_v49  ;;  %v17607_v61 = vadd.f32 %v17599_v3, %v8586_v20 }
 0xfd7   : > { %13359 = vpow2.f32 %v8801_v11  ;;  %v8770_v31 = vmin.f32 %v17604_v42, 0.0  ;;  %vm8738_vm14 = vcmp.gt.f32.partialorder %v17604_v42, 0.0 }
 0xfd8   : > { %13361 = vpow2.f32 %v8799_v6  ;;  %v8769_v41 = vmin.f32 %v17607_v61, 0.0  ;;  %v11638_v51 = vpop.f32.mrb[166].mxu1  ;;  %vm8737_vm13 = vcmp.gt.f32.partialorder %v17607_v61, 0.0 }
 0xfd9   : > { %v8805_v33 = vmul.f32 1.442695, %v8770_v31  ;;  %v17612_v59 = vadd.f32 %v11638_v51, %v17599_v3  ;;  %v8596_v36 = vpop.f32.mrb[167].mxu1 }
 0xfda   : > { %v8803_v53 = vmul.f32 1.442695, %v8769_v41  ;;  %v17615_v48 = vadd.f32 %v17599_v3, %v8596_v36 }
 0xfdb   : > { %13363 = vpow2.f32 %v8805_v33  ;;  %v8772_v12 = vmin.f32 %v17612_v59, 0.0  ;;  %vm8740_vm0 = vcmp.gt.f32.partialorder %v17612_v59, 0.0 }
 0xfdc   : > { %13365 = vpow2.f32 %v8803_v53  ;;  %v8771_v15 = vmin.f32 %v17615_v48, 0.0  ;;  %v11641_v50 = vpop.f32.mrb[168].mxu1  ;;  %vm8739_vm15 = vcmp.gt.f32.partialorder %v17615_v48, 0.0 }
 0xfdd   : > { %v8809_v38 = vmul.f32 1.442695, %v8772_v12  ;;  %v17620_v5 = vadd.f32 %v11641_v50, %v17599_v3  ;;  %v8606_v56 = vpop.f32.mrb[169].mxu1 }
 0xfde   : > { %v8807_v60 = vmul.f32 1.442695, %v8771_v15  ;;  %v17623_v57 = vadd.f32 %v17599_v3, %v8606_v56 }
 0xfdf   : > { %13367 = vpow2.f32 %v8809_v38  ;;  %v8774_v30 = vmin.f32 %v17620_v5, 0.0  ;;  %vm8742_vm3 = vcmp.gt.f32.partialorder %v17620_v5, 0.0 }
 0xfe0   : > { %13369 = vpow2.f32 %v8807_v60  ;;  %v8773_v10 = vmin.f32 %v17623_v57, 0.0  ;;  %v11644_v7 = vpop.f32.mrb[170].mxu1  ;;  %vm8741_vm1 = vcmp.gt.f32.partialorder %v17623_v57, 0.0 }
 0xfe1   : > { %v13360_v43 = vpop.eup %13359  ;;  %v8813_v27 = vmul.f32 1.442695, %v8774_v30  ;;  %v17628_v37 = vadd.f32 %v11644_v7, %v17599_v3  ;;  %v8616_v32 = vpop.f32.mrb[171].mxu1 }
 0xfe2   : > { %v13362_v8 = vpop.eup %13361  ;;  %v9869_v23 = vadd.f32 -1.0, %v13360_v43  ;;  %v8811_v40 = vmul.f32 1.442695, %v8773_v10  ;;  %v17631_v63 = vadd.f32 %v17599_v3, %v8616_v32 }
 0xfe3   : > { %13371 = vpow2.f32 %v8813_v27  ;;  %v8776_v39 = vmin.f32 %v17628_v37, 0.0  ;;  %v9868_v24 = vadd.f32 -1.0, %v13362_v8  ;;  %vm8744_vm5 = vcmp.gt.f32.partialorder %v17628_v37, 0.0 }
 0xfe4   : > { %13373 = vpow2.f32 %v8811_v40  ;;  %v8775_v29 = vmin.f32 %v17631_v63, 0.0  ;;  %v11647_v26 = vpop.f32.mrb[172].mxu1  ;;  %v8896_v21 = vsel %vm8736_vm12, %v8582_v25, %v9869_v23  ;;  %vm8743_vm4 = vcmp.gt.f32.partialorder %v17631_v63, 0.0 }
 0xfe5   : > { %v13364_v19 = vpop.eup %13363  ;;  %v8817_v62 = vmul.f32 1.442695, %v8776_v39  ;;  %v17636_v52 = vadd.f32 %v11647_v26, %v17599_v3  ;;  %v8626_v35 = vpop.f32.mrb[173].mxu1  ;;  %v8895_v54 = vsel %vm8735_vm11, %v8577_v22, %v9868_v24 }
 0xfe6   : > { %v13366_v0 = vpop.eup %13365  ;;  %v8815_v14 = vmul.f32 1.442695, %v8775_v29  ;;  %v17639_v45 = vadd.f32 %v17599_v3, %v8626_v35  ;;  %11686 = vmatprep.mubr.msk.f32.mxu0 %vm777_vm2, %v8895_v54  ;;  %v9871_v18 = vadd.f32 -1.0, %v13364_v19 }
 0xfe7   : > { %13375 = vpow2.f32 %v8817_v62  ;;  %v8778_v47 = vmin.f32 %v17636_v52, 0.0  ;;  %11687 = vmatmul.mubr.msk.f32.vlgmr.msra.gmra.mrb[166].mxu0 %vm777_vm2, %v8896_v21  ;;  %v9870_v1 = vadd.f32 -1.0, %v13366_v0  ;;  %vm8746_vm7 = vcmp.gt.f32.partialorder %v17636_v52, 0.0 }
 0xfe8   : > { %13377 = vpow2.f32 %v8815_v14  ;;  %v8777_v44 = vmin.f32 %v17639_v45, 0.0  ;;  %v11650_v9 = vpop.f32.mrb[174].mxu1  ;;  %v8898_v55 = vsel %vm8738_vm14, %v17604_v42, %v9871_v18  ;;  %vm8745_vm6 = vcmp.gt.f32.partialorder %v17639_v45, 0.0 }
 0xfe9   : > { %v13368_v34 = vpop.eup %13367  ;;  %v8821_v13 = vmul.f32 1.442695, %v8778_v47  ;;  %v17648_v16 = vadd.f32 %v11650_v9, %v17599_v3  ;;  %v8636_v46 = vpop.f32.mrb[175].mxu1  ;;  %v8897_v4 = vsel %vm8737_vm13, %v17607_v61, %v9870_v1 }
 0xfea   : > { %v13370_v28 = vpop.eup %13369  ;;  %v8819_v58 = vmul.f32 1.442695, %v8777_v44  ;;  %v17652_v25 = vadd.f32 %v17599_v3, %v8636_v46  ;;  %11689 = vmatprep.mubr.msk.f32.mxu0 %vm777_vm2, %v8897_v4  ;;  %v9873_v22 = vadd.f32 -1.0, %v13368_v34 }
 0xfeb   : > { %13379 = vpow2.f32 %v8821_v13  ;;  %v8780_v17 = vmin.f32 %v17648_v16, 0.0  ;;  %11690 = vmatmul.mubr.msk.f32.gmra.mrb[168].mxu0 %vm777_vm2, %v8898_v55  ;;  %v9872_v49 = vadd.f32 -1.0, %v13370_v28  ;;  %vm8748_vm9 = vcmp.gt.f32.partialorder %v17648_v16, 0.0 }
 0xfec   : > { %13381 = vpow2.f32 %v8819_v58  ;;  %v8779_v2 = vmin.f32 %v17652_v25, 0.0  ;;  %v11653_v11 = vpop.f32.mrb[176].mxu1  ;;  %v8900_v36 = vsel %vm8740_vm0, %v17612_v59, %v9873_v22  ;;  %vm8747_vm8 = vcmp.gt.f32.partialorder %v17652_v25, 0.0 }
 0xfed   : > { %v13372_v20 = vpop.eup %13371  ;;  %v8825_v6 = vmul.f32 1.442695, %v8780_v17  ;;  %v17662_v61 = vadd.f32 %v11653_v11, %v17599_v3  ;;  %v8646_v42 = vpop.f32.mrb[177].mxu1  ;;  %v8899_v31 = vsel %vm8739_vm15, %v17615_v48, %v9872_v49 }
 0xfee   : > { %v13374_v41 = vpop.eup %13373  ;;  %v8823_v51 = vmul.f32 1.442695, %v8779_v2  ;;  %v17666_v33 = vadd.f32 %v17599_v3, %v8646_v42  ;;  %11692 = vmatprep.mubr.msk.f32.mxu0 %vm777_vm2, %v8899_v31  ;;  %v9875_v53 = vadd.f32 -1.0, %v13372_v20 }
 0xfef   : > { %13383 = vpow2.f32 %v8825_v6  ;;  %v8782_v12 = vmin.f32 %v17662_v61, 0.0  ;;  %11693 = vmatmul.mubr.msk.f32.gmra.mrb[170].mxu0 %vm777_vm2, %v8900_v36  ;;  %v9874_v15 = vadd.f32 -1.0, %v13374_v41  ;;  %vm8750_vm11 = vcmp.gt.f32.partialorder %v17662_v61, 0.0 }
 0xff0   : > { %13385 = vpow2.f32 %v8823_v51  ;;  %v8781_v48 = vmin.f32 %v17666_v33, 0.0  ;;  %v11656_v50 = vpop.f32.mrb[178].mxu1  ;;  %v8902_v27 = vsel %vm8742_vm3, %v17620_v5, %v9875_v53  ;;  %vm8749_vm10 = vcmp.gt.f32.partialorder %v17666_v33, 0.0 }
 0xff1   : > { %v13376_v38 = vpop.eup %13375  ;;  %v8829_v56 = vmul.f32 1.442695, %v8782_v12  ;;  %v17676_v60 = vadd.f32 %v11656_v50, %v17599_v3  ;;  %v8656_v59 = vpop.f32.mrb[179].mxu1  ;;  %v8901_v30 = vsel %vm8741_vm1, %v17623_v57, %v9874_v15 }
 0xff2   : > { %v13378_v10 = vpop.eup %13377  ;;  %v8827_v7 = vmul.f32 1.442695, %v8781_v48  ;;  %v17680_v43 = vadd.f32 %v17599_v3, %v8656_v59  ;;  %11695 = vmatprep.mubr.msk.f32.mxu0 %vm777_vm2, %v8901_v30  ;;  %v9877_v32 = vadd.f32 -1.0, %v13376_v38 }
 0xff3   : > { %13387 = vpow2.f32 %v8829_v56  ;;  %v8784_v8 = vmin.f32 %v17676_v60, 0.0  ;;  %11696 = vmatmul.mubr.msk.f32.gmra.mrb[172].mxu0 %vm777_vm2, %v8902_v27  ;;  %v9876_v23 = vadd.f32 -1.0, %v13378_v10  ;;  %vm8752_vm13 = vcmp.gt.f32.partialorder %v17676_v60, 0.0 }
 0xff4   : > { %13389 = vpow2.f32 %v8827_v7  ;;  %v8783_v57 = vmin.f32 %v17680_v43, 0.0  ;;  %v11659_v40 = vpop.f32.mrb[180].mxu1  ;;  %v8904_v54 = vsel %vm8744_vm5, %v17628_v37, %v9877_v32  ;;  %vm8751_vm12 = vcmp.gt.f32.partialorder %v17680_v43, 0.0 }
 0xff5   : > { %v13380_v39 = vpop.eup %13379  ;;  %v8833_v24 = vmul.f32 1.442695, %v8784_v8  ;;  %v17690_v29 = vadd.f32 %v11659_v40, %v17599_v3  ;;  %v8666_v5 = vpop.f32.mrb[181].mxu1  ;;  %v8903_v26 = vsel %vm8743_vm4, %v17631_v63, %v9876_v23 }
 0xff6   : > { %v13382_v19 = vpop.eup %13381  ;;  %v8831_v62 = vmul.f32 1.442695, %v8783_v57  ;;  %v17694_v35 = vadd.f32 %v17599_v3, %v8666_v5  ;;  %11698 = vmatprep.mubr.msk.f32.mxu0 %vm777_vm2, %v8903_v26  ;;  %v9879_v0 = vadd.f32 -1.0, %v13380_v39 }
 0xff7   : > { %13391 = vpow2.f32 %v8833_v24  ;;  %v8786_v21 = vmin.f32 %v17690_v29, 0.0  ;;  %11699 = vmatmul.mubr.msk.f32.gmra.mrb[174].mxu0 %vm777_vm2, %v8904_v54  ;;  %v9878_v14 = vadd.f32 -1.0, %v13382_v19  ;;  %vm8754_vm15 = vcmp.gt.f32.partialorder %v17690_v29, 0.0 }
 0xff8   : > { %13393 = vpow2.f32 %v8831_v62  ;;  %v8785_v63 = vmin.f32 %v17694_v35, 0.0  ;;  %v11662_v18 = vpop.f32.mrb[182].mxu1  ;;  %v8906_v4 = vsel %vm8746_vm7, %v17636_v52, %v9879_v0  ;;  %vm8753_vm14 = vcmp.gt.f32.partialorder %v17694_v35, 0.0 }
 0xff9   : > { %v13384_v47 = vpop.eup %13383  ;;  %v8837_v1 = vmul.f32 1.442695, %v8786_v21  ;;  %v17704_v44 = vadd.f32 %v11662_v18, %v17599_v3  ;;  %v8676_v37 = vpop.f32.mrb[183].mxu1  ;;  %v8905_v9 = vsel %vm8745_vm6, %v17639_v45, %v9878_v14 }
 0xffa   : > { %v13386_v34 = vpop.eup %13385  ;;  %v8835_v13 = vmul.f32 1.442695, %v8785_v63  ;;  %v17708_v46 = vadd.f32 %v17599_v3, %v8676_v37  ;;  %11701 = vmatprep.mubr.msk.f32.mxu0 %vm777_vm2, %v8905_v9  ;;  %v9881_v28 = vadd.f32 -1.0, %v13384_v47 }
 0xffb   : > { %13395 = vpow2.f32 %v8837_v1  ;;  %v8788_v58 = vmin.f32 %v17704_v44, 0.0  ;;  %11702 = vmatmul.mubr.msk.f32.gmra.mrb[176].mxu0 %vm777_vm2, %v8906_v4  ;;  %v9880_v55 = vadd.f32 -1.0, %v13386_v34  ;;  %vm8756_vm1 = vcmp.gt.f32.partialorder %v17704_v44, 0.0 }
 0xffc   : > { %13397 = vpow2.f32 %v8835_v13  ;;  %v8787_v45 = vmin.f32 %v17708_v46, 0.0  ;;  %v11665_v22 = vpop.f32.mrb[184].mxu1  ;;  %v8908_v31 = vsel %vm8748_vm9, %v17648_v16, %v9881_v28  ;;  %vm8755_vm0 = vcmp.gt.f32.partialorder %v17708_v46, 0.0 }
 0xffd   : > { %v13388_v17 = vpop.eup %13387  ;;  %v8841_v49 = vmul.f32 1.442695, %v8788_v58  ;;  %v17718_v2 = vadd.f32 %v11665_v22, %v17599_v3  ;;  %v8686_v52 = vpop.f32.mrb[185].mxu1  ;;  %v8907_v11 = vsel %vm8747_vm8, %v17652_v25, %v9880_v55 }
 0xffe   : > { %v13390_v20 = vpop.eup %13389  ;;  %v8839_v6 = vmul.f32 1.442695, %v8787_v45  ;;  %v17722_v42 = vadd.f32 %v17599_v3, %v8686_v52  ;;  %11704 = vmatprep.mubr.msk.f32.mxu0 %vm777_vm2, %v8907_v11  ;;  %v9883_v41 = vadd.f32 -1.0, %v13388_v17 }
 0xfff   : > { %13399 = vpow2.f32 %v8841_v49  ;;  %v8790_v51 = vmin.f32 %v17718_v2, 0.0  ;;  %11705 = vmatmul.mubr.msk.f32.gmra.mrb[178].mxu0 %vm777_vm2, %v8908_v31  ;;  %v9882_v36 = vadd.f32 -1.0, %v13390_v20  ;;  %vm8758_vm4 = vcmp.gt.f32.partialorder %v17718_v2, 0.0 }
0x1000   : > { %13401 = vpow2.f32 %v8839_v6  ;;  %v8789_v25 = vmin.f32 %v17722_v42, 0.0  ;;  %v11668_v53 = vpop.f32.mrb[186].mxu1  ;;  %v8910_v30 = vsel %vm8750_vm11, %v17662_v61, %v9883_v41  ;;  %vm8757_vm3 = vcmp.gt.f32.partialorder %v17722_v42, 0.0 }
0x1001   : > { %v13392_v12 = vpop.eup %13391  ;;  %v8845_v15 = vmul.f32 1.442695, %v8790_v51  ;;  %v17732_v48 = vadd.f32 %v11668_v53, %v17599_v3  ;;  %v8696_v16 = vpop.f32.mrb[187].mxu1  ;;  %v8909_v50 = vsel %vm8749_vm10, %v17666_v33, %v9882_v36 }
0x1002   : > { %v13394_v38 = vpop.eup %13393  ;;  %v8843_v56 = vmul.f32 1.442695, %v8789_v25  ;;  %v17736_v59 = vadd.f32 %v17599_v3, %v8696_v16  ;;  %11707 = vmatprep.mubr.msk.f32.mxu0 %vm777_vm2, %v8909_v50  ;;  %v9885_v10 = vadd.f32 -1.0, %v13392_v12 }
0x1003   : > { %13403 = vpow2.f32 %v8845_v15  ;;  %v8792_v7 = vmin.f32 %v17732_v48, 0.0  ;;  %11708 = vmatmul.mubr.msk.f32.gmra.mrb[180].mxu0 %vm777_vm2, %v8910_v30  ;;  %v9884_v27 = vadd.f32 -1.0, %v13394_v38  ;;  %vm8760_vm6 = vcmp.gt.f32.partialorder %v17732_v48, 0.0 }
0x1004   : > { %13405 = vpow2.f32 %v8843_v56  ;;  %v8791_v33 = vmin.f32 %v17736_v59, 0.0  ;;  %v11671_v32 = vpop.f32.mrb[188].mxu1  ;;  %v8912_v26 = vsel %vm8752_vm13, %v17676_v60, %v9885_v10  ;;  %vm8759_vm5 = vcmp.gt.f32.partialorder %v17736_v59, 0.0 }
0x1005   : > { %v13396_v8 = vpop.eup %13395  ;;  %v8849_v23 = vmul.f32 1.442695, %v8792_v7  ;;  %v17746_v57 = vadd.f32 %v11671_v32, %v17599_v3  ;;  %v8706_v61 = vpop.f32.mrb[189].mxu1  ;;  %v8911_v40 = vsel %vm8751_vm12, %v17680_v43, %v9884_v27 }
0x1006   : > { %v13398_v39 = vpop.eup %13397  ;;  %v8847_v24 = vmul.f32 1.442695, %v8791_v33  ;;  %v17750_v5 = vadd.f32 %v17599_v3, %v8706_v61  ;;  %11710 = vmatprep.mubr.msk.f32.mxu0 %vm777_vm2, %v8911_v40  ;;  %v9887_v19 = vadd.f32 -1.0, %v13396_v8 }
0x1007   : > { %13407 = vpow2.f32 %v8849_v23  ;;  %v8794_v62 = vmin.f32 %v17746_v57, 0.0  ;;  %11711 = vmatmul.mubr.msk.f32.gmra.mrb[182].mxu0 %vm777_vm2, %v8912_v26  ;;  %v9886_v54 = vadd.f32 -1.0, %v13398_v39  ;;  %vm8762_vm8 = vcmp.gt.f32.partialorder %v17746_v57, 0.0  ;;  %v17816_v39 = vld [vmem:[%s17942_s6] ss:$0 sm:$0xff] }
0x1008   : > { %13409 = vpow2.f32 %v8847_v24  ;;  %v8793_v43 = vmin.f32 %v17750_v5, 0.0  ;;  %v11674_v0 = vpop.f32.mrb[190].mxu1  ;;  %v8914_v9 = vsel %vm8754_vm15, %v17690_v29, %v9887_v19  ;;  %vm8761_vm7 = vcmp.gt.f32.partialorder %v17750_v5, 0.0 }
0x1009   : > { %v13400_v21 = vpop.eup %13399  ;;  %v8853_v14 = vmul.f32 1.442695, %v8794_v62  ;;  %v17760_v63 = vadd.f32 %v11674_v0, %v17599_v3  ;;  %v8716_v60 = vpop.f32.mrb[191].mxu1  ;;  %v8913_v18 = vsel %vm8753_vm14, %v17694_v35, %v9886_v54 }
0x100a   : > { %v13402_v47 = vpop.eup %13401  ;;  %v8851_v1 = vmul.f32 1.442695, %v8793_v43  ;;  %v17764_v37 = vadd.f32 %v17599_v3, %v8716_v60  ;;  %11713 = vmatprep.mubr.msk.f32.mxu0 %vm777_vm2, %v8913_v18  ;;  %v9889_v34 = vadd.f32 -1.0, %v13400_v21 }
0x100b   : > { %13411 = vpow2.f32 %v8853_v14  ;;  %v8796_v13 = vmin.f32 %v17760_v63, 0.0  ;;  %11714 = vmatmul.mubr.msk.f32.gmra.mrb[184].mxu0 %vm777_vm2, %v8914_v9  ;;  %v9888_v4 = vadd.f32 -1.0, %v13402_v47  ;;  %vm8764_vm10 = vcmp.gt.f32.partialorder %v17760_v63, 0.0 }
0x100c   : > { %13413 = vpow2.f32 %v8851_v1  ;;  %v8795_v35 = vmin.f32 %v17764_v37, 0.0  ;;  %v11677_v28 = vpop.f32.mrb[192].mxu1  ;;  %v8916_v11 = vsel %vm8756_vm1, %v17704_v44, %v9889_v34  ;;  %vm8763_vm9 = vcmp.gt.f32.partialorder %v17764_v37, 0.0 }
0x100d   : > { %v13404_v58 = vpop.eup %13403  ;;  %v8857_v55 = vmul.f32 1.442695, %v8796_v13  ;;  %v17774_v45 = vadd.f32 %v11677_v28, %v17599_v3  ;;  %v8726_v29 = vpop.f32.mrb[193].mxu1  ;;  %v8915_v22 = vsel %vm8755_vm0, %v17708_v46, %v9888_v4 }
0x100e   : > { %v13406_v17 = vpop.eup %13405  ;;  %v8855_v49 = vmul.f32 1.442695, %v8795_v35  ;;  %v8727_v52 = vadd.f32 %v17599_v3, %v8726_v29  ;;  %11716 = vmatprep.mubr.msk.f32.mxu0 %vm777_vm2, %v8915_v22  ;;  %v9891_v20 = vadd.f32 -1.0, %v13404_v58 }
0x100f   : > { %13415 = vpow2.f32 %v8857_v55  ;;  %v8798_v6 = vmin.f32 %v17774_v45, 0.0  ;;  %11717 = vmatmul.mubr.msk.f32.gmra.mrb[186].mxu0 %vm777_vm2, %v8916_v11  ;;  %v9890_v31 = vadd.f32 -1.0, %v13406_v17  ;;  %vm8766_vm12 = vcmp.gt.f32.partialorder %v17774_v45, 0.0 }
0x1010   : > { %13417 = vpow2.f32 %v8855_v49  ;;  %v8797_v41 = vmin.f32 %v8727_v52, 0.0  ;;  %v8918_v44 = vsel %vm8758_vm4, %v17718_v2, %v9891_v20  ;;  %vm8765_vm11 = vcmp.gt.f32.partialorder %v8727_v52, 0.0 }
0x1011   : > { %v13408_v46 = vpop.eup %13407  ;;  %v8861_v51 = vmul.f32 1.442695, %v8798_v6  ;;  %v8917_v3 = vsel %vm8757_vm3, %v17722_v42, %v9890_v31 }
0x1012   : > { %v13410_v36 = vpop.eup %13409  ;;  %v8859_v25 = vmul.f32 1.442695, %v8797_v41  ;;  %11719 = vmatprep.mubr.msk.f32.mxu0 %vm777_vm2, %v8917_v3  ;;  %v9893_v53 = vadd.f32 -1.0, %v13408_v46 }
0x1013   : > { %13419 = vpow2.f32 %v8861_v51  ;;  %11720 = vmatmul.mubr.msk.f32.gmra.mrb[188].mxu0 %vm777_vm2, %v8918_v44  ;;  %v9892_v12 = vadd.f32 -1.0, %v13410_v36 }
0x1014   : > { %13421 = vpow2.f32 %v8859_v25  ;;  %v8920_v50 = vsel %vm8760_vm6, %v17732_v48, %v9893_v53 }
0x1015   : > { %v13412_v15 = vpop.eup %13411  ;;  %v8919_v16 = vsel %vm8759_vm5, %v17736_v59, %v9892_v12 }
0x1016   : > { %v13414_v42 = vpop.eup %13413  ;;  %11722 = vmatprep.mubr.msk.f32.mxu0 %vm777_vm2, %v8919_v16  ;;  %v9895_v38 = vadd.f32 -1.0, %v13412_v15 }
0x1017   : > { %11723 = vmatmul.mubr.msk.f32.gmra.mrb[190].mxu0 %vm777_vm2, %v8920_v50  ;;  %v9894_v2 = vadd.f32 -1.0, %v13414_v42 }
0x1018   : > { %v8922_v59 = vsel %vm8762_vm8, %v17746_v57, %v9895_v38 }
0x1019   : > { %v13416_v56 = vpop.eup %13415  ;;  %v8921_v30 = vsel %vm8761_vm7, %v17750_v5, %v9894_v2 }
0x101a   : > { %v13418_v10 = vpop.eup %13417  ;;  %11725 = vmatprep.mubr.msk.f32.mxu0 %vm777_vm2, %v8921_v30  ;;  %v9897_v7 = vadd.f32 -1.0, %v13416_v56 }
0x101b   : > { %11726 = vmatmul.mubr.msk.f32.gmra.mrb[192].mxu0 %vm777_vm2, %v8922_v59  ;;  %v9896_v48 = vadd.f32 -1.0, %v13418_v10 }
0x101c   : > { %v8924_v8 = vsel %vm8764_vm10, %v17760_v63, %v9897_v7 }
0x101d   : > { %v13420_v27 = vpop.eup %13419  ;;  %v8923_v33 = vsel %vm8763_vm9, %v17764_v37, %v9896_v48 }
0x101e   : > { %v13422_v32 = vpop.eup %13421  ;;  %11728 = vmatprep.mubr.msk.f32.mxu0 %vm777_vm2, %v8923_v33  ;;  %v9899_v23 = vadd.f32 -1.0, %v13420_v27 }
0x101f   : > { %11729 = vmatmul.mubr.msk.f32.gmra.mrb[194].mxu0 %vm777_vm2, %v8924_v8  ;;  %v9898_v57 = vadd.f32 -1.0, %v13422_v32 }
0x1020   : > { %v8926_v40 = vsel %vm8766_vm12, %v17774_v45, %v9899_v23 }
0x1021   : > { %v8925_v61 = vsel %vm8765_vm11, %v8727_v52, %v9898_v57 }
0x1022   : > { %11731 = vmatprep.mubr.msk.f32.mxu0 %vm777_vm2, %v8925_v61 }
0x1023   : > { %11732 = vmatmul.mubr.msk.f32.gmra.mrb[196].mxu0 %vm777_vm2, %v8926_v40 }
0x10ba   : > { %v11688_v24 = vpop.f32.mrb[166].mxu0 }
0x10bb   : > { %v9106_v5 = vadd.f32 %v11688_v24, %v17816_v39  ;;  %v9100_v26 = vpop.f32.mrb[167].mxu0 }
0x10bc   : > { %v9101_v19 = vadd.f32 %v17816_v39, %v9100_v26 }
0x10bd   : > { %9260 = vst [vmem:[%s17820_s27 + $0x8] sm:$0xff] %v9106_v5 }
0x10be   : > { %9259 = vst [vmem:[%s17820_s27] sm:$0xff] %v9101_v19  ;;  %v11691_v62 = vpop.f32.mrb[168].mxu0 }
0x10bf   : > { %v9116_v54 = vadd.f32 %v11691_v62, %v17816_v39  ;;  %v9110_v43 = vpop.f32.mrb[169].mxu0 }
0x10c0   : > { %v9111_v0 = vadd.f32 %v17816_v39, %v9110_v43 }
0x10c1   : > { %9262 = vst [vmem:[%s17820_s27 + $0x18] sm:$0xff] %v9116_v54 }
0x10c2   : > { %9261 = vst [vmem:[%s17820_s27 + $0x10] sm:$0xff] %v9111_v0  ;;  %v11694_v21 = vpop.f32.mrb[170].mxu0 }
0x10c3   : > { %v9126_v14 = vadd.f32 %v11694_v21, %v17816_v39  ;;  %v9120_v63 = vpop.f32.mrb[171].mxu0 }
0x10c4   : > { %v9121_v60 = vadd.f32 %v17816_v39, %v9120_v63 }
0x10c5   : > { %9264 = vst [vmem:[%s17820_s27 + $0x28] sm:$0xff] %v9126_v14 }
0x10c6   : > { %9263 = vst [vmem:[%s17820_s27 + $0x20] sm:$0xff] %v9121_v60  ;;  %v11697_v18 = vpop.f32.mrb[172].mxu0 }
0x10c7   : > { %v9136_v47 = vadd.f32 %v11697_v18, %v17816_v39  ;;  %v9130_v1 = vpop.f32.mrb[173].mxu0 }
0x10c8   : > { %v9131_v37 = vadd.f32 %v17816_v39, %v9130_v1 }
0x10c9   : > { %9266 = vst [vmem:[%s17820_s27 + $0x38] sm:$0xff] %v9136_v47 }
0x10ca   : > { %9265 = vst [vmem:[%s17820_s27 + $0x30] sm:$0xff] %v9131_v37  ;;  %v11700_v9 = vpop.f32.mrb[174].mxu0 }
0x10cb   : > { %v9146_v34 = vadd.f32 %v11700_v9, %v17816_v39  ;;  %v9140_v13 = vpop.f32.mrb[175].mxu0 }
0x10cc   : > { %v9141_v4 = vadd.f32 %v17816_v39, %v9140_v13 }
0x10cd   : > { %9268 = vst [vmem:[%s17820_s27 + $0x48] sm:$0xff] %v9146_v34 }
0x10ce   : > { %9267 = vst [vmem:[%s17820_s27 + $0x40] sm:$0xff] %v9141_v4  ;;  %v11703_v35 = vpop.f32.mrb[176].mxu0 }
0x10cf   : > { %v9156_v28 = vadd.f32 %v11703_v35, %v17816_v39  ;;  %v9150_v58 = vpop.f32.mrb[177].mxu0 }
0x10d0   : > { %v9151_v55 = vadd.f32 %v17816_v39, %v9150_v58 }
0x10d1   : > { %9270 = vst [vmem:[%s17820_s27 + $0x58] sm:$0xff] %v9156_v28 }
0x10d2   : > { %9269 = vst [vmem:[%s17820_s27 + $0x50] sm:$0xff] %v9151_v55  ;;  %v11706_v45 = vpop.f32.mrb[178].mxu0 }
0x10d3   : > { %v9166_v29 = vadd.f32 %v11706_v45, %v17816_v39  ;;  %v9160_v22 = vpop.f32.mrb[179].mxu0 }
0x10d4   : > { %v9161_v17 = vadd.f32 %v17816_v39, %v9160_v22 }
0x10d5   : > { %9272 = vst [vmem:[%s17820_s27 + $0x68] sm:$0xff] %v9166_v29 }
0x10d6   : > { %9271 = vst [vmem:[%s17820_s27 + $0x60] sm:$0xff] %v9161_v17  ;;  %v11709_v49 = vpop.f32.mrb[180].mxu0 }
0x10d7   : > { %v9176_v52 = vadd.f32 %v11709_v49, %v17816_v39  ;;  %v9170_v11 = vpop.f32.mrb[181].mxu0 }
0x10d8   : > { %v9171_v20 = vadd.f32 %v17816_v39, %v9170_v11 }
0x10d9   : > { %9274 = vst [vmem:[%s17820_s27 + $0x78] sm:$0xff] %v9176_v52 }
0x10da   : > { %9273 = vst [vmem:[%s17820_s27 + $0x70] sm:$0xff] %v9171_v20  ;;  %v11712_v6 = vpop.f32.mrb[182].mxu0 }
0x10db   : > { %v9186_v31 = vadd.f32 %v11712_v6, %v17816_v39  ;;  %v9180_v41 = vpop.f32.mrb[183].mxu0 }
0x10dc   : > { %v9181_v46 = vadd.f32 %v17816_v39, %v9180_v41 }
0x10dd   : > { %9276 = vst [vmem:[%s17820_s27 + $0x88] sm:$0xff] %v9186_v31 }
0x10de   : > { %9275 = vst [vmem:[%s17820_s27 + $0x80] sm:$0xff] %v9181_v46  ;;  %v11715_v51 = vpop.f32.mrb[184].mxu0 }
0x10df   : > { %v9196_v3 = vadd.f32 %v11715_v51, %v17816_v39  ;;  %v9190_v36 = vpop.f32.mrb[185].mxu0 }
0x10e0   : > { %v9191_v25 = vadd.f32 %v17816_v39, %v9190_v36 }
0x10e1   : > { %9278 = vst [vmem:[%s17820_s27 + $0x98] sm:$0xff] %v9196_v3 }
0x10e2   : > { %9277 = vst [vmem:[%s17820_s27 + $0x90] sm:$0xff] %v9191_v25  ;;  %v11718_v44 = vpop.f32.mrb[186].mxu0 }
0x10e3   : > { %v9206_v53 = vadd.f32 %v11718_v44, %v17816_v39  ;;  %v9200_v12 = vpop.f32.mrb[187].mxu0 }
0x10e4   : > { %v9201_v15 = vadd.f32 %v17816_v39, %v9200_v12 }
0x10e5   : > { %9280 = vst [vmem:[%s17820_s27 + $0xa8] sm:$0xff] %v9206_v53 }
0x10e6   : > { %9279 = vst [vmem:[%s17820_s27 + $0xa0] sm:$0xff] %v9201_v15  ;;  %v11721_v16 = vpop.f32.mrb[188].mxu0 }
0x10e7   : > { %v9216_v42 = vadd.f32 %v11721_v16, %v17816_v39  ;;  %v9210_v50 = vpop.f32.mrb[189].mxu0 }
0x10e8   : > { %v9211_v38 = vadd.f32 %v17816_v39, %v9210_v50 }
0x10e9   : > { %9282 = vst [vmem:[%s17820_s27 + $0xb8] sm:$0xff] %v9216_v42 }
0x10ea   : > { %9281 = vst [vmem:[%s17820_s27 + $0xb0] sm:$0xff] %v9211_v38  ;;  %v11724_v2 = vpop.f32.mrb[190].mxu0 }
0x10eb   : > { %v9226_v56 = vadd.f32 %v11724_v2, %v17816_v39  ;;  %v9220_v30 = vpop.f32.mrb[191].mxu0 }
0x10ec   : > { %v9221_v10 = vadd.f32 %v17816_v39, %v9220_v30 }
0x10ed   : > { %9284 = vst [vmem:[%s17820_s27 + $0xc8] sm:$0xff] %v9226_v56 }
0x10ee   : > { %9283 = vst [vmem:[%s17820_s27 + $0xc0] sm:$0xff] %v9221_v10  ;;  %v11727_v59 = vpop.f32.mrb[192].mxu0 }
0x10ef   : > { %v9236_v7 = vadd.f32 %v11727_v59, %v17816_v39  ;;  %v9230_v48 = vpop.f32.mrb[193].mxu0 }
0x10f0   : > { %v9231_v27 = vadd.f32 %v17816_v39, %v9230_v48 }
0x10f1   : > { %9286 = vst [vmem:[%s17820_s27 + $0xd8] sm:$0xff] %v9236_v7 }
0x10f2   : > { %9285 = vst [vmem:[%s17820_s27 + $0xd0] sm:$0xff] %v9231_v27  ;;  %v11730_v33 = vpop.f32.mrb[194].mxu0 }
0x10f3   : > { %v9246_v32 = vadd.f32 %v11730_v33, %v17816_v39  ;;  %v9240_v8 = vpop.f32.mrb[195].mxu0 }
0x10f4   : > { %v9241_v23 = vadd.f32 %v17816_v39, %v9240_v8 }
0x10f5   : > { %9288 = vst [vmem:[%s17820_s27 + $0xe8] sm:$0xff] %v9246_v32 }
0x10f6   : > { %9287 = vst [vmem:[%s17820_s27 + $0xe0] sm:$0xff] %v9241_v23  ;;  %v11733_v57 = vpop.f32.mrb[196].mxu0 }
0x10f7   : > { %v9256_v61 = vadd.f32 %v11733_v57, %v17816_v39  ;;  %v9250_v40 = vpop.f32.mrb[197].mxu0 }
0x10f8   : > { %v9251_v24 = vadd.f32 %v17816_v39, %v9250_v40 }
0x10f9   : > { %9290 = vst [vmem:[%s17820_s27 + $0xf8] sm:$0xff] %v9256_v61 }
0x10fa   : > { %9289 = vst [vmem:[%s17820_s27 + $0xf0] sm:$0xff] %v9251_v24 }
0x10fb   : > { %13439 = shalt.err (!%p13436_p3)
}
0x10fc   : > { %s13440_s26 = scalar_lea.hbm %s17886_s17, 4096  ;;  %s13444_s28 = scalar_lea.hbm %s17945_s9, 8192 }
0x10fd   : > { %p13441_p4 = scmp.ne.s32.totalorder %s17886_s17, %s13440_s26  ;;  %p13445_p9 = scmp.lt.u32.totalorder %s17886_s17, %s17945_s9 }
0x10fe   : > { %p13446_p10 = scmp.lt.u32.totalorder %s13444_s28, %s13440_s26  ;;  %p13448_p12 = scmp.lt.u32.totalorder %s13440_s26, %s17886_s17 }
0x10ff   : > { %p13442_p7 = pnand %p13441_p4, %p13587_p5 }
0x1100   : > { %p13447_p11 = por %p13446_p10, %p13445_p9 }
0x1101   : > { %p13443_p8 = pneg %p13442_p7 }
0x1102   : > { %p13449_p13 = por %p13448_p12, %p13447_p11 }
0x1104   : > { %p13450_p0 = pnand %p13449_p13, %p13443_p8 }
0x1106   : > { %13453 = shalt.err (!%p13450_p0)
}
0x1107   : > { %s13497_s21 = smov 128   ;;  %s13498_s22 = smov 8  }
0x1108   : > { %12398 = dma.vmem_to_hbm [thread:$0]  (%p13587_p5), %s17888_s29, 4096, %s17886_s17, %s17895_s13, %s13497_s21, %s13497_s21, %s13498_s22  }
0x1109 PF: > { %p12404_p1 = scmp.ge.s32.totalorder %s13488_s12, 2  ;;  %s9320_s23 = sand.u32 1, %s13476_s30  }
0x110a   : > { %s9321_s24 = scalar_lea.sflag [#allocation3], %s9320_s23 }
0x110b   : > { %p12401_p2 = pnand %p12404_p1, %p13591_p6 }
0x110d   : > { %13471 = dma.done.wait (!%p12401_p2), %s9321_s24, 4096  }
0x110e   : > { %13473 = vsyncadd (!%p12401_p2), %s9321_s24, 4294963200  ;;  %p19_p3 = scmp.ge.s32.totalorder %s13574_s15, 4   ;;  %s18592_s30 = smov %s13480_s10 }
0x110f   : > { %s18593_s10 = smov %s13484_s11  ;;  %s18594_s11 = smov %s13585_s18 }
0x1110   : > { %s18595_s12 = smov %s13574_s15  ;;  %21 = sbr.rel (!%p19_p3) target bundleno = 3 (0x3), region = 91 }
0x1117   :  { %9326 = vsyncpa [#allocation3], 1 }
0x1118   :  { %9328 = vsyncpa [#allocation3 + $0x1], 1 }

</bundles_post_ra>
